<compile_context>
chip_gen: v7x
topology: tpu7x:2x2x1
jax: 0.10.0
libtpu: 0.0.40
codegen_flags: <defaults>
</compile_context>

<pallas_src>
import jax
import jax.numpy as jnp
from jax.experimental import pallas as pl
from jax.experimental.pallas import tpu as pltpu

EPS = 1e-5
FPAD = 128  # zero front-pad columns of every canvas ref (>= max tap shift Wc + 1)


# ----------------------------------------------------------------------------
# Fused whole-decoder kernel
# ----------------------------------------------------------------------------
def _make_decoder_kernel(chans, counts, wc, m):
    """chans: ((cin,cout),)*3; counts: real output positions per stage; wc: canvas row
    stride; m: flat canvas width (multiple of 128)."""
    shifts = (0, 1, wc, wc + 1)  # taps (ky,kx) = (0,0),(0,1),(1,0),(1,1)

    def stage(in_ref, w_ref, g_ref, b_ref, mask_ref, cout, count):
        # 4 shifted-tap matmuls accumulated in f32 (MXU is idle; K is tiny).
        acc = None
        for t, s in enumerate(shifts):
            wt = w_ref[pl.ds(t * cout, cout), :]            # (cout, cin) tap weight
            xt = in_ref[:, pl.ds(FPAD - s, m)]              # (cin, m) shifted canvas view
            d = jnp.dot(wt, xt, preferred_element_type=jnp.float32)
            acc = d if acc is None else acc + d
        # Masked single-pass batch statistics (mask is {0,1} over the real image region).
        mask = mask_ref[...]                                # (1, m)
        ym = acc * mask
        s1 = jnp.sum(ym, axis=1, keepdims=True)             # (cout, 1)
        s2 = jnp.sum(ym * ym, axis=1, keepdims=True)        # mask^2 == mask
        inv = 1.0 / count
        mean = s1 * inv
        var = jnp.maximum(s2 * inv - mean * mean, 0.0)
        scale = g_ref[...] * jax.lax.rsqrt(var + EPS)       # (cout, 1)
        shift = b_ref[...] - mean * scale
        # One FMA + ReLU epilogue; re-mask so the canvas border stays zero.
        return jnp.maximum(acc * scale + shift, 0.0) * mask

    (_, c1o), (_, c2o), (_, c3o) = chans
    n1, n2, n3 = counts

    def kernel(xd_ref, w1_ref, w2_ref, w3_ref, g1_ref, b1_ref, g2_ref, b2_ref,
               g3_ref, b3_ref, m1_ref, m2_ref, m3_ref, o_ref, c1_ref, c2_ref):
        # Zero the front-pad columns so shifted reads off the left edge see zeros.
        c1_ref[:, pl.ds(0, FPAD)] = jnp.zeros((c1o, FPAD), jnp.float32)
        c2_ref[:, pl.ds(0, FPAD)] = jnp.zeros((c2o, FPAD), jnp.float32)

        # Stage 1 (stride-2 deconv via zero-dilated input canvas) -> VMEM canvas 1.
        c1_ref[:, pl.ds(FPAD, m)] = stage(xd_ref, w1_ref, g1_ref, b1_ref, m1_ref, c1o, n1)
        # Stage 2 (stride-1 deconv) -> VMEM canvas 2.
        c2_ref[:, pl.ds(FPAD, m)] = stage(c1_ref, w2_ref, g2_ref, b2_ref, m2_ref, c2o, n2)
        # Stage 3 (stride-1 deconv) -> output, written exactly once.
        o_ref[...] = stage(c2_ref, w3_ref, g3_ref, b3_ref, m3_ref, c3o, n3)

    return kernel


# ----------------------------------------------------------------------------
# Forward pass (NCHW in / NCHW out, like the PyTorch module)
# ----------------------------------------------------------------------------
def decoder_forward(x_nchw, params):
    x = x_nchw.astype(jnp.float32)
    n, cin, h, w = x.shape

    hc, wc = 2 * h + 4, 2 * w + 3            # canvas; images live at offset (1, 1)
    assert wc + 1 <= FPAD
    mcore = n * hc * wc
    m = ((mcore + 127) // 128) * 128         # lane-dense flat width
    assert m % 128 == 0

    # --- glue: zero-dilated input on the canvas, channel-major, 128-col front pad ---
    xt = jnp.transpose(x, (1, 0, 2, 3))                                    # (cin, n, h, w)
    xd = jax.lax.pad(xt, jnp.float32(0.0),
                     ((0, 0, 0), (0, 0, 0),
                      (1, hc - 2 * h, 1), (1, wc - 2 * w, 1)))             # (cin, n, hc, wc)
    xd = jnp.pad(xd.reshape(cin, mcore), ((0, 0), (FPAD, m - mcore)))      # (cin, FPAD + m)

    # --- per-stage fused tap weights, BN params, output-region masks (consts under jit) ---
    pos = jnp.arange(m)
    row = (pos % (hc * wc)) // wc
    col = pos % wc
    core = pos < mcore

    def region_mask(hout, wout):
        msk = core & (row >= 1) & (row <= hout) & (col >= 1) & (col <= wout)
        return msk.astype(jnp.float32)[None, :]                            # (1, m)

    w_in, g_in, b_in, masks, counts, chans = [], [], [], [], [], []
    ho, wo = h, w
    for name, stride in (("1", 2), ("2", 1), ("3", 1)):
        wgt, _bias, gam, bet = params[name]        # conv bias cancelled by BN batch mean
        ci, co = wgt.shape[0], wgt.shape[1]
        ho, wo = (2 * ho, 2 * wo) if stride == 2 else (ho + 1, wo + 1)
        # rows ordered (ky*2 + kx)*cout + co  ->  tap t weight block = w[:, :, ky, kx].T
        w_in.append(jnp.transpose(wgt, (2, 3, 1, 0)).reshape(4 * co, ci))
        g_in.append(gam.reshape(co, 1))
        b_in.append(bet.reshape(co, 1))
        masks.append(region_mask(ho, wo))
        counts.append(float(n * ho * wo))
        chans.append((ci, co))

    co1, co2, co3 = chans[0][1], chans[1][1], chans[2][1]
    vmem = [pl.BlockSpec(memory_space=pltpu.MemorySpace.VMEM) for _ in range(13)]
    out_flat = pl.pallas_call(
        _make_decoder_kernel(tuple(chans), tuple(counts), wc, m),
        out_shape=jax.ShapeDtypeStruct((co3, m), jnp.float32),
        in_specs=vmem,
        out_specs=pl.BlockSpec(memory_space=pltpu.MemorySpace.VMEM),
        scratch_shapes=[pltpu.VMEM((co1, FPAD + m), jnp.float32),
                        pltpu.VMEM((co2, FPAD + m), jnp.float32)],
    )(xd, w_in[0], w_in[1], w_in[2],
      g_in[0], b_in[0], g_in[1], b_in[1], g_in[2], b_in[2],
      masks[0], masks[1], masks[2])

    # --- glue: crop the image region off the canvas and convert to NCHW ---
    out = out_flat[:, :mcore].reshape(co3, n, hc, wc)[:, :, 1:1 + ho, 1:1 + wo]
    return jnp.transpose(out, (1, 0, 2, 3))                                # (n, 3, 34, 34)


# ----------------------------------------------------------------------------
# Pure-JAX reference (XLA conv, HIGHEST precision) for verification
# ----------------------------------------------------------------------------
_PREC_REF = jax.lax.Precision.HIGHEST


def _conv_transpose_ref(x_nhwc, w_pt, b, stride):
    k = w_pt.shape[2]
    w_corr = jnp.transpose(w_pt[:, :, ::-1, ::-1], (2, 3, 0, 1))  # HWIO
    out = jax.lax.conv_general_dilated(
        x_nhwc, w_corr, window_strides=(1, 1),
        padding=[(k - 1, k - 1), (k - 1, k - 1)],
        lhs_dilation=(stride, stride),
        dimension_numbers=("NHWC", "HWIO", "NHWC"),
        precision=_PREC_REF,
    )
    return out + b.reshape(1, 1, 1, -1)


def _bn_relu_ref(x, g, be):
    mean = jnp.mean(x, axis=(0, 1, 2), keepdims=True)
    var = jnp.mean((x - mean) ** 2, axis=(0, 1, 2), keepdims=True)
    return jnp.maximum(
        (x - mean) * jax.lax.rsqrt(var + EPS) * g.reshape(1, 1, 1, -1)
        + be.reshape(1, 1, 1, -1),
        0.0,
    )


def decoder_forward_ref(x_nchw, params):
    x = jnp.transpose(x_nchw, (0, 2, 3, 1)).astype(jnp.float32)
    for name, stride in (("1", 2), ("2", 1), ("3", 1)):
        w, b, g, be = params[name]
        x = _bn_relu_ref(_conv_transpose_ref(x, w, b, stride), g, be)
    return jnp.transpose(x, (0, 3, 1, 2))


# ----------------------------------------------------------------------------
# Deterministic parameter init (synthetic — not a checkpoint load)
# ----------------------------------------------------------------------------
def make_params(key):
    params = {}
    shapes = {"1": (3, 16), "2": (16, 32), "3": (32, 3)}
    for name, (cin, cout) in shapes.items():
        key, kw, kb, kg, kbe = jax.random.split(key, 5)
        w = 0.1 * jax.random.normal(kw, (cin, cout, 2, 2), jnp.float32)  # PyTorch layout
        b = 0.1 * jax.random.normal(kb, (1, cout), jnp.float32)          # conv bias (ref only)
        g = 1.0 + 0.1 * jax.random.normal(kg, (1, cout), jnp.float32)    # BN gamma
        be = 0.1 * jax.random.normal(kbe, (1, cout), jnp.float32)        # BN beta
        params[name] = (w, b, g, be)
    return params


if __name__ == "__main__":
    key = jax.random.PRNGKey(0)
    key, kx = jax.random.split(key)
    x = jax.random.normal(kx, (2, 3, 16, 16), jnp.float32)  # NCHW, like the PyTorch module

    params = make_params(key)

    fwd = jax.jit(decoder_forward)
    out = jax.block_until_ready(fwd(x, params))
    assert out.shape == (2, 3, 34, 34), out.shape

    ref = jax.block_until_ready(decoder_forward_ref(x, params))
    assert bool(jnp.isfinite(out).all())
    max_err = float(jnp.max(jnp.abs(out - ref)))
    # Kernel uses default (fast) MXU precision vs HIGHEST-precision reference.
    assert bool(jnp.allclose(out, ref, rtol=3e-2, atol=3e-2)), max_err

    print("KERNEL_OK")
</pallas_src>

<mosaic_0001>
module attributes {stable_mosaic.version = 11 : i64} {
  func.func @kernel(%arg0: memref<3x2688xf32, #tpu.memory_space<vmem>>, %arg1: memref<64x3xf32, #tpu.memory_space<vmem>>, %arg2: memref<128x16xf32, #tpu.memory_space<vmem>>, %arg3: memref<12x32xf32, #tpu.memory_space<vmem>>, %arg4: memref<16x1xf32, #tpu.memory_space<vmem>>, %arg5: memref<16x1xf32, #tpu.memory_space<vmem>>, %arg6: memref<32x1xf32, #tpu.memory_space<vmem>>, %arg7: memref<32x1xf32, #tpu.memory_space<vmem>>, %arg8: memref<3x1xf32, #tpu.memory_space<vmem>>, %arg9: memref<3x1xf32, #tpu.memory_space<vmem>>, %arg10: memref<1x2560xf32, #tpu.memory_space<vmem>>, %arg11: memref<1x2560xf32, #tpu.memory_space<vmem>>, %arg12: memref<1x2560xf32, #tpu.memory_space<vmem>>, %arg13: memref<3x2560xf32, #tpu.memory_space<vmem>>, %arg14: memref<16x2688xf32, #tpu.memory_space<vmem>>, %arg15: memref<32x2688xf32, #tpu.memory_space<vmem>>) attributes {dimension_semantics = [], scalar_prefetch = 0 : i64, scratch_operands = 2 : i64, tpu.core_type = #tpu.core_type<tc>} {
    %cst = arith.constant 0.000000e+00 : f32
    %0 = vector.broadcast %cst : f32 to vector<16x128xf32>
    %c0 = arith.constant 0 : index
    %c0_0 = arith.constant 0 : index
    %1 = vector.load %arg14[%c0, %c0_0] : memref<16x2688xf32, #tpu.memory_space<vmem>>, vector<16x128xf32>
    tpu.vector_store %arg14[%c0, %c0_0], %0 {strides = array<i32>} : memref<16x2688xf32, #tpu.memory_space<vmem>>, vector<16x128xf32>,
    %cst_1 = arith.constant 0.000000e+00 : f32
    %2 = vector.broadcast %cst_1 : f32 to vector<32x128xf32>
    %c0_2 = arith.constant 0 : index
    %c0_3 = arith.constant 0 : index
    %3 = vector.load %arg15[%c0_2, %c0_3] : memref<32x2688xf32, #tpu.memory_space<vmem>>, vector<32x128xf32>
    tpu.vector_store %arg15[%c0_2, %c0_3], %2 {strides = array<i32>} : memref<32x2688xf32, #tpu.memory_space<vmem>>, vector<32x128xf32>,
    %c0_4 = arith.constant 0 : index
    %c0_5 = arith.constant 0 : index
    %4 = vector.load %arg1[%c0_4, %c0_5] : memref<64x3xf32, #tpu.memory_space<vmem>>, vector<16x3xf32>
    %c0_6 = arith.constant 0 : index
    %c128 = arith.constant 128 : index
    %5 = vector.load %arg0[%c0_6, %c128] : memref<3x2688xf32, #tpu.memory_space<vmem>>, vector<3x2560xf32>
    %cst_7 = arith.constant dense<0.000000e+00> : vector<16x2560xf32>
    %6 = tpu.matmul %4, %5, %cst_7 {dimension_numbers = #tpu.dot_dimension_numbers<[1], [0], [0], [1], [0, 0, 1, 1], [], []>} : vector<16x3xf32>, vector<3x2560xf32>, vector<16x2560xf32> -> vector<16x2560xf32>
    %c16 = arith.constant 16 : index
    %c0_8 = arith.constant 0 : index
    %7 = vector.load %arg1[%c16, %c0_8] : memref<64x3xf32, #tpu.memory_space<vmem>>, vector<16x3xf32>
    %c0_9 = arith.constant 0 : index
    %c127 = arith.constant 127 : index
    %8 = vector.load %arg0[%c0_9, %c127] : memref<3x2688xf32, #tpu.memory_space<vmem>>, vector<3x2560xf32>
    %cst_10 = arith.constant dense<0.000000e+00> : vector<16x2560xf32>
    %9 = tpu.matmul %7, %8, %cst_10 {dimension_numbers = #tpu.dot_dimension_numbers<[1], [0], [0], [1], [0, 0, 1, 1], [], []>} : vector<16x3xf32>, vector<3x2560xf32>, vector<16x2560xf32> -> vector<16x2560xf32>
    %10 = arith.addf %6, %9 : vector<16x2560xf32>
    %c32 = arith.constant 32 : index
    %c0_11 = arith.constant 0 : index
    %11 = vector.load %arg1[%c32, %c0_11] : memref<64x3xf32, #tpu.memory_space<vmem>>, vector<16x3xf32>
    %c0_12 = arith.constant 0 : index
    %c93 = arith.constant 93 : index
    %12 = vector.load %arg0[%c0_12, %c93] : memref<3x2688xf32, #tpu.memory_space<vmem>>, vector<3x2560xf32>
    %cst_13 = arith.constant dense<0.000000e+00> : vector<16x2560xf32>
    %13 = tpu.matmul %11, %12, %cst_13 {dimension_numbers = #tpu.dot_dimension_numbers<[1], [0], [0], [1], [0, 0, 1, 1], [], []>} : vector<16x3xf32>, vector<3x2560xf32>, vector<16x2560xf32> -> vector<16x2560xf32>
    %14 = arith.addf %10, %13 : vector<16x2560xf32>
    %c48 = arith.constant 48 : index
    %c0_14 = arith.constant 0 : index
    %15 = vector.load %arg1[%c48, %c0_14] : memref<64x3xf32, #tpu.memory_space<vmem>>, vector<16x3xf32>
    %c0_15 = arith.constant 0 : index
    %c92 = arith.constant 92 : index
    %16 = vector.load %arg0[%c0_15, %c92] : memref<3x2688xf32, #tpu.memory_space<vmem>>, vector<3x2560xf32>
    %cst_16 = arith.constant dense<0.000000e+00> : vector<16x2560xf32>
    %17 = tpu.matmul %15, %16, %cst_16 {dimension_numbers = #tpu.dot_dimension_numbers<[1], [0], [0], [1], [0, 0, 1, 1], [], []>} : vector<16x3xf32>, vector<3x2560xf32>, vector<16x2560xf32> -> vector<16x2560xf32>
    %18 = arith.addf %14, %17 : vector<16x2560xf32>
    %c0_17 = arith.constant 0 : index
    %c0_18 = arith.constant 0 : index
    %19 = vector.load %arg10[%c0_17, %c0_18] : memref<1x2560xf32, #tpu.memory_space<vmem>>, vector<1x2560xf32>
    %20 = vector.broadcast %19 : vector<1x2560xf32> to vector<16x2560xf32>
    %21 = arith.mulf %18, %20 : vector<16x2560xf32>
    %cst_19 = arith.constant dense<0.000000e+00> : vector<16xf32>
    %22 = vector.multi_reduction <add>, %21, %cst_19 [1] : vector<16x2560xf32> to vector<16xf32>
    %23 = vector.shape_cast %22 : vector<16xf32> to vector<16x1xf32>
    %24 = arith.mulf %21, %21 : vector<16x2560xf32>
    %cst_20 = arith.constant dense<0.000000e+00> : vector<16xf32>
    %25 = vector.multi_reduction <add>, %24, %cst_20 [1] : vector<16x2560xf32> to vector<16xf32>
    %26 = vector.shape_cast %25 : vector<16xf32> to vector<16x1xf32>
    %cst_21 = arith.constant 4.8828125E-4 : f32
    %27 = vector.broadcast %cst_21 : f32 to vector<16x1xf32>
    %28 = arith.mulf %23, %27 : vector<16x1xf32>
    %cst_22 = arith.constant 4.8828125E-4 : f32
    %29 = vector.broadcast %cst_22 : f32 to vector<16x1xf32>
    %30 = arith.mulf %26, %29 : vector<16x1xf32>
    %31 = arith.mulf %28, %28 : vector<16x1xf32>
    %32 = arith.subf %30, %31 : vector<16x1xf32>
    %cst_23 = arith.constant 0.000000e+00 : f32
    %33 = vector.broadcast %cst_23 : f32 to vector<16x1xf32>
    %34 = arith.maximumf %32, %33 : vector<16x1xf32>
    %c0_24 = arith.constant 0 : index
    %c0_25 = arith.constant 0 : index
    %35 = vector.load %arg4[%c0_24, %c0_25] : memref<16x1xf32, #tpu.memory_space<vmem>>, vector<16x1xf32>
    %cst_26 = arith.constant 9.99999974E-6 : f32
    %36 = vector.broadcast %cst_26 : f32 to vector<16x1xf32>
    %37 = arith.addf %34, %36 : vector<16x1xf32>
    %38 = math.rsqrt %37 : vector<16x1xf32>
    %39 = arith.mulf %35, %38 : vector<16x1xf32>
    %c0_27 = arith.constant 0 : index
    %c0_28 = arith.constant 0 : index
    %40 = vector.load %arg5[%c0_27, %c0_28] : memref<16x1xf32, #tpu.memory_space<vmem>>, vector<16x1xf32>
    %41 = arith.mulf %28, %39 : vector<16x1xf32>
    %42 = arith.subf %40, %41 : vector<16x1xf32>
    %43 = vector.broadcast %39 : vector<16x1xf32> to vector<16x2560xf32>
    %44 = arith.mulf %18, %43 : vector<16x2560xf32>
    %45 = vector.broadcast %42 : vector<16x1xf32> to vector<16x2560xf32>
    %46 = arith.addf %44, %45 : vector<16x2560xf32>
    %cst_29 = arith.constant 0.000000e+00 : f32
    %47 = vector.broadcast %cst_29 : f32 to vector<16x2560xf32>
    %48 = arith.maximumf %46, %47 : vector<16x2560xf32>
    %49 = vector.broadcast %19 : vector<1x2560xf32> to vector<16x2560xf32>
    %50 = arith.mulf %48, %49 : vector<16x2560xf32>
    %c0_30 = arith.constant 0 : index
    %c128_31 = arith.constant 128 : index
    %51 = vector.load %arg14[%c0_30, %c128_31] : memref<16x2688xf32, #tpu.memory_space<vmem>>, vector<16x2560xf32>
    tpu.vector_store %arg14[%c0_30, %c128_31], %50 {strides = array<i32>} : memref<16x2688xf32, #tpu.memory_space<vmem>>, vector<16x2560xf32>,
    %c0_32 = arith.constant 0 : index
    %c0_33 = arith.constant 0 : index
    %52 = vector.load %arg2[%c0_32, %c0_33] : memref<128x16xf32, #tpu.memory_space<vmem>>, vector<32x16xf32>
    %c0_34 = arith.constant 0 : index
    %c128_35 = arith.constant 128 : index
    %53 = vector.load %arg14[%c0_34, %c128_35] : memref<16x2688xf32, #tpu.memory_space<vmem>>, vector<16x2560xf32>
    %cst_36 = arith.constant dense<0.000000e+00> : vector<32x2560xf32>
    %54 = tpu.matmul %52, %53, %cst_36 {dimension_numbers = #tpu.dot_dimension_numbers<[1], [0], [0], [1], [0, 0, 1, 1], [], []>} : vector<32x16xf32>, vector<16x2560xf32>, vector<32x2560xf32> -> vector<32x2560xf32>
    %c32_37 = arith.constant 32 : index
    %c0_38 = arith.constant 0 : index
    %55 = vector.load %arg2[%c32_37, %c0_38] : memref<128x16xf32, #tpu.memory_space<vmem>>, vector<32x16xf32>
    %c0_39 = arith.constant 0 : index
    %c127_40 = arith.constant 127 : index
    %56 = vector.load %arg14[%c0_39, %c127_40] : memref<16x2688xf32, #tpu.memory_space<vmem>>, vector<16x2560xf32>
    %cst_41 = arith.constant dense<0.000000e+00> : vector<32x2560xf32>
    %57 = tpu.matmul %55, %56, %cst_41 {dimension_numbers = #tpu.dot_dimension_numbers<[1], [0], [0], [1], [0, 0, 1, 1], [], []>} : vector<32x16xf32>, vector<16x2560xf32>, vector<32x2560xf32> -> vector<32x2560xf32>
    %58 = arith.addf %54, %57 : vector<32x2560xf32>
    %c64 = arith.constant 64 : index
    %c0_42 = arith.constant 0 : index
    %59 = vector.load %arg2[%c64, %c0_42] : memref<128x16xf32, #tpu.memory_space<vmem>>, vector<32x16xf32>
    %c0_43 = arith.constant 0 : index
    %c93_44 = arith.constant 93 : index
    %60 = vector.load %arg14[%c0_43, %c93_44] : memref<16x2688xf32, #tpu.memory_space<vmem>>, vector<16x2560xf32>
    %cst_45 = arith.constant dense<0.000000e+00> : vector<32x2560xf32>
    %61 = tpu.matmul %59, %60, %cst_45 {dimension_numbers = #tpu.dot_dimension_numbers<[1], [0], [0], [1], [0, 0, 1, 1], [], []>} : vector<32x16xf32>, vector<16x2560xf32>, vector<32x2560xf32> -> vector<32x2560xf32>
    %62 = arith.addf %58, %61 : vector<32x2560xf32>
    %c96 = arith.constant 96 : index
    %c0_46 = arith.constant 0 : index
    %63 = vector.load %arg2[%c96, %c0_46] : memref<128x16xf32, #tpu.memory_space<vmem>>, vector<32x16xf32>
    %c0_47 = arith.constant 0 : index
    %c92_48 = arith.constant 92 : index
    %64 = vector.load %arg14[%c0_47, %c92_48] : memref<16x2688xf32, #tpu.memory_space<vmem>>, vector<16x2560xf32>
    %cst_49 = arith.constant dense<0.000000e+00> : vector<32x2560xf32>
    %65 = tpu.matmul %63, %64, %cst_49 {dimension_numbers = #tpu.dot_dimension_numbers<[1], [0], [0], [1], [0, 0, 1, 1], [], []>} : vector<32x16xf32>, vector<16x2560xf32>, vector<32x2560xf32> -> vector<32x2560xf32>
    %66 = arith.addf %62, %65 : vector<32x2560xf32>
    %c0_50 = arith.constant 0 : index
    %c0_51 = arith.constant 0 : index
    %67 = vector.load %arg11[%c0_50, %c0_51] : memref<1x2560xf32, #tpu.memory_space<vmem>>, vector<1x2560xf32>
    %68 = vector.broadcast %67 : vector<1x2560xf32> to vector<32x2560xf32>
    %69 = arith.mulf %66, %68 : vector<32x2560xf32>
    %cst_52 = arith.constant dense<0.000000e+00> : vector<32xf32>
    %70 = vector.multi_reduction <add>, %69, %cst_52 [1] : vector<32x2560xf32> to vector<32xf32>
    %71 = vector.shape_cast %70 : vector<32xf32> to vector<32x1xf32>
    %72 = arith.mulf %69, %69 : vector<32x2560xf32>
    %cst_53 = arith.constant dense<0.000000e+00> : vector<32xf32>
    %73 = vector.multi_reduction <add>, %72, %cst_53 [1] : vector<32x2560xf32> to vector<32xf32>
    %74 = vector.shape_cast %73 : vector<32xf32> to vector<32x1xf32>
    %cst_54 = arith.constant 4.5913682E-4 : f32
    %75 = vector.broadcast %cst_54 : f32 to vector<32x1xf32>
    %76 = arith.mulf %71, %75 : vector<32x1xf32>
    %cst_55 = arith.constant 4.5913682E-4 : f32
    %77 = vector.broadcast %cst_55 : f32 to vector<32x1xf32>
    %78 = arith.mulf %74, %77 : vector<32x1xf32>
    %79 = arith.mulf %76, %76 : vector<32x1xf32>
    %80 = arith.subf %78, %79 : vector<32x1xf32>
    %cst_56 = arith.constant 0.000000e+00 : f32
    %81 = vector.broadcast %cst_56 : f32 to vector<32x1xf32>
    %82 = arith.maximumf %80, %81 : vector<32x1xf32>
    %c0_57 = arith.constant 0 : index
    %c0_58 = arith.constant 0 : index
    %83 = vector.load %arg6[%c0_57, %c0_58] : memref<32x1xf32, #tpu.memory_space<vmem>>, vector<32x1xf32>
    %cst_59 = arith.constant 9.99999974E-6 : f32
    %84 = vector.broadcast %cst_59 : f32 to vector<32x1xf32>
    %85 = arith.addf %82, %84 : vector<32x1xf32>
    %86 = math.rsqrt %85 : vector<32x1xf32>
    %87 = arith.mulf %83, %86 : vector<32x1xf32>
    %c0_60 = arith.constant 0 : index
    %c0_61 = arith.constant 0 : index
    %88 = vector.load %arg7[%c0_60, %c0_61] : memref<32x1xf32, #tpu.memory_space<vmem>>, vector<32x1xf32>
    %89 = arith.mulf %76, %87 : vector<32x1xf32>
    %90 = arith.subf %88, %89 : vector<32x1xf32>
    %91 = vector.broadcast %87 : vector<32x1xf32> to vector<32x2560xf32>
    %92 = arith.mulf %66, %91 : vector<32x2560xf32>
    %93 = vector.broadcast %90 : vector<32x1xf32> to vector<32x2560xf32>
    %94 = arith.addf %92, %93 : vector<32x2560xf32>
    %cst_62 = arith.constant 0.000000e+00 : f32
    %95 = vector.broadcast %cst_62 : f32 to vector<32x2560xf32>
    %96 = arith.maximumf %94, %95 : vector<32x2560xf32>
    %97 = vector.broadcast %67 : vector<1x2560xf32> to vector<32x2560xf32>
    %98 = arith.mulf %96, %97 : vector<32x2560xf32>
    %c0_63 = arith.constant 0 : index
    %c128_64 = arith.constant 128 : index
    %99 = vector.load %arg15[%c0_63, %c128_64] : memref<32x2688xf32, #tpu.memory_space<vmem>>, vector<32x2560xf32>
    tpu.vector_store %arg15[%c0_63, %c128_64], %98 {strides = array<i32>} : memref<32x2688xf32, #tpu.memory_space<vmem>>, vector<32x2560xf32>,
    %c0_65 = arith.constant 0 : index
    %c0_66 = arith.constant 0 : index
    %100 = vector.load %arg3[%c0_65, %c0_66] : memref<12x32xf32, #tpu.memory_space<vmem>>, vector<3x32xf32>
    %c0_67 = arith.constant 0 : index
    %c128_68 = arith.constant 128 : index
    %101 = vector.load %arg15[%c0_67, %c128_68] : memref<32x2688xf32, #tpu.memory_space<vmem>>, vector<32x2560xf32>
    %cst_69 = arith.constant dense<0.000000e+00> : vector<3x2560xf32>
    %102 = tpu.matmul %100, %101, %cst_69 {dimension_numbers = #tpu.dot_dimension_numbers<[1], [0], [0], [1], [0, 0, 1, 1], [], []>} : vector<3x32xf32>, vector<32x2560xf32>, vector<3x2560xf32> -> vector<3x2560xf32>
    %c3 = arith.constant 3 : index
    %c0_70 = arith.constant 0 : index
    %103 = vector.load %arg3[%c3, %c0_70] : memref<12x32xf32, #tpu.memory_space<vmem>>, vector<3x32xf32>
    %c0_71 = arith.constant 0 : index
    %c127_72 = arith.constant 127 : index
    %104 = vector.load %arg15[%c0_71, %c127_72] : memref<32x2688xf32, #tpu.memory_space<vmem>>, vector<32x2560xf32>
    %cst_73 = arith.constant dense<0.000000e+00> : vector<3x2560xf32>
    %105 = tpu.matmul %103, %104, %cst_73 {dimension_numbers = #tpu.dot_dimension_numbers<[1], [0], [0], [1], [0, 0, 1, 1], [], []>} : vector<3x32xf32>, vector<32x2560xf32>, vector<3x2560xf32> -> vector<3x2560xf32>
    %106 = arith.addf %102, %105 : vector<3x2560xf32>
    %c6 = arith.constant 6 : index
    %c0_74 = arith.constant 0 : index
    %107 = vector.load %arg3[%c6, %c0_74] : memref<12x32xf32, #tpu.memory_space<vmem>>, vector<3x32xf32>
    %c0_75 = arith.constant 0 : index
    %c93_76 = arith.constant 93 : index
    %108 = vector.load %arg15[%c0_75, %c93_76] : memref<32x2688xf32, #tpu.memory_space<vmem>>, vector<32x2560xf32>
    %cst_77 = arith.constant dense<0.000000e+00> : vector<3x2560xf32>
    %109 = tpu.matmul %107, %108, %cst_77 {dimension_numbers = #tpu.dot_dimension_numbers<[1], [0], [0], [1], [0, 0, 1, 1], [], []>} : vector<3x32xf32>, vector<32x2560xf32>, vector<3x2560xf32> -> vector<3x2560xf32>
    %110 = arith.addf %106, %109 : vector<3x2560xf32>
    %c9 = arith.constant 9 : index
    %c0_78 = arith.constant 0 : index
    %111 = vector.load %arg3[%c9, %c0_78] : memref<12x32xf32, #tpu.memory_space<vmem>>, vector<3x32xf32>
    %c0_79 = arith.constant 0 : index
    %c92_80 = arith.constant 92 : index
    %112 = vector.load %arg15[%c0_79, %c92_80] : memref<32x2688xf32, #tpu.memory_space<vmem>>, vector<32x2560xf32>
    %cst_81 = arith.constant dense<0.000000e+00> : vector<3x2560xf32>
    %113 = tpu.matmul %111, %112, %cst_81 {dimension_numbers = #tpu.dot_dimension_numbers<[1], [0], [0], [1], [0, 0, 1, 1], [], []>} : vector<3x32xf32>, vector<32x2560xf32>, vector<3x2560xf32> -> vector<3x2560xf32>
    %114 = arith.addf %110, %113 : vector<3x2560xf32>
    %c0_82 = arith.constant 0 : index
    %c0_83 = arith.constant 0 : index
    %115 = vector.load %arg12[%c0_82, %c0_83] : memref<1x2560xf32, #tpu.memory_space<vmem>>, vector<1x2560xf32>
    %116 = vector.broadcast %115 : vector<1x2560xf32> to vector<3x2560xf32>
    %117 = arith.mulf %114, %116 : vector<3x2560xf32>
    %cst_84 = arith.constant dense<0.000000e+00> : vector<3xf32>
    %118 = vector.multi_reduction <add>, %117, %cst_84 [1] : vector<3x2560xf32> to vector<3xf32>
    %119 = vector.shape_cast %118 : vector<3xf32> to vector<3x1xf32>
    %120 = arith.mulf %117, %117 : vector<3x2560xf32>
    %cst_85 = arith.constant dense<0.000000e+00> : vector<3xf32>
    %121 = vector.multi_reduction <add>, %120, %cst_85 [1] : vector<3x2560xf32> to vector<3xf32>
    %122 = vector.shape_cast %121 : vector<3xf32> to vector<3x1xf32>
    %cst_86 = arith.constant 4.32525965E-4 : f32
    %123 = vector.broadcast %cst_86 : f32 to vector<3x1xf32>
    %124 = arith.mulf %119, %123 : vector<3x1xf32>
    %cst_87 = arith.constant 4.32525965E-4 : f32
    %125 = vector.broadcast %cst_87 : f32 to vector<3x1xf32>
    %126 = arith.mulf %122, %125 : vector<3x1xf32>
    %127 = arith.mulf %124, %124 : vector<3x1xf32>
    %128 = arith.subf %126, %127 : vector<3x1xf32>
    %cst_88 = arith.constant 0.000000e+00 : f32
    %129 = vector.broadcast %cst_88 : f32 to vector<3x1xf32>
    %130 = arith.maximumf %128, %129 : vector<3x1xf32>
    %c0_89 = arith.constant 0 : index
    %c0_90 = arith.constant 0 : index
    %131 = vector.load %arg8[%c0_89, %c0_90] : memref<3x1xf32, #tpu.memory_space<vmem>>, vector<3x1xf32>
    %cst_91 = arith.constant 9.99999974E-6 : f32
    %132 = vector.broadcast %cst_91 : f32 to vector<3x1xf32>
    %133 = arith.addf %130, %132 : vector<3x1xf32>
    %134 = math.rsqrt %133 : vector<3x1xf32>
    %135 = arith.mulf %131, %134 : vector<3x1xf32>
    %c0_92 = arith.constant 0 : index
    %c0_93 = arith.constant 0 : index
    %136 = vector.load %arg9[%c0_92, %c0_93] : memref<3x1xf32, #tpu.memory_space<vmem>>, vector<3x1xf32>
    %137 = arith.mulf %124, %135 : vector<3x1xf32>
    %138 = arith.subf %136, %137 : vector<3x1xf32>
    %139 = vector.broadcast %135 : vector<3x1xf32> to vector<3x2560xf32>
    %140 = arith.mulf %114, %139 : vector<3x2560xf32>
    %141 = vector.broadcast %138 : vector<3x1xf32> to vector<3x2560xf32>
    %142 = arith.addf %140, %141 : vector<3x2560xf32>
    %cst_94 = arith.constant 0.000000e+00 : f32
    %143 = vector.broadcast %cst_94 : f32 to vector<3x2560xf32>
    %144 = arith.maximumf %142, %143 : vector<3x2560xf32>
    %145 = vector.broadcast %115 : vector<1x2560xf32> to vector<3x2560xf32>
    %146 = arith.mulf %144, %145 : vector<3x2560xf32>
    %c0_95 = arith.constant 0 : index
    %c0_96 = arith.constant 0 : index
    %147 = vector.load %arg13[%c0_95, %c0_96] : memref<3x2560xf32, #tpu.memory_space<vmem>>, vector<3x2560xf32>
    tpu.vector_store %arg13[%c0_95, %c0_96], %146 {strides = array<i32>} : memref<3x2560xf32, #tpu.memory_space<vmem>>, vector<3x2560xf32>,
    return
  }
}

</mosaic_0001>

<bundles_post_ra>
// kernel: decoder_forward.1
= control target key start
LH: loop header
LB: loop body
LE: loop exit
PB: predicated region body
PF: predicated region fallthrough
CT: control target
= control target key end

     0   :  { %v21995_v2 = vmov 0.0   ;;  %s16216_s29 = smov 1   ;;  %s16217_s17 = smov 35   ;;  %vm138_vm0 = vcmask 7168   ;;  %vm166_vm1 = vcmask 1042432   ;;  %vm159_vm2 = vcmask 23552   ;;  %s21981_s0 = inlined_call_operand.vmem [shape: f32[3,2688], index: 0, kind: input, shape index: {}]   ;;  %s21982_s1 = inlined_call_operand.vmem [shape: f32[64,3], index: 1, kind: input, shape index: {}]   ;;  %s21983_s10 = inlined_call_operand.vmem [shape: f32[1,2560], index: 10, kind: input, shape index: {}]   ;;  %s21984_s4 = inlined_call_operand.vmem [shape: f32[16,1], index: 4, kind: input, shape index: {}]   ;;  %s21985_s5 = inlined_call_operand.vmem [shape: f32[16,1], index: 5, kind: input, shape index: {}]   ;;  %s21986_s2 = inlined_call_operand.vmem [shape: f32[128,16], index: 2, kind: input, shape index: {}]   ;;  %s21987_s11 = inlined_call_operand.vmem [shape: f32[1,2560], index: 11, kind: input, shape index: {}]   ;;  %s21988_s6 = inlined_call_operand.vmem [shape: f32[32,1], index: 6, kind: input, shape index: {}]   ;;  %s21989_s7 = inlined_call_operand.vmem [shape: f32[32,1], index: 7, kind: input, shape index: {}]   ;;  %s21990_s3 = inlined_call_operand.vmem [shape: f32[12,32], index: 3, kind: input, shape index: {}]   ;;  %s21991_s12 = inlined_call_operand.vmem [shape: f32[1,2560], index: 12, kind: input, shape index: {}]   ;;  %s21992_s8 = inlined_call_operand.vmem [shape: f32[3,1], index: 8, kind: input, shape index: {}]   ;;  %s21993_s9 = inlined_call_operand.vmem [shape: f32[3,1], index: 9, kind: input, shape index: {}]   ;;  %s21994_s13 = inlined_call_operand.vmem [shape: f32[3,2560], index: 13, kind: output, shape index: {}]  }
   0x1   :  { %v65_v0 = vld [vmem:[%s21981_s0 + $0x8] sm:$0x77]  ;;  %v64_v1 = vld [vmem:[%s21981_s0] sm:$0x77]  ;;  %271 = vmatprep.mubr.f32.mxu0 %v21995_v2  ;;  %348 = vmatprep.mubr.f32.mxu1 %v21995_v2  ;;  %v66_v5 = vld [vmem:[%s21981_s0 + $0x10] sm:$0x77] }
   0x2   :  { %100 = vrot.lane.b32.xlu0 %v65_v0, %s16216_s29  ;;  %v87_v3 = vcombine.high %v65_v0, %v65_v0  ;;  %96 = vrot.lane.b32.xlu1 %v64_v1, %s16216_s29  ;;  %v86_v4 = vcombine.high %v64_v1, %v64_v1  ;;  %v88_v6 = vcombine.high %v66_v5, %v66_v5  ;;  %v67_v7 = vld [vmem:[%s21981_s0 + $0x18] sm:$0x77]  ;;  %v68_v9 = vld [vmem:[%s21981_s0 + $0x20] sm:$0x77]  ;;  %s16218_s27 = smov 36   ;;  %vm1889_vm3 = vcmask 285696  }
   0x3   :  { %v89_v8 = vcombine.high %v67_v7, %v67_v7  ;;  %v90_v10 = vcombine.high %v68_v9, %v68_v9  ;;  %v69_v11 = vld [vmem:[%s21981_s0 + $0x28] sm:$0x77]  ;;  %v70_v13 = vld [vmem:[%s21981_s0 + $0x30] sm:$0x77]  ;;  %v71_v15 = vld [vmem:[%s21981_s0 + $0x38] sm:$0x77] }
   0x4   :  { %v91_v12 = vcombine.high %v69_v11, %v69_v11  ;;  %v92_v14 = vcombine.high %v70_v13, %v70_v13  ;;  %v93_v16 = vcombine.high %v71_v15, %v71_v15  ;;  %v72_v17 = vld [vmem:[%s21981_s0 + $0x40] sm:$0x77]  ;;  %v73_v19 = vld [vmem:[%s21981_s0 + $0x48] sm:$0x77]  ;;  %v74_v23 = vld [vmem:[%s21981_s0 + $0x50] sm:$0x7] }
   0x5   :  { %v94_v18 = vcombine.high %v72_v17, %v72_v17  ;;  %v95_v20 = vcombine.high %v73_v19, %v73_v19  ;;  %v1815_v21 = vld [vmem:[%s21981_s0] sm:$0x77]  ;;  %v1816_v24 = vld [vmem:[%s21981_s0 + $0x8] sm:$0x77]  ;;  %v1817_v26 = vld [vmem:[%s21981_s0 + $0x10] sm:$0x77] }
   0x6   :  { %102 = vrot.lane.b32.xlu1 %v87_v3, %s16216_s29  ;;  %98 = vrot.lane.b32.xlu0 %v86_v4, %s16216_s29  ;;  %v1837_v22 = vcombine.high %v1815_v21, %v1815_v21  ;;  %v1838_v25 = vcombine.high %v1816_v24, %v1816_v24  ;;  %v1839_v27 = vcombine.high %v1817_v26, %v1817_v26  ;;  %v1818_v28 = vld [vmem:[%s21981_s0 + $0x18] sm:$0x77]  ;;  %v1819_v30 = vld [vmem:[%s21981_s0 + $0x20] sm:$0x77]  ;;  %vm2842_vm4 = vcmask 293888  }
   0x7   :  { %v1840_v29 = vcombine.high %v1818_v28, %v1818_v28  ;;  %v1841_v31 = vcombine.high %v1819_v30, %v1819_v30  ;;  %v1820_v32 = vld [vmem:[%s21981_s0 + $0x28] sm:$0x77]  ;;  %v1821_v34 = vld [vmem:[%s21981_s0 + $0x30] sm:$0x77]  ;;  %v1822_v36 = vld [vmem:[%s21981_s0 + $0x38] sm:$0x77] }
   0x8   :  { %v1842_v33 = vcombine.high %v1820_v32, %v1820_v32  ;;  %v1843_v35 = vcombine.high %v1821_v34, %v1821_v34  ;;  %v1844_v37 = vcombine.high %v1822_v36, %v1822_v36  ;;  %v1823_v38 = vld [vmem:[%s21981_s0 + $0x40] sm:$0x77]  ;;  %v1824_v40 = vld [vmem:[%s21981_s0 + $0x48] sm:$0x77]  ;;  %v1825_v42 = vld [vmem:[%s21981_s0 + $0x50] sm:$0x7] }
   0x9   :  { %v1845_v39 = vcombine.high %v1823_v38, %v1823_v38  ;;  %v1846_v41 = vcombine.high %v1824_v40, %v1824_v40  ;;  %v2768_v43 = vld [vmem:[%s21981_s0] sm:$0x77]  ;;  %v2769_v45 = vld [vmem:[%s21981_s0 + $0x8] sm:$0x77]  ;;  %v2770_v47 = vld [vmem:[%s21981_s0 + $0x10] sm:$0x77] }
   0xa   :  { %106 = vrot.lane.b32.xlu1 %v88_v6, %s16216_s29  ;;  %104 = vrot.lane.b32.xlu0 %v66_v5, %s16216_s29  ;;  %v2790_v44 = vcombine.high %v2768_v43, %v2768_v43  ;;  %v2791_v46 = vcombine.high %v2769_v45, %v2769_v45  ;;  %v2792_v48 = vcombine.high %v2770_v47, %v2770_v47  ;;  %v2771_v49 = vld [vmem:[%s21981_s0 + $0x18] sm:$0x77]  ;;  %v2772_v51 = vld [vmem:[%s21981_s0 + $0x20] sm:$0x77]  ;;  %vm4489_vm5 = vcmask 130048  }
   0xb   :  { %v2793_v50 = vcombine.high %v2771_v49, %v2771_v49  ;;  %v2794_v52 = vcombine.high %v2772_v51, %v2772_v51  ;;  %v2773_v53 = vld [vmem:[%s21981_s0 + $0x28] sm:$0x77]  ;;  %v2774_v55 = vld [vmem:[%s21981_s0 + $0x30] sm:$0x77]  ;;  %v2775_v57 = vld [vmem:[%s21981_s0 + $0x38] sm:$0x77] }
   0xc   :  { %v2795_v54 = vcombine.high %v2773_v53, %v2773_v53  ;;  %v2796_v56 = vcombine.high %v2774_v55, %v2774_v55  ;;  %v2797_v58 = vcombine.high %v2775_v57, %v2775_v57  ;;  %v2776_v59 = vld [vmem:[%s21981_s0 + $0x40] sm:$0x77]  ;;  %v2777_v63 = vld [vmem:[%s21981_s0 + $0x48] sm:$0x77]  ;;  %v16453_v6 = vld [vmem:[%s21982_s1 + $0x10] sm:$0xff]  ;;  %vm10014_vm6 = vcmask 261120  }
   0xd   :  { %v2798_v60 = vcombine.high %v2776_v59, %v2776_v59  ;;  %v2799_v0 = vcombine.high %v2777_v63, %v2777_v63 }
   0xe   :  { %110 = vrot.lane.b32.xlu1 %v89_v8, %s16216_s29  ;;  %108 = vrot.lane.b32.xlu0 %v67_v7, %s16216_s29  ;;  %v2778_v7 = vld [vmem:[%s21981_s0 + $0x50] sm:$0x7] }
  0x12   :  { %114 = vrot.lane.b32.xlu1 %v90_v10, %s16216_s29  ;;  %112 = vrot.lane.b32.xlu0 %v68_v9, %s16216_s29 }
  0x16   :  { %118 = vrot.lane.b32.xlu1 %v91_v12, %s16216_s29  ;;  %116 = vrot.lane.b32.xlu0 %v69_v11, %s16216_s29  ;;  %v16469_v11 = vld [vmem:[%s21982_s1 + $0x18] sm:$0xff] }
  0x1a   :  { %122 = vrot.lane.b32.xlu1 %v92_v14, %s16216_s29  ;;  %120 = vrot.lane.b32.xlu0 %v70_v13, %s16216_s29 }
  0x1e   :  { %126 = vrot.lane.b32.xlu1 %v93_v16, %s16216_s29  ;;  %124 = vrot.lane.b32.xlu0 %v71_v15, %s16216_s29 }
  0x22   :  { %130 = vrot.lane.b32.xlu1 %v94_v18, %s16216_s29  ;;  %128 = vrot.lane.b32.xlu0 %v72_v17, %s16216_s29 }
  0x26   :  { %134 = vrot.lane.b32.xlu1 %v95_v20, %s16216_s29  ;;  %132 = vrot.lane.b32.xlu0 %v73_v19, %s16216_s29 }
  0x2a   :  { %136 = vrot.lane.b32.xlu0 %v74_v23, %s16216_s29  ;;  %1849 = vrot.lane.b32.xlu1 %v1837_v22, %s16217_s17 }
  0x2e   :  { %1851 = vrot.lane.b32.xlu0 %v1816_v24, %s16217_s17  ;;  %1847 = vrot.lane.b32.xlu1 %v1815_v21, %s16217_s17 }
  0x32   :  { %1853 = vrot.lane.b32.xlu0 %v1838_v25, %s16217_s17  ;;  %1855 = vrot.lane.b32.xlu1 %v1817_v26, %s16217_s17 }
  0x36   :  { %1857 = vrot.lane.b32.xlu0 %v1839_v27, %s16217_s17  ;;  %1859 = vrot.lane.b32.xlu1 %v1818_v28, %s16217_s17 }
  0x3a   :  { %1861 = vrot.lane.b32.xlu0 %v1840_v29, %s16217_s17  ;;  %1863 = vrot.lane.b32.xlu1 %v1819_v30, %s16217_s17 }
  0x3e   :  { %1865 = vrot.lane.b32.xlu0 %v1841_v31, %s16217_s17  ;;  %1867 = vrot.lane.b32.xlu1 %v1820_v32, %s16217_s17 }
  0x42   :  { %1869 = vrot.lane.b32.xlu0 %v1842_v33, %s16217_s17  ;;  %1871 = vrot.lane.b32.xlu1 %v1821_v34, %s16217_s17 }
  0x46   :  { %1873 = vrot.lane.b32.xlu0 %v1843_v35, %s16217_s17  ;;  %1875 = vrot.lane.b32.xlu1 %v1822_v36, %s16217_s17 }
  0x4a   :  { %1877 = vrot.lane.b32.xlu0 %v1844_v37, %s16217_s17  ;;  %1879 = vrot.lane.b32.xlu1 %v1823_v38, %s16217_s17  ;;  %v52_v37 = vld [vmem:[%s21981_s0 + $0x4] sm:$0x77] }
  0x4e   :  { %1881 = vrot.lane.b32.xlu0 %v1845_v39, %s16217_s17  ;;  %1883 = vrot.lane.b32.xlu1 %v1824_v40, %s16217_s17 }
  0x52   :  { %1885 = vrot.lane.b32.xlu0 %v1846_v41, %s16217_s17  ;;  %1887 = vrot.lane.b32.xlu1 %v1825_v42, %s16217_s17  ;;  %v987_v42 = vcombine.high %v52_v37, %v52_v37 }
  0x56   :  { %2802 = vrot.lane.b32.xlu0 %v2790_v44, %s16218_s27  ;;  %2804 = vrot.lane.b32.xlu1 %v2769_v45, %s16218_s27  ;;  %v54_v44 = vld [vmem:[%s21981_s0 + $0x14] sm:$0x77] }
  0x5a   :  { %2800 = vrot.lane.b32.xlu0 %v2768_v43, %s16218_s27  ;;  %2806 = vrot.lane.b32.xlu1 %v2791_v46, %s16218_s27  ;;  %v53_v43 = vld [vmem:[%s21981_s0 + $0xc] sm:$0x77] }
  0x5e   :  { %2808 = vrot.lane.b32.xlu0 %v2770_v47, %s16218_s27  ;;  %2810 = vrot.lane.b32.xlu1 %v2792_v48, %s16218_s27 }
  0x62   :  { %2812 = vrot.lane.b32.xlu0 %v2771_v49, %s16218_s27  ;;  %2814 = vrot.lane.b32.xlu1 %v2793_v50, %s16218_s27  ;;  %v988_v49 = vcombine.high %v53_v43, %v53_v43  ;;  %v989_v50 = vcombine.high %v54_v44, %v54_v44 }
  0x66   :  { %2816 = vrot.lane.b32.xlu0 %v2772_v51, %s16218_s27  ;;  %2818 = vrot.lane.b32.xlu1 %v2794_v52, %s16218_s27  ;;  %v55_v51 = vld [vmem:[%s21981_s0 + $0x1c] sm:$0x77]  ;;  %v56_v52 = vld [vmem:[%s21981_s0 + $0x24] sm:$0x77] }
  0x6a   :  { %2820 = vrot.lane.b32.xlu0 %v2773_v53, %s16218_s27  ;;  %2822 = vrot.lane.b32.xlu1 %v2795_v54, %s16218_s27 }
  0x6e   :  { %2824 = vrot.lane.b32.xlu0 %v2774_v55, %s16218_s27  ;;  %2826 = vrot.lane.b32.xlu1 %v2796_v56, %s16218_s27  ;;  %v16587_v55 = vld [vmem:[%s21982_s1] sm:$0xff]  ;;  %v990_v56 = vcombine.high %v55_v51, %v55_v51 }
  0x72   :  { %2828 = vrot.lane.b32.xlu0 %v2775_v57, %s16218_s27  ;;  %2830 = vrot.lane.b32.xlu1 %v2797_v58, %s16218_s27  ;;  %v991_v57 = vcombine.high %v56_v52, %v56_v52  ;;  %v57_v58 = vld [vmem:[%s21981_s0 + $0x2c] sm:$0x77] }
  0x74   :  { %v101_v61 = vpop.permute.xlu0 %100  ;;  %v97_v62 = vpop.permute.xlu1 %96 }
  0x76   :  { %2832 = vrot.lane.b32.xlu0 %v2776_v59, %s16218_s27  ;;  %2834 = vrot.lane.b32.xlu1 %v2798_v60, %s16218_s27 }
  0x78   :  { %v103_v1 = vpop.permute.xlu1 %102  ;;  %v99_v3 = vpop.permute.xlu0 %98 }
  0x79   :  { %v140_v4 = vsel %vm138_vm0, %v99_v3, %v101_v61  ;;  %v139_v5 = vsel %vm138_vm0, %v97_v62, %v99_v3  ;;  %v141_v12 = vsel %vm138_vm0, %v101_v61, %v103_v1  ;;  %v16608_v61 = vld [vmem:[%s21982_s1 + $0x8] sm:$0xff]  ;;  %v992_v62 = vcombine.high %v57_v58, %v57_v58 }
  0x7a   :  { %13949 = vmatprep.subr.msk.mxu0 %vm166_vm1, %v140_v4  ;;  %2836 = vrot.lane.b32.xlu0 %v2777_v63, %s16218_s27  ;;  %v58_v63 = vld [vmem:[%s21981_s0 + $0x34] sm:$0x77]  ;;  %v59_v4 = vld [vmem:[%s21981_s0 + $0x3c] sm:$0x77] }
  0x7b   :  { %13950 = vmatpush1.msk.msra.mxu0 %vm166_vm1, %v139_v5  ;;  %2838 = vrot.lane.b32.xlu1 %v2799_v0, %s16218_s27  ;;  %v993_v3 = vcombine.high %v58_v63, %v58_v63 }
  0x7c   :  { %v107_v8 = vpop.permute.xlu1 %106  ;;  %13951 = vmatmul.mubr.msk.f32.vlgmr.msra.gmra.mrb[0].mxu0 %vm159_vm2, %v16453_v6  ;;  %v105_v9 = vpop.permute.xlu0 %104 }
  0x7d   :  { %v142_v10 = vsel %vm138_vm0, %v103_v1, %v105_v9  ;;  %277 = vmatprep.mubr.f32.mxu0 %v21995_v2  ;;  %v143_v16 = vsel %vm138_vm0, %v105_v9, %v107_v8 }
  0x7e   :  { %13953 = vmatprep.subr.msk.mxu1 %vm166_vm1, %v142_v10  ;;  %2840 = vrot.lane.b32.xlu0 %v2778_v7, %s16218_s27  ;;  %v994_v7 = vcombine.high %v59_v4, %v59_v4 }
  0x7f   :  { %13954 = vmatpush1.msk.msra.mxu1 %vm166_vm1, %v141_v12  ;;  %v61_v12 = vld [vmem:[%s21981_s0 + $0x4c] sm:$0x77] }
  0x80   :  { %v111_v13 = vpop.permute.xlu1 %110  ;;  %13952 = vmatmul.mubr.msk.f32.gmra.mrb[2].mxu0 %vm159_vm2, %v16469_v11  ;;  %13955 = vmatmul.mubr.msk.f32.vlgmr.msra.gmra.mrb[0].mxu1 %vm159_vm2, %v16453_v6  ;;  %v109_v14 = vpop.permute.xlu0 %108 }
  0x81   :  { %v144_v15 = vsel %vm138_vm0, %v107_v8, %v109_v14  ;;  %354 = vmatprep.mubr.f32.mxu1 %v21995_v2  ;;  %425 = vmatprep.mubr.f32.mxu0 %v21995_v2  ;;  %v145_v20 = vsel %vm138_vm0, %v109_v14, %v111_v13  ;;  %v60_v8 = vld [vmem:[%s21981_s0 + $0x44] sm:$0x77] }
  0x82   :  { %13957 = vmatprep.subr.msk.mxu0 %vm166_vm1, %v144_v15  ;;  %v996_v15 = vcombine.high %v61_v12, %v61_v12 }
  0x83   :  { %13958 = vmatpush1.msk.msra.mxu0 %vm166_vm1, %v143_v16 }
  0x84   :  { %v115_v17 = vpop.permute.xlu1 %114  ;;  %13956 = vmatmul.mubr.msk.f32.gmra.mrb[2].mxu1 %vm159_vm2, %v16469_v11  ;;  %13959 = vmatmul.mubr.msk.f32.vlgmr.msra.gmra.mrb[4].mxu0 %vm159_vm2, %v16453_v6  ;;  %v113_v18 = vpop.permute.xlu0 %112 }
  0x85   :  { %v146_v19 = vsel %vm138_vm0, %v111_v13, %v113_v18  ;;  %431 = vmatprep.mubr.f32.mxu0 %v21995_v2  ;;  %502 = vmatprep.mubr.f32.mxu1 %v21995_v2  ;;  %v147_v24 = vsel %vm138_vm0, %v113_v18, %v115_v17 }
  0x86   :  { %13961 = vmatprep.subr.msk.mxu1 %vm166_vm1, %v146_v19 }
  0x87   :  { %13962 = vmatpush1.msk.msra.mxu1 %vm166_vm1, %v145_v20 }
  0x88   :  { %v119_v21 = vpop.permute.xlu1 %118  ;;  %13960 = vmatmul.mubr.msk.f32.gmra.mrb[6].mxu0 %vm159_vm2, %v16469_v11  ;;  %13963 = vmatmul.mubr.msk.f32.vlgmr.msra.gmra.mrb[4].mxu1 %vm159_vm2, %v16453_v6  ;;  %v117_v22 = vpop.permute.xlu0 %116 }
  0x89   :  { %v148_v23 = vsel %vm138_vm0, %v115_v17, %v117_v22  ;;  %508 = vmatprep.mubr.f32.mxu1 %v21995_v2  ;;  %579 = vmatprep.mubr.f32.mxu0 %v21995_v2  ;;  %v149_v28 = vsel %vm138_vm0, %v117_v22, %v119_v21 }
  0x8a   :  { %13965 = vmatprep.subr.msk.mxu0 %vm166_vm1, %v148_v23 }
  0x8b   :  { %13966 = vmatpush1.msk.msra.mxu0 %vm166_vm1, %v147_v24 }
  0x8c   :  { %v123_v25 = vpop.permute.xlu1 %122  ;;  %13964 = vmatmul.mubr.msk.f32.gmra.mrb[6].mxu1 %vm159_vm2, %v16469_v11  ;;  %13967 = vmatmul.mubr.msk.f32.vlgmr.msra.gmra.mrb[8].mxu0 %vm159_vm2, %v16453_v6  ;;  %v121_v26 = vpop.permute.xlu0 %120 }
  0x8d   :  { %v150_v27 = vsel %vm138_vm0, %v119_v21, %v121_v26  ;;  %585 = vmatprep.mubr.f32.mxu0 %v21995_v2  ;;  %656 = vmatprep.mubr.f32.mxu1 %v21995_v2  ;;  %v151_v32 = vsel %vm138_vm0, %v121_v26, %v123_v25 }
  0x8e   :  { %13969 = vmatprep.subr.msk.mxu1 %vm166_vm1, %v150_v27 }
  0x8f   :  { %13970 = vmatpush1.msk.msra.mxu1 %vm166_vm1, %v149_v28 }
  0x90   :  { %v127_v29 = vpop.permute.xlu1 %126  ;;  %13968 = vmatmul.mubr.msk.f32.gmra.mrb[10].mxu0 %vm159_vm2, %v16469_v11  ;;  %13971 = vmatmul.mubr.msk.f32.vlgmr.msra.gmra.mrb[8].mxu1 %vm159_vm2, %v16453_v6  ;;  %v125_v30 = vpop.permute.xlu0 %124 }
  0x91   :  { %v152_v31 = vsel %vm138_vm0, %v123_v25, %v125_v30  ;;  %662 = vmatprep.mubr.f32.mxu1 %v21995_v2  ;;  %733 = vmatprep.mubr.f32.mxu0 %v21995_v2  ;;  %v153_v36 = vsel %vm138_vm0, %v125_v30, %v127_v29 }
  0x92   :  { %13973 = vmatprep.subr.msk.mxu0 %vm166_vm1, %v152_v31  ;;  %v16748_v31 = vld [vmem:[%s21982_s1 + $0x20] sm:$0xff] }
  0x93   :  { %13974 = vmatpush1.msk.msra.mxu0 %vm166_vm1, %v151_v32 }
  0x94   :  { %v131_v33 = vpop.permute.xlu1 %130  ;;  %13972 = vmatmul.mubr.msk.f32.gmra.mrb[10].mxu1 %vm159_vm2, %v16469_v11  ;;  %13975 = vmatmul.mubr.msk.f32.vlgmr.msra.gmra.mrb[12].mxu0 %vm159_vm2, %v16453_v6  ;;  %v129_v34 = vpop.permute.xlu0 %128 }
  0x95   :  { %v154_v35 = vsel %vm138_vm0, %v127_v29, %v129_v34  ;;  %739 = vmatprep.mubr.f32.mxu0 %v21995_v2  ;;  %810 = vmatprep.mubr.f32.mxu1 %v21995_v2  ;;  %v155_v41 = vsel %vm138_vm0, %v129_v34, %v131_v33  ;;  %v16767_v34 = vld [vmem:[%s21982_s1 + $0x28] sm:$0xff] }
  0x96   :  { %13977 = vmatprep.subr.msk.mxu1 %vm166_vm1, %v154_v35 }
  0x97   :  { %13978 = vmatpush1.msk.msra.mxu1 %vm166_vm1, %v153_v36 }
  0x98   :  { %v135_v38 = vpop.permute.xlu1 %134  ;;  %13976 = vmatmul.mubr.msk.f32.gmra.mrb[14].mxu0 %vm159_vm2, %v16469_v11  ;;  %13979 = vmatmul.mubr.msk.f32.vlgmr.msra.gmra.mrb[12].mxu1 %vm159_vm2, %v16453_v6  ;;  %v133_v39 = vpop.permute.xlu0 %132 }
  0x99   :  { %v156_v40 = vsel %vm138_vm0, %v131_v33, %v133_v39  ;;  %816 = vmatprep.mubr.f32.mxu1 %v21995_v2  ;;  %887 = vmatprep.mubr.f32.mxu0 %v21995_v2  ;;  %v157_v48 = vsel %vm138_vm0, %v133_v39, %v135_v38 }
  0x9a   :  { %13981 = vmatprep.subr.msk.mxu0 %vm166_vm1, %v156_v40 }
  0x9b   :  { %13982 = vmatpush1.msk.msra.mxu0 %vm166_vm1, %v155_v41 }
  0x9c   :  { %13980 = vmatmul.mubr.msk.f32.gmra.mrb[14].mxu1 %vm159_vm2, %v16469_v11  ;;  %13983 = vmatmul.mubr.msk.f32.vlgmr.msra.gmra.mrb[16].mxu0 %vm159_vm2, %v16453_v6  ;;  %v137_v45 = vpop.permute.xlu0 %136  ;;  %v16558_v46 = vpop.permute.xlu1 %1849 }
  0x9d   :  { %v158_v47 = vsel %vm138_vm0, %v135_v38, %v137_v45  ;;  %893 = vmatprep.mubr.f32.mxu0 %v21995_v2  ;;  %964 = vmatprep.mubr.f32.mxu1 %v21995_v2 }
  0x9e   :  { %13985 = vmatprep.subr.msk.mxu1 %vm166_vm1, %v158_v47  ;;  %13989 = vmatprep.subr.msk.mxu0 %vm166_vm1, %v987_v42 }
  0x9f   :  { %13986 = vmatpush1.msk.msra.mxu1 %vm166_vm1, %v157_v48  ;;  %13990 = vmatpush1.msk.msra.mxu0 %vm166_vm1, %v52_v37 }
  0xa0   :  { %13984 = vmatmul.mubr.msk.f32.gmra.mrb[18].mxu0 %vm159_vm2, %v16469_v11  ;;  %13987 = vmatmul.mubr.msk.f32.vlgmr.msra.gmra.mrb[16].mxu1 %vm159_vm2, %v16453_v6  ;;  %v16578_v53 = vpop.permute.xlu0 %1851  ;;  %v16580_v54 = vpop.permute.xlu1 %1847 }
  0xa1   :  { %970 = vmatprep.mubr.f32.mxu1 %v21995_v2  ;;  %1107 = vmatprep.mubr.f32.mxu0 %v21995_v2  ;;  %v1891_v18 = vsel %vm1889_vm3, %v16558_v46, %v16578_v53  ;;  %v1890_v23 = vsel %vm1889_vm3, %v16580_v54, %v16558_v46 }
  0xa2   :  { %13993 = vmatprep.subr.msk.mxu1 %vm166_vm1, %v988_v49  ;;  %13997 = vmatprep.subr.msk.mxu0 %vm166_vm1, %v989_v50 }
  0xa3   :  { %13994 = vmatpush1.msk.msra.mxu1 %vm166_vm1, %v53_v43 }
  0xa4   :  { %13988 = vmatmul.mubr.msk.f32.gmra.mrb[18].mxu1 %vm159_vm2, %v16469_v11  ;;  %13991 = vmatmul.mubr.msk.f32.vlgmr.msra.gmra.mrb[0].mxu0 %vm159_vm2, %v16587_v55  ;;  %v16599_v59 = vpop.permute.xlu0 %1853  ;;  %v16601_v60 = vpop.permute.xlu1 %1855  ;;  %v995_v11 = vcombine.high %v60_v8, %v60_v8 }
  0xa5   :  { %1113 = vmatprep.mubr.f32.mxu0 %v21995_v2  ;;  %1184 = vmatprep.mubr.f32.mxu1 %v21995_v2  ;;  %v1893_v21 = vsel %vm1889_vm3, %v16599_v59, %v16601_v60  ;;  %v1892_v28 = vsel %vm1889_vm3, %v16578_v53, %v16599_v59 }
  0xa6   :  { %13998 = vmatpush1.msk.msra.mxu0 %vm166_vm1, %v54_v44  ;;  %14001 = vmatprep.subr.msk.mxu1 %vm166_vm1, %v990_v56 }
  0xa7   :  { %14005 = vmatprep.subr.msk.mxu0 %vm166_vm1, %v991_v57 }
  0xa8   :  { %13992 = vmatmul.mubr.msk.f32.gmra.mrb[2].mxu0 %vm159_vm2, %v16608_v61  ;;  %13995 = vmatmul.mubr.msk.f32.vlgmr.msra.gmra.mrb[0].mxu1 %vm159_vm2, %v16587_v55  ;;  %v16620_v0 = vpop.permute.xlu0 %1857  ;;  %v16622_v1 = vpop.permute.xlu1 %1859 }
  0xa9   :  { %1190 = vmatprep.mubr.f32.mxu1 %v21995_v2  ;;  %1261 = vmatprep.mubr.f32.mxu0 %v21995_v2  ;;  %v1895_v25 = vsel %vm1889_vm3, %v16620_v0, %v16622_v1  ;;  %v1894_v32 = vsel %vm1889_vm3, %v16601_v60, %v16620_v0 }
  0xaa   :  { %14002 = vmatpush1.msk.msra.mxu1 %vm166_vm1, %v55_v51 }
  0xab   :  { %14009 = vmatprep.subr.msk.mxu1 %vm166_vm1, %v992_v62 }
  0xac   :  { %13996 = vmatmul.mubr.msk.f32.gmra.mrb[2].mxu1 %vm159_vm2, %v16608_v61  ;;  %13999 = vmatmul.mubr.msk.f32.vlgmr.msra.gmra.mrb[4].mxu0 %vm159_vm2, %v16587_v55  ;;  %v16635_v5 = vpop.permute.xlu0 %1861  ;;  %v16637_v6 = vpop.permute.xlu1 %1863 }
  0xad   :  { %1267 = vmatprep.mubr.f32.mxu0 %v21995_v2  ;;  %1338 = vmatprep.mubr.f32.mxu1 %v21995_v2  ;;  %v1897_v27 = vsel %vm1889_vm3, %v16635_v5, %v16637_v6  ;;  %v1896_v35 = vsel %vm1889_vm3, %v16622_v1, %v16635_v5  ;;  %v16900_v1 = vld [vmem:[%s21982_s1 + $0x30] sm:$0xff] }
  0xae   :  { %14006 = vmatpush1.msk.msra.mxu0 %vm166_vm1, %v56_v52 }
  0xaf   :  { %14013 = vmatprep.subr.msk.mxu0 %vm166_vm1, %v993_v3 }
  0xb0   :  { %14000 = vmatmul.mubr.msk.f32.gmra.mrb[6].mxu0 %vm159_vm2, %v16608_v61  ;;  %14003 = vmatmul.mubr.msk.f32.vlgmr.msra.gmra.mrb[4].mxu1 %vm159_vm2, %v16587_v55  ;;  %v16650_v9 = vpop.permute.xlu0 %1865  ;;  %v16652_v10 = vpop.permute.xlu1 %1867 }
  0xb1   :  { %1344 = vmatprep.mubr.f32.mxu1 %v21995_v2  ;;  %1415 = vmatprep.mubr.f32.mxu0 %v21995_v2  ;;  %v1899_v33 = vsel %vm1889_vm3, %v16650_v9, %v16652_v10  ;;  %v1898_v39 = vsel %vm1889_vm3, %v16637_v6, %v16650_v9 }
  0xb2   :  { %14010 = vmatpush1.msk.msra.mxu1 %vm166_vm1, %v57_v58 }
  0xb3   :  { %14017 = vmatprep.subr.msk.mxu1 %vm166_vm1, %v994_v7  ;;  %v16916_v7 = vld [vmem:[%s21982_s1 + $0x38] sm:$0xff] }
  0xb4   :  { %14004 = vmatmul.mubr.msk.f32.gmra.mrb[6].mxu1 %vm159_vm2, %v16608_v61  ;;  %14007 = vmatmul.mubr.msk.f32.vlgmr.msra.gmra.mrb[8].mxu0 %vm159_vm2, %v16587_v55  ;;  %v16665_v13 = vpop.permute.xlu0 %1869  ;;  %v16667_v14 = vpop.permute.xlu1 %1871 }
  0xb5   :  { %1421 = vmatprep.mubr.f32.mxu0 %v21995_v2  ;;  %1492 = vmatprep.mubr.f32.mxu1 %v21995_v2  ;;  %v1901_v38 = vsel %vm1889_vm3, %v16665_v13, %v16667_v14  ;;  %v1900_v43 = vsel %vm1889_vm3, %v16652_v10, %v16665_v13 }
  0xb6   :  { %14014 = vmatpush1.msk.msra.mxu0 %vm166_vm1, %v58_v63 }
  0xb7   :  { %14021 = vmatprep.subr.msk.mxu0 %vm166_vm1, %v995_v11 }
  0xb8   :  { %14008 = vmatmul.mubr.msk.f32.gmra.mrb[10].mxu0 %vm159_vm2, %v16608_v61  ;;  %14011 = vmatmul.mubr.msk.f32.vlgmr.msra.gmra.mrb[8].mxu1 %vm159_vm2, %v16587_v55  ;;  %v16677_v16 = vpop.permute.xlu0 %1873  ;;  %v16679_v17 = vpop.permute.xlu1 %1875 }
  0xb9   :  { %1498 = vmatprep.mubr.f32.mxu1 %v21995_v2  ;;  %1569 = vmatprep.mubr.f32.mxu0 %v21995_v2  ;;  %v1903_v40 = vsel %vm1889_vm3, %v16677_v16, %v16679_v17  ;;  %v1902_v45 = vsel %vm1889_vm3, %v16667_v14, %v16677_v16 }
  0xba   :  { %14018 = vmatpush1.msk.msra.mxu1 %vm166_vm1, %v59_v4 }
  0xbb   :  { %14025 = vmatprep.subr.msk.mxu1 %vm166_vm1, %v996_v15 }
  0xbc   :  { %14012 = vmatmul.mubr.msk.f32.gmra.mrb[10].mxu1 %vm159_vm2, %v16608_v61  ;;  %14015 = vmatmul.mubr.msk.f32.vlgmr.msra.gmra.mrb[12].mxu0 %vm159_vm2, %v16587_v55  ;;  %v16692_v19 = vpop.permute.xlu0 %1877  ;;  %v16694_v20 = vpop.permute.xlu1 %1879 }
  0xbd   :  { %1575 = vmatprep.mubr.f32.mxu0 %v21995_v2  ;;  %1646 = vmatprep.mubr.f32.mxu1 %v21995_v2  ;;  %v1905_v44 = vsel %vm1889_vm3, %v16692_v19, %v16694_v20  ;;  %v1904_v49 = vsel %vm1889_vm3, %v16679_v17, %v16692_v19 }
  0xbe   :  { %14022 = vmatpush1.msk.msra.mxu0 %vm166_vm1, %v60_v8 }
  0xbf   :  { %14029 = vmatprep.subr.msk.mxu0 %vm166_vm1, %v1891_v18 }
  0xc0   :  { %14016 = vmatmul.mubr.msk.f32.gmra.mrb[14].mxu0 %vm159_vm2, %v16608_v61  ;;  %14019 = vmatmul.mubr.msk.f32.vlgmr.msra.gmra.mrb[12].mxu1 %vm159_vm2, %v16587_v55  ;;  %v16707_v22 = vpop.permute.xlu0 %1881  ;;  %v16715_v24 = vpop.permute.xlu1 %1883 }
  0xc1   :  { %1652 = vmatprep.mubr.f32.mxu1 %v21995_v2  ;;  %1723 = vmatprep.mubr.f32.mxu0 %v21995_v2  ;;  %v1907_v48 = vsel %vm1889_vm3, %v16707_v22, %v16715_v24  ;;  %v1906_v53 = vsel %vm1889_vm3, %v16694_v20, %v16707_v22 }
  0xc2   :  { %14026 = vmatpush1.msk.msra.mxu1 %vm166_vm1, %v61_v12 }
  0xc3   :  { %14033 = vmatprep.subr.msk.mxu1 %vm166_vm1, %v1893_v21 }
  0xc4   :  { %14020 = vmatmul.mubr.msk.f32.gmra.mrb[14].mxu1 %vm159_vm2, %v16608_v61  ;;  %14023 = vmatmul.mubr.msk.f32.vlgmr.msra.gmra.mrb[16].mxu0 %vm159_vm2, %v16587_v55  ;;  %v16725_v26 = vpop.permute.xlu0 %1885  ;;  %v1888_v29 = vpop.permute.xlu1 %1887 }
  0xc5   :  { %14030 = vmatpush1.msk.msra.mxu0 %vm166_vm1, %v1890_v23  ;;  %1729 = vmatprep.mubr.f32.mxu0 %v21995_v2  ;;  %v1909_v50 = vsel %vm1889_vm3, %v16725_v26, %v1888_v29  ;;  %v3719_v29 = vld [vmem:[%s21983_s10] sm:$0xff] }
  0xc6   :  { %1800 = vmatprep.mubr.f32.mxu1 %v21995_v2  ;;  %14037 = vmatprep.subr.msk.mxu0 %vm166_vm1, %v1895_v25 }
  0xc8   :  { %14024 = vmatmul.mubr.msk.f32.gmra.mrb[18].mxu0 %vm159_vm2, %v16608_v61  ;;  %14027 = vmatmul.mubr.msk.f32.vlgmr.msra.gmra.mrb[16].mxu1 %vm159_vm2, %v16587_v55  ;;  %v16741_v30 = vpop.permute.xlu0 %2802  ;;  %v16774_v36 = vpop.permute.xlu1 %2804  ;;  %v1908_v55 = vsel %vm1889_vm3, %v16715_v24, %v16725_v26  ;;  %v3725_v26 = vlaneseq }
  0xc9   :  { %14034 = vmatpush1.msk.msra.mxu1 %vm166_vm1, %v1892_v28  ;;  %1806 = vmatprep.mubr.f32.mxu1 %v21995_v2  ;;  %v2844_v54 = vsel %vm2842_vm4, %v16741_v30, %v16774_v36 }
  0xca   :  { %2020 = vmatprep.mubr.f32.mxu0 %v21995_v2  ;;  %14041 = vmatprep.subr.msk.mxu1 %vm166_vm1, %v1897_v27  ;;  %v3726_v27 = vshrl.u32 %v3725_v26, 7 }
  0xcc   :  { %14028 = vmatmul.mubr.msk.f32.gmra.mrb[18].mxu1 %vm159_vm2, %v16608_v61  ;;  %14031 = vmatmul.mubr.msk.f32.vlgmr.msra.gmra.mrb[0].mxu0 %vm159_vm2, %v16748_v31  ;;  %v16776_v37 = vpop.permute.xlu0 %2800  ;;  %v2807_v41 = vpop.permute.xlu1 %2806  ;;  %v17002_v28 = vsub.s32 0, %v3726_v27 }
  0xcd   :  { %14038 = vmatpush1.msk.msra.mxu0 %vm166_vm1, %v1894_v32  ;;  %2026 = vmatprep.mubr.f32.mxu0 %v21995_v2  ;;  %v2843_v59 = vsel %vm2842_vm4, %v16776_v37, %v16741_v30  ;;  %v2845_v63 = vsel %vm2842_vm4, %v16774_v36, %v2807_v41  ;;  %v17007_v30 = vsub.s32 1, %v3726_v27  ;;  %v17012_v32 = vsub.s32 2, %v3726_v27 }
  0xce   :  { %2097 = vmatprep.mubr.f32.mxu1 %v21995_v2  ;;  %14045 = vmatprep.subr.msk.mxu0 %vm166_vm1, %v1899_v33  ;;  %22349 = vst [vmem:[#allocation4_spill] sm:$0xff] %v17002_v28  ;;  %v17014_v33 = vsub.s32 3, %v3726_v27  ;;  %v17021_v36 = vsub.s32 5, %v3726_v27  ;;  %v17023_v37 = vsub.s32 6, %v3726_v27 }
  0xcf   :  { %22350 = vst [vmem:[#allocation5_spill] sm:$0xff] %v17007_v30  ;;  %22351 = vst [vmem:[#allocation6_spill] sm:$0xff] %v17012_v32 }
  0xd0   :  { %14032 = vmatmul.mubr.msk.f32.gmra.mrb[2].mxu0 %vm159_vm2, %v16767_v34  ;;  %14035 = vmatmul.mubr.msk.f32.vlgmr.msra.gmra.mrb[0].mxu1 %vm159_vm2, %v16748_v31  ;;  %v16799_v42 = vpop.permute.xlu0 %2808  ;;  %v2811_v46 = vpop.permute.xlu1 %2810  ;;  %22352 = vst [vmem:[#allocation7_spill] sm:$0xff] %v17014_v33  ;;  %22354 = vst [vmem:[#allocation9_spill] sm:$0xff] %v17021_v36 }
  0xd1   :  { %14042 = vmatpush1.msk.msra.mxu1 %vm166_vm1, %v1896_v35  ;;  %2103 = vmatprep.mubr.f32.mxu1 %v21995_v2  ;;  %v2846_v58 = vsel %vm2842_vm4, %v2807_v41, %v16799_v42  ;;  %v2847_v3 = vsel %vm2842_vm4, %v16799_v42, %v2811_v46  ;;  %v17019_v35 = vsub.s32 4, %v3726_v27  ;;  %22355 = vst [vmem:[#allocation10_spill] sm:$0xff] %v17023_v37 }
  0xd2   :  { %2174 = vmatprep.mubr.f32.mxu0 %v21995_v2  ;;  %14049 = vmatprep.subr.msk.mxu1 %vm166_vm1, %v1901_v38  ;;  %v17025_v38 = vsub.s32 7, %v3726_v27 }
  0xd3   :  { %22353 = vst [vmem:[#allocation8_spill] sm:$0xff] %v17019_v35 }
  0xd4   :  { %14036 = vmatmul.mubr.msk.f32.gmra.mrb[2].mxu1 %vm159_vm2, %v16767_v34  ;;  %14039 = vmatmul.mubr.msk.f32.vlgmr.msra.gmra.mrb[4].mxu0 %vm159_vm2, %v16748_v31  ;;  %v16822_v47 = vpop.permute.xlu0 %2812  ;;  %v2815_v51 = vpop.permute.xlu1 %2814  ;;  %22356 = vst [vmem:[#allocation11_spill] sm:$0xff] %v17025_v38 }
  0xd5   :  { %14046 = vmatpush1.msk.msra.mxu0 %vm166_vm1, %v1898_v39  ;;  %2180 = vmatprep.mubr.f32.mxu0 %v21995_v2  ;;  %v2848_v60 = vsel %vm2842_vm4, %v2811_v46, %v16822_v47  ;;  %v2849_v8 = vsel %vm2842_vm4, %v16822_v47, %v2815_v51  ;;  %v17045_v46 = vrot.slane %v3719_v29, %v17019_v35 }
  0xd6   :  { %2251 = vmatprep.mubr.f32.mxu1 %v21995_v2  ;;  %14053 = vmatprep.subr.msk.mxu0 %vm166_vm1, %v1903_v40  ;;  %v3720_v40 = vld [vmem:[%s21983_s10 + $0x8] sm:$0xff]  ;;  %v17048_v47 = vrot.slane %v3719_v29, %v17021_v36 }
  0xd8   :  { %14040 = vmatmul.mubr.msk.f32.gmra.mrb[6].mxu0 %vm159_vm2, %v16767_v34  ;;  %14043 = vmatmul.mubr.msk.f32.vlgmr.msra.gmra.mrb[4].mxu1 %vm159_vm2, %v16748_v31  ;;  %v2817_v52 = vpop.permute.xlu0 %2816  ;;  %v2819_v56 = vpop.permute.xlu1 %2818 }
  0xd9   :  { %14050 = vmatpush1.msk.msra.mxu1 %vm166_vm1, %v1900_v43  ;;  %2257 = vmatprep.mubr.f32.mxu1 %v21995_v2  ;;  %v2850_v0 = vsel %vm2842_vm4, %v2815_v51, %v2817_v52  ;;  %v2851_v12 = vsel %vm2842_vm4, %v2817_v52, %v2819_v56  ;;  %v17037_v43 = vrot.slane %v3719_v29, %v17012_v32 }
  0xda   :  { %2328 = vmatprep.mubr.f32.mxu0 %v21995_v2  ;;  %14057 = vmatprep.subr.msk.mxu1 %vm166_vm1, %v1905_v44  ;;  %v17040_v44 = vrot.slane %v3719_v29, %v17014_v33  ;;  %v17057_v51 = vrot.slane %v3720_v40, %v17002_v28  ;;  %v17060_v52 = vrot.slane %v3720_v40, %v17007_v30 }
  0xdc   :  { %14044 = vmatmul.mubr.msk.f32.gmra.mrb[6].mxu1 %vm159_vm2, %v16767_v34  ;;  %14047 = vmatmul.mubr.msk.f32.vlgmr.msra.gmra.mrb[8].mxu0 %vm159_vm2, %v16748_v31  ;;  %v2821_v57 = vpop.permute.xlu0 %2820  ;;  %v2823_v61 = vpop.permute.xlu1 %2822 }
  0xdd   :  { %14054 = vmatpush1.msk.msra.mxu0 %vm166_vm1, %v1902_v45  ;;  %2334 = vmatprep.mubr.f32.mxu0 %v21995_v2  ;;  %v2852_v6 = vsel %vm2842_vm4, %v2819_v56, %v2821_v57  ;;  %v2853_v14 = vsel %vm2842_vm4, %v2821_v57, %v2823_v61  ;;  %v17067_v57 = vrot.slane %v3720_v40, %v17012_v32 }
  0xde   :  { %2405 = vmatprep.mubr.f32.mxu1 %v21995_v2  ;;  %14061 = vmatprep.subr.msk.mxu0 %vm166_vm1, %v1907_v48  ;;  %v17051_v48 = vrot.slane %v3719_v29, %v17023_v37 }
  0xdf   :  { %22357 = vst [vmem:[#allocation12_spill] sm:$0xff] %v17067_v57 }
  0xe0   :  { %14048 = vmatmul.mubr.msk.f32.gmra.mrb[10].mxu0 %vm159_vm2, %v16767_v34  ;;  %14051 = vmatmul.mubr.msk.f32.vlgmr.msra.gmra.mrb[8].mxu1 %vm159_vm2, %v16748_v31  ;;  %v2825_v62 = vpop.permute.xlu0 %2824  ;;  %v2827_v4 = vpop.permute.xlu1 %2826 }
  0xe1   :  { %14058 = vmatpush1.msk.msra.mxu1 %vm166_vm1, %v1904_v49  ;;  %2411 = vmatprep.mubr.f32.mxu1 %v21995_v2  ;;  %v2854_v9 = vsel %vm2842_vm4, %v2823_v61, %v2825_v62  ;;  %v2855_v18 = vsel %vm2842_vm4, %v2825_v62, %v2827_v4 }
  0xe2   :  { %2482 = vmatprep.mubr.f32.mxu0 %v21995_v2  ;;  %14065 = vmatprep.subr.msk.mxu1 %vm166_vm1, %v1909_v50  ;;  %v17054_v50 = vrot.slane %v3719_v29, %v17025_v38 }
  0xe4   :  { %14052 = vmatmul.mubr.msk.f32.gmra.mrb[10].mxu1 %vm159_vm2, %v16767_v34  ;;  %14055 = vmatmul.mubr.msk.f32.vlgmr.msra.gmra.mrb[12].mxu0 %vm159_vm2, %v16748_v31  ;;  %v2829_v5 = vpop.permute.xlu0 %2828  ;;  %v2831_v10 = vpop.permute.xlu1 %2830 }
  0xe5   :  { %14062 = vmatpush1.msk.msra.mxu0 %vm166_vm1, %v1906_v53  ;;  %2488 = vmatprep.mubr.f32.mxu0 %v21995_v2  ;;  %v2856_v13 = vsel %vm2842_vm4, %v2827_v4, %v2829_v5  ;;  %v2857_v22 = vsel %vm2842_vm4, %v2829_v5, %v2831_v10 }
  0xe6   :  { %2559 = vmatprep.mubr.f32.mxu1 %v21995_v2  ;;  %14069 = vmatprep.subr.msk.mxu0 %vm166_vm1, %v2844_v54 }
  0xe8   :  { %14056 = vmatmul.mubr.msk.f32.gmra.mrb[14].mxu0 %vm159_vm2, %v16767_v34  ;;  %14059 = vmatmul.mubr.msk.f32.vlgmr.msra.gmra.mrb[12].mxu1 %vm159_vm2, %v16748_v31  ;;  %v2833_v11 = vpop.permute.xlu0 %2832  ;;  %v2835_v15 = vpop.permute.xlu1 %2834 }
  0xe9   :  { %14066 = vmatpush1.msk.msra.mxu1 %vm166_vm1, %v1908_v55  ;;  %2565 = vmatprep.mubr.f32.mxu1 %v21995_v2  ;;  %v2858_v17 = vsel %vm2842_vm4, %v2831_v10, %v2833_v11  ;;  %v2859_v24 = vsel %vm2842_vm4, %v2833_v11, %v2835_v15  ;;  %v17097_v10 = vrot.slane %v3720_v40, %v17025_v38 }
  0xea   :  { %2636 = vmatprep.mubr.f32.mxu0 %v21995_v2  ;;  %14073 = vmatprep.subr.msk.mxu1 %vm166_vm1, %v2846_v58  ;;  %v17070_v58 = vrot.slane %v3720_v40, %v17014_v33 }
  0xec   :  { %14060 = vmatmul.mubr.msk.f32.gmra.mrb[14].mxu1 %vm159_vm2, %v16767_v34  ;;  %14063 = vmatmul.mubr.msk.f32.vlgmr.msra.gmra.mrb[16].mxu0 %vm159_vm2, %v16748_v31  ;;  %v2837_v16 = vpop.permute.xlu0 %2836  ;;  %22358 = vst [vmem:[#allocation13_spill] sm:$0xff] %v17070_v58 }
  0xed   :  { %14070 = vmatpush1.msk.msra.mxu0 %vm166_vm1, %v2843_v59  ;;  %2642 = vmatprep.mubr.f32.mxu0 %v21995_v2  ;;  %v2860_v19 = vsel %vm2842_vm4, %v2835_v15, %v2837_v16  ;;  %v2839_v20 = vpop.permute.xlu1 %2838 }
  0xee   :  { %2713 = vmatprep.mubr.f32.mxu1 %v21995_v2  ;;  %14077 = vmatprep.subr.msk.mxu0 %vm166_vm1, %v2848_v60  ;;  %v2861_v25 = vsel %vm2842_vm4, %v2837_v16, %v2839_v20 }
  0xf0   :  { %14064 = vmatmul.mubr.msk.f32.gmra.mrb[18].mxu0 %vm159_vm2, %v16767_v34  ;;  %14067 = vmatmul.mubr.msk.f32.vlgmr.msra.gmra.mrb[16].mxu1 %vm159_vm2, %v16748_v31  ;;  %v2841_v21 = vpop.permute.xlu0 %2840  ;;  %v17010_v31 = vrot.slane %v3719_v29, %v17002_v28 }
  0xf1   :  { %14074 = vmatpush1.msk.msra.mxu1 %vm166_vm1, %v2845_v63  ;;  %2719 = vmatprep.mubr.f32.mxu1 %v21995_v2  ;;  %v2862_v23 = vsel %vm2842_vm4, %v2839_v20, %v2841_v21  ;;  %v17081_v63 = vrot.slane %v3720_v40, %v17019_v35 }
  0xf2   :  { %2973 = vmatprep.mubr.f32.mxu0 %v21995_v2  ;;  %14081 = vmatprep.subr.msk.mxu1 %vm166_vm1, %v2850_v0  ;;  %v17084_v0 = vrot.slane %v3720_v40, %v17021_v36 }
  0xf3   :  { %22359 = vst [vmem:[#allocation14_spill] sm:$0xff] %v17081_v63 }
  0xf4   :  { %14068 = vmatmul.mubr.msk.f32.gmra.mrb[18].mxu1 %vm159_vm2, %v16767_v34  ;;  %14071 = vmatmul.mubr.msk.f32.vlgmr.msra.gmra.mrb[0].mxu0 %vm159_vm2, %v16900_v1  ;;  %v17017_v34 = vrot.slane %v3719_v29, %v17007_v30  ;;  %22360 = vst [vmem:[#allocation15_spill] sm:$0xff] %v17084_v0 }
  0xf5   :  { %14078 = vmatpush1.msk.msra.mxu0 %vm166_vm1, %v2847_v3  ;;  %2979 = vmatprep.mubr.f32.mxu0 %v21995_v2 }
  0xf6   :  { %3050 = vmatprep.mubr.f32.mxu1 %v21995_v2  ;;  %14085 = vmatprep.subr.msk.mxu0 %vm166_vm1, %v2852_v6  ;;  %v17094_v6 = vrot.slane %v3720_v40, %v17023_v37 }
  0xf8   :  { %14072 = vmatmul.mubr.msk.f32.gmra.mrb[2].mxu0 %vm159_vm2, %v16916_v7  ;;  %14075 = vmatmul.mubr.msk.f32.vlgmr.msra.gmra.mrb[0].mxu1 %vm159_vm2, %v16900_v1  ;;  %22361 = vst [vmem:[#allocation16_spill] sm:$0xff] %v17094_v6 }
  0xf9   :  { %14082 = vmatpush1.msk.msra.mxu1 %vm166_vm1, %v2849_v8  ;;  %3056 = vmatprep.mubr.f32.mxu1 %v21995_v2 }
  0xfa   :  { %3127 = vmatprep.mubr.f32.mxu0 %v21995_v2  ;;  %14089 = vmatprep.subr.msk.mxu1 %vm166_vm1, %v2854_v9 }
  0xfc   :  { %14076 = vmatmul.mubr.msk.f32.gmra.mrb[2].mxu1 %vm159_vm2, %v16916_v7  ;;  %14079 = vmatmul.mubr.msk.f32.vlgmr.msra.gmra.mrb[4].mxu0 %vm159_vm2, %v16900_v1 }
  0xfd   :  { %14086 = vmatpush1.msk.msra.mxu0 %vm166_vm1, %v2851_v12  ;;  %3133 = vmatprep.mubr.f32.mxu0 %v21995_v2 }
  0xfe   :  { %3204 = vmatprep.mubr.f32.mxu1 %v21995_v2  ;;  %14093 = vmatprep.subr.msk.mxu0 %vm166_vm1, %v2856_v13 }
 0x100   :  { %14080 = vmatmul.mubr.msk.f32.gmra.mrb[6].mxu0 %vm159_vm2, %v16916_v7  ;;  %14083 = vmatmul.mubr.msk.f32.vlgmr.msra.gmra.mrb[4].mxu1 %vm159_vm2, %v16900_v1 }
 0x101   :  { %14090 = vmatpush1.msk.msra.mxu1 %vm166_vm1, %v2853_v14  ;;  %3210 = vmatprep.mubr.f32.mxu1 %v21995_v2 }
 0x102   :  { %3281 = vmatprep.mubr.f32.mxu0 %v21995_v2  ;;  %14097 = vmatprep.subr.msk.mxu1 %vm166_vm1, %v2858_v17 }
 0x104   :  { %14084 = vmatmul.mubr.msk.f32.gmra.mrb[6].mxu1 %vm159_vm2, %v16916_v7  ;;  %14087 = vmatmul.mubr.msk.f32.vlgmr.msra.gmra.mrb[8].mxu0 %vm159_vm2, %v16900_v1 }
 0x105   :  { %14094 = vmatpush1.msk.msra.mxu0 %vm166_vm1, %v2855_v18  ;;  %3287 = vmatprep.mubr.f32.mxu0 %v21995_v2 }
 0x106   :  { %3358 = vmatprep.mubr.f32.mxu1 %v21995_v2  ;;  %14101 = vmatprep.subr.msk.mxu0 %vm166_vm1, %v2860_v19 }
 0x108   :  { %14088 = vmatmul.mubr.msk.f32.gmra.mrb[10].mxu0 %vm159_vm2, %v16916_v7  ;;  %14091 = vmatmul.mubr.msk.f32.vlgmr.msra.gmra.mrb[8].mxu1 %vm159_vm2, %v16900_v1 }
 0x109   :  { %14098 = vmatpush1.msk.msra.mxu1 %vm166_vm1, %v2857_v22  ;;  %3364 = vmatprep.mubr.f32.mxu1 %v21995_v2 }
 0x10a   :  { %3435 = vmatprep.mubr.f32.mxu0 %v21995_v2  ;;  %14105 = vmatprep.subr.msk.mxu1 %vm166_vm1, %v2862_v23 }
 0x10c   :  { %14092 = vmatmul.mubr.msk.f32.gmra.mrb[10].mxu1 %vm159_vm2, %v16916_v7  ;;  %14095 = vmatmul.mubr.msk.f32.vlgmr.msra.gmra.mrb[12].mxu0 %vm159_vm2, %v16900_v1 }
 0x10d   :  { %14102 = vmatpush1.msk.msra.mxu0 %vm166_vm1, %v2859_v24  ;;  %3441 = vmatprep.mubr.f32.mxu0 %v21995_v2 }
 0x10e   :  { %3512 = vmatprep.mubr.f32.mxu1 %v21995_v2 }
 0x110   :  { %14096 = vmatmul.mubr.msk.f32.gmra.mrb[14].mxu0 %vm159_vm2, %v16916_v7  ;;  %14099 = vmatmul.mubr.msk.f32.vlgmr.msra.gmra.mrb[12].mxu1 %vm159_vm2, %v16900_v1 }
 0x111   :  { %14106 = vmatpush1.msk.msra.mxu1 %vm166_vm1, %v2861_v25  ;;  %3518 = vmatprep.mubr.f32.mxu1 %v21995_v2 }
 0x112   :  { %3589 = vmatprep.mubr.f32.mxu0 %v21995_v2 }
 0x114   :  { %14100 = vmatmul.mubr.msk.f32.gmra.mrb[14].mxu1 %vm159_vm2, %v16916_v7  ;;  %14103 = vmatmul.mubr.msk.f32.vlgmr.msra.gmra.mrb[16].mxu0 %vm159_vm2, %v16900_v1 }
 0x115   :  { %3595 = vmatprep.mubr.f32.mxu0 %v21995_v2  ;;  %3666 = vmatprep.mubr.f32.mxu1 %v21995_v2 }
 0x118   :  { %14104 = vmatmul.mubr.msk.f32.gmra.mrb[18].mxu0 %vm159_vm2, %v16916_v7  ;;  %14107 = vmatmul.mubr.msk.f32.vlgmr.msra.gmra.mrb[16].mxu1 %vm159_vm2, %v16900_v1  ;;  %v3721_v1 = vld [vmem:[%s21983_s10 + $0x10] sm:$0xf] }
 0x119   :  { %3672 = vmatprep.mubr.f32.mxu1 %v21995_v2  ;;  %4566 = vmatprep.mubr.f32.mxu0 %v21995_v2  ;;  %v17104_v16 = vrot.slane %v3721_v1, %v17002_v28  ;;  %v17119_v26 = vrot.slane %v3721_v1, %v17007_v30 }
 0x11b   :  { %22362 = vst [vmem:[#allocation17_spill] sm:$0xff] %v17104_v16  ;;  %22363 = vst [vmem:[#allocation18_spill] sm:$0xff] %v17119_v26 }
 0x11c   :  { %14108 = vmatmul.mubr.msk.f32.gmra.mrb[18].mxu1 %vm159_vm2, %v16916_v7 }
 0x11d   :  { %4655 = vmatprep.mubr.f32.mxu1 %v21995_v2 }
 0x1c7   :  { %v17027_v39 = vpop.f32.mrb[0].mxu0 }
 0x1c8   :  { %v3825_v41 = vmul.f32 %v17010_v31, %v17027_v39  ;;  %v17034_v42 = vpop.f32.mrb[1].mxu0 }
 0x1c9   :  { %v3826_v45 = vmul.f32 %v17017_v34, %v17034_v42 }
 0x1ca   :  { %v3907_v49 = vmul.f32 %v3825_v41, %v3825_v41 }
 0x1cb   :  { %v3865_v53 = vadd.f32 %v3826_v45, %v3825_v41  ;;  %v3908_v54 = vmul.f32 %v3826_v45, %v3826_v45  ;;  %v17062_v55 = vpop.f32.mrb[2].mxu0  ;;  %v17064_v56 = vpop.f32.mrb[0].mxu1 }
 0x1cc   :  { %v3845_v59 = vmul.f32 %v17010_v31, %v17062_v55  ;;  %v3827_v60 = vmul.f32 %v17037_v43, %v17064_v56  ;;  %v17076_v61 = vpop.f32.mrb[3].mxu0  ;;  %v17078_v62 = vpop.f32.mrb[1].mxu1 }
 0x1cd   :  { %v3947_v3 = vadd.f32 %v3908_v54, %v3907_v49  ;;  %v3846_v4 = vmul.f32 %v17017_v34, %v17076_v61  ;;  %v3828_v5 = vmul.f32 %v17040_v44, %v17078_v62 }
 0x1ce   :  { %v3927_v7 = vmul.f32 %v3845_v59, %v3845_v59  ;;  %v3866_v8 = vadd.f32 %v3865_v53, %v3827_v60  ;;  %v3909_v9 = vmul.f32 %v3827_v60, %v3827_v60  ;;  %v17126_v60 = vrot.slane %v3721_v1, %v17012_v32 }
 0x1cf   :  { %v3886_v11 = vadd.f32 %v3846_v4, %v3845_v59  ;;  %v3928_v12 = vmul.f32 %v3846_v4, %v3846_v4  ;;  %v3910_v13 = vmul.f32 %v3828_v5, %v3828_v5  ;;  %v17099_v14 = vpop.f32.mrb[2].mxu1  ;;  %v17101_v15 = vpop.f32.mrb[4].mxu0 }
 0x1d0   :  { %v3948_v17 = vadd.f32 %v3947_v3, %v3909_v9  ;;  %v3867_v18 = vadd.f32 %v3866_v8, %v3828_v5  ;;  %v3847_v19 = vmul.f32 %v17037_v43, %v17099_v14  ;;  %v3829_v20 = vmul.f32 %v17045_v46, %v17101_v15  ;;  %v17110_v21 = vpop.f32.mrb[3].mxu1  ;;  %v17112_v22 = vpop.f32.mrb[5].mxu0 }
 0x1d1   :  { %v3968_v23 = vadd.f32 %v3928_v12, %v3927_v7  ;;  %v3848_v24 = vmul.f32 %v17040_v44, %v17110_v21  ;;  %v3830_v25 = vmul.f32 %v17048_v47, %v17112_v22 }
 0x1d2   :  { %v3949_v27 = vadd.f32 %v3948_v17, %v3910_v13  ;;  %v3887_v29 = vadd.f32 %v3886_v11, %v3847_v19  ;;  %v3929_v40 = vmul.f32 %v3847_v19, %v3847_v19  ;;  %v3868_v41 = vadd.f32 %v3867_v18, %v3829_v20 }
 0x1d3   :  { %v3911_v45 = vmul.f32 %v3829_v20, %v3829_v20  ;;  %v3930_v49 = vmul.f32 %v3848_v24, %v3848_v24  ;;  %v3912_v53 = vmul.f32 %v3830_v25, %v3830_v25  ;;  %v17121_v54 = vpop.f32.mrb[6].mxu0  ;;  %v17123_v59 = vpop.f32.mrb[4].mxu1 }
 0x1d4   :  { %v3969_v3 = vadd.f32 %v3968_v23, %v3929_v40  ;;  %v3888_v4 = vadd.f32 %v3887_v29, %v3848_v24  ;;  %v3869_v5 = vadd.f32 %v3868_v41, %v3830_v25  ;;  %v3849_v7 = vmul.f32 %v17045_v46, %v17121_v54  ;;  %v17130_v8 = vpop.f32.mrb[7].mxu0  ;;  %v17132_v9 = vpop.f32.mrb[5].mxu1 }
 0x1d5   :  { %v3950_v11 = vadd.f32 %v3949_v27, %v3911_v45  ;;  %v3831_v12 = vmul.f32 %v17051_v48, %v17123_v59  ;;  %v3850_v13 = vmul.f32 %v17048_v47, %v17130_v8  ;;  %v3832_v17 = vmul.f32 %v17054_v50, %v17132_v9 }
 0x1d6   :  { %v3970_v18 = vadd.f32 %v3969_v3, %v3930_v49  ;;  %v3889_v19 = vadd.f32 %v3888_v4, %v3849_v7  ;;  %v3931_v20 = vmul.f32 %v3849_v7, %v3849_v7  ;;  %v17141_v23 = vrot.slane %v3721_v1, %v17014_v33 }
 0x1d7   :  { %v3951_v24 = vadd.f32 %v3950_v11, %v3912_v53  ;;  %v3870_v25 = vadd.f32 %v3869_v5, %v3831_v12  ;;  %v3913_v29 = vmul.f32 %v3831_v12, %v3831_v12  ;;  %v3932_v40 = vmul.f32 %v3850_v13, %v3850_v13  ;;  %v17143_v27 = vpop.f32.mrb[6].mxu1  ;;  %v17145_v41 = vpop.f32.mrb[8].mxu0 }
 0x1d8   :  { %v3971_v45 = vadd.f32 %v3970_v18, %v3931_v20  ;;  %v3890_v2 = vadd.f32 %v3889_v19, %v3850_v13  ;;  %v3914_v38 = vmul.f32 %v3832_v17, %v3832_v17  ;;  %v3851_v37 = vmul.f32 %v17051_v48, %v17143_v27  ;;  %v17149_v49 = vpop.f32.mrb[7].mxu1  ;;  %v17151_v3 = vpop.f32.mrb[9].mxu0 }
 0x1d9   :  { %v3952_v1 = vadd.f32 %v3951_v24, %v3913_v29  ;;  %v3871_v4 = vadd.f32 %v3870_v25, %v3832_v17  ;;  %v3833_v53 = vmul.f32 %v17057_v51, %v17145_v41  ;;  %v3852_v5 = vmul.f32 %v17054_v50, %v17149_v49 }
 0x1da   :  { %v3972_v7 = vadd.f32 %v3971_v45, %v3932_v40  ;;  %v3891_v11 = vadd.f32 %v3890_v2, %v3851_v37  ;;  %v3933_v12 = vmul.f32 %v3851_v37, %v3851_v37  ;;  %v3834_v13 = vmul.f32 %v17060_v52, %v17151_v3 }
 0x1db   :  { %v3953_v18 = vadd.f32 %v3952_v1, %v3914_v38  ;;  %v3872_v19 = vadd.f32 %v3871_v4, %v3833_v53  ;;  %v3915_v20 = vmul.f32 %v3833_v53, %v3833_v53  ;;  %v3934_v36 = vmul.f32 %v3852_v5, %v3852_v5  ;;  %v17159_v35 = vpop.f32.mrb[10].mxu0  ;;  %v17161_v24 = vpop.f32.mrb[8].mxu1 }
 0x1dc   :  { %22364 = vst [vmem:[#allocation19_spill] sm:$0xff] %v17159_v35  ;;  %v3973_v17 = vadd.f32 %v3972_v7, %v3933_v12  ;;  %v3892_v25 = vadd.f32 %v3891_v11, %v3852_v5  ;;  %v3916_v29 = vmul.f32 %v3834_v13, %v3834_v13  ;;  %v3853_v33 = vmul.f32 %v17057_v51, %v17159_v35  ;;  %v17165_v40 = vpop.f32.mrb[11].mxu0  ;;  %v17167_v2 = vpop.f32.mrb[9].mxu1 }
 0x1dd   :  { %22365 = vst [vmem:[#allocation20_spill] sm:$0xff] %v17165_v40  ;;  %v3954_v37 = vadd.f32 %v3953_v18, %v3915_v20  ;;  %v3873_v45 = vadd.f32 %v3872_v19, %v3834_v13  ;;  %v3835_v38 = vmul.f32 %v17067_v57, %v17161_v24  ;;  %v3854_v1 = vmul.f32 %v17060_v52, %v17165_v40 }
 0x1de   :  { %v3974_v4 = vadd.f32 %v3973_v17, %v3934_v36  ;;  %v3893_v53 = vadd.f32 %v3892_v25, %v3853_v33  ;;  %v3935_v7 = vmul.f32 %v3853_v33, %v3853_v33  ;;  %v3836_v5 = vmul.f32 %v17070_v58, %v17167_v2 }
 0x1df   :  { %v3955_v11 = vadd.f32 %v3954_v37, %v3916_v29  ;;  %v3874_v12 = vadd.f32 %v3873_v45, %v3835_v38  ;;  %v3917_v32 = vmul.f32 %v3835_v38, %v3835_v38  ;;  %v3936_v30 = vmul.f32 %v3854_v1, %v3854_v1  ;;  %v17175_v28 = vpop.f32.mrb[10].mxu1  ;;  %v17177_v18 = vpop.f32.mrb[12].mxu0 }
 0x1e0   :  { %22366 = vst [vmem:[#allocation21_spill] sm:$0xff] %v17175_v28  ;;  %v3975_v13 = vadd.f32 %v3974_v4, %v3935_v7  ;;  %v3894_v19 = vadd.f32 %v3893_v53, %v3854_v1  ;;  %v3918_v20 = vmul.f32 %v3836_v5, %v3836_v5  ;;  %v3855_v40 = vmul.f32 %v17067_v57, %v17175_v28  ;;  %v17181_v36 = vpop.f32.mrb[11].mxu1  ;;  %v17183_v33 = vpop.f32.mrb[13].mxu0 }
 0x1e1   :  { %22367 = vst [vmem:[#allocation22_spill] sm:$0xff] %v17181_v36  ;;  %v3956_v17 = vadd.f32 %v3955_v11, %v3917_v32  ;;  %v3875_v25 = vadd.f32 %v3874_v12, %v3836_v5  ;;  %v3837_v29 = vmul.f32 %v17081_v63, %v17177_v18  ;;  %v3856_v37 = vmul.f32 %v17070_v58, %v17181_v36 }
 0x1e2   :  { %v3976_v45 = vadd.f32 %v3975_v13, %v3936_v30  ;;  %v3895_v38 = vadd.f32 %v3894_v19, %v3855_v40  ;;  %v3937_v4 = vmul.f32 %v3855_v40, %v3855_v40  ;;  %v3838_v1 = vmul.f32 %v17084_v0, %v17183_v33 }
 0x1e3   :  { %v3957_v53 = vadd.f32 %v3956_v17, %v3918_v20  ;;  %v3876_v7 = vadd.f32 %v3875_v25, %v3837_v29  ;;  %v3919_v28 = vmul.f32 %v3837_v29, %v3837_v29  ;;  %v3938_v35 = vmul.f32 %v3856_v37, %v3856_v37  ;;  %v17191_v57 = vpop.f32.mrb[14].mxu0  ;;  %v17193_v32 = vpop.f32.mrb[12].mxu1 }
 0x1e4   :  { %22368 = vst [vmem:[#allocation23_spill] sm:$0xff] %v17191_v57  ;;  %v3977_v5 = vadd.f32 %v3976_v45, %v3937_v4  ;;  %v3896_v11 = vadd.f32 %v3895_v38, %v3856_v37  ;;  %v3920_v12 = vmul.f32 %v3838_v1, %v3838_v1  ;;  %v3857_v36 = vmul.f32 %v17081_v63, %v17191_v57  ;;  %v17197_v30 = vpop.f32.mrb[15].mxu0  ;;  %v17199_v40 = vpop.f32.mrb[13].mxu1 }
 0x1e5   :  { %22369 = vst [vmem:[#allocation24_spill] sm:$0xff] %v17197_v30  ;;  %v3958_v13 = vadd.f32 %v3957_v53, %v3919_v28  ;;  %v3877_v19 = vadd.f32 %v3876_v7, %v3838_v1  ;;  %v3839_v20 = vmul.f32 %v17094_v6, %v17193_v32  ;;  %v3858_v17 = vmul.f32 %v17084_v0, %v17197_v30 }
 0x1e6   :  { %v3978_v25 = vadd.f32 %v3977_v5, %v3938_v35  ;;  %v3897_v29 = vadd.f32 %v3896_v11, %v3857_v36  ;;  %v3939_v45 = vmul.f32 %v3857_v36, %v3857_v36  ;;  %v3840_v37 = vmul.f32 %v17097_v10, %v17199_v40 }
 0x1e7   :  { %v3959_v38 = vadd.f32 %v3958_v13, %v3920_v12  ;;  %v3878_v4 = vadd.f32 %v3877_v19, %v3839_v20  ;;  %v3921_v57 = vmul.f32 %v3839_v20, %v3839_v20  ;;  %v3940_v63 = vmul.f32 %v3858_v17, %v3858_v17  ;;  %v17207_v58 = vpop.f32.mrb[14].mxu1  ;;  %v17209_v28 = vpop.f32.mrb[16].mxu0 }
 0x1e8   :  { %22370 = vst [vmem:[#allocation25_spill] sm:$0xff] %v17207_v58  ;;  %v3979_v1 = vadd.f32 %v3978_v25, %v3939_v45  ;;  %v3898_v53 = vadd.f32 %v3897_v29, %v3858_v17  ;;  %v3922_v7 = vmul.f32 %v3840_v37, %v3840_v37  ;;  %v3859_v30 = vmul.f32 %v17094_v6, %v17207_v58  ;;  %v17213_v35 = vpop.f32.mrb[15].mxu1  ;;  %v17215_v36 = vpop.f32.mrb[17].mxu0 }
 0x1e9   :  { %22371 = vst [vmem:[#allocation26_spill] sm:$0xff] %v17213_v35  ;;  %22372 = vst [vmem:[#allocation27_spill] sm:$0xff] %v17215_v36  ;;  %v3960_v5 = vadd.f32 %v3959_v38, %v3921_v57  ;;  %v3879_v11 = vadd.f32 %v3878_v4, %v3840_v37  ;;  %v3841_v12 = vmul.f32 %v17104_v16, %v17209_v28 }
 0x1ea   :  { %v3860_v13 = vmul.f32 %v17097_v10, %v17213_v35  ;;  %v3980_v19 = vadd.f32 %v3979_v1, %v3940_v63  ;;  %v3899_v20 = vadd.f32 %v3898_v53, %v3859_v30  ;;  %v3941_v25 = vmul.f32 %v3859_v30, %v3859_v30 }
 0x1eb   :  { %v3842_v17 = vmul.f32 %v17119_v26, %v17215_v36  ;;  %v3961_v29 = vadd.f32 %v3960_v5, %v3922_v7  ;;  %v3880_v45 = vadd.f32 %v3879_v11, %v3841_v12  ;;  %v3923_v58 = vmul.f32 %v3841_v12, %v3841_v12  ;;  %v17223_v0 = vpop.f32.mrb[18].mxu0  ;;  %v17225_v57 = vpop.f32.mrb[16].mxu1 }
 0x1ec   :  { %v3942_v6 = vmul.f32 %v3860_v13, %v3860_v13  ;;  %22373 = vst [vmem:[#allocation28_spill] sm:$0xff] %v17223_v0  ;;  %22374 = vst [vmem:[#allocation29_spill] sm:$0xff] %v17225_v57  ;;  %v3981_v37 = vadd.f32 %v3980_v19, %v3941_v25  ;;  %v3900_v38 = vadd.f32 %v3899_v20, %v3860_v13  ;;  %v17229_v63 = vpop.f32.mrb[19].mxu0  ;;  %v17231_v30 = vpop.f32.mrb[17].mxu1 }
 0x1ed   :  { %v3924_v4 = vmul.f32 %v3842_v17, %v3842_v17  ;;  %v3861_v35 = vmul.f32 %v17104_v16, %v17223_v0  ;;  %22375 = vst [vmem:[#allocation30_spill] sm:$0xff] %v17229_v63  ;;  %22376 = vst [vmem:[#allocation31_spill] sm:$0xff] %v17231_v30  ;;  %v3962_v1 = vadd.f32 %v3961_v29, %v3923_v58 }
 0x1ee   :  { %v3881_v53 = vadd.f32 %v3880_v45, %v3842_v17  ;;  %v3843_v7 = vmul.f32 %v17126_v60, %v17225_v57  ;;  %v3862_v5 = vmul.f32 %v17119_v26, %v17229_v63  ;;  %v3982_v11 = vadd.f32 %v3981_v37, %v3942_v6 }
 0x1ef   :  { %v3901_v12 = vadd.f32 %v3900_v38, %v3861_v35  ;;  %v3943_v19 = vmul.f32 %v3861_v35, %v3861_v35  ;;  %v3844_v13 = vmul.f32 %v17141_v23, %v17231_v30  ;;  %v17239_v0 = vpop.f32.mrb[18].mxu1  ;;  %v3963_v36 = vadd.f32 %v3962_v1, %v3924_v4 }
 0x1f0   :  { %v3925_v20 = vmul.f32 %v3843_v7, %v3843_v7  ;;  %v3944_v25 = vmul.f32 %v3862_v5, %v3862_v5  ;;  %v3882_v16 = vadd.f32 %v3881_v53, %v3843_v7  ;;  %v3863_v29 = vmul.f32 %v17126_v60, %v17239_v0  ;;  %v17243_v45 = vpop.f32.mrb[19].mxu1 }
 0x1f1   :  { %v3983_v58 = vadd.f32 %v3982_v11, %v3943_v19  ;;  %v3902_v17 = vadd.f32 %v3901_v12, %v3862_v5  ;;  %v3926_v63 = vmul.f32 %v3844_v13, %v3844_v13  ;;  %v3864_v6 = vmul.f32 %v17141_v23, %v17243_v45 }
 0x1f2   :  { %v3883_v35 = vadd.f32 %v3882_v16, %v3844_v13  ;;  %v3964_v37 = vadd.f32 %v3963_v36, %v3925_v20  ;;  %v3945_v38 = vmul.f32 %v3863_v29, %v3863_v29  ;;  %v16219_v5 = vmov 0  }
 0x1f3   :  { %v3903_v26 = vadd.f32 %v3902_v17, %v3863_v29  ;;  %v3984_v30 = vadd.f32 %v3983_v58, %v3944_v25  ;;  %v3946_v57 = vmul.f32 %v3864_v6, %v3864_v6  ;;  %15215 = vset.pattern.permute.xlu1 %v16219_v5  ;;  %15214 = vset.pattern.permute.xlu0 %v16219_v5 }
 0x1f4   :  { %3884 = vadd.xlane.f32.xlu1 %v3883_v35  ;;  %v3965_v53 = vadd.f32 %v3964_v37, %v3926_v63  ;;  %v4000_v35 = vld [vmem:[%s21984_s4 + $0x8] sm:$0xff] }
 0x1f5   :  { %v3904_v4 = vadd.f32 %v3903_v26, %v3864_v6  ;;  %v3985_v1 = vadd.f32 %v3984_v30, %v3945_v38  ;;  %v3999_v38 = vld [vmem:[%s21984_s4] sm:$0xff] }
 0x1f7   :  { %3905 = vadd.xlane.f32.xlu0 %v3904_v4  ;;  %v3986_v7 = vadd.f32 %v3985_v1, %v3946_v57 }
 0x1f9   :  { %3987 = vadd.xlane.f32.xlu1 %v3986_v7  ;;  %v4007_v7 = vld [vmem:[%s21985_s5] sm:$0xff] }
 0x1fb   :  { %3966 = vadd.xlane.f32.xlu0 %v3965_v53 }
 0x281   :  { %v3885_v11 = vpop.xlane.xlu1 %3884 }
 0x282   :  { %v3989_v19 = vmul.f32 0.00048828125, %v3885_v11 }
 0x284   :  { %v3906_v12 = vpop.xlane.xlu0 %3905  ;;  %v3993_v58 = vmul.f32 %v3989_v19, %v3989_v19 }
 0x285   :  { %v3990_v16 = vmul.f32 0.00048828125, %v3906_v12 }
 0x286   :  { %v3988_v36 = vpop.xlane.xlu1 %3987 }
 0x287   :  { %v3994_v13 = vmul.f32 %v3990_v16, %v3990_v16  ;;  %v3992_v20 = vmul.f32 0.00048828125, %v3988_v36  ;;  %v4008_v36 = vld [vmem:[%s21985_s5 + $0x8] sm:$0xff] }
 0x288   :  { %v3967_v25 = vpop.xlane.xlu0 %3966 }
 0x289   :  { %v3996_v17 = vsub.f32 %v3992_v20, %v3994_v13  ;;  %v3991_v63 = vmul.f32 0.00048828125, %v3967_v25  ;;  %v22377_v20 = vmov 0.0  }
 0x28b   :  { %v3998_v26 = vmax.f32 %v3996_v17, 0.0  ;;  %v3995_v30 = vsub.f32 %v3991_v63, %v3993_v58 }
 0x28d   :  { %v4002_v29 = vadd.f32 1e-05, %v3998_v26  ;;  %v3997_v57 = vmax.f32 %v3995_v30, 0.0 }
 0x28f   :  { %16201 = vrsqrt.f32 %v4002_v29  ;;  %v4001_v6 = vadd.f32 1e-05, %v3997_v57 }
 0x291   :  { %16203 = vrsqrt.f32 %v4001_v6 }
 0x299   :  { %v16202_v37 = vpop.eup %16201 }
 0x29a   :  { %v4006_v53 = vmul.f32 %v16202_v37, %v4000_v35 }
 0x29b   :  { %v16204_v4 = vpop.eup %16203 }
 0x29c   :  { %4020 = vperm.xlu1 %15215, %v4006_v53   ;;  %v4005_v1 = vmul.f32 %v16204_v4, %v3999_v38  ;;  %v4010_v12 = vmul.f32 %v4006_v53, %v3990_v16 }
 0x29e   :  { %4015 = vperm.xlu0 %15214, %v4005_v1   ;;  %v4009_v5 = vmul.f32 %v4005_v1, %v3989_v19  ;;  %v4012_v13 = vsub.f32 %v4008_v36, %v4010_v12 }
 0x2a0   :  { %v4011_v11 = vsub.f32 %v4007_v7, %v4009_v5 }
 0x2a2   :  { %4065 = vperm.xlu1 %15215, %v4011_v11  }
 0x2a6   :  { %4070 = vperm.xlu1 %15215, %v4012_v13  }
 0x2aa   :  { %15217 = vrot.lane.b32.xlu1 %v22377_v20, %s16216_s29 }
 0x31b   :  { %v17261_v25 = vpop.permute.xlu1 %4020 }
 0x31c   :  { %v4043_v58 = vmul.f32 %v17261_v25, %v17062_v55  ;;  %v4044_v19 = vmul.f32 %v17261_v25, %v17076_v61  ;;  %v17269_v16 = vmul.f32 %v17261_v25, %v17099_v14  ;;  %v17273_v17 = vmul.f32 %v17261_v25, %v17110_v21 }
 0x31d   :  { %v17275_v63 = vpop.permute.xlu0 %4015  ;;  %v17279_v26 = vmul.f32 %v17261_v25, %v17121_v54  ;;  %v17283_v55 = vmul.f32 %v17261_v25, %v17130_v8  ;;  %v17287_v61 = vmul.f32 %v17261_v25, %v17143_v27  ;;  %v17291_v14 = vmul.f32 %v17261_v25, %v17149_v49 }
 0x31e   :  { %v4027_v21 = vmul.f32 %v17275_v63, %v17101_v15  ;;  %v4028_v30 = vmul.f32 %v17275_v63, %v17112_v22  ;;  %v4023_v54 = vmul.f32 %v17275_v63, %v17027_v39  ;;  %v4024_v8 = vmul.f32 %v17275_v63, %v17034_v42 }
 0x31f   :  { %v4029_v27 = vmul.f32 %v17275_v63, %v17123_v59  ;;  %v4030_v29 = vmul.f32 %v17275_v63, %v17132_v9  ;;  %v4025_v49 = vmul.f32 %v17275_v63, %v17064_v56  ;;  %v4026_v15 = vmul.f32 %v17275_v63, %v17078_v62 }
 0x320   :  { %v4031_v22 = vmul.f32 %v17275_v63, %v17145_v41  ;;  %v4032_v39 = vmul.f32 %v17275_v63, %v17151_v3  ;;  %v4033_v42 = vmul.f32 %v17275_v63, %v17161_v24  ;;  %v4034_v59 = vmul.f32 %v17275_v63, %v17167_v2 }
 0x321   :  { %v17317_v57 = vpop.permute.xlu1 %4065  ;;  %v17321_v56 = vmul.f32 %v17275_v63, %v17177_v18  ;;  %v17325_v62 = vmul.f32 %v17275_v63, %v17183_v33  ;;  %v17329_v9 = vmul.f32 %v17275_v63, %v17193_v32  ;;  %v17333_v41 = vmul.f32 %v17275_v63, %v17199_v40 }
 0x322   :  { %v4077_v3 = vadd.f32 %v17317_v57, %v4027_v21  ;;  %v4078_v24 = vadd.f32 %v17317_v57, %v4028_v30  ;;  %v4073_v2 = vadd.f32 %v17317_v57, %v4023_v54  ;;  %v4074_v18 = vadd.f32 %v17317_v57, %v4024_v8 }
 0x323   :  { %v4079_v6 = vadd.f32 %v17317_v57, %v4029_v27  ;;  %v4080_v33 = vadd.f32 %v17317_v57, %v4030_v29  ;;  %v4075_v35 = vadd.f32 %v17317_v57, %v4025_v49  ;;  %v4076_v32 = vadd.f32 %v17317_v57, %v4026_v15 }
 0x324   :  { %v4117_v37 = vmax.f32 %v4077_v3, 0.0  ;;  %v4118_v38 = vmax.f32 %v4078_v24, 0.0  ;;  %v4113_v40 = vmax.f32 %v4073_v2, 0.0  ;;  %v4114_v53 = vmax.f32 %v4074_v18, 0.0 }
 0x325   :  { %v4119_v4 = vmax.f32 %v4079_v6, 0.0  ;;  %v4120_v1 = vmax.f32 %v4080_v33, 0.0  ;;  %v4115_v7 = vmax.f32 %v4075_v35, 0.0  ;;  %v4116_v5 = vmax.f32 %v4076_v32, 0.0  ;;  %v17343_v11 = vpop.permute.xlu1 %4070 }
 0x326   :  { %v17346_v12 = vmul.f32 %v4117_v37, %v17045_v46  ;;  %v17349_v36 = vmul.f32 %v4118_v38, %v17048_v47  ;;  %v17352_v13 = vmul.f32 %v4113_v40, %v17010_v31  ;;  %v17355_v21 = vmul.f32 %v4114_v53, %v17017_v34 }
 0x327   :  { %v17358_v30 = vmul.f32 %v4119_v4, %v17051_v48  ;;  %v17361_v54 = vmul.f32 %v4120_v1, %v17054_v50  ;;  %v17364_v8 = vmul.f32 %v4115_v7, %v17037_v43  ;;  %v17367_v27 = vmul.f32 %v4116_v5, %v17040_v44 }
 0x328   :  { %v17371_v29 = vpack.i.bf16 %v17349_v36, %v17346_v12  ;;  %v17375_v49 = vpack.i.bf16 %v17355_v21, %v17352_v13  ;;  %v4081_v15 = vadd.f32 %v17317_v57, %v4031_v22  ;;  %v4082_v3 = vadd.f32 %v17317_v57, %v4032_v39 }
 0x329   :  { %v17381_v24 = vpack.i.bf16 %v17361_v54, %v17358_v30  ;;  %v17385_v2 = vpack.i.bf16 %v17367_v27, %v17364_v8  ;;  %v4093_v18 = vadd.f32 %v17343_v11, %v4043_v58  ;;  %v4094_v6 = vadd.f32 %v17343_v11, %v4044_v19 }
 0x32a   :  { %22378 = vst [vmem:[#allocation32_spill] sm:$0xff] %v17371_v29  ;;  %15242 = vrot.lane.b32.xlu0 %v17371_v29, %s16216_s29  ;;  %15222 = vrot.lane.b32.xlu1 %v17375_v49, %s16216_s29  ;;  %v4121_v22 = vmax.f32 %v4081_v15, 0.0  ;;  %v4122_v39 = vmax.f32 %v4082_v3, 0.0  ;;  %v4083_v33 = vadd.f32 %v17317_v57, %v4033_v42  ;;  %v4084_v35 = vadd.f32 %v17317_v57, %v4034_v59 }
 0x32b   :  { %22379 = vst [vmem:[#allocation33_spill] sm:$0xff] %v17381_v24  ;;  %22380 = vst [vmem:[#allocation34_spill] sm:$0xff] %v17385_v2  ;;  %v4133_v32 = vmax.f32 %v4093_v18, 0.0  ;;  %v4134_v37 = vmax.f32 %v4094_v6, 0.0  ;;  %v4095_v38 = vadd.f32 %v17343_v11, %v17269_v16  ;;  %v4096_v58 = vadd.f32 %v17343_v11, %v17273_v17  ;;  %v22382_v17 = vld [vmem:[#allocation12_spill] sm:$0xff] }
 0x32c   :  { %v17400_v19 = vmul.f32 %v4121_v22, %v17057_v51  ;;  %v17403_v40 = vmul.f32 %v4122_v39, %v17060_v52  ;;  %v4123_v53 = vmax.f32 %v4083_v33, 0.0  ;;  %v4124_v4 = vmax.f32 %v4084_v35, 0.0 }
 0x32d   :  { %v17406_v42 = vmul.f32 %v4133_v32, %v17010_v31  ;;  %v17409_v59 = vmul.f32 %v4134_v37, %v17017_v34  ;;  %v4135_v1 = vmax.f32 %v4095_v38, 0.0  ;;  %v4136_v7 = vmax.f32 %v4096_v58, 0.0  ;;  %v22383_v31 = vld [vmem:[#allocation13_spill] sm:$0xff]  ;;  %v22386_v38 = vld [vmem:[#allocation14_spill] sm:$0xff] }
 0x32e   :  { %15247 = vrot.lane.b32.xlu0 %v17381_v24, %s16216_s29  ;;  %15227 = vrot.lane.b32.xlu1 %v17385_v2, %s16216_s29  ;;  %v17417_v16 = vpack.i.bf16 %v17403_v40, %v17400_v19  ;;  %v17420_v5 = vmul.f32 %v4123_v53, %v22382_v17  ;;  %v17423_v15 = vmul.f32 %v4124_v4, %v22383_v31  ;;  %v22388_v4 = vld [vmem:[#allocation15_spill] sm:$0xff] }
 0x32f   :  { %v17427_v34 = vpack.i.bf16 %v17409_v59, %v17406_v42  ;;  %v17430_v3 = vmul.f32 %v4135_v1, %v17037_v43  ;;  %v17433_v18 = vmul.f32 %v4136_v7, %v17040_v44  ;;  %v4085_v6 = vadd.f32 %v17317_v57, %v17321_v56 }
 0x330   :  { %22381 = vst [vmem:[#allocation35_spill] sm:$0xff] %v17417_v16  ;;  %v17439_v22 = vpack.i.bf16 %v17423_v15, %v17420_v5  ;;  %v4086_v39 = vadd.f32 %v17317_v57, %v17325_v62  ;;  %v4097_v33 = vadd.f32 %v17343_v11, %v17279_v26  ;;  %v4098_v43 = vadd.f32 %v17343_v11, %v17283_v55 }
 0x331   :  { %22384 = vst [vmem:[#allocation12_spill] sm:$0xff] %v17427_v34  ;;  %v17449_v44 = vpack.i.bf16 %v17433_v18, %v17430_v3  ;;  %v4125_v35 = vmax.f32 %v4085_v6, 0.0  ;;  %v4087_v56 = vadd.f32 %v17317_v57, %v17329_v9  ;;  %v4088_v32 = vadd.f32 %v17317_v57, %v17333_v41 }
 0x332   :  { %22385 = vst [vmem:[#allocation13_spill] sm:$0xff] %v17439_v22  ;;  %15262 = vrot.lane.b32.xlu0 %v17417_v16, %s16216_s29  ;;  %15232 = vrot.lane.b32.xlu1 %v17427_v34, %s16216_s29  ;;  %v4126_v26 = vmax.f32 %v4086_v39, 0.0  ;;  %v4137_v62 = vmax.f32 %v4097_v33, 0.0  ;;  %v4138_v55 = vmax.f32 %v4098_v43, 0.0  ;;  %v4099_v37 = vadd.f32 %v17343_v11, %v17287_v61  ;;  %v22389_v33 = vld [vmem:[#allocation16_spill] sm:$0xff] }
 0x333   :  { %v17462_v58 = vmul.f32 %v4125_v35, %v22386_v38  ;;  %v4127_v53 = vmax.f32 %v4087_v56, 0.0  ;;  %v4128_v9 = vmax.f32 %v4088_v32, 0.0  ;;  %v4100_v41 = vadd.f32 %v17343_v11, %v17291_v14 }
 0x334   :  { %v17467_v1 = vmul.f32 %v4126_v26, %v22388_v4  ;;  %v17470_v7 = vmul.f32 %v4137_v62, %v17045_v46  ;;  %v17473_v6 = vmul.f32 %v4138_v55, %v17048_v47  ;;  %v4139_v39 = vmax.f32 %v4099_v37, 0.0  ;;  %v22393_v26 = vld [vmem:[#allocation27_spill] sm:$0xff] }
 0x335   :  { %22387 = vst [vmem:[#allocation14_spill] sm:$0xff] %v17462_v58  ;;  %v17476_v61 = vmul.f32 %v4127_v53, %v22389_v33  ;;  %v17479_v43 = vmul.f32 %v4128_v9, %v17097_v10  ;;  %v4140_v35 = vmax.f32 %v4100_v41, 0.0  ;;  %v4039_v14 = vmul.f32 %v17275_v63, %v17209_v28  ;;  %v22394_v37 = vld [vmem:[#allocation19_spill] sm:$0xff]  ;;  %v22395_v9 = vld [vmem:[#allocation20_spill] sm:$0xff] }
 0x336   :  { %15267 = vrot.lane.b32.xlu0 %v17439_v22, %s16216_s29  ;;  %15237 = vrot.lane.b32.xlu1 %v17449_v44, %s16216_s29  ;;  %v17489_v46 = vpack.i.bf16 %v17467_v1, %v17462_v58  ;;  %v17493_v47 = vpack.i.bf16 %v17473_v6, %v17470_v7  ;;  %v17496_v56 = vmul.f32 %v4139_v39, %v17051_v48  ;;  %v22396_v48 = vld [vmem:[#allocation29_spill] sm:$0xff]  ;;  %v22397_v22 = vld [vmem:[#allocation31_spill] sm:$0xff]  ;;  %v22402_v58 = vld [vmem:[#allocation18_spill] sm:$0xff] }
 0x337   :  { %22390 = vst [vmem:[#allocation15_spill] sm:$0xff] %v17476_v61  ;;  %v17500_v28 = vpack.i.bf16 %v17479_v43, %v17476_v61  ;;  %v17503_v32 = vmul.f32 %v4140_v35, %v17054_v50  ;;  %v4040_v62 = vmul.f32 %v17275_v63, %v22393_v26  ;;  %v4089_v55 = vadd.f32 %v17317_v57, %v4039_v14  ;;  %v22398_v14 = vld [vmem:[#allocation21_spill] sm:$0xff] }
 0x338   :  { %22391 = vst [vmem:[#allocation16_spill] sm:$0xff] %v17489_v46  ;;  %v4051_v53 = vmul.f32 %v17261_v25, %v22394_v37  ;;  %v4052_v41 = vmul.f32 %v17261_v25, %v22395_v9  ;;  %v4041_v39 = vmul.f32 %v17275_v63, %v22396_v48  ;;  %v4042_v16 = vmul.f32 %v17275_v63, %v22397_v22  ;;  %v22399_v48 = vld [vmem:[#allocation17_spill] sm:$0xff] }
 0x339   :  { %22392 = vst [vmem:[#allocation36_spill] sm:$0xff] %v17500_v28  ;;  %v17518_v50 = vpack.i.bf16 %v17503_v32, %v17496_v56  ;;  %v4090_v35 = vadd.f32 %v17317_v57, %v4040_v62  ;;  %v4129_v26 = vmax.f32 %v4089_v55, 0.0  ;;  %v4053_v24 = vmul.f32 %v17261_v25, %v22398_v14  ;;  %v22401_v55 = vld [vmem:[#allocation22_spill] sm:$0xff] }
 0x33a   :  { %15282 = vrot.lane.b32.xlu0 %v17489_v46, %s16216_s29  ;;  %15252 = vrot.lane.b32.xlu1 %v17493_v47, %s16216_s29  ;;  %v4101_v37 = vadd.f32 %v17343_v11, %v4051_v53  ;;  %v4102_v63 = vadd.f32 %v17343_v11, %v4052_v41  ;;  %v4091_v22 = vadd.f32 %v17317_v57, %v4041_v39 }
 0x33b   :  { %v4130_v9 = vmax.f32 %v4090_v35, 0.0  ;;  %v17531_v29 = vmul.f32 %v4129_v26, %v22399_v48  ;;  %v4092_v62 = vadd.f32 %v17317_v57, %v4042_v16  ;;  %v4054_v14 = vmul.f32 %v17261_v25, %v22401_v55 }
 0x33c   :  { %v4141_v2 = vmax.f32 %v4101_v37, 0.0  ;;  %v4142_v46 = vmax.f32 %v4102_v63, 0.0  ;;  %v4131_v34 = vmax.f32 %v4091_v22, 0.0  ;;  %v4103_v61 = vadd.f32 %v17343_v11, %v4053_v24  ;;  %v22406_v22 = vld [vmem:[#allocation23_spill] sm:$0xff] }
 0x33d   :  { %22400 = vst [vmem:[#allocation27_spill] sm:$0xff] %v17531_v29  ;;  %v17538_v53 = vmul.f32 %v4130_v9, %v22402_v58  ;;  %v4132_v41 = vmax.f32 %v4092_v62, 0.0  ;;  %v4104_v39 = vadd.f32 %v17343_v11, %v4054_v14  ;;  %v4055_v9 = vmul.f32 %v17261_v25, %v22406_v22 }
 0x33e   :  { %15287 = vrot.lane.b32.xlu0 %v17500_v28, %s16216_s29  ;;  %15257 = vrot.lane.b32.xlu1 %v17518_v50, %s16216_s29  ;;  %v17546_v57 = vmul.f32 %v4141_v2, %v17057_v51  ;;  %v17549_v16 = vmul.f32 %v4142_v46, %v17060_v52  ;;  %v17552_v24 = vmul.f32 %v4131_v34, %v17126_v60  ;;  %v4143_v35 = vmax.f32 %v4103_v61, 0.0  ;;  %v22408_v2 = vld [vmem:[#allocation24_spill] sm:$0xff]  ;;  %v22409_v61 = vld [vmem:[#allocation25_spill] sm:$0xff] }
 0x33f   :  { %v17556_v26 = vpack.i.bf16 %v17538_v53, %v17531_v29  ;;  %v17559_v37 = vmul.f32 %v4132_v41, %v17141_v23  ;;  %v4144_v63 = vmax.f32 %v4104_v39, 0.0  ;;  %v4056_v34 = vmul.f32 %v17261_v25, %v22408_v2  ;;  %v22410_v41 = vld [vmem:[#allocation26_spill] sm:$0xff] }
 0x340   :  { %22403 = vst [vmem:[#allocation19_spill] sm:$0xff] %v17552_v24  ;;  %v17565_v51 = vpack.i.bf16 %v17549_v16, %v17546_v57  ;;  %v17568_v52 = vmul.f32 %v4143_v35, %v22382_v17  ;;  %v4057_v46 = vmul.f32 %v17261_v25, %v22409_v61  ;;  %v4105_v14 = vadd.f32 %v17343_v11, %v4055_v9  ;;  %v22411_v9 = vld [vmem:[#allocation28_spill] sm:$0xff] }
 0x341   :  { %22404 = vst [vmem:[#allocation20_spill] sm:$0xff] %v17556_v26  ;;  %22405 = vst [vmem:[#allocation29_spill] sm:$0xff] %v17559_v37  ;;  %v17576_v62 = vpack.i.bf16 %v17559_v37, %v17552_v24  ;;  %v17579_v55 = vmul.f32 %v4144_v63, %v22383_v31  ;;  %v4058_v39 = vmul.f32 %v17261_v25, %v22410_v41 }
 0x342   :  { %22407 = vst [vmem:[#allocation31_spill] sm:$0xff] %v17565_v51  ;;  %15302 = vrot.lane.b32.xlu0 %v17556_v26, %s16216_s29  ;;  %15272 = vrot.lane.b32.xlu1 %v17565_v51, %s16216_s29  ;;  %v4106_v17 = vadd.f32 %v17343_v11, %v4056_v34  ;;  %v4107_v35 = vadd.f32 %v17343_v11, %v4057_v46  ;;  %v4145_v31 = vmax.f32 %v4105_v14, 0.0  ;;  %v22412_v26 = vld [vmem:[#allocation30_spill] sm:$0xff] }
 0x343   :  { %v17592_v22 = vpack.i.bf16 %v17579_v55, %v17568_v52  ;;  %v4108_v63 = vadd.f32 %v17343_v11, %v4058_v39  ;;  %v4059_v2 = vmul.f32 %v17261_v25, %v22411_v9  ;;  %v4060_v28 = vmul.f32 %v17261_v25, %v22412_v26 }
 0x344   :  { %v4146_v61 = vmax.f32 %v4106_v17, 0.0  ;;  %v4147_v41 = vmax.f32 %v4107_v35, 0.0  ;;  %v17600_v51 = vmul.f32 %v4145_v31, %v22386_v38  ;;  %v4061_v24 = vmul.f32 %v17261_v25, %v17239_v0 }
 0x345   :  { %v4148_v34 = vmax.f32 %v4108_v63, 0.0  ;;  %v4109_v46 = vadd.f32 %v17343_v11, %v4059_v2  ;;  %v4110_v38 = vadd.f32 %v17343_v11, %v4060_v28  ;;  %v4062_v0 = vmul.f32 %v17261_v25, %v17243_v45 }
 0x346   :  { %15307 = vrot.lane.b32.xlu0 %v17576_v62, %s16216_s29  ;;  %15277 = vrot.lane.b32.xlu1 %v17592_v22, %s16216_s29  ;;  %v17610_v14 = vmul.f32 %v4146_v61, %v22388_v4  ;;  %v17613_v26 = vmul.f32 %v4147_v41, %v22389_v33  ;;  %v4111_v35 = vadd.f32 %v17343_v11, %v4061_v24  ;;  %v22426_v41 = vld [vmem:[#allocation16_spill] sm:$0xff] }
 0x347   :  { %v17617_v39 = vmul.f32 %v4148_v34, %v17097_v10  ;;  %v4149_v17 = vmax.f32 %v4109_v46, 0.0  ;;  %v4150_v4 = vmax.f32 %v4110_v38, 0.0  ;;  %v4112_v10 = vadd.f32 %v17343_v11, %v4062_v0  ;;  %v22417_v46 = vld [vmem:[#allocation15_spill] sm:$0xff]  ;;  %v22423_v0 = vld [vmem:[#allocation33_spill] sm:$0xff]  ;;  %v22427_v61 = vld [vmem:[#allocation36_spill] sm:$0xff] }
 0x348   :  { %v17624_v31 = vpack.i.bf16 %v17610_v14, %v17600_v51  ;;  %v4151_v63 = vmax.f32 %v4111_v35, 0.0  ;;  %v22422_v35 = vld [vmem:[#allocation32_spill] sm:$0xff]  ;;  %v22425_v34 = vld [vmem:[#allocation13_spill] sm:$0xff] }
 0x349   :  { %v17628_v33 = vpack.i.bf16 %v17617_v39, %v17613_v26  ;;  %v17631_v28 = vmul.f32 %v4149_v17, %v22399_v48  ;;  %v17639_v45 = vmul.f32 %v4150_v4, %v22402_v58  ;;  %v4152_v25 = vmax.f32 %v4112_v10, 0.0  ;;  %v22418_v10 = vld [vmem:[#allocation12_spill] sm:$0xff]  ;;  %v22420_v38 = vld [vmem:[#allocation31_spill] sm:$0xff]  ;;  %v22421_v17 = vld [vmem:[#allocation34_spill] sm:$0xff] }
 0x34a   :  { %15322 = vrot.lane.b32.xlu0 %v17375_v49, %s16217_s17  ;;  %15292 = vrot.lane.b32.xlu1 %v17624_v31, %s16216_s29  ;;  %v17642_v24 = vmul.f32 %v4151_v63, %v17126_v60  ;;  %v22416_v63 = vld [vmem:[#allocation14_spill] sm:$0xff]  ;;  %v22428_v2 = vld [vmem:[#allocation20_spill] sm:$0xff] }
 0x34b   :  { %22413 = vst [vmem:[#allocation21_spill] sm:$0xff] %v17631_v28  ;;  %v17646_v48 = vpack.i.bf16 %v17639_v45, %v17631_v28  ;;  %v17649_v11 = vmul.f32 %v4152_v25, %v17141_v23  ;;  %v22424_v25 = vld [vmem:[#allocation35_spill] sm:$0xff] }
 0x34c   :  { %22414 = vst [vmem:[#allocation17_spill] sm:$0xff] %v17642_v24 }
 0x34d   :  { %22415 = vst [vmem:[#allocation22_spill] sm:$0xff] %v17649_v11  ;;  %v17657_v58 = vpack.i.bf16 %v17649_v11, %v17642_v24 }
 0x34e   :  { %15327 = vrot.lane.b32.xlu0 %v22377_v20, %s16217_s17  ;;  %15297 = vrot.lane.b32.xlu1 %v17628_v33, %s16216_s29 }
 0x352   :  { %15342 = vrot.lane.b32.xlu0 %v17449_v44, %s16217_s17  ;;  %15312 = vrot.lane.b32.xlu1 %v17646_v48, %s16216_s29 }
 0x356   :  { %15357 = vrot.lane.b32.xlu0 %v17493_v47, %s16217_s17  ;;  %15317 = vrot.lane.b32.xlu1 %v17657_v58, %s16216_s29 }
 0x35a   :  { %15362 = vrot.lane.b32.xlu0 %v17518_v50, %s16217_s17  ;;  %15332 = vrot.lane.b32.xlu1 %v22418_v10, %s16217_s17 }
 0x35e   :  { %15377 = vrot.lane.b32.xlu0 %v22420_v38, %s16217_s17  ;;  %15337 = vrot.lane.b32.xlu1 %v22421_v17, %s16217_s17 }
 0x362   :  { %15382 = vrot.lane.b32.xlu0 %v17592_v22, %s16217_s17  ;;  %15347 = vrot.lane.b32.xlu1 %v22422_v35, %s16217_s17 }
 0x366   :  { %15397 = vrot.lane.b32.xlu0 %v17624_v31, %s16217_s17  ;;  %15352 = vrot.lane.b32.xlu1 %v22423_v0, %s16217_s17 }
 0x36a   :  { %15402 = vrot.lane.b32.xlu0 %v17628_v33, %s16217_s17  ;;  %15367 = vrot.lane.b32.xlu1 %v22424_v25, %s16217_s17 }
 0x36e   :  { %15417 = vrot.lane.b32.xlu0 %v17646_v48, %s16217_s17  ;;  %15372 = vrot.lane.b32.xlu1 %v22425_v34, %s16217_s17 }
 0x372   :  { %15422 = vrot.lane.b32.xlu0 %v17657_v58, %s16217_s17  ;;  %15387 = vrot.lane.b32.xlu1 %v22426_v41, %s16217_s17 }
 0x376   :  { %15437 = vrot.lane.b32.xlu0 %v22418_v10, %s16218_s27  ;;  %15392 = vrot.lane.b32.xlu1 %v22427_v61, %s16217_s17 }
 0x37a   :  { %15442 = vrot.lane.b32.xlu0 %v22421_v17, %s16218_s27  ;;  %15407 = vrot.lane.b32.xlu1 %v22428_v2, %s16217_s17 }
 0x37e   :  { %15452 = vrot.lane.b32.xlu0 %v22422_v35, %s16218_s27  ;;  %15412 = vrot.lane.b32.xlu1 %v17576_v62, %s16217_s17 }
 0x382   :  { %15457 = vrot.lane.b32.xlu0 %v22423_v0, %s16218_s27  ;;  %15427 = vrot.lane.b32.xlu1 %v17375_v49, %s16218_s27  ;;  %v15218_v49 = vpop.permute.xlu1 %15217 }
 0x383   :  { %v15220_v17 = vunpack.i.h.bf16 %v15218_v49 }
 0x386   :  { %15472 = vrot.lane.b32.xlu0 %v22424_v25, %s16218_s27  ;;  %15432 = vrot.lane.b32.xlu1 %v22377_v20, %s16218_s27 }
 0x38a   :  { %15477 = vrot.lane.b32.xlu0 %v22425_v34, %s16218_s27  ;;  %15447 = vrot.lane.b32.xlu1 %v17449_v44, %s16218_s27 }
 0x38e   :  { %15492 = vrot.lane.b32.xlu0 %v22426_v41, %s16218_s27  ;;  %15462 = vrot.lane.b32.xlu1 %v17493_v47, %s16218_s27 }
 0x392   :  { %15497 = vrot.lane.b32.xlu0 %v22427_v61, %s16218_s27  ;;  %15467 = vrot.lane.b32.xlu1 %v17518_v50, %s16218_s27 }
 0x396   :  { %15512 = vrot.lane.b32.xlu0 %v22428_v2, %s16218_s27  ;;  %15482 = vrot.lane.b32.xlu1 %v22420_v38, %s16218_s27  ;;  %v15219_v2 = vunpack.i.l.bf16 %v15218_v49 }
 0x39a   :  { %15517 = vrot.lane.b32.xlu0 %v17576_v62, %s16218_s27  ;;  %15487 = vrot.lane.b32.xlu1 %v17592_v22, %s16218_s27 }
 0x39c   :  { %v15223_v44 = vpop.permute.xlu1 %15222  ;;  %v15243_v47 = vpop.permute.xlu0 %15242 }
 0x39d   :  { %v15225_v50 = vunpack.i.h.bf16 %v15223_v44  ;;  %v15224_v41 = vunpack.i.l.bf16 %v15223_v44  ;;  %v15245_v4 = vunpack.i.h.bf16 %v15243_v47 }
 0x39e   :  { %15502 = vrot.lane.b32.xlu1 %v17624_v31, %s16218_s27 }
 0x39f   :  { %v4409_v22 = vsel %vm138_vm0, %v15219_v2, %v15224_v41  ;;  %v4410_v31 = vsel %vm138_vm0, %v15224_v41, %v15225_v50  ;;  %v17796_v41 = vld [vmem:[%s21986_s2 + $0x20] sm:$0xff] }
 0x3a0   :  { %v15228_v61 = vpop.permute.xlu1 %15227  ;;  %v17779_v34 = vpop.permute.xlu0 %15247 }
 0x3a1   :  { %v15230_v35 = vunpack.i.h.bf16 %v15228_v61  ;;  %v15229_v10 = vunpack.i.l.bf16 %v15228_v61 }
 0x3a2   :  { %15507 = vrot.lane.b32.xlu1 %v17628_v33, %s16218_s27 }
 0x3a3   :  { %v4412_v2 = vsel %vm138_vm0, %v15229_v10, %v15230_v35 }
 0x3a4   :  { %v15233_v38 = vpop.permute.xlu1 %15232  ;;  %v17787_v24 = vpop.permute.xlu0 %15262 }
 0x3a5   :  { %v15235_v62 = vunpack.i.h.bf16 %v15233_v38  ;;  %v15234_v0 = vunpack.i.l.bf16 %v15233_v38  ;;  %v15244_v38 = vunpack.i.l.bf16 %v15243_v47 }
 0x3a6   :  { %15522 = vrot.lane.b32.xlu1 %v17646_v48, %s16218_s27  ;;  %v4411_v48 = vsel %vm138_vm0, %v15225_v50, %v15229_v10  ;;  %v15249_v50 = vunpack.i.l.bf16 %v17779_v34 }
 0x3a7   :  { %v4429_v25 = vsel %vm138_vm0, %v15220_v17, %v15234_v0  ;;  %v4430_v33 = vsel %vm138_vm0, %v15234_v0, %v15235_v62 }
 0x3a8   :  { %v15238_v44 = vpop.permute.xlu1 %15237  ;;  %v14309_v9 = vpack.c.bf16 %v4430_v33, %v4410_v31  ;;  %v14311_v23 = vpack.c.bf16 %v4429_v25, %v4409_v22  ;;  %v15250_v31 = vunpack.i.h.bf16 %v17779_v34  ;;  %v17811_v25 = vld [vmem:[%s21986_s2 + $0x28] sm:$0xff]  ;;  %v17814_v33 = vpop.permute.xlu0 %15267 }
 0x3a9   :  { %v15240_v60 = vunpack.i.h.bf16 %v15238_v44  ;;  %v15239_v49 = vunpack.i.l.bf16 %v15238_v44 }
 0x3aa   :  { %15527 = vrot.lane.b32.xlu1 %v17657_v58, %s16218_s27  ;;  %14310 = vmatprep.subr.bf16.mxu0 %v14309_v9 }
 0x3ab   :  { %v4431_v61 = vsel %vm138_vm0, %v15235_v62, %v15239_v49  ;;  %14312 = vmatpush1.bf16.msra.mxu0 %v14311_v23  ;;  %v4432_v47 = vsel %vm138_vm0, %v15239_v49, %v15240_v60  ;;  %v4414_v23 = vsel %vm138_vm0, %v15244_v38, %v15245_v4  ;;  %v4413_v62 = vsel %vm138_vm0, %v15230_v35, %v15244_v38 }
 0x3ac   :  { %v15253_v17 = vpop.permute.xlu1 %15252  ;;  %v14313_v0 = vpack.c.bf16 %v4432_v47, %v4412_v2  ;;  %v14315_v22 = vpack.c.bf16 %v4431_v61, %v4411_v48  ;;  %v4415_v35 = vsel %vm138_vm0, %v15245_v4, %v15249_v50  ;;  %v15265_v38 = vunpack.i.h.bf16 %v17787_v24  ;;  %v17829_v4 = vld [vmem:[%s21986_s2 + $0x30] sm:$0xff] }
 0x3ad   :  { %v15255_v58 = vunpack.i.h.bf16 %v15253_v17  ;;  %v15254_v9 = vunpack.i.l.bf16 %v15253_v17  ;;  %v15264_v47 = vunpack.i.l.bf16 %v17787_v24 }
 0x3ae   :  { %14109 = vmatmul.mubr.msk.f32.vlgmr.msra.gmra.mrb[20].mxu0 %vm4489_vm5, %v17796_v41  ;;  %14314 = vmatprep.subr.bf16.mxu1 %v14313_v0 }
 0x3af   :  { %v4433_v10 = vsel %vm138_vm0, %v15240_v60, %v15254_v9  ;;  %14316 = vmatpush1.bf16.msra.mxu1 %v14315_v22  ;;  %4572 = vmatprep.mubr.f32.mxu0 %v22377_v20  ;;  %v4434_v34 = vsel %vm138_vm0, %v15254_v9, %v15255_v58  ;;  %v4416_v60 = vsel %vm138_vm0, %v15249_v50, %v15250_v31 }
 0x3b0   :  { %v15258_v44 = vpop.permute.xlu1 %15257  ;;  %v14317_v49 = vpack.c.bf16 %v4434_v34, %v4414_v23  ;;  %v14319_v48 = vpack.c.bf16 %v4433_v10, %v4413_v62  ;;  %v17833_v62 = vpop.permute.xlu0 %15282  ;;  %v15269_v10 = vunpack.i.l.bf16 %v17814_v33  ;;  %v17845_v34 = vld [vmem:[%s21986_s2 + $0x38] sm:$0xff] }
 0x3b1   :  { %v15260_v61 = vunpack.i.h.bf16 %v15258_v44  ;;  %v15259_v2 = vunpack.i.l.bf16 %v15258_v44  ;;  %v4418_v44 = vsel %vm138_vm0, %v15264_v47, %v15265_v38 }
 0x3b2   :  { %14110 = vmatmul.mubr.msk.f32.gmra.mrb[22].mxu0 %vm4489_vm5, %v17811_v25  ;;  %14113 = vmatmul.mubr.msk.f32.vlgmr.msra.gmra.mrb[20].mxu1 %vm4489_vm5, %v17796_v41 }
 0x3b3   :  { %v4435_v17 = vsel %vm138_vm0, %v15255_v58, %v15259_v2  ;;  %14318 = vmatprep.subr.bf16.mxu0 %v14317_v49  ;;  %4578 = vmatprep.mubr.f32.mxu0 %v22377_v20  ;;  %v4436_v0 = vsel %vm138_vm0, %v15259_v2, %v15260_v61  ;;  %v22068_v58 = vunpack.i.h.bf16 %v17814_v33 }
 0x3b4   :  { %14320 = vmatpush1.bf16.msra.mxu0 %v14319_v48  ;;  %v15273_v22 = vpop.permute.xlu1 %15272  ;;  %4661 = vmatprep.mubr.f32.mxu1 %v22377_v20  ;;  %v14321_v9 = vpack.c.bf16 %v4436_v0, %v4416_v60  ;;  %v14323_v50 = vpack.c.bf16 %v4435_v17, %v4415_v35 }
 0x3b5   :  { %v15275_v23 = vunpack.i.h.bf16 %v15273_v22  ;;  %v15274_v24 = vunpack.i.l.bf16 %v15273_v22  ;;  %v15284_v22 = vunpack.i.l.bf16 %v17833_v62 }
 0x3b6   :  { %14111 = vmatmul.mubr.msk.f32.gmra.mrb[24].mxu0 %vm4489_vm5, %v17829_v4  ;;  %14114 = vmatmul.mubr.msk.f32.gmra.mrb[22].mxu1 %vm4489_vm5, %v17811_v25 }
 0x3b7   :  { %14322 = vmatprep.subr.bf16.mxu1 %v14321_v9  ;;  %4584 = vmatprep.mubr.f32.mxu0 %v22377_v20  ;;  %v4438_v49 = vsel %vm138_vm0, %v15274_v24, %v15275_v23  ;;  %v4437_v17 = vsel %vm138_vm0, %v15260_v61, %v15274_v24  ;;  %v4420_v9 = vsel %vm138_vm0, %v15269_v10, %v22068_v58  ;;  %v17867_v24 = vpop.permute.xlu0 %15287 }
 0x3b8   :  { %14324 = vmatpush1.bf16.msra.mxu1 %v14323_v50  ;;  %v17849_v48 = vpop.permute.xlu1 %15277  ;;  %4667 = vmatprep.mubr.f32.mxu1 %v22377_v20  ;;  %v14325_v2 = vpack.c.bf16 %v4438_v49, %v4418_v44  ;;  %v4417_v61 = vsel %vm138_vm0, %v15250_v31, %v15264_v47  ;;  %v22069_v58 = vunpack.i.h.bf16 %v17867_v24  ;;  %v15289_v31 = vunpack.i.l.bf16 %v17867_v24 }
 0x3b9   :  { %v15280_v35 = vunpack.i.h.bf16 %v17849_v48  ;;  %v15279_v60 = vunpack.i.l.bf16 %v17849_v48  ;;  %v14327_v29 = vpack.c.bf16 %v4437_v17, %v4417_v61  ;;  %v22429_v47 = vunpack.i.h.bf16 %v17833_v62 }
 0x3ba   :  { %14112 = vmatmul.mubr.msk.f32.gmra.mrb[26].mxu0 %vm4489_vm5, %v17845_v34  ;;  %14115 = vmatmul.mubr.msk.f32.gmra.mrb[24].mxu1 %vm4489_vm5, %v17829_v4 }
 0x3bb   :  { %14326 = vmatprep.subr.bf16.mxu0 %v14325_v2  ;;  %4673 = vmatprep.mubr.f32.mxu1 %v22377_v20  ;;  %v4440_v50 = vsel %vm138_vm0, %v15279_v60, %v15280_v35  ;;  %v4439_v2 = vsel %vm138_vm0, %v15275_v23, %v15279_v60  ;;  %v4419_v23 = vsel %vm138_vm0, %v15265_v38, %v15269_v10 }
 0x3bc   :  { %v15293_v44 = vpop.permute.xlu1 %15292  ;;  %4744 = vmatprep.mubr.f32.mxu0 %v22377_v20  ;;  %v14329_v49 = vpack.c.bf16 %v4440_v50, %v4420_v9  ;;  %v4422_v9 = vsel %vm138_vm0, %v15284_v22, %v22429_v47  ;;  %v4424_v38 = vsel %vm138_vm0, %v15289_v31, %v22069_v58  ;;  %v22430_v58 = vunpack.i.h.bf16 %v17814_v33 }
 0x3bd   :  { %v15295_v48 = vunpack.i.h.bf16 %v15293_v44  ;;  %v15294_v0 = vunpack.i.l.bf16 %v15293_v44  ;;  %v14331_v44 = vpack.c.bf16 %v4439_v2, %v4419_v23 }
 0x3be   :  { %14116 = vmatmul.mubr.msk.f32.gmra.mrb[26].mxu1 %vm4489_vm5, %v17845_v34  ;;  %14117 = vmatmul.mubr.msk.f32.vlgmr.msra.gmra.mrb[28].mxu0 %vm4489_vm5, %v17796_v41 }
 0x3bf   :  { %14328 = vmatpush1.bf16.msra.mxu0 %v14327_v29  ;;  %14330 = vmatprep.subr.bf16.mxu1 %v14329_v49  ;;  %v4442_v17 = vsel %vm138_vm0, %v15294_v0, %v15295_v48  ;;  %v17896_v49 = vpop.permute.xlu0 %15302 }
 0x3c0   :  { %v17882_v60 = vpop.permute.xlu1 %15297  ;;  %4750 = vmatprep.mubr.f32.mxu0 %v22377_v20  ;;  %4833 = vmatprep.mubr.f32.mxu1 %v22377_v20  ;;  %v14333_v50 = vpack.c.bf16 %v4442_v17, %v4422_v9 }
 0x3c1   :  { %v15300_v61 = vunpack.i.h.bf16 %v17882_v60  ;;  %v15299_v29 = vunpack.i.l.bf16 %v17882_v60  ;;  %v15305_v60 = vunpack.i.h.bf16 %v17896_v49 }
 0x3c2   :  { %14118 = vmatmul.mubr.msk.f32.gmra.mrb[30].mxu0 %vm4489_vm5, %v17811_v25  ;;  %14121 = vmatmul.mubr.msk.f32.vlgmr.msra.gmra.mrb[28].mxu1 %vm4489_vm5, %v17796_v41 }
 0x3c3   :  { %14332 = vmatpush1.bf16.msra.mxu1 %v14331_v44  ;;  %14334 = vmatprep.subr.bf16.mxu0 %v14333_v50  ;;  %v4444_v10 = vsel %vm138_vm0, %v15299_v29, %v15300_v61  ;;  %v15304_v50 = vunpack.i.l.bf16 %v17896_v49  ;;  %v15308_v44 = vpop.permute.xlu0 %15307  ;;  %v4421_v49 = vsel %vm138_vm0, %v22430_v58, %v15284_v22  ;;  %v4443_v11 = vsel %vm138_vm0, %v15295_v48, %v15299_v29 }
 0x3c4   :  { %v15313_v47 = vpop.permute.xlu1 %15312  ;;  %4756 = vmatprep.mubr.f32.mxu0 %v22377_v20  ;;  %4839 = vmatprep.mubr.f32.mxu1 %v22377_v20  ;;  %v14337_v2 = vpack.c.bf16 %v4444_v10, %v4424_v38  ;;  %v4441_v38 = vsel %vm138_vm0, %v15280_v35, %v15294_v0  ;;  %v15310_v28 = vunpack.i.h.bf16 %v15308_v44  ;;  %v15309_v35 = vunpack.i.l.bf16 %v15308_v44 }
 0x3c5   :  { %v15315_v9 = vunpack.i.h.bf16 %v15313_v47  ;;  %v15314_v17 = vunpack.i.l.bf16 %v15313_v47  ;;  %v14335_v0 = vpack.c.bf16 %v4441_v38, %v4421_v49  ;;  %v4426_v37 = vsel %vm138_vm0, %v15304_v50, %v15305_v60 }
 0x3c6   :  { %14119 = vmatmul.mubr.msk.f32.gmra.mrb[32].mxu0 %vm4489_vm5, %v17829_v4  ;;  %14122 = vmatmul.mubr.msk.f32.gmra.mrb[30].mxu1 %vm4489_vm5, %v17811_v25  ;;  %v22431_v58 = vunpack.i.h.bf16 %v17833_v62  ;;  %v4428_v29 = vsel %vm138_vm0, %v15309_v35, %v15310_v28 }
 0x3c7   :  { %14338 = vmatprep.subr.bf16.mxu1 %v14337_v2  ;;  %4762 = vmatprep.mubr.f32.mxu0 %v22377_v20  ;;  %v4446_v2 = vsel %vm138_vm0, %v15314_v17, %v15315_v9  ;;  %v4445_v28 = vsel %vm138_vm0, %v15300_v61, %v15314_v17  ;;  %v4427_v61 = vsel %vm138_vm0, %v15305_v60, %v15309_v35  ;;  %v22453_v60 = vld [vmem:[#allocation21_spill] sm:$0xff] }
 0x3c8   :  { %v15318_v23 = vpop.permute.xlu1 %15317  ;;  %4845 = vmatprep.mubr.f32.mxu1 %v22377_v20  ;;  %v4423_v22 = vsel %vm138_vm0, %v22431_v58, %v15289_v31  ;;  %v22433_v17 = vpack.c.bf16 %v17409_v59, %v17355_v21  ;;  %v22435_v21 = vpack.c.bf16 %v17406_v42, %v17352_v13  ;;  %v22437_v59 = vpack.c.bf16 %v17430_v3, %v17364_v8  ;;  %v18038_v8 = vld [vmem:[%s21986_s2 + $0x8] sm:$0xff]  ;;  %v18055_v3 = vld [vmem:[%s21986_s2 + $0x10] sm:$0xff] }
 0x3c9   :  { %v15320_v10 = vunpack.i.h.bf16 %v15318_v23  ;;  %v15319_v47 = vunpack.i.l.bf16 %v15318_v23  ;;  %v14341_v23 = vpack.c.bf16 %v4446_v2, %v4426_v37  ;;  %v14339_v48 = vpack.c.bf16 %v4443_v11, %v4423_v22  ;;  %v22456_v35 = vld [vmem:[#allocation17_spill] sm:$0xff] }
 0x3ca   :  { %14120 = vmatmul.mubr.msk.f32.gmra.mrb[34].mxu0 %vm4489_vm5, %v17845_v34  ;;  %14123 = vmatmul.mubr.msk.f32.gmra.mrb[32].mxu1 %vm4489_vm5, %v17829_v4  ;;  %v22432_v11 = vunpack.i.h.bf16 %v17867_v24  ;;  %v22438_v13 = vpack.c.bf16 %v17503_v32, %v17361_v54  ;;  %v22439_v54 = vpack.c.bf16 %v17470_v7, %v17346_v12  ;;  %v22440_v42 = vpack.c.bf16 %v17549_v16, %v17403_v40 }
 0x3cb   :  { %4851 = vmatprep.mubr.f32.mxu1 %v22377_v20  ;;  %4922 = vmatprep.mubr.f32.mxu0 %v22377_v20  ;;  %v4448_v33 = vsel %vm138_vm0, %v15319_v47, %v15320_v10  ;;  %v4447_v44 = vsel %vm138_vm0, %v15315_v9, %v15319_v47  ;;  %v22434_v9 = vpack.c.bf16 %v17433_v18, %v17367_v27 }
 0x3cc   :  { %v14345_v37 = vpack.c.bf16 %v4448_v33, %v4428_v29  ;;  %v4425_v62 = vsel %vm138_vm0, %v22432_v11, %v15304_v50  ;;  %v14347_v24 = vpack.c.bf16 %v4447_v44, %v4427_v61  ;;  %v22436_v27 = vpack.c.bf16 %v17473_v6, %v17349_v36  ;;  %v18025_v36 = vld [vmem:[%s21986_s2] sm:$0xff]  ;;  %v22454_v50 = vld [vmem:[#allocation27_spill] sm:$0xff] }
 0x3cd   :  { %v14343_v31 = vpack.c.bf16 %v4445_v28, %v4425_v62  ;;  %v22441_v12 = vpack.c.bf16 %v17496_v56, %v17358_v30  ;;  %v22442_v40 = vpack.c.bf16 %v17579_v55, %v17423_v15  ;;  %v18070_v30 = vld [vmem:[%s21986_s2 + $0x18] sm:$0xff]  ;;  %v22443_v15 = vpack.c.bf16 %v17546_v57, %v17400_v19  ;;  %v22451_v57 = vld [vmem:[#allocation29_spill] sm:$0xff] }
 0x3ce   :  { %14124 = vmatmul.mubr.msk.f32.gmra.mrb[34].mxu1 %vm4489_vm5, %v17845_v34  ;;  %14125 = vmatmul.mubr.msk.f32.vlgmr.msra.gmra.mrb[36].mxu0 %vm4489_vm5, %v17796_v41  ;;  %v22444_v18 = vpack.c.bf16 %v17610_v14, %v17467_v1  ;;  %v22445_v7 = vpack.c.bf16 %v17568_v52, %v17420_v5  ;;  %v22446_v19 = vpack.c.bf16 %v17617_v39, %v17479_v43  ;;  %v18114_v5 = vpop.permute.xlu0 %15322  ;;  %v18128_v43 = vpop.permute.xlu1 %15332 }
 0x3cf   :  { %14336 = vmatpush1.bf16.msra.mxu0 %v14335_v0  ;;  %4928 = vmatprep.mubr.f32.mxu0 %v22377_v20  ;;  %v22447_v1 = vpack.c.bf16 %v17600_v51, %v22416_v63  ;;  %v22448_v6 = vpack.c.bf16 %v17639_v45, %v17538_v53  ;;  %v22449_v56 = vpack.c.bf16 %v17613_v26, %v22417_v46  ;;  %v22450_v53 = vld [vmem:[#allocation22_spill] sm:$0xff]  ;;  %v15335_v51 = vunpack.i.h.bf16 %v18128_v43  ;;  %v22457_v0 = vld [vmem:[#allocation19_spill] sm:$0xff] }
 0x3d0   :  { %14342 = vmatprep.subr.bf16.mxu0 %v14341_v23  ;;  %5011 = vmatprep.mubr.f32.mxu1 %v22377_v20  ;;  %v22452_v16 = vpack.c.bf16 %v22450_v53, %v22451_v57  ;;  %v15334_v52 = vunpack.i.l.bf16 %v18128_v43  ;;  %v15325_v14 = vunpack.i.h.bf16 %v18114_v5  ;;  %v15324_v26 = vunpack.i.l.bf16 %v18114_v5  ;;  %v18288_v57 = vld [vmem:[%s21986_s2 + $0x40] sm:$0xff] }
 0x3d1   :  { %v22455_v38 = vpack.c.bf16 %v22453_v60, %v22454_v50  ;;  %v22458_v23 = vpack.c.bf16 %v22456_v35, %v22457_v0 }
 0x3d2   :  { %14126 = vmatmul.mubr.msk.f32.gmra.mrb[38].mxu0 %vm4489_vm5, %v17811_v25  ;;  %14129 = vmatmul.mubr.msk.f32.vlgmr.msra.gmra.mrb[36].mxu1 %vm4489_vm5, %v17796_v41  ;;  %v18138_v32 = vpop.permute.xlu0 %15327  ;;  %v18152_v55 = vpop.permute.xlu1 %15337  ;;  %v6403_v63 = vsel %vm1889_vm3, %v15334_v52, %v15335_v51 }
 0x3d3   :  { %14340 = vmatpush1.bf16.msra.mxu1 %v14339_v48  ;;  %4934 = vmatprep.mubr.f32.mxu0 %v22377_v20  ;;  %v15340_v45 = vunpack.i.h.bf16 %v18152_v55  ;;  %v15339_v46 = vunpack.i.l.bf16 %v18152_v55  ;;  %v15330_v58 = vunpack.i.h.bf16 %v18138_v32  ;;  %v15329_v29 = vunpack.i.l.bf16 %v18138_v32 }
 0x3d4   :  { %14346 = vmatprep.subr.bf16.mxu1 %v14345_v37  ;;  %5017 = vmatprep.mubr.f32.mxu1 %v22377_v20 }
 0x3d5   :  { %v6385_v10 = vsel %vm1889_vm3, %v15339_v46, %v15340_v45 }
 0x3d6   :  { %14127 = vmatmul.mubr.msk.f32.gmra.mrb[40].mxu0 %vm4489_vm5, %v17829_v4  ;;  %14130 = vmatmul.mubr.msk.f32.gmra.mrb[38].mxu1 %vm4489_vm5, %v17811_v25  ;;  %v18156_v39 = vpop.permute.xlu0 %15342  ;;  %v18187_v2 = vpop.permute.xlu1 %15347 }
 0x3d7   :  { %4940 = vmatprep.mubr.f32.mxu0 %v22377_v20  ;;  %5023 = vmatprep.mubr.f32.mxu1 %v22377_v20  ;;  %v15350_v22 = vunpack.i.h.bf16 %v18187_v2  ;;  %v15349_v48 = vunpack.i.l.bf16 %v18187_v2 }
 0x3da   :  { %14128 = vmatmul.mubr.msk.f32.gmra.mrb[42].mxu0 %vm4489_vm5, %v17845_v34  ;;  %14131 = vmatmul.mubr.msk.f32.gmra.mrb[40].mxu1 %vm4489_vm5, %v17829_v4  ;;  %v18197_v33 = vpop.permute.xlu0 %15357  ;;  %v18210_v37 = vpop.permute.xlu1 %15352 }
 0x3db   :  { %5029 = vmatprep.mubr.f32.mxu1 %v22377_v20  ;;  %5100 = vmatprep.mubr.f32.mxu0 %v22377_v20  ;;  %v15360_v28 = vunpack.i.h.bf16 %v18197_v33  ;;  %v15359_v11 = vunpack.i.l.bf16 %v18197_v33  ;;  %v15355_v44 = vunpack.i.h.bf16 %v18210_v37  ;;  %v15354_v61 = vunpack.i.l.bf16 %v18210_v37 }
 0x3de   :  { %14132 = vmatmul.mubr.msk.f32.gmra.mrb[42].mxu1 %vm4489_vm5, %v17845_v34  ;;  %14133 = vmatmul.mubr.msk.f32.vlgmr.msra.gmra.mrb[44].mxu0 %vm4489_vm5, %v17796_v41  ;;  %v18214_v62 = vpop.permute.xlu0 %15362 }
 0x3df   :  { %14344 = vmatpush1.bf16.msra.mxu0 %v14343_v31  ;;  %5106 = vmatprep.mubr.f32.mxu0 %v22377_v20  ;;  %v6402_v31 = vsel %vm1889_vm3, %v15330_v58, %v15334_v52 }
 0x3e0   :  { %14350 = vmatprep.subr.bf16.mxu0 %v22433_v17  ;;  %5189 = vmatprep.mubr.f32.mxu1 %v22377_v20  ;;  %v6387_v17 = vsel %vm1889_vm3, %v15349_v48, %v15350_v22 }
 0x3e2   :  { %14134 = vmatmul.mubr.msk.f32.gmra.mrb[46].mxu0 %vm4489_vm5, %v17811_v25  ;;  %14137 = vmatmul.mubr.msk.f32.vlgmr.msra.gmra.mrb[44].mxu1 %vm4489_vm5, %v17796_v41 }
 0x3e3   :  { %14348 = vmatpush1.bf16.msra.mxu1 %v14347_v24  ;;  %5112 = vmatprep.mubr.f32.mxu0 %v22377_v20  ;;  %v6382_v24 = vsel %vm1889_vm3, %v15329_v29, %v15324_v26 }
 0x3e4   :  { %14354 = vmatprep.subr.bf16.mxu1 %v22434_v9  ;;  %5195 = vmatprep.mubr.f32.mxu1 %v22377_v20  ;;  %v15365_v9 = vunpack.i.h.bf16 %v18214_v62 }
 0x3e6   :  { %14135 = vmatmul.mubr.msk.f32.gmra.mrb[48].mxu0 %vm4489_vm5, %v17829_v4  ;;  %14138 = vmatmul.mubr.msk.f32.gmra.mrb[46].mxu1 %vm4489_vm5, %v17811_v25 }
 0x3e7   :  { %5118 = vmatprep.mubr.f32.mxu0 %v22377_v20  ;;  %5201 = vmatprep.mubr.f32.mxu1 %v22377_v20 }
 0x3ea   :  { %14136 = vmatmul.mubr.msk.f32.gmra.mrb[50].mxu0 %vm4489_vm5, %v17845_v34  ;;  %14139 = vmatmul.mubr.msk.f32.gmra.mrb[48].mxu1 %vm4489_vm5, %v17829_v4 }
 0x3eb   :  { %5207 = vmatprep.mubr.f32.mxu1 %v22377_v20  ;;  %5278 = vmatprep.mubr.f32.mxu0 %v22377_v20 }
 0x3ee   :  { %14140 = vmatmul.mubr.msk.f32.gmra.mrb[50].mxu1 %vm4489_vm5, %v17845_v34  ;;  %14141 = vmatmul.mubr.msk.f32.vlgmr.msra.gmra.mrb[52].mxu0 %vm4489_vm5, %v17796_v41 }
 0x3ef   :  { %14352 = vmatpush1.bf16.msra.mxu0 %v22435_v21  ;;  %5284 = vmatprep.mubr.f32.mxu0 %v22377_v20  ;;  %v15364_v21 = vunpack.i.l.bf16 %v18214_v62 }
 0x3f0   :  { %14358 = vmatprep.subr.bf16.mxu0 %v22436_v27  ;;  %5367 = vmatprep.mubr.f32.mxu1 %v22377_v20  ;;  %v14391_v27 = vpack.c.bf16 %v6402_v31, %v6382_v24 }
 0x3f2   :  { %14142 = vmatmul.mubr.msk.f32.gmra.mrb[54].mxu0 %vm4489_vm5, %v17811_v25  ;;  %14145 = vmatmul.mubr.msk.f32.vlgmr.msra.gmra.mrb[52].mxu1 %vm4489_vm5, %v17796_v41  ;;  %v15345_v41 = vunpack.i.h.bf16 %v18156_v39 }
 0x3f3   :  { %14356 = vmatpush1.bf16.msra.mxu1 %v22437_v59  ;;  %5290 = vmatprep.mubr.f32.mxu0 %v22377_v20  ;;  %v6407_v59 = vsel %vm1889_vm3, %v15359_v11, %v15360_v28 }
 0x3f4   :  { %14362 = vmatprep.subr.bf16.mxu1 %v22438_v13  ;;  %5373 = vmatprep.mubr.f32.mxu1 %v22377_v20  ;;  %v6384_v13 = vsel %vm1889_vm3, %v15325_v14, %v15339_v46 }
 0x3f6   :  { %14143 = vmatmul.mubr.msk.f32.gmra.mrb[56].mxu0 %vm4489_vm5, %v17829_v4  ;;  %14146 = vmatmul.mubr.msk.f32.gmra.mrb[54].mxu1 %vm4489_vm5, %v17811_v25  ;;  %v15344_v25 = vunpack.i.l.bf16 %v18156_v39 }
 0x3f7   :  { %5296 = vmatprep.mubr.f32.mxu0 %v22377_v20  ;;  %5379 = vmatprep.mubr.f32.mxu1 %v22377_v20 }
 0x3f8   :  { %v6405_v47 = vsel %vm1889_vm3, %v15344_v25, %v15345_v41 }
 0x3f9   :  { %v14393_v49 = vpack.c.bf16 %v6405_v47, %v6385_v10  ;;  %v18350_v10 = vld [vmem:[%s21986_s2 + $0x58] sm:$0xff] }
 0x3fa   :  { %14144 = vmatmul.mubr.msk.f32.gmra.mrb[58].mxu0 %vm4489_vm5, %v17845_v34  ;;  %14147 = vmatmul.mubr.msk.f32.gmra.mrb[56].mxu1 %vm4489_vm5, %v17829_v4  ;;  %v6383_v4 = vsel %vm1889_vm3, %v15324_v26, %v15325_v14  ;;  %v6388_v26 = vsel %vm1889_vm3, %v15350_v22, %v15354_v61 }
 0x3fb   :  { %5385 = vmatprep.mubr.f32.mxu1 %v22377_v20  ;;  %5468 = vmatprep.mubr.f32.mxu0 %v22377_v20 }
 0x3fe   :  { %14148 = vmatmul.mubr.msk.f32.gmra.mrb[58].mxu1 %vm4489_vm5, %v17845_v34  ;;  %14149 = vmatmul.mubr.msk.f32.vlgmr.msra.gmra.mrb[20].mxu0 %vm4489_vm5, %v18025_v36  ;;  %v14389_v34 = vpack.c.bf16 %v6403_v63, %v6383_v4 }
 0x3ff   :  { %14360 = vmatpush1.bf16.msra.mxu0 %v22439_v54  ;;  %5474 = vmatprep.mubr.f32.mxu0 %v22377_v20  ;;  %v14397_v54 = vpack.c.bf16 %v6407_v59, %v6387_v17 }
 0x400   :  { %14366 = vmatprep.subr.bf16.mxu0 %v22440_v42  ;;  %5557 = vmatprep.mubr.f32.mxu1 %v22377_v20  ;;  %v6389_v42 = vsel %vm1889_vm3, %v15354_v61, %v15355_v44 }
 0x402   :  { %14150 = vmatmul.mubr.msk.f32.gmra.mrb[22].mxu0 %vm4489_vm5, %v18038_v8  ;;  %14153 = vmatmul.mubr.msk.f32.vlgmr.msra.gmra.mrb[20].mxu1 %vm4489_vm5, %v18025_v36 }
 0x403   :  { %14364 = vmatpush1.bf16.msra.mxu1 %v22441_v12  ;;  %5480 = vmatprep.mubr.f32.mxu0 %v22377_v20  ;;  %v6404_v12 = vsel %vm1889_vm3, %v15335_v51, %v15344_v25 }
 0x404   :  { %14370 = vmatprep.subr.bf16.mxu1 %v22442_v40  ;;  %5563 = vmatprep.mubr.f32.mxu1 %v22377_v20  ;;  %v14395_v40 = vpack.c.bf16 %v6404_v12, %v6384_v13 }
 0x406   :  { %14151 = vmatmul.mubr.msk.f32.gmra.mrb[24].mxu0 %vm4489_vm5, %v18055_v3  ;;  %14154 = vmatmul.mubr.msk.f32.gmra.mrb[22].mxu1 %vm4489_vm5, %v18038_v8 }
 0x407   :  { %5486 = vmatprep.mubr.f32.mxu0 %v22377_v20  ;;  %5569 = vmatprep.mubr.f32.mxu1 %v22377_v20 }
 0x40a   :  { %14152 = vmatmul.mubr.msk.f32.gmra.mrb[26].mxu0 %vm4489_vm5, %v18070_v30  ;;  %14155 = vmatmul.mubr.msk.f32.gmra.mrb[24].mxu1 %vm4489_vm5, %v18055_v3 }
 0x40b   :  { %5575 = vmatprep.mubr.f32.mxu1 %v22377_v20  ;;  %5646 = vmatprep.mubr.f32.mxu0 %v22377_v20 }
 0x40e   :  { %14156 = vmatmul.mubr.msk.f32.gmra.mrb[26].mxu1 %vm4489_vm5, %v18070_v30  ;;  %14157 = vmatmul.mubr.msk.f32.vlgmr.msra.gmra.mrb[28].mxu0 %vm4489_vm5, %v18025_v36 }
 0x40f   :  { %14368 = vmatpush1.bf16.msra.mxu0 %v22443_v15  ;;  %5652 = vmatprep.mubr.f32.mxu0 %v22377_v20  ;;  %v6409_v15 = vsel %vm1889_vm3, %v15364_v21, %v15365_v9 }
 0x410   :  { %14374 = vmatprep.subr.bf16.mxu0 %v22444_v18  ;;  %5735 = vmatprep.mubr.f32.mxu1 %v22377_v20  ;;  %v18250_v18 = vpop.permute.xlu1 %15367 }
 0x411   :  { %v15370_v5 = vunpack.i.h.bf16 %v18250_v18 }
 0x412   :  { %14158 = vmatmul.mubr.msk.f32.gmra.mrb[30].mxu0 %vm4489_vm5, %v18038_v8  ;;  %14161 = vmatmul.mubr.msk.f32.vlgmr.msra.gmra.mrb[28].mxu1 %vm4489_vm5, %v18025_v36 }
 0x413   :  { %14372 = vmatpush1.bf16.msra.mxu1 %v22445_v7  ;;  %5658 = vmatprep.mubr.f32.mxu0 %v22377_v20  ;;  %v14401_v7 = vpack.c.bf16 %v6409_v15, %v6389_v42 }
 0x414   :  { %14378 = vmatprep.subr.bf16.mxu1 %v22446_v19  ;;  %5741 = vmatprep.mubr.f32.mxu1 %v22377_v20  ;;  %v18257_v19 = vpop.permute.xlu0 %15377 }
 0x415   :  { %v15379_v43 = vunpack.i.l.bf16 %v18257_v19 }
 0x416   :  { %14159 = vmatmul.mubr.msk.f32.gmra.mrb[32].mxu0 %vm4489_vm5, %v18055_v3  ;;  %14162 = vmatmul.mubr.msk.f32.gmra.mrb[30].mxu1 %vm4489_vm5, %v18038_v8 }
 0x417   :  { %5664 = vmatprep.mubr.f32.mxu0 %v22377_v20  ;;  %5747 = vmatprep.mubr.f32.mxu1 %v22377_v20  ;;  %v6410_v22 = vsel %vm1889_vm3, %v15365_v9, %v15379_v43 }
 0x41a   :  { %14160 = vmatmul.mubr.msk.f32.gmra.mrb[34].mxu0 %vm4489_vm5, %v18070_v30  ;;  %14163 = vmatmul.mubr.msk.f32.gmra.mrb[32].mxu1 %vm4489_vm5, %v18055_v3 }
 0x41b   :  { %5753 = vmatprep.mubr.f32.mxu1 %v22377_v20  ;;  %5824 = vmatprep.mubr.f32.mxu0 %v22377_v20 }
 0x41e   :  { %14164 = vmatmul.mubr.msk.f32.gmra.mrb[34].mxu1 %vm4489_vm5, %v18070_v30  ;;  %14165 = vmatmul.mubr.msk.f32.vlgmr.msra.gmra.mrb[36].mxu0 %vm4489_vm5, %v18025_v36 }
 0x41f   :  { %14376 = vmatpush1.bf16.msra.mxu0 %v22447_v1  ;;  %5830 = vmatprep.mubr.f32.mxu0 %v22377_v20  ;;  %v15369_v1 = vunpack.i.l.bf16 %v18250_v18 }
 0x420   :  { %14382 = vmatprep.subr.bf16.mxu0 %v22448_v6  ;;  %5913 = vmatprep.mubr.f32.mxu1 %v22377_v20  ;;  %v15380_v6 = vunpack.i.h.bf16 %v18257_v19 }
 0x421   :  { %v6390_v0 = vsel %vm1889_vm3, %v15355_v44, %v15369_v1 }
 0x422   :  { %14166 = vmatmul.mubr.msk.f32.gmra.mrb[38].mxu0 %vm4489_vm5, %v18038_v8  ;;  %14169 = vmatmul.mubr.msk.f32.vlgmr.msra.gmra.mrb[36].mxu1 %vm4489_vm5, %v18025_v36  ;;  %v6411_v14 = vsel %vm1889_vm3, %v15379_v43, %v15380_v6  ;;  %v14407_v37 = vpack.c.bf16 %v6410_v22, %v6390_v0 }
 0x423   :  { %14380 = vmatpush1.bf16.msra.mxu1 %v22449_v56  ;;  %5836 = vmatprep.mubr.f32.mxu0 %v22377_v20  ;;  %v18272_v56 = vpop.permute.xlu0 %15382 }
 0x424   :  { %14386 = vmatprep.subr.bf16.mxu1 %v22452_v16  ;;  %5919 = vmatprep.mubr.f32.mxu1 %v22377_v20  ;;  %v6391_v16 = vsel %vm1889_vm3, %v15369_v1, %v15370_v5  ;;  %v15385_v51 = vunpack.i.h.bf16 %v18272_v56  ;;  %v15384_v52 = vunpack.i.l.bf16 %v18272_v56 }
 0x425   :  { %v14405_v39 = vpack.c.bf16 %v6411_v14, %v6391_v16 }
 0x426   :  { %14167 = vmatmul.mubr.msk.f32.gmra.mrb[40].mxu0 %vm4489_vm5, %v18055_v3  ;;  %14170 = vmatmul.mubr.msk.f32.gmra.mrb[38].mxu1 %vm4489_vm5, %v18038_v8  ;;  %v6412_v44 = vsel %vm1889_vm3, %v15380_v6, %v15384_v52 }
 0x427   :  { %5842 = vmatprep.mubr.f32.mxu0 %v22377_v20  ;;  %5925 = vmatprep.mubr.f32.mxu1 %v22377_v20  ;;  %v18336_v60 = vpop.permute.xlu0 %15397 }
 0x428   :  { %v15400_v2 = vunpack.i.h.bf16 %v18336_v60 }
 0x42a   :  { %14168 = vmatmul.mubr.msk.f32.gmra.mrb[42].mxu0 %vm4489_vm5, %v18070_v30  ;;  %14171 = vmatmul.mubr.msk.f32.gmra.mrb[40].mxu1 %vm4489_vm5, %v18055_v3 }
 0x42b   :  { %5931 = vmatprep.mubr.f32.mxu1 %v22377_v20  ;;  %6002 = vmatprep.mubr.f32.mxu0 %v22377_v20  ;;  %v18356_v35 = vpop.permute.xlu0 %15402 }
 0x42c   :  { %v15404_v29 = vunpack.i.l.bf16 %v18356_v35 }
 0x42e   :  { %14172 = vmatmul.mubr.msk.f32.gmra.mrb[42].mxu1 %vm4489_vm5, %v18070_v30  ;;  %14173 = vmatmul.mubr.msk.f32.vlgmr.msra.gmra.mrb[44].mxu0 %vm4489_vm5, %v18025_v36 }
 0x42f   :  { %14384 = vmatpush1.bf16.msra.mxu0 %v22455_v38  ;;  %6008 = vmatprep.mubr.f32.mxu0 %v22377_v20 }
 0x430   :  { %14390 = vmatprep.subr.bf16.mxu0 %v14389_v34  ;;  %6091 = vmatprep.mubr.f32.mxu1 %v22377_v20  ;;  %v18334_v34 = vld [vmem:[%s21986_s2 + $0x50] sm:$0xff] }
 0x432   :  { %14174 = vmatmul.mubr.msk.f32.gmra.mrb[46].mxu0 %vm4489_vm5, %v18038_v8  ;;  %14177 = vmatmul.mubr.msk.f32.vlgmr.msra.gmra.mrb[44].mxu1 %vm4489_vm5, %v18025_v36 }
 0x433   :  { %14388 = vmatpush1.bf16.msra.mxu1 %v22458_v23  ;;  %6014 = vmatprep.mubr.f32.mxu0 %v22377_v20 }
 0x434   :  { %14394 = vmatprep.subr.bf16.mxu1 %v14393_v49  ;;  %6097 = vmatprep.mubr.f32.mxu1 %v22377_v20  ;;  %v15399_v49 = vunpack.i.l.bf16 %v18336_v60 }
 0x436   :  { %14175 = vmatmul.mubr.msk.f32.gmra.mrb[48].mxu0 %vm4489_vm5, %v18055_v3  ;;  %14178 = vmatmul.mubr.msk.f32.gmra.mrb[46].mxu1 %vm4489_vm5, %v18038_v8  ;;  %v6414_v19 = vsel %vm1889_vm3, %v15385_v51, %v15399_v49 }
 0x437   :  { %6020 = vmatprep.mubr.f32.mxu0 %v22377_v20  ;;  %6103 = vmatprep.mubr.f32.mxu1 %v22377_v20 }
 0x43a   :  { %14176 = vmatmul.mubr.msk.f32.gmra.mrb[50].mxu0 %vm4489_vm5, %v18070_v30  ;;  %14179 = vmatmul.mubr.msk.f32.gmra.mrb[48].mxu1 %vm4489_vm5, %v18055_v3 }
 0x43b   :  { %6109 = vmatprep.mubr.f32.mxu1 %v22377_v20  ;;  %6180 = vmatprep.mubr.f32.mxu0 %v22377_v20 }
 0x43e   :  { %14180 = vmatmul.mubr.msk.f32.gmra.mrb[50].mxu1 %vm4489_vm5, %v18070_v30  ;;  %14181 = vmatmul.mubr.msk.f32.vlgmr.msra.gmra.mrb[52].mxu0 %vm4489_vm5, %v18025_v36 }
 0x43f   :  { %14392 = vmatpush1.bf16.msra.mxu0 %v14391_v27  ;;  %6186 = vmatprep.mubr.f32.mxu0 %v22377_v20 }
 0x440   :  { %14398 = vmatprep.subr.bf16.mxu0 %v14397_v54  ;;  %6269 = vmatprep.mubr.f32.mxu1 %v22377_v20 }
 0x442   :  { %14182 = vmatmul.mubr.msk.f32.gmra.mrb[54].mxu0 %vm4489_vm5, %v18038_v8  ;;  %14185 = vmatmul.mubr.msk.f32.vlgmr.msra.gmra.mrb[52].mxu1 %vm4489_vm5, %v18025_v36  ;;  %v18268_v36 = vpop.permute.xlu1 %15372 }
 0x443   :  { %14396 = vmatpush1.bf16.msra.mxu1 %v14395_v40  ;;  %6192 = vmatprep.mubr.f32.mxu0 %v22377_v20  ;;  %v15375_v32 = vunpack.i.h.bf16 %v18268_v36  ;;  %v15374_v53 = vunpack.i.l.bf16 %v18268_v36 }
 0x444   :  { %14402 = vmatprep.subr.bf16.mxu1 %v14401_v7  ;;  %6275 = vmatprep.mubr.f32.mxu1 %v22377_v20 }
 0x445   :  { %v6393_v46 = vsel %vm1889_vm3, %v15374_v53, %v15375_v32 }
 0x446   :  { %14183 = vmatmul.mubr.msk.f32.gmra.mrb[56].mxu0 %vm4489_vm5, %v18055_v3  ;;  %14186 = vmatmul.mubr.msk.f32.gmra.mrb[54].mxu1 %vm4489_vm5, %v18038_v8  ;;  %v6386_v8 = vsel %vm1889_vm3, %v15340_v45, %v15349_v48  ;;  %v18312_v45 = vld [vmem:[%s21986_s2 + $0x48] sm:$0xff]  ;;  %v18324_v25 = vpop.permute.xlu1 %15387  ;;  %v15405_v48 = vunpack.i.h.bf16 %v18356_v35 }
 0x447   :  { %6198 = vmatprep.mubr.f32.mxu0 %v22377_v20  ;;  %6281 = vmatprep.mubr.f32.mxu1 %v22377_v20  ;;  %v15390_v50 = vunpack.i.h.bf16 %v18324_v25  ;;  %v15389_v38 = vunpack.i.l.bf16 %v18324_v25 }
 0x448   :  { %v6417_v24 = vsel %vm1889_vm3, %v15404_v29, %v15405_v48 }
 0x449   :  { %v6395_v58 = vsel %vm1889_vm3, %v15389_v38, %v15390_v50  ;;  %v6394_v40 = vsel %vm1889_vm3, %v15375_v32, %v15389_v38 }
 0x44a   :  { %14184 = vmatmul.mubr.msk.f32.gmra.mrb[58].mxu0 %vm4489_vm5, %v18070_v30  ;;  %14187 = vmatmul.mubr.msk.f32.gmra.mrb[56].mxu1 %vm4489_vm5, %v18055_v3  ;;  %v6406_v3 = vsel %vm1889_vm3, %v15345_v41, %v15359_v11  ;;  %v6413_v41 = vsel %vm1889_vm3, %v15384_v52, %v15385_v51  ;;  %v18352_v47 = vpop.permute.xlu1 %15392  ;;  %v6392_v11 = vsel %vm1889_vm3, %v15370_v5, %v15374_v53 }
 0x44b   :  { %6287 = vmatprep.mubr.f32.mxu1 %v22377_v20  ;;  %6538 = vmatprep.mubr.f32.mxu0 %v22377_v20  ;;  %v14399_v55 = vpack.c.bf16 %v6406_v3, %v6386_v8  ;;  %v14409_v4 = vpack.c.bf16 %v6413_v41, %v6393_v46  ;;  %v15395_v23 = vunpack.i.h.bf16 %v18352_v47  ;;  %v15394_v33 = vunpack.i.l.bf16 %v18352_v47 }
 0x44c   :  { %v14411_v17 = vpack.c.bf16 %v6412_v44, %v6392_v11  ;;  %v14415_v6 = vpack.c.bf16 %v6414_v19, %v6394_v40  ;;  %v6416_v53 = vsel %vm1889_vm3, %v15400_v2, %v15404_v29 }
 0x44d   :  { %v6397_v31 = vsel %vm1889_vm3, %v15394_v33, %v15395_v23  ;;  %v6396_v8 = vsel %vm1889_vm3, %v15390_v50, %v15394_v33 }
 0x44e   :  { %14188 = vmatmul.mubr.msk.f32.gmra.mrb[58].mxu1 %vm4489_vm5, %v18070_v30  ;;  %14189 = vmatmul.mubr.msk.f32.vlgmr.msra.gmra.mrb[20].mxu0 %vm4489_vm5, %v18288_v57  ;;  %v6408_v30 = vsel %vm1889_vm3, %v15360_v28, %v15364_v21  ;;  %v6415_v28 = vsel %vm1889_vm3, %v15399_v49, %v15400_v2  ;;  %v18394_v61 = vpop.permute.xlu1 %15407  ;;  %v14417_v9 = vpack.c.bf16 %v6417_v24, %v6397_v31  ;;  %v18405_v21 = vpop.permute.xlu0 %15417 }
 0x44f   :  { %14400 = vmatpush1.bf16.msra.mxu0 %v14399_v55  ;;  %6544 = vmatprep.mubr.f32.mxu0 %v22377_v20  ;;  %v14403_v63 = vpack.c.bf16 %v6408_v30, %v6388_v26  ;;  %v14413_v62 = vpack.c.bf16 %v6415_v28, %v6395_v58  ;;  %v15410_v59 = vunpack.i.h.bf16 %v18394_v61  ;;  %v15409_v13 = vunpack.i.l.bf16 %v18394_v61 }
 0x450   :  { %14406 = vmatprep.subr.bf16.mxu0 %v14405_v39  ;;  %6627 = vmatprep.mubr.f32.mxu1 %v22377_v20  ;;  %v15420_v54 = vunpack.i.h.bf16 %v18405_v21  ;;  %v15419_v42 = vunpack.i.l.bf16 %v18405_v21  ;;  %v14419_v16 = vpack.c.bf16 %v6416_v53, %v6396_v8 }
 0x451   :  { %v6399_v7 = vsel %vm1889_vm3, %v15409_v13, %v15410_v59  ;;  %v6398_v41 = vsel %vm1889_vm3, %v15395_v23, %v15409_v13 }
 0x452   :  { %14190 = vmatmul.mubr.msk.f32.gmra.mrb[22].mxu0 %vm4489_vm5, %v18312_v45  ;;  %14193 = vmatmul.mubr.msk.f32.vlgmr.msra.gmra.mrb[20].mxu1 %vm4489_vm5, %v18288_v57  ;;  %v18408_v27 = vpop.permute.xlu1 %15412  ;;  %v18420_v12 = vpop.permute.xlu0 %15422  ;;  %v6419_v43 = vsel %vm1889_vm3, %v15419_v42, %v15420_v54  ;;  %v6418_v50 = vsel %vm1889_vm3, %v15405_v48, %v15419_v42 }
 0x453   :  { %14404 = vmatpush1.bf16.msra.mxu1 %v14403_v63  ;;  %6550 = vmatprep.mubr.f32.mxu0 %v22377_v20  ;;  %v15415_v15 = vunpack.i.h.bf16 %v18408_v27  ;;  %v15414_v18 = vunpack.i.l.bf16 %v18408_v27  ;;  %v15425_v1 = vunpack.i.h.bf16 %v18420_v12  ;;  %v15424_v36 = vunpack.i.l.bf16 %v18420_v12 }
 0x454   :  { %14410 = vmatprep.subr.bf16.mxu1 %v14409_v4  ;;  %6633 = vmatprep.mubr.f32.mxu1 %v22377_v20  ;;  %v14421_v56 = vpack.c.bf16 %v6419_v43, %v6399_v7  ;;  %v14423_v2 = vpack.c.bf16 %v6418_v50, %v6398_v41  ;;  %v18648_v41 = vld [vmem:[%s21986_s2 + $0x68] sm:$0xff] }
 0x455   :  { %v6401_v32 = vsel %vm1889_vm3, %v15414_v18, %v15415_v15  ;;  %v6421_v3 = vsel %vm1889_vm3, %v15424_v36, %v15425_v1  ;;  %v6400_v0 = vsel %vm1889_vm3, %v15410_v59, %v15414_v18  ;;  %v6420_v33 = vsel %vm1889_vm3, %v15420_v54, %v15424_v36 }
 0x456   :  { %14191 = vmatmul.mubr.msk.f32.gmra.mrb[24].mxu0 %vm4489_vm5, %v18334_v34  ;;  %14194 = vmatmul.mubr.msk.f32.gmra.mrb[22].mxu1 %vm4489_vm5, %v18312_v45  ;;  %v18439_v5 = vpop.permute.xlu1 %15427  ;;  %v14425_v52 = vpack.c.bf16 %v6421_v3, %v6401_v32  ;;  %v18467_v55 = vpop.permute.xlu0 %15437  ;;  %v14427_v58 = vpack.c.bf16 %v6420_v33, %v6400_v0 }
 0x457   :  { %6556 = vmatprep.mubr.f32.mxu0 %v22377_v20  ;;  %6639 = vmatprep.mubr.f32.mxu1 %v22377_v20  ;;  %v15430_v14 = vunpack.i.h.bf16 %v18439_v5  ;;  %v15429_v26 = vunpack.i.l.bf16 %v18439_v5  ;;  %v15440_v46 = vunpack.i.h.bf16 %v18467_v55  ;;  %v15439_v30 = vunpack.i.l.bf16 %v18467_v55 }
 0x459   :  { %v7533_v60 = vsel %vm2842_vm4, %v15429_v26, %v15430_v14  ;;  %v7553_v49 = vsel %vm2842_vm4, %v15439_v30, %v15440_v46 }
 0x45a   :  { %14192 = vmatmul.mubr.msk.f32.gmra.mrb[26].mxu0 %vm4489_vm5, %v18350_v10  ;;  %14195 = vmatmul.mubr.msk.f32.gmra.mrb[24].mxu1 %vm4489_vm5, %v18334_v34  ;;  %v18460_v51 = vpop.permute.xlu1 %15432  ;;  %v18482_v63 = vpop.permute.xlu0 %15442  ;;  %v14429_v35 = vpack.c.bf16 %v7553_v49, %v7533_v60 }
 0x45b   :  { %6645 = vmatprep.mubr.f32.mxu1 %v22377_v20  ;;  %6716 = vmatprep.mubr.f32.mxu0 %v22377_v20  ;;  %v15445_v38 = vunpack.i.h.bf16 %v18482_v63  ;;  %v15444_v47 = vunpack.i.l.bf16 %v18482_v63  ;;  %v15435_v28 = vunpack.i.h.bf16 %v18460_v51  ;;  %v15434_v11 = vunpack.i.l.bf16 %v18460_v51 }
 0x45d   :  { %v7535_v22 = vsel %vm2842_vm4, %v15444_v47, %v15445_v38  ;;  %v7532_v21 = vsel %vm2842_vm4, %v15434_v11, %v15429_v26  ;;  %v7534_v19 = vsel %vm2842_vm4, %v15430_v14, %v15444_v47  ;;  %v18670_v47 = vld [vmem:[%s21986_s2 + $0x70] sm:$0xff] }
 0x45e   :  { %14196 = vmatmul.mubr.msk.f32.gmra.mrb[26].mxu1 %vm4489_vm5, %v18350_v10  ;;  %14197 = vmatmul.mubr.msk.f32.vlgmr.msra.gmra.mrb[28].mxu0 %vm4489_vm5, %v18288_v57  ;;  %v18478_v39 = vpop.permute.xlu1 %15447 }
 0x45f   :  { %14408 = vmatpush1.bf16.msra.mxu0 %v14407_v37  ;;  %6722 = vmatprep.mubr.f32.mxu0 %v22377_v20  ;;  %v15450_v25 = vunpack.i.h.bf16 %v18478_v39  ;;  %v15449_v4 = vunpack.i.l.bf16 %v18478_v39  ;;  %v18531_v37 = vpop.permute.xlu0 %15452 }
 0x460   :  { %14414 = vmatprep.subr.bf16.mxu0 %v14413_v62  ;;  %6805 = vmatprep.mubr.f32.mxu1 %v22377_v20  ;;  %v15455_v61 = vunpack.i.h.bf16 %v18531_v37 }
 0x461   :  { %v7555_v23 = vsel %vm2842_vm4, %v15449_v4, %v15450_v25  ;;  %v7554_v15 = vsel %vm2842_vm4, %v15440_v46, %v15449_v4 }
 0x462   :  { %14198 = vmatmul.mubr.msk.f32.gmra.mrb[30].mxu0 %vm4489_vm5, %v18312_v45  ;;  %14201 = vmatmul.mubr.msk.f32.vlgmr.msra.gmra.mrb[28].mxu1 %vm4489_vm5, %v18288_v57  ;;  %v18524_v48 = vpop.permute.xlu1 %15462  ;;  %v14433_v29 = vpack.c.bf16 %v7555_v23, %v7535_v22  ;;  %v14435_v1 = vpack.c.bf16 %v7554_v15, %v7534_v19 }
 0x463   :  { %14412 = vmatpush1.bf16.msra.mxu1 %v14411_v17  ;;  %6728 = vmatprep.mubr.f32.mxu0 %v22377_v20  ;;  %v15465_v62 = vunpack.i.h.bf16 %v18524_v48  ;;  %v15464_v31 = vunpack.i.l.bf16 %v18524_v48  ;;  %v15454_v17 = vunpack.i.l.bf16 %v18531_v37  ;;  %v18548_v24 = vpop.permute.xlu0 %15457 }
 0x464   :  { %14418 = vmatprep.subr.bf16.mxu1 %v14417_v9  ;;  %6811 = vmatprep.mubr.f32.mxu1 %v22377_v20  ;;  %v7552_v9 = vsel %vm2842_vm4, %v15435_v28, %v15439_v30  ;;  %v15460_v54 = vunpack.i.h.bf16 %v18548_v24  ;;  %v15459_v42 = vunpack.i.l.bf16 %v18548_v24 }
 0x465   :  { %v7557_v13 = vsel %vm2842_vm4, %v15464_v31, %v15465_v62  ;;  %v14431_v12 = vpack.c.bf16 %v7552_v9, %v7532_v21  ;;  %v7537_v40 = vsel %vm2842_vm4, %v15454_v17, %v15455_v61 }
 0x466   :  { %14199 = vmatmul.mubr.msk.f32.gmra.mrb[32].mxu0 %vm4489_vm5, %v18334_v34  ;;  %14202 = vmatmul.mubr.msk.f32.gmra.mrb[30].mxu1 %vm4489_vm5, %v18312_v45  ;;  %v18544_v44 = vpop.permute.xlu1 %15467  ;;  %v14437_v18 = vpack.c.bf16 %v7557_v13, %v7537_v40  ;;  %v7539_v36 = vsel %vm2842_vm4, %v15459_v42, %v15460_v54 }
 0x467   :  { %6734 = vmatprep.mubr.f32.mxu0 %v22377_v20  ;;  %6817 = vmatprep.mubr.f32.mxu1 %v22377_v20  ;;  %v15470_v27 = vunpack.i.h.bf16 %v18544_v44  ;;  %v15469_v59 = vunpack.i.l.bf16 %v18544_v44  ;;  %v18593_v5 = vpop.permute.xlu0 %15472 }
 0x468   :  { %v15475_v32 = vunpack.i.h.bf16 %v18593_v5  ;;  %v15474_v53 = vunpack.i.l.bf16 %v18593_v5 }
 0x469   :  { %v7559_v7 = vsel %vm2842_vm4, %v15469_v59, %v15470_v27  ;;  %v7558_v30 = vsel %vm2842_vm4, %v15465_v62, %v15469_v59 }
 0x46a   :  { %14200 = vmatmul.mubr.msk.f32.gmra.mrb[34].mxu0 %vm4489_vm5, %v18350_v10  ;;  %14203 = vmatmul.mubr.msk.f32.gmra.mrb[32].mxu1 %vm4489_vm5, %v18334_v34  ;;  %v14441_v43 = vpack.c.bf16 %v7559_v7, %v7539_v36  ;;  %v7541_v46 = vsel %vm2842_vm4, %v15474_v53, %v15475_v32  ;;  %v7540_v11 = vsel %vm2842_vm4, %v15460_v54, %v15474_v53 }
 0x46b   :  { %6823 = vmatprep.mubr.f32.mxu1 %v22377_v20  ;;  %6894 = vmatprep.mubr.f32.mxu0 %v22377_v20 }
 0x46e   :  { %14204 = vmatmul.mubr.msk.f32.gmra.mrb[34].mxu1 %vm4489_vm5, %v18350_v10  ;;  %14205 = vmatmul.mubr.msk.f32.vlgmr.msra.gmra.mrb[36].mxu0 %vm4489_vm5, %v18288_v57 }
 0x46f   :  { %14416 = vmatpush1.bf16.msra.mxu0 %v14415_v6  ;;  %6900 = vmatprep.mubr.f32.mxu0 %v22377_v20  ;;  %v18586_v6 = vpop.permute.xlu1 %15482 }
 0x470   :  { %14422 = vmatprep.subr.bf16.mxu0 %v14421_v56  ;;  %6983 = vmatprep.mubr.f32.mxu1 %v22377_v20  ;;  %v15485_v8 = vunpack.i.h.bf16 %v18586_v6  ;;  %v15484_v56 = vunpack.i.l.bf16 %v18586_v6 }
 0x472   :  { %14206 = vmatmul.mubr.msk.f32.gmra.mrb[38].mxu0 %vm4489_vm5, %v18312_v45  ;;  %14209 = vmatmul.mubr.msk.f32.vlgmr.msra.gmra.mrb[36].mxu1 %vm4489_vm5, %v18288_v57  ;;  %v7561_v55 = vsel %vm2842_vm4, %v15484_v56, %v15485_v8  ;;  %v7560_v48 = vsel %vm2842_vm4, %v15470_v27, %v15484_v56 }
 0x473   :  { %14420 = vmatpush1.bf16.msra.mxu1 %v14419_v16  ;;  %6906 = vmatprep.mubr.f32.mxu0 %v22377_v20  ;;  %v18608_v16 = vpop.permute.xlu0 %15477  ;;  %v14445_v63 = vpack.c.bf16 %v7561_v55, %v7541_v46  ;;  %v14447_v44 = vpack.c.bf16 %v7560_v48, %v7540_v11  ;;  %v22464_v48 = vld [vmem:[#allocation9_spill] sm:$0xff] }
 0x474   :  { %14426 = vmatprep.subr.bf16.mxu1 %v14425_v52  ;;  %6989 = vmatprep.mubr.f32.mxu1 %v22377_v20  ;;  %v18624_v52 = vld [vmem:[%s21986_s2 + $0x60] sm:$0xff]  ;;  %v15480_v14 = vunpack.i.h.bf16 %v18608_v16  ;;  %v15479_v26 = vunpack.i.l.bf16 %v18608_v16 }
 0x476   :  { %14207 = vmatmul.mubr.msk.f32.gmra.mrb[40].mxu0 %vm4489_vm5, %v18334_v34  ;;  %14210 = vmatmul.mubr.msk.f32.gmra.mrb[38].mxu1 %vm4489_vm5, %v18312_v45  ;;  %v7543_v60 = vsel %vm2842_vm4, %v15479_v26, %v15480_v14  ;;  %v7542_v21 = vsel %vm2842_vm4, %v15475_v32, %v15479_v26 }
 0x477   :  { %6912 = vmatprep.mubr.f32.mxu0 %v22377_v20  ;;  %6995 = vmatprep.mubr.f32.mxu1 %v22377_v20 }
 0x47a   :  { %14208 = vmatmul.mubr.msk.f32.gmra.mrb[42].mxu0 %vm4489_vm5, %v18350_v10  ;;  %14211 = vmatmul.mubr.msk.f32.gmra.mrb[40].mxu1 %vm4489_vm5, %v18334_v34 }
 0x47b   :  { %7001 = vmatprep.mubr.f32.mxu1 %v22377_v20  ;;  %7072 = vmatprep.mubr.f32.mxu0 %v22377_v20 }
 0x47e   :  { %14212 = vmatmul.mubr.msk.f32.gmra.mrb[42].mxu1 %vm4489_vm5, %v18350_v10  ;;  %14213 = vmatmul.mubr.msk.f32.vlgmr.msra.gmra.mrb[44].mxu0 %vm4489_vm5, %v18288_v57 }
 0x47f   :  { %14424 = vmatpush1.bf16.msra.mxu0 %v14423_v2  ;;  %7078 = vmatprep.mubr.f32.mxu0 %v22377_v20  ;;  %v18672_v2 = vpop.permute.xlu0 %15492 }
 0x480   :  { %14430 = vmatprep.subr.bf16.mxu0 %v14429_v35  ;;  %7161 = vmatprep.mubr.f32.mxu1 %v22377_v20  ;;  %v18686_v35 = vld [vmem:[%s21986_s2 + $0x78] sm:$0xff]  ;;  %v15495_v33 = vunpack.i.h.bf16 %v18672_v2 }
 0x482   :  { %14214 = vmatmul.mubr.msk.f32.gmra.mrb[46].mxu0 %vm4489_vm5, %v18312_v45  ;;  %14217 = vmatmul.mubr.msk.f32.vlgmr.msra.gmra.mrb[44].mxu1 %vm4489_vm5, %v18288_v57 }
 0x483   :  { %14428 = vmatpush1.bf16.msra.mxu1 %v14427_v58  ;;  %7084 = vmatprep.mubr.f32.mxu0 %v22377_v20  ;;  %v15494_v58 = vunpack.i.l.bf16 %v18672_v2  ;;  %v18692_v22 = vpop.permute.xlu0 %15497 }
 0x484   :  { %14434 = vmatprep.subr.bf16.mxu1 %v14433_v29  ;;  %7167 = vmatprep.mubr.f32.mxu1 %v22377_v20  ;;  %v15500_v62 = vunpack.i.h.bf16 %v18692_v22 }
 0x485   :  { %v7544_v5 = vsel %vm2842_vm4, %v15480_v14, %v15494_v58 }
 0x486   :  { %14215 = vmatmul.mubr.msk.f32.gmra.mrb[48].mxu0 %vm4489_vm5, %v18334_v34  ;;  %14218 = vmatmul.mubr.msk.f32.gmra.mrb[46].mxu1 %vm4489_vm5, %v18312_v45 }
 0x487   :  { %7090 = vmatprep.mubr.f32.mxu0 %v22377_v20  ;;  %7173 = vmatprep.mubr.f32.mxu1 %v22377_v20 }
 0x48a   :  { %14216 = vmatmul.mubr.msk.f32.gmra.mrb[50].mxu0 %vm4489_vm5, %v18350_v10  ;;  %14219 = vmatmul.mubr.msk.f32.gmra.mrb[48].mxu1 %vm4489_vm5, %v18334_v34 }
 0x48b   :  { %7179 = vmatprep.mubr.f32.mxu1 %v22377_v20  ;;  %7250 = vmatprep.mubr.f32.mxu0 %v22377_v20 }
 0x48e   :  { %14220 = vmatmul.mubr.msk.f32.gmra.mrb[50].mxu1 %vm4489_vm5, %v18350_v10  ;;  %14221 = vmatmul.mubr.msk.f32.vlgmr.msra.gmra.mrb[52].mxu0 %vm4489_vm5, %v18288_v57 }
 0x48f   :  { %14432 = vmatpush1.bf16.msra.mxu0 %v14431_v12  ;;  %7256 = vmatprep.mubr.f32.mxu0 %v22377_v20 }
 0x490   :  { %14438 = vmatprep.subr.bf16.mxu0 %v14437_v18  ;;  %7339 = vmatprep.mubr.f32.mxu1 %v22377_v20 }
 0x492   :  { %14222 = vmatmul.mubr.msk.f32.gmra.mrb[54].mxu0 %vm4489_vm5, %v18312_v45  ;;  %14225 = vmatmul.mubr.msk.f32.vlgmr.msra.gmra.mrb[52].mxu1 %vm4489_vm5, %v18288_v57  ;;  %v18604_v57 = vpop.permute.xlu1 %15487 }
 0x493   :  { %14436 = vmatpush1.bf16.msra.mxu1 %v14435_v1  ;;  %7262 = vmatprep.mubr.f32.mxu0 %v22377_v20  ;;  %v15490_v3 = vunpack.i.h.bf16 %v18604_v57  ;;  %v15489_v51 = vunpack.i.l.bf16 %v18604_v57 }
 0x494   :  { %14442 = vmatprep.subr.bf16.mxu1 %v14441_v43  ;;  %7345 = vmatprep.mubr.f32.mxu1 %v22377_v20 }
 0x496   :  { %14223 = vmatmul.mubr.msk.f32.gmra.mrb[56].mxu0 %vm4489_vm5, %v18334_v34  ;;  %14226 = vmatmul.mubr.msk.f32.gmra.mrb[54].mxu1 %vm4489_vm5, %v18312_v45  ;;  %v7556_v45 = vsel %vm2842_vm4, %v15450_v25, %v15464_v31  ;;  %v7563_v25 = vsel %vm2842_vm4, %v15489_v51, %v15490_v3  ;;  %v18660_v50 = vpop.permute.xlu1 %15502  ;;  %v15499_v31 = vunpack.i.l.bf16 %v18692_v22 }
 0x497   :  { %7268 = vmatprep.mubr.f32.mxu0 %v22377_v20  ;;  %7351 = vmatprep.mubr.f32.mxu1 %v22377_v20  ;;  %v15505_v49 = vunpack.i.h.bf16 %v18660_v50  ;;  %v15504_v0 = vunpack.i.l.bf16 %v18660_v50 }
 0x498   :  { %v7547_v59 = vsel %vm2842_vm4, %v15499_v31, %v15500_v62 }
 0x499   :  { %v7565_v28 = vsel %vm2842_vm4, %v15504_v0, %v15505_v49  ;;  %v7564_v1 = vsel %vm2842_vm4, %v15490_v3, %v15504_v0  ;;  %v7546_v3 = vsel %vm2842_vm4, %v15495_v33, %v15499_v31  ;;  %v22462_v0 = vld [vmem:[#allocation7_spill] sm:$0xff]  ;;  %v22465_v31 = vld [vmem:[#allocation10_spill] sm:$0xff] }
 0x49a   :  { %14224 = vmatmul.mubr.msk.f32.gmra.mrb[58].mxu0 %vm4489_vm5, %v18350_v10  ;;  %14227 = vmatmul.mubr.msk.f32.gmra.mrb[56].mxu1 %vm4489_vm5, %v18334_v34  ;;  %v7536_v34 = vsel %vm2842_vm4, %v15445_v38, %v15454_v17  ;;  %v14449_v38 = vpack.c.bf16 %v7563_v25, %v7543_v60  ;;  %v18688_v23 = vpop.permute.xlu1 %15507  ;;  %v7562_v17 = vsel %vm2842_vm4, %v15485_v8, %v15489_v51 }
 0x49b   :  { %7357 = vmatprep.mubr.f32.mxu1 %v22377_v20  ;;  %7688 = vmatprep.mubr.f32.mxu0 %v22377_v20  ;;  %v14439_v39 = vpack.c.bf16 %v7556_v45, %v7536_v34  ;;  %v15510_v29 = vunpack.i.h.bf16 %v18688_v23  ;;  %v15509_v37 = vunpack.i.l.bf16 %v18688_v23  ;;  %v14451_v27 = vpack.c.bf16 %v7562_v17, %v7542_v21  ;;  %v8595_v23 = vld [vmem:[%s21987_s11 + $0x8] sm:$0xff] }
 0x49c   :  { %v14455_v57 = vpack.c.bf16 %v7564_v1, %v7544_v5 }
 0x49d   :  { %v7567_v9 = vsel %vm2842_vm4, %v15509_v37, %v15510_v29  ;;  %v7566_v53 = vsel %vm2842_vm4, %v15505_v49, %v15509_v37 }
 0x49e   :  { %14228 = vmatmul.mubr.msk.f32.gmra.mrb[58].mxu1 %vm4489_vm5, %v18350_v10  ;;  %14229 = vmatmul.mubr.msk.f32.vlgmr.msra.gmra.mrb[20].mxu0 %vm4489_vm5, %v18624_v52  ;;  %v7538_v10 = vsel %vm2842_vm4, %v15455_v61, %v15459_v42  ;;  %v7545_v61 = vsel %vm2842_vm4, %v15494_v58, %v15495_v33  ;;  %v18734_v13 = vpop.permute.xlu1 %15522  ;;  %v14457_v54 = vpack.c.bf16 %v7567_v9, %v7547_v59  ;;  %v18741_v42 = vpop.permute.xlu0 %15512  ;;  %v22463_v58 = vld [vmem:[#allocation8_spill] sm:$0xff] }
 0x49f   :  { %14440 = vmatpush1.bf16.msra.mxu0 %v14439_v39  ;;  %7694 = vmatprep.mubr.f32.mxu0 %v22377_v20  ;;  %v14443_v4 = vpack.c.bf16 %v7558_v30, %v7538_v10  ;;  %v14453_v24 = vpack.c.bf16 %v7565_v28, %v7545_v61  ;;  %v15525_v12 = vunpack.i.h.bf16 %v18734_v13  ;;  %v15524_v40 = vunpack.i.l.bf16 %v18734_v13  ;;  %v22460_v10 = vld [vmem:[#allocation5_spill] sm:$0xff]  ;;  %v22466_v61 = vld [vmem:[#allocation11_spill] sm:$0xff] }
 0x4a0   :  { %14446 = vmatprep.subr.bf16.mxu0 %v14445_v63  ;;  %7777 = vmatprep.mubr.f32.mxu1 %v22377_v20  ;;  %v15515_v18 = vunpack.i.h.bf16 %v18741_v42  ;;  %v15514_v7 = vunpack.i.l.bf16 %v18741_v42  ;;  %v14459_v51 = vpack.c.bf16 %v7566_v53, %v7546_v3  ;;  %v18913_v13 = vrot.slane %v8595_v23, %v22460_v10 }
 0x4a1   :  { %v7569_v43 = vsel %vm2842_vm4, %v15524_v40, %v15525_v12  ;;  %v7568_v14 = vsel %vm2842_vm4, %v15510_v29, %v15524_v40 }
 0x4a2   :  { %14230 = vmatmul.mubr.msk.f32.gmra.mrb[22].mxu0 %vm4489_vm5, %v18648_v41  ;;  %14233 = vmatmul.mubr.msk.f32.vlgmr.msra.gmra.mrb[20].mxu1 %vm4489_vm5, %v18624_v52  ;;  %v15528_v15 = vpop.permute.xlu1 %15527  ;;  %v15518_v19 = vpop.permute.xlu0 %15517  ;;  %v7549_v32 = vsel %vm2842_vm4, %v15514_v7, %v15515_v18  ;;  %v7548_v26 = vsel %vm2842_vm4, %v15500_v62, %v15514_v7  ;;  %22468 = vst [vmem:[#allocation23_spill] sm:$0xff] %v18913_v13 }
 0x4a3   :  { %14444 = vmatpush1.bf16.msra.mxu1 %v14443_v4  ;;  %7700 = vmatprep.mubr.f32.mxu0 %v22377_v20  ;;  %v15530_v36 = vunpack.i.h.bf16 %v15528_v15  ;;  %v15529_v6 = vunpack.i.l.bf16 %v15528_v15  ;;  %v15520_v8 = vunpack.i.h.bf16 %v15518_v19  ;;  %v15519_v56 = vunpack.i.l.bf16 %v15518_v19 }
 0x4a4   :  { %14450 = vmatprep.subr.bf16.mxu1 %v14449_v38  ;;  %7783 = vmatprep.mubr.f32.mxu1 %v22377_v20  ;;  %v14461_v45 = vpack.c.bf16 %v7569_v43, %v7549_v32  ;;  %v14463_v39 = vpack.c.bf16 %v7568_v14, %v7548_v26  ;;  %v18923_v19 = vrot.slane %v8595_v23, %v22462_v0 }
 0x4a5   :  { %v7571_v16 = vsel %vm2842_vm4, %v15529_v6, %v15530_v36  ;;  %v7551_v55 = vsel %vm2842_vm4, %v15519_v56, %v15520_v8  ;;  %v7570_v46 = vsel %vm2842_vm4, %v15525_v12, %v15529_v6  ;;  %v7550_v30 = vsel %vm2842_vm4, %v15515_v18, %v15519_v56 }
 0x4a6   :  { %14231 = vmatmul.mubr.msk.f32.gmra.mrb[24].mxu0 %vm4489_vm5, %v18670_v47  ;;  %14234 = vmatmul.mubr.msk.f32.gmra.mrb[22].mxu1 %vm4489_vm5, %v18648_v41  ;;  %v14465_v34 = vpack.c.bf16 %v7571_v16, %v7551_v55  ;;  %v14467_v63 = vpack.c.bf16 %v7570_v46, %v7550_v30  ;;  %22470 = vst [vmem:[#allocation25_spill] sm:$0xff] %v18923_v19 }
 0x4a7   :  { %7706 = vmatprep.mubr.f32.mxu0 %v22377_v20  ;;  %7789 = vmatprep.mubr.f32.mxu1 %v22377_v20  ;;  %v18930_v8 = vrot.slane %v8595_v23, %v22463_v58 }
 0x4aa   :  { %14232 = vmatmul.mubr.msk.f32.gmra.mrb[26].mxu0 %vm4489_vm5, %v18686_v35  ;;  %14235 = vmatmul.mubr.msk.f32.gmra.mrb[24].mxu1 %vm4489_vm5, %v18670_v47 }
 0x4ab   :  { %7795 = vmatprep.mubr.f32.mxu1 %v22377_v20  ;;  %7866 = vmatprep.mubr.f32.mxu0 %v22377_v20 }
 0x4ae   :  { %14236 = vmatmul.mubr.msk.f32.gmra.mrb[26].mxu1 %vm4489_vm5, %v18686_v35  ;;  %14237 = vmatmul.mubr.msk.f32.vlgmr.msra.gmra.mrb[28].mxu0 %vm4489_vm5, %v18624_v52 }
 0x4af   :  { %14448 = vmatpush1.bf16.msra.mxu0 %v14447_v44  ;;  %7872 = vmatprep.mubr.f32.mxu0 %v22377_v20 }
 0x4b0   :  { %14454 = vmatprep.subr.bf16.mxu0 %v14453_v24  ;;  %7955 = vmatprep.mubr.f32.mxu1 %v22377_v20 }
 0x4b2   :  { %14238 = vmatmul.mubr.msk.f32.gmra.mrb[30].mxu0 %vm4489_vm5, %v18648_v41  ;;  %14241 = vmatmul.mubr.msk.f32.vlgmr.msra.gmra.mrb[28].mxu1 %vm4489_vm5, %v18624_v52 }
 0x4b3   :  { %14452 = vmatpush1.bf16.msra.mxu1 %v14451_v27  ;;  %7878 = vmatprep.mubr.f32.mxu0 %v22377_v20 }
 0x4b4   :  { %14458 = vmatprep.subr.bf16.mxu1 %v14457_v54  ;;  %7961 = vmatprep.mubr.f32.mxu1 %v22377_v20 }
 0x4b6   :  { %14239 = vmatmul.mubr.msk.f32.gmra.mrb[32].mxu0 %vm4489_vm5, %v18670_v47  ;;  %14242 = vmatmul.mubr.msk.f32.gmra.mrb[30].mxu1 %vm4489_vm5, %v18648_v41 }
 0x4b7   :  { %7884 = vmatprep.mubr.f32.mxu0 %v22377_v20  ;;  %7967 = vmatprep.mubr.f32.mxu1 %v22377_v20 }
 0x4ba   :  { %14240 = vmatmul.mubr.msk.f32.gmra.mrb[34].mxu0 %vm4489_vm5, %v18686_v35  ;;  %14243 = vmatmul.mubr.msk.f32.gmra.mrb[32].mxu1 %vm4489_vm5, %v18670_v47 }
 0x4bb   :  { %7973 = vmatprep.mubr.f32.mxu1 %v22377_v20  ;;  %8044 = vmatprep.mubr.f32.mxu0 %v22377_v20 }
 0x4be   :  { %14244 = vmatmul.mubr.msk.f32.gmra.mrb[34].mxu1 %vm4489_vm5, %v18686_v35  ;;  %14245 = vmatmul.mubr.msk.f32.vlgmr.msra.gmra.mrb[36].mxu0 %vm4489_vm5, %v18624_v52 }
 0x4bf   :  { %14456 = vmatpush1.bf16.msra.mxu0 %v14455_v57  ;;  %8050 = vmatprep.mubr.f32.mxu0 %v22377_v20 }
 0x4c0   :  { %14462 = vmatprep.subr.bf16.mxu0 %v14461_v45  ;;  %8133 = vmatprep.mubr.f32.mxu1 %v22377_v20 }
 0x4c2   :  { %14246 = vmatmul.mubr.msk.f32.gmra.mrb[38].mxu0 %vm4489_vm5, %v18648_v41  ;;  %14249 = vmatmul.mubr.msk.f32.vlgmr.msra.gmra.mrb[36].mxu1 %vm4489_vm5, %v18624_v52 }
 0x4c3   :  { %14460 = vmatpush1.bf16.msra.mxu1 %v14459_v51  ;;  %8056 = vmatprep.mubr.f32.mxu0 %v22377_v20 }
 0x4c4   :  { %14466 = vmatprep.subr.bf16.mxu1 %v14465_v34  ;;  %8139 = vmatprep.mubr.f32.mxu1 %v22377_v20  ;;  %v18945_v34 = vrot.slane %v8595_v23, %v22464_v48 }
 0x4c6   :  { %14247 = vmatmul.mubr.msk.f32.gmra.mrb[40].mxu0 %vm4489_vm5, %v18670_v47  ;;  %14250 = vmatmul.mubr.msk.f32.gmra.mrb[38].mxu1 %vm4489_vm5, %v18648_v41 }
 0x4c7   :  { %8062 = vmatprep.mubr.f32.mxu0 %v22377_v20  ;;  %8145 = vmatprep.mubr.f32.mxu1 %v22377_v20 }
 0x4ca   :  { %14248 = vmatmul.mubr.msk.f32.gmra.mrb[42].mxu0 %vm4489_vm5, %v18686_v35  ;;  %14251 = vmatmul.mubr.msk.f32.gmra.mrb[40].mxu1 %vm4489_vm5, %v18670_v47 }
 0x4cb   :  { %8151 = vmatprep.mubr.f32.mxu1 %v22377_v20  ;;  %8222 = vmatprep.mubr.f32.mxu0 %v22377_v20 }
 0x4ce   :  { %14252 = vmatmul.mubr.msk.f32.gmra.mrb[42].mxu1 %vm4489_vm5, %v18686_v35  ;;  %14253 = vmatmul.mubr.msk.f32.vlgmr.msra.gmra.mrb[44].mxu0 %vm4489_vm5, %v18624_v52 }
 0x4cf   :  { %14464 = vmatpush1.bf16.msra.mxu0 %v14463_v39  ;;  %8228 = vmatprep.mubr.f32.mxu0 %v22377_v20 }
 0x4d0   :  { %8311 = vmatprep.mubr.f32.mxu1 %v22377_v20 }
 0x4d2   :  { %14254 = vmatmul.mubr.msk.f32.gmra.mrb[46].mxu0 %vm4489_vm5, %v18648_v41  ;;  %14257 = vmatmul.mubr.msk.f32.vlgmr.msra.gmra.mrb[44].mxu1 %vm4489_vm5, %v18624_v52 }
 0x4d3   :  { %14468 = vmatpush1.bf16.msra.mxu1 %v14467_v63  ;;  %8234 = vmatprep.mubr.f32.mxu0 %v22377_v20 }
 0x4d4   :  { %8317 = vmatprep.mubr.f32.mxu1 %v22377_v20 }
 0x4d6   :  { %14255 = vmatmul.mubr.msk.f32.gmra.mrb[48].mxu0 %vm4489_vm5, %v18670_v47  ;;  %14258 = vmatmul.mubr.msk.f32.gmra.mrb[46].mxu1 %vm4489_vm5, %v18648_v41 }
 0x4d7   :  { %8240 = vmatprep.mubr.f32.mxu0 %v22377_v20  ;;  %8323 = vmatprep.mubr.f32.mxu1 %v22377_v20 }
 0x4da   :  { %14256 = vmatmul.mubr.msk.f32.gmra.mrb[50].mxu0 %vm4489_vm5, %v18686_v35  ;;  %14259 = vmatmul.mubr.msk.f32.gmra.mrb[48].mxu1 %vm4489_vm5, %v18670_v47 }
 0x4db   :  { %8329 = vmatprep.mubr.f32.mxu1 %v22377_v20  ;;  %8400 = vmatprep.mubr.f32.mxu0 %v22377_v20 }
 0x4de   :  { %14260 = vmatmul.mubr.msk.f32.gmra.mrb[50].mxu1 %vm4489_vm5, %v18686_v35  ;;  %14261 = vmatmul.mubr.msk.f32.vlgmr.msra.gmra.mrb[52].mxu0 %vm4489_vm5, %v18624_v52 }
 0x4df   :  { %8406 = vmatprep.mubr.f32.mxu0 %v22377_v20  ;;  %8489 = vmatprep.mubr.f32.mxu1 %v22377_v20 }
 0x4e2   :  { %14262 = vmatmul.mubr.msk.f32.gmra.mrb[54].mxu0 %vm4489_vm5, %v18648_v41  ;;  %14265 = vmatmul.mubr.msk.f32.vlgmr.msra.gmra.mrb[52].mxu1 %vm4489_vm5, %v18624_v52  ;;  %v8594_v52 = vld [vmem:[%s21987_s11] sm:$0xff] }
 0x4e3   :  { %8412 = vmatprep.mubr.f32.mxu0 %v22377_v20  ;;  %8495 = vmatprep.mubr.f32.mxu1 %v22377_v20  ;;  %v18866_v4 = vrot.slane %v8594_v52, %v22460_v10  ;;  %v18886_v22 = vrot.slane %v8594_v52, %v22463_v58  ;;  %v18889_v29 = vrot.slane %v8594_v52, %v22464_v48 }
 0x4e4   :  { %v18896_v44 = vrot.slane %v8594_v52, %v22465_v31  ;;  %v18899_v17 = vrot.slane %v8594_v52, %v22466_v61 }
 0x4e6   :  { %14263 = vmatmul.mubr.msk.f32.gmra.mrb[56].mxu0 %vm4489_vm5, %v18670_v47  ;;  %14266 = vmatmul.mubr.msk.f32.gmra.mrb[54].mxu1 %vm4489_vm5, %v18648_v41  ;;  %v22459_v41 = vld [vmem:[#allocation4_spill] sm:$0xff] }
 0x4e7   :  { %8418 = vmatprep.mubr.f32.mxu0 %v22377_v20  ;;  %8501 = vmatprep.mubr.f32.mxu1 %v22377_v20  ;;  %v18863_v25 = vrot.slane %v8594_v52, %v22459_v41  ;;  %v18910_v59 = vrot.slane %v8595_v23, %v22459_v41 }
 0x4e9   :  { %22467 = vst [vmem:[#allocation18_spill] sm:$0xff] %v18910_v59 }
 0x4ea   :  { %14264 = vmatmul.mubr.msk.f32.gmra.mrb[58].mxu0 %vm4489_vm5, %v18686_v35  ;;  %14267 = vmatmul.mubr.msk.f32.gmra.mrb[56].mxu1 %vm4489_vm5, %v18670_v47  ;;  %v22461_v47 = vld [vmem:[#allocation6_spill] sm:$0xff] }
 0x4eb   :  { %8507 = vmatprep.mubr.f32.mxu1 %v22377_v20  ;;  %10082 = vmatprep.mubr.f32.mxu0 %v22377_v20  ;;  %v18875_v2 = vrot.slane %v8594_v52, %v22461_v47  ;;  %v18920_v40 = vrot.slane %v8595_v23, %v22461_v47 }
 0x4ed   :  { %22469 = vst [vmem:[#allocation24_spill] sm:$0xff] %v18920_v40 }
 0x4ee   :  { %14268 = vmatmul.mubr.msk.f32.gmra.mrb[58].mxu1 %vm4489_vm5, %v18686_v35  ;;  %v18880_v35 = vrot.slane %v8594_v52, %v22462_v0 }
 0x4ef   :  { %10153 = vmatprep.mubr.f32.mxu1 %v22377_v20 }
 0x571   :  { %v18868_v60 = vpop.f32.mrb[20].mxu0 }
 0x572   :  { %v8700_v50 = vmul.f32 %v18863_v25, %v18868_v60  ;;  %v18872_v38 = vpop.f32.mrb[21].mxu0 }
 0x573   :  { %v8701_v49 = vmul.f32 %v18866_v4, %v18872_v38 }
 0x574   :  { %v8864_v33 = vmul.f32 %v8700_v50, %v8700_v50 }
 0x575   :  { %v8780_v37 = vadd.f32 %v8701_v49, %v8700_v50  ;;  %v8865_v28 = vmul.f32 %v8701_v49, %v8701_v49  ;;  %v18891_v11 = vpop.f32.mrb[22].mxu0  ;;  %v18893_v62 = vpop.f32.mrb[20].mxu1 }
 0x576   :  { %v8720_v24 = vmul.f32 %v18863_v25, %v18891_v11  ;;  %v8702_v9 = vmul.f32 %v18875_v2, %v18893_v62  ;;  %v18905_v21 = vpop.f32.mrb[23].mxu0  ;;  %v18907_v27 = vpop.f32.mrb[21].mxu1 }
 0x577   :  { %v8944_v54 = vadd.f32 %v8865_v28, %v8864_v33  ;;  %v8721_v42 = vmul.f32 %v18866_v4, %v18905_v21  ;;  %v8703_v12 = vmul.f32 %v18880_v35, %v18907_v27  ;;  %v18952_v33 = vrot.slane %v8595_v23, %v22465_v31 }
 0x578   :  { %v8884_v15 = vmul.f32 %v8720_v24, %v8720_v24  ;;  %v8781_v18 = vadd.f32 %v8780_v37, %v8702_v9  ;;  %v8866_v7 = vmul.f32 %v8702_v9, %v8702_v9 }
 0x579   :  { %v8801_v1 = vadd.f32 %v8721_v42, %v8720_v24  ;;  %v8885_v36 = vmul.f32 %v8721_v42, %v8721_v42  ;;  %v8867_v6 = vmul.f32 %v8703_v12, %v8703_v12  ;;  %v18925_v43 = vpop.f32.mrb[24].mxu0  ;;  %v18927_v5 = vpop.f32.mrb[22].mxu1 }
 0x57a   :  { %22471 = vst [vmem:[#allocation26_spill] sm:$0xff] %v18925_v43  ;;  %22472 = vst [vmem:[#allocation28_spill] sm:$0xff] %v18927_v5  ;;  %v8945_v56 = vadd.f32 %v8944_v54, %v8866_v7  ;;  %v8782_v57 = vadd.f32 %v8781_v18, %v8703_v12  ;;  %v8740_v32 = vmul.f32 %v18863_v25, %v18925_v43  ;;  %v18936_v45 = vpop.f32.mrb[25].mxu0  ;;  %v18938_v16 = vpop.f32.mrb[23].mxu1  ;;  %v8596_v12 = vld [vmem:[%s21987_s11 + $0x10] sm:$0xf] }
 0x57b   :  { %v8722_v53 = vmul.f32 %v18875_v2, %v18927_v5  ;;  %22473 = vst [vmem:[#allocation30_spill] sm:$0xff] %v18936_v45  ;;  %22474 = vst [vmem:[#allocation14_spill] sm:$0xff] %v18938_v16  ;;  %v8965_v3 = vadd.f32 %v8885_v36, %v8884_v15  ;;  %v8741_v51 = vmul.f32 %v18866_v4, %v18936_v45 }
 0x57c   :  { %v8723_v55 = vmul.f32 %v18880_v35, %v18938_v16  ;;  %v8946_v14 = vadd.f32 %v8945_v56, %v8867_v6  ;;  %v8904_v26 = vmul.f32 %v8740_v32, %v8740_v32 }
 0x57d   :  { %v8802_v39 = vadd.f32 %v8801_v1, %v8722_v53  ;;  %v8886_v46 = vmul.f32 %v8722_v53, %v8722_v53  ;;  %v8822_v30 = vadd.f32 %v8741_v51, %v8740_v32  ;;  %v8905_v63 = vmul.f32 %v8741_v51, %v8741_v51  ;;  %v18947_v50 = vpop.f32.mrb[26].mxu0  ;;  %v18949_v49 = vpop.f32.mrb[24].mxu1 }
 0x57e   :  { %v8887_v52 = vmul.f32 %v8723_v55, %v8723_v55  ;;  %22475 = vst [vmem:[#allocation15_spill] sm:$0xff] %v18947_v50  ;;  %22476 = vst [vmem:[#allocation12_spill] sm:$0xff] %v18949_v49  ;;  %v8760_v24 = vmul.f32 %v18863_v25, %v18947_v50  ;;  %v8742_v9 = vmul.f32 %v18875_v2, %v18949_v49  ;;  %v18958_v54 = vpop.f32.mrb[27].mxu0  ;;  %v18960_v42 = vpop.f32.mrb[25].mxu1 }
 0x57f   :  { %v8966_v37 = vadd.f32 %v8965_v3, %v8886_v46  ;;  %v8803_v28 = vadd.f32 %v8802_v39, %v8723_v55  ;;  %22477 = vst [vmem:[#allocation31_spill] sm:$0xff] %v18958_v54  ;;  %22478 = vst [vmem:[#allocation34_spill] sm:$0xff] %v18960_v42  ;;  %v8986_v15 = vadd.f32 %v8905_v63, %v8904_v26 }
 0x580   :  { %v8761_v18 = vmul.f32 %v18866_v4, %v18958_v54  ;;  %v8743_v7 = vmul.f32 %v18880_v35, %v18960_v42  ;;  %v18970_v1 = vrot.slane %v8595_v23, %v22466_v61  ;;  %v8924_v6 = vmul.f32 %v8760_v24, %v8760_v24 }
 0x581   :  { %v8967_v36 = vadd.f32 %v8966_v37, %v8887_v52  ;;  %v8823_v56 = vadd.f32 %v8822_v30, %v8742_v9  ;;  %v8906_v32 = vmul.f32 %v8742_v9, %v8742_v9  ;;  %v18972_v55 = vpop.f32.mrb[26].mxu1  ;;  %v18974_v39 = vpop.f32.mrb[28].mxu0  ;;  %v18977_v26 = vrot.slane %v8596_v12, %v22459_v41 }
 0x582   :  { %v8843_v53 = vadd.f32 %v8761_v18, %v8760_v24  ;;  %v8925_v3 = vmul.f32 %v8761_v18, %v8761_v18  ;;  %v8907_v51 = vmul.f32 %v8743_v7, %v8743_v7  ;;  %22479 = vst [vmem:[#allocation32_spill] sm:$0xff] %v18972_v55  ;;  %v8762_v23 = vmul.f32 %v18875_v2, %v18972_v55  ;;  %v18983_v30 = vpop.f32.mrb[27].mxu1  ;;  %v18985_v37 = vpop.f32.mrb[29].mxu0 }
 0x583   :  { %v8987_v46 = vadd.f32 %v8986_v15, %v8906_v32  ;;  %v8824_v63 = vadd.f32 %v8823_v56, %v8743_v7  ;;  %v8704_v52 = vmul.f32 %v18886_v22, %v18974_v39  ;;  %22480 = vst [vmem:[#allocation33_spill] sm:$0xff] %v18983_v30  ;;  %v8763_v9 = vmul.f32 %v18880_v35, %v18983_v30 }
 0x584   :  { %v9007_v24 = vadd.f32 %v8925_v3, %v8924_v6  ;;  %v8705_v18 = vmul.f32 %v18889_v29, %v18985_v37  ;;  %v18992_v15 = vrot.slane %v8596_v12, %v22460_v10  ;;  %v8844_v56 = vadd.f32 %v8843_v53, %v8762_v23 }
 0x585   :  { %v8988_v7 = vadd.f32 %v8987_v46, %v8907_v51  ;;  %v8926_v32 = vmul.f32 %v8762_v23, %v8762_v23  ;;  %v8783_v61 = vadd.f32 %v8782_v57, %v8704_v52  ;;  %v8868_v31 = vmul.f32 %v8704_v52, %v8704_v52  ;;  %v18994_v41 = vpop.f32.mrb[30].mxu0  ;;  %v18996_v55 = vpop.f32.mrb[28].mxu1 }
 0x586   :  { %v8927_v48 = vmul.f32 %v8763_v9, %v8763_v9  ;;  %v8869_v58 = vmul.f32 %v8705_v18, %v8705_v18  ;;  %22481 = vst [vmem:[#allocation35_spill] sm:$0xff] %v18994_v41  ;;  %v18999_v6 = vrot.slane %v8596_v12, %v22461_v47  ;;  %v8845_v30 = vadd.f32 %v8844_v56, %v8763_v9  ;;  %v19003_v51 = vpop.f32.mrb[31].mxu0  ;;  %v19005_v53 = vpop.f32.mrb[29].mxu1 }
 0x587   :  { %v9008_v3 = vadd.f32 %v9007_v24, %v8926_v32  ;;  %v8784_v54 = vadd.f32 %v8783_v61, %v8705_v18  ;;  %v8724_v10 = vmul.f32 %v18886_v22, %v18994_v41  ;;  %22482 = vst [vmem:[#allocation13_spill] sm:$0xff] %v19003_v51  ;;  %v8947_v57 = vadd.f32 %v8946_v14, %v8868_v31 }
 0x588   :  { %v8706_v46 = vmul.f32 %v18896_v44, %v18996_v55  ;;  %v8725_v23 = vmul.f32 %v18889_v29, %v19003_v51  ;;  %v8707_v52 = vmul.f32 %v18899_v17, %v19005_v53  ;;  %v19014_v18 = vrot.slane %v8596_v12, %v22462_v0 }
 0x589   :  { %v9009_v24 = vadd.f32 %v9008_v3, %v8927_v48  ;;  %v8804_v9 = vadd.f32 %v8803_v28, %v8724_v10  ;;  %v8888_v61 = vmul.f32 %v8724_v10, %v8724_v10  ;;  %v8948_v56 = vadd.f32 %v8947_v57, %v8869_v58  ;;  %v19016_v31 = vpop.f32.mrb[32].mxu0  ;;  %v19018_v14 = vpop.f32.mrb[30].mxu1 }
 0x58a   :  { %v8785_v32 = vadd.f32 %v8784_v54, %v8706_v46  ;;  %v8870_v47 = vmul.f32 %v8706_v46, %v8706_v46  ;;  %v8889_v50 = vmul.f32 %v8725_v23, %v8725_v23  ;;  %22483 = vst [vmem:[#allocation16_spill] sm:$0xff] %v19016_v31  ;;  %22484 = vst [vmem:[#allocation36_spill] sm:$0xff] %v19018_v14  ;;  %v19022_v48 = vpop.f32.mrb[33].mxu0  ;;  %v19024_v10 = vpop.f32.mrb[31].mxu1 }
 0x58b   :  { %v8968_v45 = vadd.f32 %v8967_v36, %v8888_v61  ;;  %v8805_v43 = vadd.f32 %v8804_v9, %v8725_v23  ;;  %v8871_v42 = vmul.f32 %v8707_v52, %v8707_v52  ;;  %v8744_v49 = vmul.f32 %v18886_v22, %v19016_v31  ;;  %22485 = vst [vmem:[#allocation20_spill] sm:$0xff] %v19022_v48 }
 0x58c   :  { %22486 = vst [vmem:[#allocation22_spill] sm:$0xff] %v19024_v10  ;;  %v8949_v28 = vadd.f32 %v8948_v56, %v8870_v47  ;;  %v8786_v12 = vadd.f32 %v8785_v32, %v8707_v52  ;;  %v8726_v58 = vmul.f32 %v18896_v44, %v19018_v14  ;;  %v8745_v54 = vmul.f32 %v18889_v29, %v19022_v48 }
 0x58d   :  { %v8969_v3 = vadd.f32 %v8968_v45, %v8889_v50  ;;  %v8825_v57 = vadd.f32 %v8824_v63, %v8744_v49  ;;  %v8908_v36 = vmul.f32 %v8744_v49, %v8744_v49  ;;  %v8727_v46 = vmul.f32 %v18899_v17, %v19024_v10  ;;  %v19032_v31 = vpop.f32.mrb[34].mxu0  ;;  %v19034_v47 = vpop.f32.mrb[32].mxu1 }
 0x58e   :  { %v8950_v23 = vadd.f32 %v8949_v28, %v8871_v42  ;;  %v8806_v9 = vadd.f32 %v8805_v43, %v8726_v58  ;;  %v8890_v61 = vmul.f32 %v8726_v58, %v8726_v58  ;;  %v8909_v0 = vmul.f32 %v8745_v54, %v8745_v54  ;;  %22487 = vst [vmem:[#allocation29_spill] sm:$0xff] %v19032_v31  ;;  %v19038_v45 = vpop.f32.mrb[35].mxu0  ;;  %v19040_v50 = vpop.f32.mrb[33].mxu1 }
 0x58f   :  { %22488 = vst [vmem:[#allocation21_spill] sm:$0xff] %v19034_v47  ;;  %v8989_v52 = vadd.f32 %v8988_v7, %v8908_v36  ;;  %v8826_v56 = vadd.f32 %v8825_v57, %v8745_v54  ;;  %v8891_v32 = vmul.f32 %v8727_v46, %v8727_v46  ;;  %v8764_v48 = vmul.f32 %v18886_v22, %v19032_v31 }
 0x590   :  { %22489 = vst [vmem:[#allocation27_spill] sm:$0xff] %v19038_v45  ;;  %22490 = vst [vmem:[#allocation17_spill] sm:$0xff] %v19040_v50  ;;  %v8970_v49 = vadd.f32 %v8969_v3, %v8890_v61  ;;  %v8807_v63 = vadd.f32 %v8806_v9, %v8727_v46  ;;  %v8746_v43 = vmul.f32 %v18896_v44, %v19034_v47 }
 0x591   :  { %v8765_v42 = vmul.f32 %v18889_v29, %v19038_v45  ;;  %v8990_v28 = vadd.f32 %v8989_v52, %v8909_v0  ;;  %v8846_v58 = vadd.f32 %v8845_v30, %v8764_v48  ;;  %v8928_v7 = vmul.f32 %v8764_v48, %v8764_v48  ;;  %v19048_v5 = vpop.f32.mrb[34].mxu1  ;;  %v19050_v3 = vpop.f32.mrb[36].mxu0 }
 0x592   :  { %v8747_v54 = vmul.f32 %v18899_v17, %v19040_v50  ;;  %v8971_v57 = vadd.f32 %v8970_v49, %v8891_v32  ;;  %v8827_v36 = vadd.f32 %v8826_v56, %v8746_v43  ;;  %v8910_v31 = vmul.f32 %v8746_v43, %v8746_v43  ;;  %22491 = vst [vmem:[#allocation19_spill] sm:$0xff] %v19048_v5  ;;  %v19054_v0 = vpop.f32.mrb[35].mxu1  ;;  %v19056_v30 = vpop.f32.mrb[37].mxu0 }
 0x593   :  { %v8929_v16 = vmul.f32 %v8765_v42, %v8765_v42  ;;  %v9010_v46 = vadd.f32 %v9009_v24, %v8928_v7  ;;  %v8847_v9 = vadd.f32 %v8846_v58, %v8765_v42  ;;  %v8766_v45 = vmul.f32 %v18896_v44, %v19048_v5  ;;  %22492 = vst [vmem:[#allocation37_spill] sm:$0xff] %v19054_v0 }
 0x594   :  { %v8911_v61 = vmul.f32 %v8747_v54, %v8747_v54  ;;  %v8991_v48 = vadd.f32 %v8990_v28, %v8910_v31  ;;  %v8828_v52 = vadd.f32 %v8827_v36, %v8747_v54  ;;  %v8708_v56 = vmul.f32 %v18910_v59, %v19050_v3 }
 0x595   :  { %v8767_v32 = vmul.f32 %v18899_v17, %v19054_v0  ;;  %v9011_v49 = vadd.f32 %v9010_v46, %v8929_v16  ;;  %v8848_v43 = vadd.f32 %v8847_v9, %v8766_v45  ;;  %v8930_v24 = vmul.f32 %v8766_v45, %v8766_v45  ;;  %v19064_v47 = vpop.f32.mrb[38].mxu0  ;;  %v19066_v31 = vpop.f32.mrb[36].mxu1 }
 0x596   :  { %v8709_v42 = vmul.f32 %v18913_v13, %v19056_v30  ;;  %v8992_v58 = vadd.f32 %v8991_v48, %v8911_v61  ;;  %v8787_v7 = vadd.f32 %v8786_v12, %v8708_v56  ;;  %v8872_v5 = vmul.f32 %v8708_v56, %v8708_v56  ;;  %22493 = vst [vmem:[#allocation38_spill] sm:$0xff] %v19064_v47  ;;  %v19070_v16 = vpop.f32.mrb[39].mxu0  ;;  %v19072_v45 = vpop.f32.mrb[37].mxu1 }
 0x597   :  { %v8931_v50 = vmul.f32 %v8767_v32, %v8767_v32  ;;  %v9012_v28 = vadd.f32 %v9011_v49, %v8930_v24  ;;  %v8849_v54 = vadd.f32 %v8848_v43, %v8767_v32  ;;  %v8728_v0 = vmul.f32 %v18910_v59, %v19064_v47  ;;  %22494 = vst [vmem:[#allocation39_spill] sm:$0xff] %v19070_v16 }
 0x598   :  { %v8873_v36 = vmul.f32 %v8709_v42, %v8709_v42  ;;  %v8951_v46 = vadd.f32 %v8950_v23, %v8872_v5  ;;  %v8788_v9 = vadd.f32 %v8787_v7, %v8709_v42  ;;  %v8710_v12 = vmul.f32 %v18920_v40, %v19066_v31 }
 0x599   :  { %v8729_v61 = vmul.f32 %v18913_v13, %v19070_v16  ;;  %v9013_v48 = vadd.f32 %v9012_v28, %v8931_v50  ;;  %v8808_v56 = vadd.f32 %v8807_v63, %v8728_v0  ;;  %v8892_v49 = vmul.f32 %v8728_v0, %v8728_v0  ;;  %v19080_v14 = vpop.f32.mrb[40].mxu0  ;;  %v19082_v5 = vpop.f32.mrb[38].mxu1 }
 0x59a   :  { %v8711_v32 = vmul.f32 %v18923_v19, %v19072_v45  ;;  %v8952_v43 = vadd.f32 %v8951_v46, %v8873_v36  ;;  %v8789_v24 = vadd.f32 %v8788_v9, %v8710_v12  ;;  %v8874_v47 = vmul.f32 %v8710_v12, %v8710_v12  ;;  %22495 = vst [vmem:[#allocation40_spill] sm:$0xff] %v19080_v14  ;;  %v19086_v50 = vpop.f32.mrb[41].mxu0  ;;  %v19088_v63 = vpop.f32.mrb[39].mxu1 }
 0x59b   :  { %v8893_v10 = vmul.f32 %v8729_v61, %v8729_v61  ;;  %22496 = vst [vmem:[#allocation41_spill] sm:$0xff] %v19082_v5  ;;  %v8972_v23 = vadd.f32 %v8971_v57, %v8892_v49  ;;  %v8809_v42 = vadd.f32 %v8808_v56, %v8729_v61  ;;  %v8748_v16 = vmul.f32 %v18910_v59, %v19080_v14 }
 0x59c   :  { %v8875_v7 = vmul.f32 %v8711_v32, %v8711_v32  ;;  %22497 = vst [vmem:[#allocation42_spill] sm:$0xff] %v19086_v50  ;;  %22498 = vst [vmem:[#allocation43_spill] sm:$0xff] %v19088_v63  ;;  %v8953_v0 = vadd.f32 %v8952_v43, %v8874_v47  ;;  %v8790_v28 = vadd.f32 %v8789_v24, %v8711_v32 }
 0x59d   :  { %v8730_v36 = vmul.f32 %v18920_v40, %v19082_v5  ;;  %v8749_v46 = vmul.f32 %v18913_v13, %v19086_v50  ;;  %v8973_v9 = vadd.f32 %v8972_v23, %v8893_v10  ;;  %v8829_v12 = vadd.f32 %v8828_v52, %v8748_v16  ;;  %v19096_v41 = vpop.f32.mrb[42].mxu0  ;;  %v19098_v47 = vpop.f32.mrb[40].mxu1 }
 0x59e   :  { %v8912_v57 = vmul.f32 %v8748_v16, %v8748_v16  ;;  %v8731_v61 = vmul.f32 %v18923_v19, %v19088_v63  ;;  %v8954_v56 = vadd.f32 %v8953_v0, %v8875_v7  ;;  %22499 = vst [vmem:[#allocation44_spill] sm:$0xff] %v19096_v41  ;;  %22500 = vst [vmem:[#allocation45_spill] sm:$0xff] %v19098_v47  ;;  %v19102_v10 = vpop.f32.mrb[43].mxu0  ;;  %v19104_v52 = vpop.f32.mrb[41].mxu1 }
 0x59f   :  { %v8810_v49 = vadd.f32 %v8809_v42, %v8730_v36  ;;  %v8894_v14 = vmul.f32 %v8730_v36, %v8730_v36  ;;  %v8913_v51 = vmul.f32 %v8749_v46, %v8749_v46  ;;  %v8830_v43 = vadd.f32 %v8829_v12, %v8749_v46  ;;  %22501 = vst [vmem:[#allocation46_spill] sm:$0xff] %v19102_v10 }
 0x5a0   :  { %v8993_v32 = vadd.f32 %v8992_v58, %v8912_v57  ;;  %v8895_v24 = vmul.f32 %v8731_v61, %v8731_v61  ;;  %v8768_v50 = vmul.f32 %v18910_v59, %v19096_v41  ;;  %22502 = vst [vmem:[#allocation47_spill] sm:$0xff] %v19104_v52  ;;  %v8750_v42 = vmul.f32 %v18920_v40, %v19098_v47 }
 0x5a1   :  { %v8974_v16 = vadd.f32 %v8973_v9, %v8894_v14  ;;  %v8811_v23 = vadd.f32 %v8810_v49, %v8731_v61  ;;  %v8769_v7 = vmul.f32 %v18913_v13, %v19102_v10  ;;  %v8751_v46 = vmul.f32 %v18923_v19, %v19104_v52  ;;  %v19112_v5 = vpop.f32.mrb[42].mxu1  ;;  %v19114_v14 = vpop.f32.mrb[44].mxu0 }
 0x5a2   :  { %v8994_v0 = vadd.f32 %v8993_v32, %v8913_v51  ;;  %v8850_v36 = vadd.f32 %v8849_v54, %v8768_v50  ;;  %v8932_v58 = vmul.f32 %v8768_v50, %v8768_v50  ;;  %v8831_v57 = vadd.f32 %v8830_v43, %v8750_v42  ;;  %22503 = vst [vmem:[#allocation48_spill] sm:$0xff] %v19112_v5  ;;  %v19118_v51 = vpop.f32.mrb[43].mxu1  ;;  %v19120_v54 = vpop.f32.mrb[45].mxu0 }
 0x5a3   :  { %v8975_v12 = vadd.f32 %v8974_v16, %v8895_v24  ;;  %v8914_v41 = vmul.f32 %v8750_v42, %v8750_v42  ;;  %v8933_v63 = vmul.f32 %v8769_v7, %v8769_v7  ;;  %v8915_v49 = vmul.f32 %v8751_v46, %v8751_v46  ;;  %22504 = vst [vmem:[#allocation49_spill] sm:$0xff] %v19118_v51 }
 0x5a4   :  { %v9014_v9 = vadd.f32 %v9013_v48, %v8932_v58  ;;  %v8851_v61 = vadd.f32 %v8850_v36, %v8769_v7  ;;  %v8770_v10 = vmul.f32 %v18920_v40, %v19112_v5  ;;  %v8832_v32 = vadd.f32 %v8831_v57, %v8751_v46 }
 0x5a5   :  { %v8995_v50 = vadd.f32 %v8994_v0, %v8914_v41  ;;  %v8712_v43 = vmul.f32 %v18930_v8, %v19114_v14  ;;  %v8771_v24 = vmul.f32 %v18923_v19, %v19118_v51  ;;  %v8713_v7 = vmul.f32 %v18945_v34, %v19120_v54  ;;  %v19128_v47 = vpop.f32.mrb[46].mxu0  ;;  %v19130_v41 = vpop.f32.mrb[44].mxu1 }
 0x5a6   :  { %v9015_v16 = vadd.f32 %v9014_v9, %v8933_v63  ;;  %v8852_v42 = vadd.f32 %v8851_v61, %v8770_v10  ;;  %v8934_v48 = vmul.f32 %v8770_v10, %v8770_v10  ;;  %22505 = vst [vmem:[#allocation50_spill] sm:$0xff] %v19128_v47  ;;  %v8732_v51 = vmul.f32 %v18930_v8, %v19128_v47  ;;  %v19134_v63 = vpop.f32.mrb[47].mxu0  ;;  %v19136_v10 = vpop.f32.mrb[45].mxu1 }
 0x5a7   :  { %v8996_v36 = vadd.f32 %v8995_v50, %v8915_v49  ;;  %v8791_v58 = vadd.f32 %v8790_v28, %v8712_v43  ;;  %v8876_v5 = vmul.f32 %v8712_v43, %v8712_v43  ;;  %v8935_v52 = vmul.f32 %v8771_v24, %v8771_v24  ;;  %22506 = vst [vmem:[#allocation51_spill] sm:$0xff] %v19134_v63 }
 0x5a8   :  { %v9016_v0 = vadd.f32 %v9015_v16, %v8934_v48  ;;  %v8853_v46 = vadd.f32 %v8852_v42, %v8771_v24  ;;  %v8877_v57 = vmul.f32 %v8713_v7, %v8713_v7  ;;  %v8714_v28 = vmul.f32 %v18952_v33, %v19130_v41 }
 0x5a9   :  { %v8955_v9 = vadd.f32 %v8954_v56, %v8876_v5  ;;  %v8792_v61 = vadd.f32 %v8791_v58, %v8713_v7  ;;  %v8733_v49 = vmul.f32 %v18945_v34, %v19134_v63  ;;  %v8812_v43 = vadd.f32 %v8811_v23, %v8732_v51  ;;  %v19144_v40 = vpop.f32.mrb[48].mxu0  ;;  %v19146_v5 = vpop.f32.mrb[46].mxu1 }
 0x5aa   :  { %v9017_v50 = vadd.f32 %v9016_v0, %v8935_v52  ;;  %v8896_v16 = vmul.f32 %v8732_v51, %v8732_v51  ;;  %v8715_v24 = vmul.f32 %v18970_v1, %v19136_v10  ;;  %v8878_v47 = vmul.f32 %v8714_v28, %v8714_v28  ;;  %22507 = vst [vmem:[#allocation52_spill] sm:$0xff] %v19144_v40  ;;  %v19150_v52 = vpop.f32.mrb[49].mxu0  ;;  %v19152_v23 = vpop.f32.mrb[47].mxu1 }
 0x5ab   :  { %v8956_v42 = vadd.f32 %v8955_v9, %v8877_v57  ;;  %v8793_v48 = vadd.f32 %v8792_v61, %v8714_v28  ;;  %v8897_v19 = vmul.f32 %v8733_v49, %v8733_v49  ;;  %22508 = vst [vmem:[#allocation53_spill] sm:$0xff] %v19146_v5  ;;  %v8813_v7 = vadd.f32 %v8812_v43, %v8733_v49 }
 0x5ac   :  { %v8976_v56 = vadd.f32 %v8975_v12, %v8896_v16  ;;  %v8879_v58 = vmul.f32 %v8715_v24, %v8715_v24  ;;  %v8752_v63 = vmul.f32 %v18930_v8, %v19144_v40  ;;  %22509 = vst [vmem:[#allocation54_spill] sm:$0xff] %v19150_v52  ;;  %22510 = vst [vmem:[#allocation55_spill] sm:$0xff] %v19152_v23 }
 0x5ad   :  { %v8957_v51 = vadd.f32 %v8956_v42, %v8878_v47  ;;  %v8794_v0 = vadd.f32 %v8793_v48, %v8715_v24  ;;  %v8734_v57 = vmul.f32 %v18952_v33, %v19146_v5  ;;  %v8753_v9 = vmul.f32 %v18945_v34, %v19150_v52  ;;  %v19160_v59 = vpop.f32.mrb[50].mxu0  ;;  %v19162_v47 = vpop.f32.mrb[48].mxu1 }
 0x5ae   :  { %v8977_v61 = vadd.f32 %v8976_v56, %v8897_v19  ;;  %v8833_v28 = vadd.f32 %v8832_v32, %v8752_v63  ;;  %v8916_v12 = vmul.f32 %v8752_v63, %v8752_v63  ;;  %v8735_v49 = vmul.f32 %v18970_v1, %v19152_v23  ;;  %22511 = vst [vmem:[#allocation56_spill] sm:$0xff] %v19160_v59  ;;  %v19166_v19 = vpop.f32.mrb[51].mxu0  ;;  %v19168_v32 = vpop.f32.mrb[49].mxu1 }
 0x5af   :  { %v8958_v43 = vadd.f32 %v8957_v51, %v8879_v58  ;;  %v8814_v16 = vadd.f32 %v8813_v7, %v8734_v57  ;;  %v8898_v40 = vmul.f32 %v8734_v57, %v8734_v57  ;;  %v8917_v13 = vmul.f32 %v8753_v9, %v8753_v9  ;;  %22512 = vst [vmem:[#allocation57_spill] sm:$0xff] %v19162_v47 }
 0x5b0   :  { %v8997_v24 = vadd.f32 %v8996_v36, %v8916_v12  ;;  %v8834_v42 = vadd.f32 %v8833_v28, %v8753_v9  ;;  %v8899_v48 = vmul.f32 %v8735_v49, %v8735_v49  ;;  %v8772_v52 = vmul.f32 %v18930_v8, %v19160_v59  ;;  %22513 = vst [vmem:[#allocation58_spill] sm:$0xff] %v19166_v19 }
 0x5b1   :  { %22514 = vst [vmem:[#allocation59_spill] sm:$0xff] %v19168_v32  ;;  %v8978_v63 = vadd.f32 %v8977_v61, %v8898_v40  ;;  %v8815_v56 = vadd.f32 %v8814_v16, %v8735_v49  ;;  %v8754_v7 = vmul.f32 %v18952_v33, %v19162_v47  ;;  %v8773_v58 = vmul.f32 %v18945_v34, %v19166_v19  ;;  %v19176_v5 = vpop.f32.mrb[50].mxu1  ;;  %v19178_v40 = vpop.f32.mrb[52].mxu0 }
 0x5b2   :  { %v8998_v51 = vadd.f32 %v8997_v24, %v8917_v13  ;;  %v8854_v57 = vadd.f32 %v8853_v46, %v8772_v52  ;;  %v8936_v36 = vmul.f32 %v8772_v52, %v8772_v52  ;;  %v8755_v9 = vmul.f32 %v18970_v1, %v19168_v32  ;;  %22515 = vst [vmem:[#allocation60_spill] sm:$0xff] %v19176_v5  ;;  %v19182_v13 = vpop.f32.mrb[51].mxu1  ;;  %v19184_v46 = vpop.f32.mrb[53].mxu0 }
 0x5b3   :  { %v8979_v28 = vadd.f32 %v8978_v63, %v8899_v48  ;;  %v8835_v12 = vadd.f32 %v8834_v42, %v8754_v7  ;;  %v8918_v59 = vmul.f32 %v8754_v7, %v8754_v7  ;;  %v8937_v23 = vmul.f32 %v8773_v58, %v8773_v58  ;;  %22516 = vst [vmem:[#allocation61_spill] sm:$0xff] %v19178_v40 }
 0x5b4   :  { %v9018_v61 = vadd.f32 %v9017_v50, %v8936_v36  ;;  %v8855_v49 = vadd.f32 %v8854_v57, %v8773_v58  ;;  %v8919_v16 = vmul.f32 %v8755_v9, %v8755_v9  ;;  %v8774_v19 = vmul.f32 %v18952_v33, %v19176_v5  ;;  %22517 = vst [vmem:[#allocation62_spill] sm:$0xff] %v19182_v13 }
 0x5b5   :  { %22518 = vst [vmem:[#allocation63_spill] sm:$0xff] %v19184_v46  ;;  %v8999_v52 = vadd.f32 %v8998_v51, %v8918_v59  ;;  %v8836_v24 = vadd.f32 %v8835_v12, %v8755_v9  ;;  %v8716_v42 = vmul.f32 %v18977_v26, %v19178_v40  ;;  %v8775_v48 = vmul.f32 %v18970_v1, %v19182_v13  ;;  %v19192_v47 = vpop.f32.mrb[54].mxu0  ;;  %v19194_v59 = vpop.f32.mrb[52].mxu1 }
 0x5b6   :  { %v9019_v63 = vadd.f32 %v9018_v61, %v8937_v23  ;;  %v8856_v7 = vadd.f32 %v8855_v49, %v8774_v19  ;;  %v8938_v50 = vmul.f32 %v8774_v19, %v8774_v19  ;;  %v8717_v58 = vmul.f32 %v18992_v15, %v19184_v46  ;;  %22519 = vst [vmem:[#allocation64_spill] sm:$0xff] %v19192_v47  ;;  %v19198_v23 = vpop.f32.mrb[55].mxu0  ;;  %v19200_v19 = vpop.f32.mrb[53].mxu1 }
 0x5b7   :  { %v9000_v57 = vadd.f32 %v8999_v52, %v8919_v16  ;;  %v8795_v36 = vadd.f32 %v8794_v0, %v8716_v42  ;;  %v8880_v5 = vmul.f32 %v8716_v42, %v8716_v42  ;;  %v8939_v32 = vmul.f32 %v8775_v48, %v8775_v48  ;;  %22520 = vst [vmem:[#allocation65_spill] sm:$0xff] %v19198_v23 }
 0x5b8   :  { %v9020_v51 = vadd.f32 %v9019_v63, %v8938_v50  ;;  %v8857_v9 = vadd.f32 %v8856_v7, %v8775_v48  ;;  %v8881_v12 = vmul.f32 %v8717_v58, %v8717_v58  ;;  %v8736_v13 = vmul.f32 %v18977_v26, %v19192_v47  ;;  %22521 = vst [vmem:[#allocation66_spill] sm:$0xff] %v19200_v19 }
 0x5b9   :  { %v8959_v61 = vadd.f32 %v8958_v43, %v8880_v5  ;;  %v8796_v49 = vadd.f32 %v8795_v36, %v8717_v58  ;;  %v8718_v0 = vmul.f32 %v18999_v6, %v19194_v59  ;;  %v8737_v16 = vmul.f32 %v18992_v15, %v19198_v23  ;;  %v19208_v40 = vpop.f32.mrb[56].mxu0  ;;  %v19210_v5 = vpop.f32.mrb[54].mxu1 }
 0x5ba   :  { %v9021_v52 = vadd.f32 %v9020_v51, %v8939_v32  ;;  %v8816_v42 = vadd.f32 %v8815_v56, %v8736_v13  ;;  %v8900_v63 = vmul.f32 %v8736_v13, %v8736_v13  ;;  %v8719_v48 = vmul.f32 %v19014_v18, %v19200_v19  ;;  %22522 = vst [vmem:[#allocation67_spill] sm:$0xff] %v19208_v40  ;;  %v19214_v32 = vpop.f32.mrb[57].mxu0  ;;  %v19216_v56 = vpop.f32.mrb[55].mxu1 }
 0x5bb   :  { %v8960_v7 = vadd.f32 %v8959_v61, %v8881_v12  ;;  %v8797_v50 = vadd.f32 %v8796_v49, %v8718_v0  ;;  %v8882_v47 = vmul.f32 %v8718_v0, %v8718_v0  ;;  %v8901_v46 = vmul.f32 %v8737_v16, %v8737_v16  ;;  %22523 = vst [vmem:[#allocation68_spill] sm:$0xff] %v19210_v5 }
 0x5bc   :  { %v8980_v43 = vadd.f32 %v8979_v28, %v8900_v63  ;;  %v8817_v58 = vadd.f32 %v8816_v42, %v8737_v16  ;;  %v8883_v36 = vmul.f32 %v8719_v48, %v8719_v48  ;;  %v8756_v23 = vmul.f32 %v18977_v26, %v19208_v40  ;;  %22524 = vst [vmem:[#allocation69_spill] sm:$0xff] %v19214_v32 }
 0x5bd   :  { %v8961_v13 = vadd.f32 %v8960_v7, %v8882_v47  ;;  %v8798_v51 = vadd.f32 %v8797_v50, %v8719_v48  ;;  %v8738_v12 = vmul.f32 %v18999_v6, %v19210_v5  ;;  %v8757_v61 = vmul.f32 %v18992_v15, %v19214_v32  ;;  %v19224_v19 = vpop.f32.mrb[58].mxu0  ;;  %v19226_v47 = vpop.f32.mrb[56].mxu1 }
 0x5be   :  { %v8981_v49 = vadd.f32 %v8980_v43, %v8901_v46  ;;  %v8837_v0 = vadd.f32 %v8836_v24, %v8756_v23  ;;  %v8920_v28 = vmul.f32 %v8756_v23, %v8756_v23  ;;  %v8739_v16 = vmul.f32 %v19014_v18, %v19216_v56  ;;  %22525 = vst [vmem:[#allocation70_spill] sm:$0xff] %v19224_v19  ;;  %v19230_v24 = vpop.f32.mrb[59].mxu0  ;;  %v19232_v23 = vpop.f32.mrb[57].mxu1 }
 0x5bf   :  { %v8818_v42 = vadd.f32 %v8817_v58, %v8738_v12  ;;  %v8902_v63 = vmul.f32 %v8738_v12, %v8738_v12  ;;  %v8921_v40 = vmul.f32 %v8757_v61, %v8757_v61  ;;  %8799 = vadd.xlane.f32.xlu0 %v8798_v51  ;;  %v8962_v48 = vadd.f32 %v8961_v13, %v8883_v36 }
 0x5c0   :  { %v9001_v7 = vadd.f32 %v9000_v57, %v8920_v28  ;;  %v8838_v50 = vadd.f32 %v8837_v0, %v8757_v61  ;;  %v8903_v5 = vmul.f32 %v8739_v16, %v8739_v16  ;;  %v8776_v46 = vmul.f32 %v18977_v26, %v19224_v19  ;;  %22526 = vst [vmem:[#allocation71_spill] sm:$0xff] %v19230_v24 }
 0x5c1   :  { %v8982_v43 = vadd.f32 %v8981_v49, %v8902_v63  ;;  %v8819_v58 = vadd.f32 %v8818_v42, %v8739_v16  ;;  %v8758_v51 = vmul.f32 %v18999_v6, %v19226_v47  ;;  %v8777_v12 = vmul.f32 %v18992_v15, %v19230_v24  ;;  %v19240_v19 = vpop.f32.mrb[58].mxu1 }
 0x5c2   :  { %v9002_v32 = vadd.f32 %v9001_v7, %v8921_v40  ;;  %v8858_v36 = vadd.f32 %v8857_v9, %v8776_v46  ;;  %v8940_v57 = vmul.f32 %v8776_v46, %v8776_v46  ;;  %v8759_v13 = vmul.f32 %v19014_v18, %v19232_v23  ;;  %v19244_v24 = vpop.f32.mrb[59].mxu1 }
 0x5c3   :  { %v8839_v61 = vadd.f32 %v8838_v50, %v8758_v51  ;;  %v8922_v0 = vmul.f32 %v8758_v51, %v8758_v51  ;;  %v8941_v28 = vmul.f32 %v8777_v12, %v8777_v12  ;;  %8963 = vadd.xlane.f32.xlu0 %v8962_v48  ;;  %8820 = vadd.xlane.f32.xlu1 %v8819_v58 }
 0x5c4   :  { %v9022_v49 = vadd.f32 %v9021_v52, %v8940_v57  ;;  %v8859_v16 = vadd.f32 %v8858_v36, %v8777_v12  ;;  %v8923_v42 = vmul.f32 %v8759_v13, %v8759_v13  ;;  %v8778_v63 = vmul.f32 %v18999_v6, %v19240_v19 }
 0x5c5   :  { %v9003_v40 = vadd.f32 %v9002_v32, %v8922_v0  ;;  %v8840_v9 = vadd.f32 %v8839_v61, %v8759_v13  ;;  %v8779_v7 = vmul.f32 %v19014_v18, %v19244_v24  ;;  %v8983_v50 = vadd.f32 %v8982_v43, %v8903_v5 }
 0x5c6   :  { %v9023_v46 = vadd.f32 %v9022_v49, %v8941_v28  ;;  %v8860_v51 = vadd.f32 %v8859_v16, %v8778_v63  ;;  %v8942_v48 = vmul.f32 %v8778_v63, %v8778_v63 }
 0x5c7   :  { %v8943_v58 = vmul.f32 %v8779_v7, %v8779_v7  ;;  %8984 = vadd.xlane.f32.xlu0 %v8983_v50  ;;  %8841 = vadd.xlane.f32.xlu1 %v8840_v9  ;;  %v9004_v52 = vadd.f32 %v9003_v40, %v8923_v42 }
 0x5c8   :  { %v9024_v12 = vadd.f32 %v9023_v46, %v8942_v48  ;;  %v8861_v36 = vadd.f32 %v8860_v51, %v8779_v7 }
 0x5ca   :  { %v9025_v57 = vadd.f32 %v9024_v12, %v8943_v58 }
 0x5cb   :  { %9005 = vadd.xlane.f32.xlu1 %v9004_v52  ;;  %8862 = vadd.xlane.f32.xlu0 %v8861_v36 }
 0x5cf   :  { %9026 = vadd.xlane.f32.xlu0 %v9025_v57 }
 0x5dc   :  { %15537 = vrot.lane.b32.xlu1 %v22377_v20, %s16216_s29 }
 0x5e0   :  { %15547 = vrot.lane.b32.xlu1 %v22377_v20, %s16217_s17 }
 0x5e5   :  { %15532 = vrot.lane.b32.xlu0 %v22377_v20, %s16216_s29 }
 0x5e9   :  { %15542 = vrot.lane.b32.xlu0 %v22377_v20, %s16217_s17 }
 0x64c   :  { %v8800_v5 = vpop.xlane.xlu0 %8799 }
 0x64d   :  { %v9028_v32 = vmul.f32 0.00045913682, %v8800_v5 }
 0x64f   :  { %v9036_v61 = vmul.f32 %v9028_v32, %v9028_v32 }
 0x650   :  { %v8964_v43 = vpop.xlane.xlu0 %8963  ;;  %v8821_v13 = vpop.xlane.xlu1 %8820 }
 0x651   :  { %v9032_v0 = vmul.f32 0.00045913682, %v8964_v43  ;;  %v9029_v28 = vmul.f32 0.00045913682, %v8821_v13 }
 0x653   :  { %v9040_v49 = vsub.f32 %v9032_v0, %v9036_v61  ;;  %v9037_v40 = vmul.f32 %v9029_v28, %v9029_v28 }
 0x654   :  { %v8985_v16 = vpop.xlane.xlu0 %8984  ;;  %v8842_v42 = vpop.xlane.xlu1 %8841 }
 0x655   :  { %v9044_v63 = vmax.f32 %v9040_v49, 0.0  ;;  %v9033_v9 = vmul.f32 0.00045913682, %v8985_v16  ;;  %v9030_v7 = vmul.f32 0.00045913682, %v8842_v42  ;;  %v9048_v42 = vld [vmem:[%s21988_s6] sm:$0xff] }
 0x657   :  { %v9052_v50 = vadd.f32 1e-05, %v9044_v63  ;;  %v9041_v46 = vsub.f32 %v9033_v9, %v9037_v40  ;;  %v9038_v51 = vmul.f32 %v9030_v7, %v9030_v7 }
 0x658   :  { %v9006_v48 = vpop.xlane.xlu1 %9005  ;;  %v8863_v58 = vpop.xlane.xlu0 %8862 }
 0x659   :  { %16205 = vrsqrt.f32 %v9052_v50  ;;  %v9045_v52 = vmax.f32 %v9041_v46, 0.0  ;;  %v9034_v12 = vmul.f32 0.00045913682, %v9006_v48  ;;  %v9031_v36 = vmul.f32 0.00045913682, %v8863_v58  ;;  %v9064_v50 = vld [vmem:[%s21989_s7] sm:$0xff] }
 0x65a   :  { %v9049_v46 = vld [vmem:[%s21988_s6 + $0x8] sm:$0xff] }
 0x65b   :  { %v9053_v57 = vadd.f32 1e-05, %v9045_v52  ;;  %v9042_v5 = vsub.f32 %v9034_v12, %v9038_v51  ;;  %v9039_v61 = vmul.f32 %v9031_v36, %v9031_v36  ;;  %v9065_v52 = vld [vmem:[%s21989_s7 + $0x8] sm:$0xff]  ;;  %v9050_v12 = vld [vmem:[%s21988_s6 + $0x10] sm:$0xff] }
 0x65c   :  { %v9027_v43 = vpop.xlane.xlu0 %9026 }
 0x65d   :  { %16207 = vrsqrt.f32 %v9053_v57  ;;  %v9046_v13 = vmax.f32 %v9042_v5, 0.0  ;;  %v9035_v0 = vmul.f32 0.00045913682, %v9027_v43 }
 0x65f   :  { %v9054_v49 = vadd.f32 1e-05, %v9046_v13  ;;  %v9043_v20 = vsub.f32 %v9035_v0, %v9039_v61  ;;  %v9051_v61 = vld [vmem:[%s21988_s6 + $0x18] sm:$0xff] }
 0x661   :  { %16209 = vrsqrt.f32 %v9054_v49  ;;  %v9047_v16 = vmax.f32 %v9043_v20, 0.0 }
 0x663   :  { %v16206_v63 = vpop.eup %16205  ;;  %v9055_v40 = vadd.f32 1e-05, %v9047_v16 }
 0x664   :  { %v9060_v9 = vmul.f32 %v16206_v63, %v9048_v42 }
 0x665   :  { %16211 = vrsqrt.f32 %v9055_v40 }
 0x666   :  { %9078 = vperm.xlu1 %15215, %v9060_v9   ;;  %v9068_v51 = vmul.f32 %v9060_v9, %v9028_v32  ;;  %v9066_v32 = vld [vmem:[%s21989_s7 + $0x10] sm:$0xff]  ;;  %v19280_v9 = vpop.permute.xlu1 %15537 }
 0x667   :  { %v16208_v48 = vpop.eup %16207  ;;  %22527 = vst [vmem:[#allocation72_spill] sm:$0xff] %v19280_v9 }
 0x668   :  { %v9072_v20 = vsub.f32 %v9064_v50, %v9068_v51  ;;  %v9061_v58 = vmul.f32 %v16208_v48, %v9049_v46  ;;  %v19284_v46 = vpop.permute.xlu0 %15532 }
 0x669   :  { %22529 = vst [vmem:[#allocation74_spill] sm:$0xff] %v19284_v46  ;;  %v22634_v46 = vld [vmem:[#allocation54_spill] sm:$0xff] }
 0x66a   :  { %9178 = vperm.xlu1 %15215, %v9072_v20   ;;  %9083 = vperm.xlu0 %15214, %v9061_v58   ;;  %v9069_v57 = vmul.f32 %v9061_v58, %v9029_v28  ;;  %v9067_v28 = vld [vmem:[%s21989_s7 + $0x18] sm:$0xff]  ;;  %v19282_v50 = vpop.permute.xlu1 %15547 }
 0x66b   :  { %v16210_v5 = vpop.eup %16209  ;;  %22528 = vst [vmem:[#allocation73_spill] sm:$0xff] %v19282_v50  ;;  %v22543_v50 = vld [vmem:[#allocation18_spill] sm:$0xff] }
 0x66c   :  { %v9073_v43 = vsub.f32 %v9065_v52, %v9069_v57  ;;  %v9062_v13 = vmul.f32 %v16210_v5, %v9050_v12  ;;  %v19312_v57 = vpop.permute.xlu0 %15542 }
 0x66d   :  { %22530 = vst [vmem:[#allocation75_spill] sm:$0xff] %v19312_v57 }
 0x66e   :  { %9183 = vperm.xlu1 %15215, %v9073_v43   ;;  %9088 = vperm.xlu0 %15214, %v9062_v13   ;;  %v9070_v0 = vmul.f32 %v9062_v13, %v9030_v7 }
 0x66f   :  { %v16212_v49 = vpop.eup %16211 }
 0x670   :  { %v9074_v16 = vsub.f32 %v9066_v32, %v9070_v0  ;;  %v9063_v42 = vmul.f32 %v16212_v49, %v9051_v61 }
 0x672   :  { %9188 = vperm.xlu0 %15214, %v9074_v16   ;;  %9093 = vperm.xlu1 %15215, %v9063_v42   ;;  %v9071_v63 = vmul.f32 %v9063_v42, %v9031_v36 }
 0x674   :  { %v9075_v40 = vsub.f32 %v9067_v28, %v9071_v63 }
 0x676   :  { %9193 = vperm.xlu1 %15215, %v9075_v40  }
 0x6e5   :  { %v19286_v51 = vpop.permute.xlu1 %9078 }
 0x6e6   :  { %v9096_v7 = vmul.f32 %v19286_v51, %v18868_v60  ;;  %v9097_v48 = vmul.f32 %v19286_v51, %v18872_v38  ;;  %v9098_v20 = vmul.f32 %v19286_v51, %v18893_v62  ;;  %v9099_v36 = vmul.f32 %v19286_v51, %v18907_v27 }
 0x6e7   :  { %v9100_v58 = vmul.f32 %v19286_v51, %v18974_v39  ;;  %v9101_v52 = vmul.f32 %v19286_v51, %v18985_v37  ;;  %v9102_v12 = vmul.f32 %v19286_v51, %v18996_v55  ;;  %v9103_v60 = vmul.f32 %v19286_v51, %v19005_v53 }
 0x6e8   :  { %v9104_v38 = vmul.f32 %v19286_v51, %v19050_v3  ;;  %v9105_v62 = vmul.f32 %v19286_v51, %v19056_v30  ;;  %v9106_v27 = vmul.f32 %v19286_v51, %v19066_v31  ;;  %v9107_v39 = vmul.f32 %v19286_v51, %v19072_v45 }
 0x6e9   :  { %v19314_v37 = vpop.permute.xlu1 %9178  ;;  %v19318_v55 = vmul.f32 %v19286_v51, %v19114_v14  ;;  %v19322_v53 = vmul.f32 %v19286_v51, %v19120_v54  ;;  %v19326_v3 = vmul.f32 %v19286_v51, %v19130_v41  ;;  %v19330_v30 = vmul.f32 %v19286_v51, %v19136_v10  ;;  %v19340_v49 = vpop.permute.xlu0 %9083 }
 0x6ea   :  { %v9196_v31 = vadd.f32 %v19314_v37, %v9096_v7  ;;  %v9197_v45 = vadd.f32 %v19314_v37, %v9097_v48  ;;  %v9198_v5 = vadd.f32 %v19314_v37, %v9098_v20  ;;  %v9199_v14 = vadd.f32 %v19314_v37, %v9099_v36 }
 0x6eb   :  { %v9200_v43 = vadd.f32 %v19314_v37, %v9100_v58  ;;  %v9201_v54 = vadd.f32 %v19314_v37, %v9101_v52  ;;  %v9202_v13 = vadd.f32 %v19314_v37, %v9102_v12  ;;  %v9203_v41 = vadd.f32 %v19314_v37, %v9103_v60 }
 0x6ec   :  { %v9276_v32 = vmax.f32 %v9196_v31, 0.0  ;;  %v9277_v61 = vmax.f32 %v9197_v45, 0.0  ;;  %v9278_v10 = vmax.f32 %v9198_v5, 0.0  ;;  %v9279_v0 = vmax.f32 %v9199_v14, 0.0 }
 0x6ed   :  { %v9280_v16 = vmax.f32 %v9200_v43, 0.0  ;;  %v9281_v42 = vmax.f32 %v9201_v54, 0.0  ;;  %v9282_v28 = vmax.f32 %v9202_v13, 0.0  ;;  %v9283_v63 = vmax.f32 %v9203_v41, 0.0  ;;  %v19354_v36 = vpop.permute.xlu1 %9183 }
 0x6ee   :  { %v19343_v40 = vmul.f32 %v9276_v32, %v18863_v25  ;;  %v19346_v7 = vmul.f32 %v9277_v61, %v18866_v4  ;;  %v19349_v48 = vmul.f32 %v9278_v10, %v18875_v2  ;;  %v19352_v20 = vmul.f32 %v9279_v0, %v18880_v35  ;;  %v22541_v32 = vld [vmem:[#allocation35_spill] sm:$0xff] }
 0x6ef   :  { %v19357_v58 = vmul.f32 %v9280_v16, %v18886_v22  ;;  %v19360_v52 = vmul.f32 %v9281_v42, %v18889_v29  ;;  %v19363_v12 = vmul.f32 %v9282_v28, %v18896_v44  ;;  %v19366_v60 = vmul.f32 %v9283_v63, %v18899_v17  ;;  %v22542_v16 = vld [vmem:[#allocation13_spill] sm:$0xff] }
 0x6f0   :  { %22531 = vst [vmem:[#allocation76_spill] sm:$0xff] %v19343_v40  ;;  %22532 = vst [vmem:[#allocation77_spill] sm:$0xff] %v19346_v7  ;;  %v19370_v31 = vpack.i.bf16 %v19346_v7, %v19343_v40  ;;  %v19374_v45 = vpack.i.bf16 %v19352_v20, %v19349_v48  ;;  %v9116_v5 = vmul.f32 %v19340_v49, %v18891_v11  ;;  %v22605_v7 = vld [vmem:[#allocation12_spill] sm:$0xff] }
 0x6f1   :  { %22533 = vst [vmem:[#allocation78_spill] sm:$0xff] %v19349_v48  ;;  %22534 = vst [vmem:[#allocation79_spill] sm:$0xff] %v19352_v20  ;;  %v19380_v14 = vpack.i.bf16 %v19360_v52, %v19357_v58  ;;  %v19384_v43 = vpack.i.bf16 %v19366_v60, %v19363_v12  ;;  %v9117_v54 = vmul.f32 %v19340_v49, %v18905_v21 }
 0x6f2   :  { %22535 = vst [vmem:[#allocation80_spill] sm:$0xff] %v19357_v58  ;;  %22536 = vst [vmem:[#allocation81_spill] sm:$0xff] %v19360_v52  ;;  %v9204_v13 = vadd.f32 %v19314_v37, %v9104_v38  ;;  %15552 = vrot.lane.b32.xlu0 %v19370_v31, %s16216_s29  ;;  %15557 = vrot.lane.b32.xlu1 %v19374_v45, %s16216_s29  ;;  %v9216_v11 = vadd.f32 %v19354_v36, %v9116_v5  ;;  %v22562_v58 = vld [vmem:[#allocation39_spill] sm:$0xff] }
 0x6f3   :  { %22537 = vst [vmem:[#allocation82_spill] sm:$0xff] %v19363_v12  ;;  %22538 = vst [vmem:[#allocation83_spill] sm:$0xff] %v19366_v60  ;;  %v9205_v41 = vadd.f32 %v19314_v37, %v9105_v62  ;;  %v9120_v61 = vmul.f32 %v19340_v49, %v22541_v32  ;;  %v9217_v10 = vadd.f32 %v19354_v36, %v9117_v54  ;;  %v22546_v54 = vld [vmem:[#allocation23_spill] sm:$0xff] }
 0x6f4   :  { %22539 = vst [vmem:[#allocation84_spill] sm:$0xff] %v19370_v31  ;;  %22540 = vst [vmem:[#allocation85_spill] sm:$0xff] %v19374_v45  ;;  %v9284_v0 = vmax.f32 %v9204_v13, 0.0  ;;  %v9121_v21 = vmul.f32 %v19340_v49, %v22542_v16  ;;  %v9206_v38 = vadd.f32 %v19314_v37, %v9106_v27  ;;  %v9296_v42 = vmax.f32 %v9216_v11, 0.0  ;;  %v22551_v16 = vld [vmem:[#allocation36_spill] sm:$0xff] }
 0x6f5   :  { %v9285_v28 = vmax.f32 %v9205_v41, 0.0  ;;  %v9220_v63 = vadd.f32 %v19354_v36, %v9120_v61  ;;  %v9207_v57 = vadd.f32 %v19314_v37, %v9107_v39  ;;  %v9297_v5 = vmax.f32 %v9217_v10, 0.0  ;;  %v22549_v10 = vld [vmem:[#allocation24_spill] sm:$0xff] }
 0x6f6   :  { %v19404_v62 = vmul.f32 %v9284_v0, %v22543_v50  ;;  %v9221_v32 = vadd.f32 %v19354_v36, %v9121_v21  ;;  %v9286_v12 = vmax.f32 %v9206_v38, 0.0  ;;  %15562 = vrot.lane.b32.xlu0 %v19380_v14, %s16216_s29  ;;  %15607 = vrot.lane.b32.xlu1 %v19374_v45, %s16217_s17  ;;  %v19412_v27 = vmul.f32 %v9296_v42, %v18863_v25 }
 0x6f7   :  { %v19415_v13 = vmul.f32 %v9285_v28, %v22546_v54  ;;  %v9300_v39 = vmax.f32 %v9220_v63, 0.0  ;;  %v9287_v11 = vmax.f32 %v9207_v57, 0.0  ;;  %v19418_v41 = vmul.f32 %v9297_v5, %v18866_v4  ;;  %v22554_v28 = vld [vmem:[#allocation25_spill] sm:$0xff]  ;;  %v22556_v57 = vld [vmem:[#allocation22_spill] sm:$0xff] }
 0x6f8   :  { %22544 = vst [vmem:[#allocation35_spill] sm:$0xff] %v19404_v62  ;;  %22545 = vst [vmem:[#allocation13_spill] sm:$0xff] %v19412_v27  ;;  %v9301_v61 = vmax.f32 %v9221_v32, 0.0  ;;  %v19421_v0 = vmul.f32 %v9286_v12, %v22549_v10  ;;  %v9122_v21 = vmul.f32 %v19340_v49, %v22551_v16  ;;  %v9123_v5 = vmul.f32 %v19340_v49, %v22556_v57 }
 0x6f9   :  { %22547 = vst [vmem:[#allocation18_spill] sm:$0xff] %v19415_v13  ;;  %22548 = vst [vmem:[#allocation23_spill] sm:$0xff] %v19418_v41  ;;  %v19427_v38 = vpack.i.bf16 %v19415_v13, %v19404_v62  ;;  %v19430_v42 = vmul.f32 %v9300_v39, %v18886_v22  ;;  %v19433_v63 = vmul.f32 %v9287_v11, %v22554_v28  ;;  %v22560_v13 = vld [vmem:[#allocation38_spill] sm:$0xff] }
 0x6fa   :  { %22550 = vst [vmem:[#allocation24_spill] sm:$0xff] %v19421_v0  ;;  %v19439_v12 = vpack.i.bf16 %v19418_v41, %v19412_v27  ;;  %v19442_v32 = vmul.f32 %v9301_v61, %v18889_v29  ;;  %v9222_v16 = vadd.f32 %v19354_v36, %v9122_v21  ;;  %v9208_v62 = vadd.f32 %v19314_v37, %v19318_v55 }
 0x6fb   :  { %22552 = vst [vmem:[#allocation36_spill] sm:$0xff] %v19427_v38  ;;  %22553 = vst [vmem:[#allocation86_spill] sm:$0xff] %v19430_v42  ;;  %15567 = vrot.lane.b32.xlu0 %v19384_v43, %s16216_s29  ;;  %v19451_v39 = vpack.i.bf16 %v19433_v63, %v19421_v0  ;;  %v9223_v11 = vadd.f32 %v19354_v36, %v9123_v5  ;;  %v9209_v57 = vadd.f32 %v19314_v37, %v19322_v53 }
 0x6fc   :  { %22555 = vst [vmem:[#allocation25_spill] sm:$0xff] %v19433_v63  ;;  %22557 = vst [vmem:[#allocation22_spill] sm:$0xff] %v19439_v12  ;;  %v9124_v61 = vmul.f32 %v19340_v49, %v22560_v13  ;;  %15612 = vrot.lane.b32.xlu1 %v19439_v12, %s16216_s29  ;;  %v19462_v55 = vpack.i.bf16 %v19442_v32, %v19430_v42  ;;  %v9302_v21 = vmax.f32 %v9222_v16, 0.0  ;;  %v9288_v60 = vmax.f32 %v9208_v62, 0.0 }
 0x6fd   :  { %22558 = vst [vmem:[#allocation87_spill] sm:$0xff] %v19442_v32  ;;  %22559 = vst [vmem:[#allocation88_spill] sm:$0xff] %v19451_v39  ;;  %v9125_v0 = vmul.f32 %v19340_v49, %v22562_v58  ;;  %v9303_v63 = vmax.f32 %v9223_v11, 0.0  ;;  %v9289_v5 = vmax.f32 %v9209_v57, 0.0  ;;  %v9210_v53 = vadd.f32 %v19314_v37, %v19326_v3 }
 0x6fe   :  { %22561 = vst [vmem:[#allocation38_spill] sm:$0xff] %v19462_v55  ;;  %v9224_v52 = vadd.f32 %v19354_v36, %v9124_v61  ;;  %v19470_v13 = vmul.f32 %v9302_v21, %v18896_v44  ;;  %v19473_v48 = vmul.f32 %v9288_v60, %v18930_v8  ;;  %v9211_v62 = vadd.f32 %v19314_v37, %v19330_v30  ;;  %v22568_v30 = vld [vmem:[#allocation43_spill] sm:$0xff] }
 0x6ff   :  { %v9225_v42 = vadd.f32 %v19354_v36, %v9125_v0  ;;  %15572 = vrot.lane.b32.xlu0 %v19427_v38, %s16216_s29  ;;  %v19481_v58 = vmul.f32 %v9303_v63, %v18899_v17  ;;  %v19484_v16 = vmul.f32 %v9289_v5, %v18945_v34  ;;  %v9290_v11 = vmax.f32 %v9210_v53, 0.0  ;;  %v22567_v0 = vld [vmem:[#allocation41_spill] sm:$0xff] }
 0x700   :  { %22563 = vst [vmem:[#allocation39_spill] sm:$0xff] %v19470_v13  ;;  %22564 = vst [vmem:[#allocation89_spill] sm:$0xff] %v19473_v48  ;;  %v9304_v3 = vmax.f32 %v9224_v52, 0.0  ;;  %15622 = vrot.lane.b32.xlu1 %v19462_v55, %s16216_s29  ;;  %v9291_v57 = vmax.f32 %v9211_v62, 0.0  ;;  %v9126_v61 = vmul.f32 %v19340_v49, %v22567_v0  ;;  %v9127_v21 = vmul.f32 %v19340_v49, %v22568_v30 }
 0x701   :  { %22565 = vst [vmem:[#allocation90_spill] sm:$0xff] %v19481_v58  ;;  %22566 = vst [vmem:[#allocation91_spill] sm:$0xff] %v19484_v16  ;;  %v9305_v60 = vmax.f32 %v9225_v42, 0.0  ;;  %v19494_v63 = vpack.i.bf16 %v19481_v58, %v19470_v13  ;;  %v19498_v5 = vpack.i.bf16 %v19484_v16, %v19473_v48  ;;  %v19504_v42 = vmul.f32 %v9290_v11, %v18952_v33  ;;  %v22575_v48 = vld [vmem:[#allocation61_spill] sm:$0xff]  ;;  %v22576_v16 = vld [vmem:[#allocation63_spill] sm:$0xff] }
 0x702   :  { %v19501_v52 = vmul.f32 %v9304_v3, %v22543_v50  ;;  %v19510_v62 = vmul.f32 %v9291_v57, %v18970_v1  ;;  %v9226_v0 = vadd.f32 %v19354_v36, %v9126_v61  ;;  %v9227_v30 = vadd.f32 %v19354_v36, %v9127_v21  ;;  %v22577_v13 = vld [vmem:[#allocation50_spill] sm:$0xff]  ;;  %v22578_v58 = vld [vmem:[#allocation51_spill] sm:$0xff] }
 0x703   :  { %22569 = vst [vmem:[#allocation41_spill] sm:$0xff] %v19494_v63  ;;  %22570 = vst [vmem:[#allocation43_spill] sm:$0xff] %v19498_v5  ;;  %v19507_v53 = vmul.f32 %v9305_v60, %v22546_v54  ;;  %15577 = vrot.lane.b32.xlu0 %v19451_v39, %s16216_s29  ;;  %v9112_v3 = vmul.f32 %v19286_v51, %v22575_v48  ;;  %v9113_v11 = vmul.f32 %v19286_v51, %v22576_v16 }
 0x704   :  { %22571 = vst [vmem:[#allocation92_spill] sm:$0xff] %v19501_v52  ;;  %22572 = vst [vmem:[#allocation93_spill] sm:$0xff] %v19504_v42  ;;  %v9128_v60 = vmul.f32 %v19340_v49, %v22577_v13  ;;  %v9129_v57 = vmul.f32 %v19340_v49, %v22578_v58  ;;  %15627 = vrot.lane.b32.xlu1 %v19494_v63, %s16216_s29  ;;  %v19532_v21 = vpack.i.bf16 %v19510_v62, %v19504_v42 }
 0x705   :  { %22573 = vst [vmem:[#allocation94_spill] sm:$0xff] %v19507_v53  ;;  %22574 = vst [vmem:[#allocation95_spill] sm:$0xff] %v19510_v62  ;;  %v19528_v61 = vpack.i.bf16 %v19507_v53, %v19501_v52  ;;  %v9306_v48 = vmax.f32 %v9226_v0, 0.0  ;;  %v9307_v32 = vmax.f32 %v9227_v30, 0.0  ;;  %v9212_v16 = vadd.f32 %v19314_v37, %v9112_v3  ;;  %v22583_v62 = vld [vmem:[#allocation66_spill] sm:$0xff] }
 0x706   :  { %22580 = vst [vmem:[#allocation63_spill] sm:$0xff] %v19532_v21  ;;  %v9213_v13 = vadd.f32 %v19314_v37, %v9113_v11  ;;  %v9228_v20 = vadd.f32 %v19354_v36, %v9128_v60  ;;  %v9229_v58 = vadd.f32 %v19354_v36, %v9129_v57  ;;  %v9114_v42 = vmul.f32 %v19286_v51, %v19194_v59  ;;  %v22597_v53 = vld [vmem:[#allocation14_spill] sm:$0xff] }
 0x707   :  { %22579 = vst [vmem:[#allocation61_spill] sm:$0xff] %v19528_v61  ;;  %v19539_v27 = vmul.f32 %v9306_v48, %v22549_v10  ;;  %v19542_v52 = vmul.f32 %v9307_v32, %v22554_v28  ;;  %v9115_v0 = vmul.f32 %v19286_v51, %v22583_v62  ;;  %15582 = vrot.lane.b32.xlu0 %v19498_v5, %s16216_s29  ;;  %v9292_v30 = vmax.f32 %v9212_v16, 0.0  ;;  %v22585_v48 = vld [vmem:[#allocation53_spill] sm:$0xff] }
 0x708   :  { %v9293_v3 = vmax.f32 %v9213_v13, 0.0  ;;  %v9308_v11 = vmax.f32 %v9228_v20, 0.0  ;;  %v9309_v60 = vmax.f32 %v9229_v58, 0.0  ;;  %15632 = vrot.lane.b32.xlu1 %v19528_v61, %s16216_s29  ;;  %v9214_v57 = vadd.f32 %v19314_v37, %v9114_v42  ;;  %v22590_v42 = vld [vmem:[#allocation55_spill] sm:$0xff] }
 0x709   :  { %22581 = vst [vmem:[#allocation50_spill] sm:$0xff] %v19539_v27  ;;  %22582 = vst [vmem:[#allocation51_spill] sm:$0xff] %v19542_v52  ;;  %v19554_v32 = vpack.i.bf16 %v19542_v52, %v19539_v27  ;;  %v9215_v59 = vadd.f32 %v19314_v37, %v9115_v0  ;;  %v9130_v51 = vmul.f32 %v19340_v49, %v22585_v48  ;;  %v19575_v48 = vpop.permute.xlu0 %9088 }
 0x70a   :  { %v19561_v62 = vmul.f32 %v9292_v30, %v18977_v26  ;;  %v19564_v20 = vmul.f32 %v9293_v3, %v18992_v15  ;;  %v19567_v16 = vmul.f32 %v9308_v11, %v18930_v8  ;;  %v19570_v13 = vmul.f32 %v9309_v60, %v18945_v34  ;;  %v22592_v3 = vld [vmem:[#allocation64_spill] sm:$0xff] }
 0x70b   :  { %22584 = vst [vmem:[#allocation66_spill] sm:$0xff] %v19554_v32  ;;  %v9294_v58 = vmax.f32 %v9214_v57, 0.0  ;;  %v9295_v27 = vmax.f32 %v9215_v59, 0.0  ;;  %v9131_v37 = vmul.f32 %v19340_v49, %v22590_v42  ;;  %v9230_v0 = vadd.f32 %v19354_v36, %v9130_v51  ;;  %15587 = vrot.lane.b32.xlu0 %v19532_v21, %s16216_s29  ;;  %v22595_v42 = vld [vmem:[#allocation65_spill] sm:$0xff] }
 0x70c   :  { %22586 = vst [vmem:[#allocation53_spill] sm:$0xff] %v19561_v62  ;;  %22587 = vst [vmem:[#allocation96_spill] sm:$0xff] %v19564_v20  ;;  %v19581_v30 = vpack.i.bf16 %v19564_v20, %v19561_v62  ;;  %v9132_v11 = vmul.f32 %v19340_v49, %v22592_v3  ;;  %15637 = vrot.lane.b32.xlu1 %v19554_v32, %s16216_s29  ;;  %v9133_v52 = vmul.f32 %v19340_v49, %v22595_v42  ;;  %v22596_v20 = vld [vmem:[#allocation28_spill] sm:$0xff] }
 0x70d   :  { %22588 = vst [vmem:[#allocation97_spill] sm:$0xff] %v19567_v16  ;;  %22589 = vst [vmem:[#allocation98_spill] sm:$0xff] %v19570_v13  ;;  %v19588_v60 = vmul.f32 %v9294_v58, %v18999_v6  ;;  %v19591_v57 = vmul.f32 %v9295_v27, %v19014_v18  ;;  %v9231_v59 = vadd.f32 %v19354_v36, %v9131_v37  ;;  %v9310_v51 = vmax.f32 %v9230_v0, 0.0  ;;  %v22600_v37 = vld [vmem:[#allocation68_spill] sm:$0xff] }
 0x70e   :  { %22591 = vst [vmem:[#allocation55_spill] sm:$0xff] %v19581_v30  ;;  %v9232_v62 = vadd.f32 %v19354_v36, %v9132_v11  ;;  %v9118_v3 = vmul.f32 %v19340_v49, %v22596_v20  ;;  %v9119_v40 = vmul.f32 %v19340_v49, %v22597_v53  ;;  %v19603_v58 = vpack.i.bf16 %v19570_v13, %v19567_v16 }
 0x70f   :  { %22593 = vst [vmem:[#allocation64_spill] sm:$0xff] %v19588_v60  ;;  %22594 = vst [vmem:[#allocation99_spill] sm:$0xff] %v19591_v57  ;;  %v9311_v27 = vmax.f32 %v9231_v59, 0.0  ;;  %v19606_v41 = vmul.f32 %v9310_v51, %v18952_v33  ;;  %v9134_v0 = vmul.f32 %v19340_v49, %v22600_v37  ;;  %15592 = vrot.lane.b32.xlu0 %v19581_v30, %s16216_s29 }
 0x710   :  { %22598 = vst [vmem:[#allocation65_spill] sm:$0xff] %v19603_v58  ;;  %v9233_v11 = vadd.f32 %v19354_v36, %v9133_v52  ;;  %v9312_v20 = vmax.f32 %v9232_v62, 0.0  ;;  %v9218_v42 = vadd.f32 %v19354_v36, %v9118_v3  ;;  %v9219_v53 = vadd.f32 %v19354_v36, %v9119_v40  ;;  %15642 = vrot.lane.b32.xlu1 %v19603_v58, %s16216_s29  ;;  %v19627_v62 = vpop.permute.xlu0 %9188 }
 0x711   :  { %22599 = vst [vmem:[#allocation28_spill] sm:$0xff] %v19606_v41  ;;  %v19619_v59 = vpack.i.bf16 %v19591_v57, %v19588_v60  ;;  %v19622_v51 = vmul.f32 %v9311_v27, %v18970_v1  ;;  %v9135_v37 = vmul.f32 %v19340_v49, %v19216_v56  ;;  %v9234_v52 = vadd.f32 %v19354_v36, %v9134_v0 }
 0x712   :  { %v9313_v3 = vmax.f32 %v9233_v11, 0.0  ;;  %v19630_v40 = vmul.f32 %v9312_v20, %v18977_v26  ;;  %v9298_v16 = vmax.f32 %v9218_v42, 0.0  ;;  %v9299_v13 = vmax.f32 %v9219_v53, 0.0  ;;  %v22609_v20 = vld [vmem:[#allocation34_spill] sm:$0xff] }
 0x713   :  { %22601 = vst [vmem:[#allocation14_spill] sm:$0xff] %v19619_v59  ;;  %22602 = vst [vmem:[#allocation68_spill] sm:$0xff] %v19622_v51  ;;  %v19634_v60 = vpack.i.bf16 %v19622_v51, %v19606_v41  ;;  %v9235_v27 = vadd.f32 %v19354_v36, %v9135_v37  ;;  %v9314_v57 = vmax.f32 %v9234_v52, 0.0  ;;  %v9138_v56 = vmul.f32 %v19575_v48, %v22605_v7  ;;  %v22610_v53 = vld [vmem:[#allocation26_spill] sm:$0xff]  ;;  %v22618_v51 = vld [vmem:[#allocation21_spill] sm:$0xff] }
 0x714   :  { %22603 = vst [vmem:[#allocation100_spill] sm:$0xff] %v19630_v40  ;;  %15597 = vrot.lane.b32.xlu0 %v19619_v59, %s16216_s29  ;;  %v19642_v49 = vmul.f32 %v9313_v3, %v18992_v15  ;;  %v19645_v0 = vmul.f32 %v9298_v16, %v18875_v2  ;;  %v19648_v11 = vmul.f32 %v9299_v13, %v18880_v35  ;;  %v22613_v41 = vld [vmem:[#allocation30_spill] sm:$0xff] }
 0x715   :  { %22604 = vst [vmem:[#allocation101_spill] sm:$0xff] %v19634_v60  ;;  %v9139_v42 = vmul.f32 %v19575_v48, %v22609_v20  ;;  %15647 = vrot.lane.b32.xlu1 %v19634_v60, %s16216_s29  ;;  %v9315_v36 = vmax.f32 %v9235_v27, 0.0  ;;  %v9238_v7 = vadd.f32 %v19627_v62, %v9138_v56  ;;  %v9136_v37 = vmul.f32 %v19575_v48, %v22610_v53 }
 0x716   :  { %22606 = vst [vmem:[#allocation12_spill] sm:$0xff] %v19642_v49  ;;  %22607 = vst [vmem:[#allocation102_spill] sm:$0xff] %v19645_v0  ;;  %v19659_v52 = vpack.i.bf16 %v19642_v49, %v19630_v40  ;;  %v19662_v16 = vmul.f32 %v9314_v57, %v18999_v6  ;;  %v9137_v27 = vmul.f32 %v19575_v48, %v22613_v41  ;;  %v22615_v40 = vld [vmem:[#allocation16_spill] sm:$0xff] }
 0x717   :  { %22608 = vst [vmem:[#allocation103_spill] sm:$0xff] %v19648_v11  ;;  %v9239_v13 = vadd.f32 %v19627_v62, %v9139_v42  ;;  %v19666_v3 = vmul.f32 %v9315_v36, %v19014_v18  ;;  %v9318_v20 = vmax.f32 %v9238_v7, 0.0  ;;  %v9236_v56 = vadd.f32 %v19627_v62, %v9136_v37  ;;  %v22616_v49 = vld [vmem:[#allocation20_spill] sm:$0xff] }
 0x718   :  { %22611 = vst [vmem:[#allocation34_spill] sm:$0xff] %v19662_v16  ;;  %15602 = vrot.lane.b32.xlu0 %v19370_v31, %s16217_s17  ;;  %v19675_v53 = vpack.i.bf16 %v19648_v11, %v19645_v0  ;;  %v9140_v42 = vmul.f32 %v19575_v48, %v22615_v40  ;;  %v9141_v36 = vmul.f32 %v19575_v48, %v22616_v49  ;;  %v22620_v49 = vld [vmem:[#allocation17_spill] sm:$0xff] }
 0x719   :  { %22612 = vst [vmem:[#allocation26_spill] sm:$0xff] %v19666_v3  ;;  %v9319_v57 = vmax.f32 %v9239_v13, 0.0  ;;  %15652 = vrot.lane.b32.xlu1 %v19659_v52, %s16216_s29  ;;  %v19684_v41 = vmul.f32 %v9318_v20, %v18875_v2  ;;  %v9237_v7 = vadd.f32 %v19627_v62, %v9137_v27  ;;  %v9316_v37 = vmax.f32 %v9236_v56, 0.0 }
 0x71a   :  { %22614 = vst [vmem:[#allocation30_spill] sm:$0xff] %v19675_v53  ;;  %v9142_v0 = vmul.f32 %v19575_v48, %v22618_v51  ;;  %v9240_v40 = vadd.f32 %v19627_v62, %v9140_v42  ;;  %v9241_v11 = vadd.f32 %v19627_v62, %v9141_v36  ;;  %v9143_v9 = vmul.f32 %v19575_v48, %v22620_v49  ;;  %v22623_v49 = vld [vmem:[#allocation40_spill] sm:$0xff] }
 0x71b   :  { %22617 = vst [vmem:[#allocation16_spill] sm:$0xff] %v19684_v41  ;;  %v19690_v13 = vmul.f32 %v9319_v57, %v18880_v35  ;;  %v19698_v20 = vpack.i.bf16 %v19666_v3, %v19662_v16  ;;  %v9317_v31 = vmax.f32 %v9237_v7, 0.0  ;;  %v19701_v27 = vmul.f32 %v9316_v37, %v18863_v25 }
 0x71c   :  { %v9242_v51 = vadd.f32 %v19627_v62, %v9142_v0  ;;  %15617 = vrot.lane.b32.xlu0 %v19675_v53, %s16216_s29  ;;  %v9320_v57 = vmax.f32 %v9240_v40, 0.0  ;;  %v9321_v42 = vmax.f32 %v9241_v11, 0.0  ;;  %v9243_v36 = vadd.f32 %v19627_v62, %v9143_v9  ;;  %v22626_v11 = vld [vmem:[#allocation42_spill] sm:$0xff] }
 0x71d   :  { %22619 = vst [vmem:[#allocation20_spill] sm:$0xff] %v19690_v13  ;;  %22621 = vst [vmem:[#allocation21_spill] sm:$0xff] %v19701_v27  ;;  %v19708_v56 = vpack.i.bf16 %v19690_v13, %v19684_v41  ;;  %15657 = vrot.lane.b32.xlu1 %v19698_v20, %s16216_s29  ;;  %v19714_v7 = vmul.f32 %v9317_v31, %v18866_v4  ;;  %v9144_v0 = vmul.f32 %v19575_v48, %v22623_v49  ;;  %v22630_v49 = vld [vmem:[#allocation45_spill] sm:$0xff]  ;;  %v22732_v41 = vld [vmem:[#allocation84_spill] sm:$0xff] }
 0x71e   :  { %v9322_v37 = vmax.f32 %v9242_v51, 0.0  ;;  %v19719_v16 = vmul.f32 %v9320_v57, %v18886_v22  ;;  %v19722_v3 = vmul.f32 %v9321_v42, %v18889_v29  ;;  %v9323_v40 = vmax.f32 %v9243_v36, 0.0 }
 0x71f   :  { %22622 = vst [vmem:[#allocation17_spill] sm:$0xff] %v19714_v7  ;;  %v9145_v9 = vmul.f32 %v19575_v48, %v22626_v11  ;;  %v19728_v59 = vpack.i.bf16 %v19714_v7, %v19701_v27  ;;  %v9244_v51 = vadd.f32 %v19627_v62, %v9144_v0  ;;  %v9146_v11 = vmul.f32 %v19575_v48, %v22630_v49  ;;  %v22631_v0 = vld [vmem:[#allocation47_spill] sm:$0xff] }
 0x720   :  { %22624 = vst [vmem:[#allocation40_spill] sm:$0xff] %v19719_v16  ;;  %22625 = vst [vmem:[#allocation104_spill] sm:$0xff] %v19722_v3  ;;  %v19731_v31 = vmul.f32 %v9322_v37, %v18896_v44  ;;  %15667 = vrot.lane.b32.xlu0 %v19675_v53, %s16217_s17  ;;  %v19738_v57 = vpack.i.bf16 %v19722_v3, %v19719_v16  ;;  %v19741_v42 = vmul.f32 %v9323_v40, %v18899_v17  ;;  %v22632_v53 = vld [vmem:[#allocation52_spill] sm:$0xff] }
 0x721   :  { %22627 = vst [vmem:[#allocation42_spill] sm:$0xff] %v19728_v59  ;;  %v9245_v36 = vadd.f32 %v19627_v62, %v9145_v9  ;;  %15662 = vrot.lane.b32.xlu1 %v19439_v12, %s16217_s17  ;;  %v9324_v37 = vmax.f32 %v9244_v51, 0.0  ;;  %v9147_v30 = vmul.f32 %v19575_v48, %v22631_v0  ;;  %v9148_v45 = vmul.f32 %v19575_v48, %v22632_v53 }
 0x722   :  { %22628 = vst [vmem:[#allocation105_spill] sm:$0xff] %v19731_v31  ;;  %22629 = vst [vmem:[#allocation106_spill] sm:$0xff] %v19741_v42  ;;  %v19754_v21 = vpack.i.bf16 %v19741_v42, %v19731_v31  ;;  %v9246_v9 = vadd.f32 %v19627_v62, %v9146_v11  ;;  %v9149_v49 = vmul.f32 %v19575_v48, %v22634_v46  ;;  %v22637_v11 = vld [vmem:[#allocation57_spill] sm:$0xff]  ;;  %v19772_v46 = vpop.permute.xlu1 %9093 }
 0x723   :  { %v9325_v40 = vmax.f32 %v9245_v36, 0.0  ;;  %v19760_v5 = vmul.f32 %v9324_v37, %v22543_v50  ;;  %v9247_v51 = vadd.f32 %v19627_v62, %v9147_v30  ;;  %v9248_v0 = vadd.f32 %v19627_v62, %v9148_v45  ;;  %v22638_v45 = vld [vmem:[#allocation59_spill] sm:$0xff] }
 0x724   :  { %22633 = vst [vmem:[#allocation45_spill] sm:$0xff] %v19754_v21  ;;  %15677 = vrot.lane.b32.xlu0 %v19708_v56, %s16216_s29  ;;  %v9326_v12 = vmax.f32 %v9246_v9, 0.0  ;;  %v9249_v36 = vadd.f32 %v19627_v62, %v9149_v49  ;;  %v9150_v39 = vmul.f32 %v19575_v48, %v22637_v11  ;;  %v9151_v38 = vmul.f32 %v19575_v48, %v22638_v45 }
 0x725   :  { %22635 = vst [vmem:[#allocation47_spill] sm:$0xff] %v19760_v5  ;;  %v19767_v53 = vmul.f32 %v9325_v40, %v22546_v54  ;;  %15672 = vrot.lane.b32.xlu1 %v19728_v59, %s16216_s29  ;;  %v9327_v30 = vmax.f32 %v9247_v51, 0.0  ;;  %v9328_v37 = vmax.f32 %v9248_v0, 0.0  ;;  %v22643_v0 = vld [vmem:[#allocation67_spill] sm:$0xff] }
 0x726   :  { %v19783_v9 = vmul.f32 %v9326_v12, %v22549_v10  ;;  %v9329_v49 = vmax.f32 %v9249_v36, 0.0  ;;  %v9250_v11 = vadd.f32 %v19627_v62, %v9150_v39  ;;  %v9251_v51 = vadd.f32 %v19627_v62, %v9151_v38 }
 0x727   :  { %22636 = vst [vmem:[#allocation52_spill] sm:$0xff] %v19767_v53  ;;  %v19780_v40 = vpack.i.bf16 %v19767_v53, %v19760_v5  ;;  %v19787_v31 = vmul.f32 %v9327_v30, %v22554_v28  ;;  %v19790_v42 = vmul.f32 %v9328_v37, %v18930_v8  ;;  %v9152_v45 = vmul.f32 %v19575_v48, %v22643_v0  ;;  %v22645_v5 = vld [vmem:[#allocation69_spill] sm:$0xff]  ;;  %v22727_v53 = vld [vmem:[#allocation14_spill] sm:$0xff] }
 0x728   :  { %22640 = vst [vmem:[#allocation57_spill] sm:$0xff] %v19783_v9  ;;  %15682 = vrot.lane.b32.xlu0 %v19738_v57, %s16216_s29  ;;  %v19798_v12 = vmul.f32 %v9329_v49, %v18945_v34  ;;  %v9330_v36 = vmax.f32 %v9250_v11, 0.0  ;;  %v9153_v39 = vmul.f32 %v19575_v48, %v22645_v5  ;;  %v9331_v38 = vmax.f32 %v9251_v51, 0.0 }
 0x729   :  { %22639 = vst [vmem:[#allocation54_spill] sm:$0xff] %v19780_v40  ;;  %22641 = vst [vmem:[#allocation59_spill] sm:$0xff] %v19787_v31  ;;  %15722 = vrot.lane.b32.xlu1 %v19728_v59, %s16217_s17  ;;  %v19806_v30 = vpack.i.bf16 %v19787_v31, %v19783_v9  ;;  %v9252_v37 = vadd.f32 %v19627_v62, %v9152_v45  ;;  %v9154_v0 = vmul.f32 %v19575_v48, %v19226_v47  ;;  %v19821_v9 = vpop.permute.xlu1 %9193  ;;  %v22651_v31 = vld [vmem:[#allocation31_spill] sm:$0xff] }
 0x72a   :  { %22642 = vst [vmem:[#allocation107_spill] sm:$0xff] %v19790_v42  ;;  %22644 = vst [vmem:[#allocation67_spill] sm:$0xff] %v19798_v12  ;;  %v19813_v49 = vpack.i.bf16 %v19798_v12, %v19790_v42  ;;  %v19816_v11 = vmul.f32 %v9330_v36, %v18952_v33  ;;  %v9253_v5 = vadd.f32 %v19627_v62, %v9153_v39  ;;  %v22650_v12 = vld [vmem:[#allocation15_spill] sm:$0xff] }
 0x72b   :  { %22646 = vst [vmem:[#allocation69_spill] sm:$0xff] %v19806_v30  ;;  %v9155_v59 = vmul.f32 %v19575_v48, %v19232_v23  ;;  %v19824_v51 = vmul.f32 %v9331_v38, %v18970_v1  ;;  %v9332_v45 = vmax.f32 %v9252_v37, 0.0  ;;  %v9254_v47 = vadd.f32 %v19627_v62, %v9154_v0 }
 0x72c   :  { %22647 = vst [vmem:[#allocation108_spill] sm:$0xff] %v19813_v49  ;;  %22648 = vst [vmem:[#allocation109_spill] sm:$0xff] %v19816_v11  ;;  %15687 = vrot.lane.b32.xlu0 %v19754_v21, %s16216_s29  ;;  %v9333_v42 = vmax.f32 %v9253_v5, 0.0  ;;  %v9156_v39 = vmul.f32 %v19772_v46, %v22650_v12  ;;  %v9157_v23 = vmul.f32 %v19772_v46, %v22651_v31  ;;  %v22656_v5 = vld [vmem:[#allocation32_spill] sm:$0xff]  ;;  %v22657_v21 = vld [vmem:[#allocation33_spill] sm:$0xff] }
 0x72d   :  { %22649 = vst [vmem:[#allocation110_spill] sm:$0xff] %v19824_v51  ;;  %v9255_v36 = vadd.f32 %v19627_v62, %v9155_v59  ;;  %15737 = vrot.lane.b32.xlu1 %v19462_v55, %s16217_s17  ;;  %v19838_v48 = vpack.i.bf16 %v19824_v51, %v19816_v11  ;;  %v19841_v38 = vmul.f32 %v9332_v45, %v18977_v26  ;;  %v9334_v37 = vmax.f32 %v9254_v47, 0.0 }
 0x72e   :  { %v19844_v0 = vmul.f32 %v9333_v42, %v18992_v15  ;;  %v9256_v62 = vadd.f32 %v19821_v9, %v9156_v39  ;;  %v9257_v12 = vadd.f32 %v19821_v9, %v9157_v23  ;;  %v9158_v55 = vmul.f32 %v19772_v46, %v22656_v5 }
 0x72f   :  { %22652 = vst [vmem:[#allocation15_spill] sm:$0xff] %v19838_v48  ;;  %22653 = vst [vmem:[#allocation31_spill] sm:$0xff] %v19841_v38  ;;  %v9335_v59 = vmax.f32 %v9255_v36, 0.0  ;;  %v19849_v31 = vmul.f32 %v9334_v37, %v18999_v6  ;;  %v9159_v11 = vmul.f32 %v19772_v46, %v22657_v21  ;;  %v22660_v21 = vld [vmem:[#allocation29_spill] sm:$0xff] }
 0x730   :  { %22654 = vst [vmem:[#allocation111_spill] sm:$0xff] %v19844_v0  ;;  %15692 = vrot.lane.b32.xlu0 %v19780_v40, %s16216_s29  ;;  %v19859_v42 = vpack.i.bf16 %v19844_v0, %v19841_v38  ;;  %v9336_v47 = vmax.f32 %v9256_v62, 0.0  ;;  %v9337_v36 = vmax.f32 %v9257_v12, 0.0  ;;  %v9258_v39 = vadd.f32 %v19821_v9, %v9158_v55  ;;  %v22664_v62 = vld [vmem:[#allocation27_spill] sm:$0xff] }
 0x731   :  { %22655 = vst [vmem:[#allocation112_spill] sm:$0xff] %v19849_v31  ;;  %v19862_v45 = vmul.f32 %v9335_v59, %v19014_v18  ;;  %15752 = vrot.lane.b32.xlu1 %v19494_v63, %s16217_s17  ;;  %v9259_v23 = vadd.f32 %v19821_v9, %v9159_v11  ;;  %v9160_v37 = vmul.f32 %v19772_v46, %v22660_v21 }
 0x732   :  { %22658 = vst [vmem:[#allocation32_spill] sm:$0xff] %v19859_v42  ;;  %v19875_v40 = vmul.f32 %v9336_v47, %v18863_v25  ;;  %v19878_v59 = vmul.f32 %v9337_v36, %v18866_v4  ;;  %v9161_v12 = vmul.f32 %v19772_v46, %v22664_v62  ;;  %v9338_v63 = vmax.f32 %v9258_v39, 0.0  ;;  %v22665_v47 = vld [vmem:[#allocation19_spill] sm:$0xff]  ;;  %v22666_v36 = vld [vmem:[#allocation37_spill] sm:$0xff] }
 0x733   :  { %22659 = vst [vmem:[#allocation33_spill] sm:$0xff] %v19862_v45  ;;  %v19872_v5 = vpack.i.bf16 %v19862_v45, %v19849_v31  ;;  %v9339_v55 = vmax.f32 %v9259_v23, 0.0  ;;  %v9260_v11 = vadd.f32 %v19821_v9, %v9160_v37  ;;  %v9162_v4 = vmul.f32 %v19772_v46, %v22665_v47  ;;  %v22669_v45 = vld [vmem:[#allocation44_spill] sm:$0xff]  ;;  %v22718_v51 = vld [vmem:[#allocation69_spill] sm:$0xff] }
 0x734   :  { %22662 = vst [vmem:[#allocation113_spill] sm:$0xff] %v19875_v40  ;;  %22663 = vst [vmem:[#allocation114_spill] sm:$0xff] %v19878_v59  ;;  %15697 = vrot.lane.b32.xlu0 %v19806_v30, %s16216_s29  ;;  %v19887_v21 = vpack.i.bf16 %v19878_v59, %v19875_v40  ;;  %v9261_v25 = vadd.f32 %v19821_v9, %v9161_v12  ;;  %v9163_v31 = vmul.f32 %v19772_v46, %v22666_v36 }
 0x735   :  { %22661 = vst [vmem:[#allocation29_spill] sm:$0xff] %v19872_v5  ;;  %15767 = vrot.lane.b32.xlu1 %v19528_v61, %s16217_s17  ;;  %v19897_v39 = vmul.f32 %v9338_v63, %v18875_v2  ;;  %v19900_v23 = vmul.f32 %v9339_v55, %v18880_v35  ;;  %v9340_v37 = vmax.f32 %v9260_v11, 0.0  ;;  %v9262_v30 = vadd.f32 %v19821_v9, %v9162_v4  ;;  %v22671_v2 = vld [vmem:[#allocation46_spill] sm:$0xff]  ;;  %v22674_v4 = vld [vmem:[#allocation49_spill] sm:$0xff] }
 0x736   :  { %v9341_v62 = vmax.f32 %v9261_v25, 0.0  ;;  %v9263_v12 = vadd.f32 %v19821_v9, %v9163_v31  ;;  %v9164_v47 = vmul.f32 %v19772_v46, %v22669_v45  ;;  %v9165_v35 = vmul.f32 %v19772_v46, %v22671_v2 }
 0x737   :  { %22667 = vst [vmem:[#allocation27_spill] sm:$0xff] %v19897_v39  ;;  %22668 = vst [vmem:[#allocation19_spill] sm:$0xff] %v19900_v23  ;;  %v19908_v36 = vpack.i.bf16 %v19900_v23, %v19897_v39  ;;  %v19911_v61 = vmul.f32 %v9340_v37, %v18886_v22  ;;  %v9342_v31 = vmax.f32 %v9262_v30, 0.0  ;;  %v22673_v22 = vld [vmem:[#allocation48_spill] sm:$0xff]  ;;  %v9167_v37 = vmul.f32 %v19772_v46, %v22674_v4 }
 0x738   :  { %15702 = vrot.lane.b32.xlu0 %v19813_v49, %s16216_s29  ;;  %v19918_v63 = vmul.f32 %v9341_v62, %v18889_v29  ;;  %v9343_v55 = vmax.f32 %v9263_v12, 0.0  ;;  %v9264_v45 = vadd.f32 %v19821_v9, %v9164_v47  ;;  %v9265_v11 = vadd.f32 %v19821_v9, %v9165_v35 }
 0x739   :  { %22670 = vst [vmem:[#allocation37_spill] sm:$0xff] %v19911_v61  ;;  %15782 = vrot.lane.b32.xlu1 %v19554_v32, %s16217_s17  ;;  %v9166_v25 = vmul.f32 %v19772_v46, %v22673_v22  ;;  %v19933_v29 = vmul.f32 %v9342_v31, %v18896_v44  ;;  %v9267_v35 = vadd.f32 %v19821_v9, %v9167_v37  ;;  %v22677_v22 = vld [vmem:[#allocation56_spill] sm:$0xff] }
 0x73a   :  { %22672 = vst [vmem:[#allocation44_spill] sm:$0xff] %v19918_v63  ;;  %v19930_v2 = vpack.i.bf16 %v19918_v63, %v19911_v61  ;;  %v19936_v30 = vmul.f32 %v9343_v55, %v18899_v17  ;;  %v9344_v62 = vmax.f32 %v9264_v45, 0.0  ;;  %v9345_v12 = vmax.f32 %v9265_v11, 0.0  ;;  %v22680_v17 = vld [vmem:[#allocation58_spill] sm:$0xff] }
 0x73b   :  { %22675 = vst [vmem:[#allocation46_spill] sm:$0xff] %v19933_v29  ;;  %v9266_v47 = vadd.f32 %v19821_v9, %v9166_v25  ;;  %v9168_v32 = vmul.f32 %v19772_v46, %v22677_v22  ;;  %v9169_v31 = vmul.f32 %v19772_v46, %v22680_v17  ;;  %v9347_v11 = vmax.f32 %v9267_v35, 0.0  ;;  %v22682_v22 = vld [vmem:[#allocation60_spill] sm:$0xff]  ;;  %v22731_v61 = vld [vmem:[#allocation66_spill] sm:$0xff] }
 0x73c   :  { %22676 = vst [vmem:[#allocation48_spill] sm:$0xff] %v19936_v30  ;;  %15707 = vrot.lane.b32.xlu0 %v19838_v48, %s16216_s29  ;;  %v19946_v4 = vpack.i.bf16 %v19936_v30, %v19933_v29  ;;  %v19949_v44 = vmul.f32 %v9344_v62, %v22543_v50  ;;  %v19956_v55 = vmul.f32 %v9345_v12, %v22546_v54  ;;  %v22683_v50 = vld [vmem:[#allocation62_spill] sm:$0xff] }
 0x73d   :  { %15797 = vrot.lane.b32.xlu1 %v19603_v58, %s16217_s17  ;;  %v9346_v45 = vmax.f32 %v9266_v47, 0.0  ;;  %v9268_v25 = vadd.f32 %v19821_v9, %v9168_v32  ;;  %v9269_v37 = vadd.f32 %v19821_v9, %v9169_v31  ;;  %v9170_v48 = vmul.f32 %v19772_v46, %v22682_v22  ;;  %v22687_v31 = vld [vmem:[#allocation70_spill] sm:$0xff] }
 0x73e   :  { %22678 = vst [vmem:[#allocation49_spill] sm:$0xff] %v19946_v4  ;;  %22679 = vst [vmem:[#allocation56_spill] sm:$0xff] %v19949_v44  ;;  %v9171_v62 = vmul.f32 %v19772_v46, %v22683_v50  ;;  %v19966_v17 = vpack.i.bf16 %v19956_v55, %v19949_v44  ;;  %v19972_v54 = vmul.f32 %v9347_v11, %v22554_v28  ;;  %v22721_v44 = vld [vmem:[#allocation85_spill] sm:$0xff] }
 0x73f   :  { %22681 = vst [vmem:[#allocation58_spill] sm:$0xff] %v19956_v55  ;;  %v19969_v58 = vmul.f32 %v9346_v45, %v22549_v10  ;;  %v9348_v12 = vmax.f32 %v9268_v25, 0.0  ;;  %v9349_v32 = vmax.f32 %v9269_v37, 0.0  ;;  %v9270_v47 = vadd.f32 %v19821_v9, %v9170_v48  ;;  %v22690_v45 = vld [vmem:[#allocation71_spill] sm:$0xff]  ;;  %v22728_v55 = vld [vmem:[#allocation41_spill] sm:$0xff] }
 0x740   :  { %22684 = vst [vmem:[#allocation60_spill] sm:$0xff] %v19966_v17  ;;  %22686 = vst [vmem:[#allocation115_spill] sm:$0xff] %v19972_v54  ;;  %15712 = vrot.lane.b32.xlu0 %v19859_v42, %s16216_s29  ;;  %v9271_v35 = vadd.f32 %v19821_v9, %v9171_v62  ;;  %v9172_v22 = vmul.f32 %v19772_v46, %v22687_v31  ;;  %v9173_v11 = vmul.f32 %v19772_v46, %v22690_v45 }
 0x741   :  { %22685 = vst [vmem:[#allocation62_spill] sm:$0xff] %v19969_v58  ;;  %15812 = vrot.lane.b32.xlu1 %v19634_v60, %s16217_s17  ;;  %v19984_v10 = vpack.i.bf16 %v19972_v54, %v19969_v58  ;;  %v19987_v28 = vmul.f32 %v9348_v12, %v18930_v8  ;;  %v19992_v48 = vmul.f32 %v9349_v32, %v18945_v34  ;;  %v9350_v25 = vmax.f32 %v9270_v47, 0.0 }
 0x742   :  { %v9351_v37 = vmax.f32 %v9271_v35, 0.0  ;;  %v9272_v50 = vadd.f32 %v19821_v9, %v9172_v22  ;;  %v9273_v62 = vadd.f32 %v19821_v9, %v9173_v11  ;;  %v9174_v31 = vmul.f32 %v19772_v46, %v19240_v19  ;;  %v22716_v11 = vld [vmem:[#allocation43_spill] sm:$0xff] }
 0x743   :  { %22688 = vst [vmem:[#allocation70_spill] sm:$0xff] %v19984_v10  ;;  %22689 = vst [vmem:[#allocation116_spill] sm:$0xff] %v19987_v28  ;;  %v9175_v60 = vmul.f32 %v19772_v46, %v19244_v24  ;;  %v20004_v8 = vpack.i.bf16 %v19992_v48, %v19987_v28  ;;  %v20007_v34 = vmul.f32 %v9350_v25, %v18952_v33 }
 0x744   :  { %22691 = vst [vmem:[#allocation71_spill] sm:$0xff] %v19992_v48  ;;  %15717 = vrot.lane.b32.xlu0 %v19872_v5, %s16216_s29  ;;  %v20010_v12 = vmul.f32 %v9351_v37, %v18970_v1  ;;  %v9352_v32 = vmax.f32 %v9272_v50, 0.0  ;;  %v9353_v19 = vmax.f32 %v9273_v62, 0.0  ;;  %v9274_v24 = vadd.f32 %v19821_v9, %v9174_v31  ;;  %v22715_v62 = vld [vmem:[#allocation54_spill] sm:$0xff]  ;;  %v22729_v50 = vld [vmem:[#allocation61_spill] sm:$0xff] }
 0x745   :  { %22692 = vst [vmem:[#allocation117_spill] sm:$0xff] %v20004_v8  ;;  %22693 = vst [vmem:[#allocation118_spill] sm:$0xff] %v20007_v34  ;;  %15827 = vrot.lane.b32.xlu1 %v19659_v52, %s16217_s17  ;;  %v9275_v46 = vadd.f32 %v19821_v9, %v9175_v60 }
 0x746   :  { %22694 = vst [vmem:[#allocation119_spill] sm:$0xff] %v20010_v12  ;;  %v20018_v47 = vpack.i.bf16 %v20010_v12, %v20007_v34  ;;  %v20021_v35 = vmul.f32 %v9352_v32, %v18977_v26  ;;  %v20024_v33 = vmul.f32 %v9353_v19, %v18992_v15  ;;  %v9354_v1 = vmax.f32 %v9274_v24, 0.0  ;;  %v22704_v24 = vld [vmem:[#allocation36_spill] sm:$0xff]  ;;  %v22719_v12 = vld [vmem:[#allocation22_spill] sm:$0xff] }
 0x747   :  { %v9355_v22 = vmax.f32 %v9275_v46, 0.0  ;;  %v22720_v46 = vld [vmem:[#allocation63_spill] sm:$0xff] }
 0x748   :  { %22695 = vst [vmem:[#allocation120_spill] sm:$0xff] %v20018_v47  ;;  %22696 = vst [vmem:[#allocation121_spill] sm:$0xff] %v20021_v35  ;;  %15727 = vrot.lane.b32.xlu0 %v19887_v21, %s16216_s29  ;;  %v20032_v60 = vpack.i.bf16 %v20024_v33, %v20021_v35  ;;  %v20035_v9 = vmul.f32 %v9354_v1, %v18999_v6  ;;  %v22714_v1 = vld [vmem:[#allocation88_spill] sm:$0xff]  ;;  %v22717_v35 = vld [vmem:[#allocation74_spill] sm:$0xff] }
 0x749   :  { %22697 = vst [vmem:[#allocation122_spill] sm:$0xff] %v20024_v33  ;;  %15842 = vrot.lane.b32.xlu1 %v19698_v20, %s16217_s17  ;;  %v20038_v26 = vmul.f32 %v9355_v22, %v19014_v18  ;;  %v22711_v22 = vld [vmem:[#allocation45_spill] sm:$0xff]  ;;  %v15535_v0 = vunpack.i.h.bf16 %v22717_v35  ;;  %v15534_v33 = vunpack.i.l.bf16 %v22717_v35 }
 0x74a   :  { %22698 = vst [vmem:[#allocation123_spill] sm:$0xff] %v20032_v60  ;;  %22699 = vst [vmem:[#allocation124_spill] sm:$0xff] %v20035_v9 }
 0x74b   :  { %22700 = vst [vmem:[#allocation125_spill] sm:$0xff] %v20038_v26  ;;  %v20042_v15 = vpack.i.bf16 %v20038_v26, %v20035_v9 }
 0x74c   :  { %15732 = vrot.lane.b32.xlu0 %v19380_v14, %s16217_s17 }
 0x74d   :  { %22701 = vst [vmem:[#allocation126_spill] sm:$0xff] %v20042_v15  ;;  %15862 = vrot.lane.b32.xlu1 %v19908_v36, %s16216_s29 }
 0x750   :  { %15742 = vrot.lane.b32.xlu0 %v19708_v56, %s16217_s17 }
 0x751   :  { %15867 = vrot.lane.b32.xlu1 %v19930_v2, %s16216_s29 }
 0x754   :  { %15747 = vrot.lane.b32.xlu0 %v19384_v43, %s16217_s17 }
 0x755   :  { %15872 = vrot.lane.b32.xlu1 %v19946_v4, %s16216_s29 }
 0x758   :  { %15757 = vrot.lane.b32.xlu0 %v19738_v57, %s16217_s17 }
 0x759   :  { %15877 = vrot.lane.b32.xlu1 %v19966_v17, %s16216_s29 }
 0x75c   :  { %15762 = vrot.lane.b32.xlu0 %v22704_v24, %s16217_s17 }
 0x75d   :  { %15882 = vrot.lane.b32.xlu1 %v19984_v10, %s16216_s29 }
 0x760   :  { %15772 = vrot.lane.b32.xlu0 %v22711_v22, %s16217_s17 }
 0x761   :  { %15887 = vrot.lane.b32.xlu1 %v20004_v8, %s16216_s29 }
 0x764   :  { %15777 = vrot.lane.b32.xlu0 %v22714_v1, %s16217_s17  ;;  %v20112_v25 = vpop.permute.xlu1 %15557  ;;  %v15553_v18 = vpop.permute.xlu0 %15552 }
 0x765   :  { %15892 = vrot.lane.b32.xlu1 %v20018_v47, %s16216_s29  ;;  %v15555_v9 = vunpack.i.h.bf16 %v15553_v18  ;;  %v15554_v37 = vunpack.i.l.bf16 %v15553_v18  ;;  %v15560_v16 = vunpack.i.h.bf16 %v20112_v25 }
 0x767   :  { %v9854_v45 = vsel %vm138_vm0, %v15534_v33, %v15554_v37  ;;  %v9855_v48 = vsel %vm138_vm0, %v15554_v37, %v15555_v9  ;;  %v22725_v37 = vld [vmem:[#allocation15_spill] sm:$0xff] }
 0x768   :  { %15787 = vrot.lane.b32.xlu0 %v22715_v62, %s16217_s17  ;;  %v20118_v32 = vpop.permute.xlu1 %15607  ;;  %v20120_v19 = vpop.permute.xlu0 %15562 }
 0x769   :  { %15897 = vrot.lane.b32.xlu1 %v20032_v60, %s16216_s29 }
 0x76c   :  { %15792 = vrot.lane.b32.xlu0 %v22716_v11, %s16217_s17 }
 0x76d   :  { %15902 = vrot.lane.b32.xlu1 %v20042_v15, %s16216_s29  ;;  %v20126_v26 = vpop.permute.xlu0 %15567 }
 0x76e   :  { %v15613_v38 = vpop.permute.xlu1 %15612 }
 0x76f   :  { %v15615_v6 = vunpack.i.h.bf16 %v15613_v38  ;;  %v15614_v34 = vunpack.i.l.bf16 %v15613_v38 }
 0x770   :  { %15802 = vrot.lane.b32.xlu0 %v22718_v51, %s16217_s17 }
 0x771   :  { %15907 = vrot.lane.b32.xlu1 %v22719_v12, %s16218_s27  ;;  %v9874_v28 = vsel %vm138_vm0, %v15535_v0, %v15614_v34  ;;  %v20136_v18 = vpop.permute.xlu0 %15572  ;;  %v9875_v58 = vsel %vm138_vm0, %v15614_v34, %v15615_v6  ;;  %v22722_v34 = vld [vmem:[#allocation42_spill] sm:$0xff] }
 0x772   :  { %v20140_v54 = vpop.permute.xlu1 %15622  ;;  %v14469_v35 = vpack.c.bf16 %v9875_v58, %v9855_v48  ;;  %v14471_v38 = vpack.c.bf16 %v9874_v28, %v9854_v45  ;;  %v22723_v48 = vld [vmem:[#allocation55_spill] sm:$0xff] }
 0x774   :  { %15807 = vrot.lane.b32.xlu0 %v22720_v46, %s16217_s17  ;;  %14470 = vmatprep.subr.bf16.mxu0 %v14469_v35  ;;  %v22726_v35 = vld [vmem:[#allocation38_spill] sm:$0xff] }
 0x775   :  { %15917 = vrot.lane.b32.xlu1 %v22721_v44, %s16218_s27  ;;  %14472 = vmatpush1.bf16.msra.mxu0 %v14471_v38  ;;  %v20146_v12 = vpop.permute.xlu0 %15577  ;;  %v22724_v44 = vmov 0.0  }
 0x776   :  { %v20148_v0 = vpop.permute.xlu1 %15627 }
 0x778   :  { %15817 = vrot.lane.b32.xlu0 %v19813_v49, %s16217_s17 }
 0x779   :  { %15932 = vrot.lane.b32.xlu1 %v22722_v34, %s16218_s27  ;;  %v20154_v58 = vpop.permute.xlu0 %15582 }
 0x77a   :  { %v20156_v28 = vpop.permute.xlu1 %15632 }
 0x77c   :  { %15822 = vrot.lane.b32.xlu0 %v22723_v48, %s16217_s17  ;;  %v15579_v48 = vunpack.i.l.bf16 %v20146_v12 }
 0x77d   :  { %15937 = vrot.lane.b32.xlu1 %v22724_v44, %s16218_s27  ;;  %v20162_v33 = vpop.permute.xlu0 %15587 }
 0x77e   :  { %v20164_v45 = vpop.permute.xlu1 %15637 }
 0x780   :  { %15832 = vrot.lane.b32.xlu0 %v22725_v37, %s16217_s17  ;;  %v15569_v37 = vunpack.i.l.bf16 %v20126_v26 }
 0x781   :  { %15947 = vrot.lane.b32.xlu1 %v22726_v35, %s16218_s27  ;;  %v20170_v38 = vpop.permute.xlu0 %15592 }
 0x782   :  { %v20172_v34 = vpop.permute.xlu1 %15642 }
 0x784   :  { %15837 = vrot.lane.b32.xlu0 %v22727_v53, %s16217_s17  ;;  %v15574_v53 = vunpack.i.l.bf16 %v20136_v18 }
 0x785   :  { %15962 = vrot.lane.b32.xlu1 %v22728_v55, %s16218_s27  ;;  %v15559_v55 = vunpack.i.l.bf16 %v20112_v25 }
 0x786   :  { %v20178_v31 = vpop.permute.xlu0 %15597 }
 0x787   :  { %v20180_v29 = vpop.permute.xlu1 %15647  ;;  %v9856_v39 = vsel %vm138_vm0, %v15555_v9, %v15559_v55 }
 0x788   :  { %15847 = vrot.lane.b32.xlu0 %v19859_v42, %s16217_s17  ;;  %v15575_v42 = vunpack.i.h.bf16 %v20136_v18  ;;  %v15580_v18 = vunpack.i.h.bf16 %v20146_v12 }
 0x789   :  { %15977 = vrot.lane.b32.xlu1 %v22729_v50, %s16218_s27 }
 0x78a   :  { %v20186_v35 = vpop.permute.xlu0 %15602  ;;  %v20325_v46 = vsel %vm138_vm0, %v15574_v53, %v15575_v42 }
 0x78b   :  { %22730 = vst [vmem:[#allocation36_spill] sm:$0xff] %v20186_v35  ;;  %v20188_v30 = vpop.permute.xlu1 %15652 }
 0x78c   :  { %15852 = vrot.lane.b32.xlu0 %v19872_v5, %s16217_s17 }
 0x78d   :  { %15992 = vrot.lane.b32.xlu1 %v22731_v61, %s16218_s27  ;;  %v9857_v61 = vsel %vm138_vm0, %v15559_v55, %v15560_v16  ;;  %v15565_v55 = vunpack.i.h.bf16 %v20120_v19 }
 0x78e   :  { %v20196_v3 = vpop.permute.xlu0 %15617 }
 0x78f   :  { %v20198_v63 = vpop.permute.xlu1 %15657  ;;  %v22273_v50 = vunpack.i.h.bf16 %v20196_v3  ;;  %v15619_v35 = vunpack.i.l.bf16 %v20196_v3 }
 0x790   :  { %15857 = vrot.lane.b32.xlu0 %v22732_v41, %s16218_s27 }
 0x791   :  { %v9876_v13 = vsel %vm138_vm0, %v15615_v6, %v15619_v35  ;;  %16002 = vrot.lane.b32.xlu1 %v19908_v36, %s16217_s17  ;;  %v9877_v25 = vsel %vm138_vm0, %v15619_v35, %v22273_v50  ;;  %v22736_v35 = vld [vmem:[#allocation72_spill] sm:$0xff]  ;;  %v15625_v50 = vunpack.i.h.bf16 %v20140_v54 }
 0x792   :  { %v20212_v23 = vpop.permute.xlu0 %15667  ;;  %v14477_v27 = vpack.c.bf16 %v9877_v25, %v9857_v61  ;;  %v14479_v40 = vpack.c.bf16 %v9876_v13, %v9856_v39 }
 0x793   :  { %v20214_v7 = vpop.permute.xlu1 %15662 }
 0x794   :  { %22733 = vst [vmem:[#allocation45_spill] sm:$0xff] %v20214_v7  ;;  %15912 = vrot.lane.b32.xlu0 %v22724_v44, %s16218_s27  ;;  %14478 = vmatprep.subr.bf16.mxu1 %v14477_v27  ;;  %v22735_v27 = vld [vmem:[#allocation30_spill] sm:$0xff] }
 0x795   :  { %16007 = vrot.lane.b32.xlu1 %v19930_v2, %s16217_s17  ;;  %14480 = vmatpush1.bf16.msra.mxu1 %v14479_v40 }
 0x796   :  { %v20220_v41 = vpop.permute.xlu0 %15677 }
 0x797   :  { %v20222_v9 = vpop.permute.xlu1 %15672 }
 0x798   :  { %15922 = vrot.lane.b32.xlu0 %v19887_v21, %s16217_s17 }
 0x799   :  { %16012 = vrot.lane.b32.xlu1 %v19946_v4, %s16217_s17 }
 0x79a   :  { %v20228_v13 = vpop.permute.xlu0 %15682 }
 0x79b   :  { %v20230_v39 = vpop.permute.xlu1 %15722 }
 0x79c   :  { %22734 = vst [vmem:[#allocation88_spill] sm:$0xff] %v20230_v39  ;;  %15927 = vrot.lane.b32.xlu0 %v22735_v27, %s16218_s27  ;;  %v15564_v27 = vunpack.i.l.bf16 %v20120_v19  ;;  %v15570_v39 = vunpack.i.h.bf16 %v20126_v26  ;;  %v22740_v26 = vunpack.i.l.bf16 %v20140_v54 }
 0x79d   :  { %16017 = vrot.lane.b32.xlu1 %v19966_v17, %s16217_s17  ;;  %v15634_v17 = vunpack.i.l.bf16 %v20156_v28 }
 0x79e   :  { %v20236_v40 = vpop.permute.xlu0 %15687  ;;  %v20284_v5 = vsel %vm138_vm0, %v22740_v26, %v15625_v50  ;;  %v20298_v26 = vsel %vm138_vm0, %v15564_v27, %v15565_v55  ;;  %v20314_v4 = vsel %vm138_vm0, %v15569_v37, %v15570_v39 }
 0x79f   :  { %v20238_v6 = vpop.permute.xlu1 %15737 }
 0x7a0   :  { %15942 = vrot.lane.b32.xlu0 %v19380_v14, %s16218_s27  ;;  %v22282_v59 = vunpack.i.h.bf16 %v20238_v6 }
 0x7a1   :  { %16022 = vrot.lane.b32.xlu1 %v19984_v10, %s16217_s17  ;;  %v15630_v10 = vunpack.i.h.bf16 %v20148_v0 }
 0x7a2   :  { %v20246_v25 = vpop.permute.xlu0 %15692 }
 0x7a3   :  { %v20251_v7 = vpop.permute.xlu1 %15752 }
 0x7a4   :  { %v22281_v14 = vunpack.i.l.bf16 %v20251_v7  ;;  %15952 = vrot.lane.b32.xlu0 %v19708_v56, %s16218_s27 }
 0x7a5   :  { %16027 = vrot.lane.b32.xlu1 %v20004_v8, %s16217_s17  ;;  %v20275_v8 = vsel %vm138_vm0, %v15560_v16, %v15564_v27  ;;  %v20317_v27 = vsel %vm138_vm0, %v15570_v39, %v15574_v53  ;;  %v15585_v53 = vunpack.i.h.bf16 %v20154_v58 }
 0x7a6   :  { %v20270_v56 = vsel %vm1889_vm3, %v22282_v59, %v22281_v14  ;;  %v20272_v19 = vpop.permute.xlu0 %15697  ;;  %v15629_v14 = vunpack.i.l.bf16 %v20148_v0  ;;  %v20301_v0 = vsel %vm138_vm0, %v15565_v55, %v15569_v37  ;;  %v15635_v59 = vunpack.i.h.bf16 %v20156_v28  ;;  %22744 = vst [vmem:[#allocation69_spill] sm:$0xff] %v20317_v27 }
 0x7a7   :  { %v20279_v61 = vpop.permute.xlu1 %15767  ;;  %v15584_v55 = vunpack.i.l.bf16 %v20154_v58  ;;  %v20341_v28 = vsel %vm138_vm0, %v15630_v10, %v15634_v17  ;;  %v15649_v27 = vunpack.i.l.bf16 %v20180_v29 }
 0x7a8   :  { %22739 = vst [vmem:[#allocation54_spill] sm:$0xff] %v20279_v61  ;;  %v22287_v16 = vunpack.i.l.bf16 %v20279_v61  ;;  %15957 = vrot.lane.b32.xlu0 %v19384_v43, %s16218_s27  ;;  %v22741_v43 = vunpack.i.h.bf16 %v20251_v7  ;;  %v20335_v39 = vsel %vm138_vm0, %v15629_v14, %v15630_v10  ;;  %22746 = vst [vmem:[#allocation85_spill] sm:$0xff] %v20341_v28  ;;  %v20361_v58 = vsel %vm138_vm0, %v15634_v17, %v15635_v59 }
 0x7a9   :  { %16032 = vrot.lane.b32.xlu1 %v20018_v47, %s16217_s17  ;;  %v15595_v17 = vunpack.i.h.bf16 %v20170_v38 }
 0x7aa   :  { %v20309_v49 = vsel %vm1889_vm3, %v22741_v43, %v22287_v16  ;;  %v20311_v12 = vpop.permute.xlu0 %15702  ;;  %v20328_v43 = vsel %vm138_vm0, %v15625_v50, %v15629_v14  ;;  %v20347_v50 = vsel %vm138_vm0, %v15579_v48, %v15580_v18  ;;  %v15640_v16 = vunpack.i.h.bf16 %v20164_v45 }
 0x7ab   :  { %22742 = vst [vmem:[#allocation43_spill] sm:$0xff] %v20309_v49  ;;  %22743 = vst [vmem:[#allocation74_spill] sm:$0xff] %v20311_v12  ;;  %v20320_v47 = vpop.permute.xlu1 %15782  ;;  %v20338_v49 = vsel %vm138_vm0, %v15575_v42, %v15579_v48  ;;  %v22747_v42 = vunpack.i.h.bf16 %v20279_v61  ;;  %v15589_v48 = vunpack.i.l.bf16 %v20162_v33 }
 0x7ac   :  { %22745 = vst [vmem:[#allocation22_spill] sm:$0xff] %v20320_v47  ;;  %v22293_v37 = vunpack.i.l.bf16 %v20320_v47  ;;  %15967 = vrot.lane.b32.xlu0 %v19738_v57, %s16218_s27  ;;  %v15639_v57 = vunpack.i.l.bf16 %v20164_v45 }
 0x7ad   :  { %16037 = vrot.lane.b32.xlu1 %v20032_v60, %s16217_s17  ;;  %v20364_v60 = vsel %vm138_vm0, %v15580_v18, %v15584_v55  ;;  %v15590_v18 = vunpack.i.h.bf16 %v20162_v33  ;;  %v22752_v33 = vunpack.i.h.bf16 %v20320_v47 }
 0x7ae   :  { %v20356_v14 = vsel %vm1889_vm3, %v22747_v42, %v22293_v37  ;;  %v20358_v10 = vpop.permute.xlu0 %15707  ;;  %v15645_v42 = vunpack.i.h.bf16 %v20172_v34  ;;  %v15644_v37 = vunpack.i.l.bf16 %v20172_v34  ;;  %v20387_v34 = vsel %vm138_vm0, %v15584_v55, %v15585_v53 }
 0x7af   :  { %22748 = vst [vmem:[#allocation42_spill] sm:$0xff] %v20356_v14  ;;  %22749 = vst [vmem:[#allocation38_spill] sm:$0xff] %v20358_v10  ;;  %v20367_v12 = vpop.permute.xlu1 %15797  ;;  %v15594_v14 = vunpack.i.l.bf16 %v20170_v38  ;;  %v20401_v45 = vsel %vm138_vm0, %v15639_v57, %v15640_v16  ;;  %v20404_v61 = vsel %vm138_vm0, %v15635_v59, %v15639_v57  ;;  %v20407_v55 = vsel %vm138_vm0, %v15585_v53, %v15589_v48  ;;  %v22756_v38 = vld [vmem:[#allocation65_spill] sm:$0xff] }
 0x7b0   :  { %22750 = vst [vmem:[#allocation41_spill] sm:$0xff] %v20367_v12  ;;  %15972 = vrot.lane.b32.xlu0 %v22704_v24, %s16218_s27  ;;  %v22751_v24 = vunpack.i.l.bf16 %v20367_v12  ;;  %v20419_v59 = vsel %vm138_vm0, %v15644_v37, %v15645_v42  ;;  %v20422_v53 = vsel %vm138_vm0, %v15640_v16, %v15644_v37  ;;  %v15600_v57 = vunpack.i.h.bf16 %v20178_v31 }
 0x7b1   :  { %16042 = vrot.lane.b32.xlu1 %v20042_v15, %s16217_s17  ;;  %v22759_v47 = vunpack.i.h.bf16 %v20367_v12  ;;  %v20470_v12 = vsel %vm138_vm0, %v15645_v42, %v15649_v27  ;;  %v15680_v37 = vunpack.i.h.bf16 %v20220_v41 }
 0x7b2   :  { %v20396_v10 = vsel %vm1889_vm3, %v22752_v33, %v22751_v24  ;;  %v20398_v15 = vpop.permute.xlu0 %15712  ;;  %v15599_v24 = vunpack.i.l.bf16 %v20178_v31  ;;  %v20430_v33 = vsel %vm138_vm0, %v15589_v48, %v15590_v18  ;;  %v15675_v48 = vunpack.i.h.bf16 %v20222_v9 }
 0x7b3   :  { %22753 = vst [vmem:[#allocation61_spill] sm:$0xff] %v20396_v10  ;;  %22754 = vst [vmem:[#allocation66_spill] sm:$0xff] %v20398_v15  ;;  %v20411_v28 = vpop.permute.xlu1 %15812  ;;  %v20433_v10 = vsel %vm138_vm0, %v15590_v18, %v15594_v14 }
 0x7b4   :  { %22755 = vst [vmem:[#allocation84_spill] sm:$0xff] %v20411_v28  ;;  %15982 = vrot.lane.b32.xlu0 %v22711_v22, %s16218_s27  ;;  %22757 = vst [vmem:[#allocation30_spill] sm:$0xff] %v20430_v33  ;;  %v22758_v22 = vunpack.i.l.bf16 %v20411_v28 }
 0x7b5   :  { %16057 = vrot.lane.b32.xlu1 %v22756_v38, %s16218_s27  ;;  %v20447_v38 = vsel %vm138_vm0, %v15594_v14, %v15595_v17  ;;  %v20477_v14 = vsel %vm138_vm0, %v15599_v24, %v15600_v57 }
 0x7b6   :  { %v20440_v16 = vsel %vm1889_vm3, %v22759_v47, %v22758_v22  ;;  %v20442_v31 = vpop.permute.xlu0 %15717  ;;  %v22763_v47 = vunpack.i.h.bf16 %v20180_v29 }
 0x7b7   :  { %22760 = vst [vmem:[#allocation72_spill] sm:$0xff] %v20440_v16  ;;  %22761 = vst [vmem:[#allocation65_spill] sm:$0xff] %v20442_v31  ;;  %v20451_v15 = vpop.permute.xlu1 %15827  ;;  %v20461_v16 = vsel %vm138_vm0, %v15595_v17, %v15599_v24  ;;  %v22766_v17 = vld [vmem:[#allocation101_spill] sm:$0xff]  ;;  %v22772_v24 = vunpack.i.h.bf16 %v20196_v3 }
 0x7b8   :  { %22762 = vst [vmem:[#allocation127_spill] sm:$0xff] %v20451_v15  ;;  %v20458_v22 = vsel %vm138_vm0, %v15649_v27, %v22763_v47  ;;  %22765 = vst [vmem:[#allocation129_spill] sm:$0xff] %v20461_v16  ;;  %15987 = vrot.lane.b32.xlu0 %v22714_v1, %s16218_s27  ;;  %v15674_v47 = vunpack.i.l.bf16 %v20222_v9  ;;  %v15679_v1 = vunpack.i.l.bf16 %v20220_v41  ;;  %v22768_v18 = vunpack.i.l.bf16 %v20451_v15 }
 0x7b9   :  { %22764 = vst [vmem:[#allocation128_spill] sm:$0xff] %v20458_v22  ;;  %16072 = vrot.lane.b32.xlu1 %v22766_v17, %s16218_s27  ;;  %22767 = vst [vmem:[#allocation101_spill] sm:$0xff] %v20477_v14  ;;  %v22769_v27 = vunpack.i.h.bf16 %v20411_v28  ;;  %v22771_v17 = vunpack.i.l.bf16 %v20140_v54  ;;  %v22774_v28 = vunpack.i.h.bf16 %v20188_v30  ;;  %v15739_v54 = vunpack.i.l.bf16 %v20238_v6 }
 0x7ba   :  { %v15728_v16 = vpop.permute.xlu0 %15727  ;;  %v22316_v3 = vunpack.i.h.bf16 %v20451_v15  ;;  %v9896_v22 = vsel %vm138_vm0, %v15675_v48, %v15679_v1  ;;  %v15684_v15 = vunpack.i.l.bf16 %v20228_v13 }
 0x7bb   :  { %v20486_v42 = vsel %vm1889_vm3, %v22769_v27, %v22768_v18  ;;  %v20495_v57 = vsel %vm138_vm0, %v22772_v24, %v22771_v17  ;;  %v20497_v14 = vpop.permute.xlu1 %15842  ;;  %v15730_v41 = vunpack.i.h.bf16 %v15728_v16  ;;  %v15729_v31 = vunpack.i.l.bf16 %v15728_v16 }
 0x7bc   :  { %22770 = vst [vmem:[#allocation130_spill] sm:$0xff] %v20486_v42  ;;  %22773 = vst [vmem:[#allocation131_spill] sm:$0xff] %v20497_v14  ;;  %v22775_v18 = vunpack.i.l.bf16 %v20188_v30  ;;  %v22315_v17 = vunpack.i.l.bf16 %v20497_v14  ;;  %15997 = vrot.lane.b32.xlu0 %v22715_v62, %s16218_s27  ;;  %v22776_v16 = vunpack.i.l.bf16 %v22736_v35  ;;  %v22777_v42 = vunpack.i.h.bf16 %v22736_v35 }
 0x7bd   :  { %16087 = vrot.lane.b32.xlu1 %v19659_v52, %s16218_s27  ;;  %v9915_v9 = vsel %vm138_vm0, %v15729_v31, %v15730_v41  ;;  %v15685_v52 = vunpack.i.h.bf16 %v20228_v13  ;;  %v20555_v13 = vld [vmem:[%s21990_s3 + $0x3] sm:$0x7] }
 0x7be   :  { %v20504_v27 = vsel %vm138_vm0, %v22775_v18, %v22774_v28  ;;  %v9894_v24 = vsel %vm138_vm0, %v22776_v16, %v15674_v47  ;;  %v9914_v28 = vsel %vm138_vm0, %v22777_v42, %v15729_v31  ;;  %v9895_v18 = vsel %vm138_vm0, %v15674_v47, %v15675_v48  ;;  %v20529_v16 = vpop.permute.xlu0 %15732 }
 0x7bf   :  { %v20527_v62 = vsel %vm1889_vm3, %v22316_v3, %v22315_v17  ;;  %v14475_v33 = vpack.c.bf16 %v9914_v28, %v9894_v24  ;;  %v14473_v35 = vpack.c.bf16 %v9915_v9, %v9895_v18  ;;  %v9897_v42 = vsel %vm138_vm0, %v15679_v1, %v15680_v37  ;;  %v15863_v47 = vpop.permute.xlu1 %15862 }
 0x7c0   :  { %22778 = vst [vmem:[#allocation132_spill] sm:$0xff] %v20527_v62  ;;  %v15735_v31 = vunpack.i.h.bf16 %v20529_v16  ;;  %v15734_v14 = vunpack.i.l.bf16 %v20529_v16  ;;  %v22779_v17 = vunpack.i.h.bf16 %v20212_v23  ;;  %v15865_v28 = vunpack.i.h.bf16 %v15863_v47  ;;  %16047 = vrot.lane.b32.xlu0 %v19887_v21, %s16218_s27 }
 0x7c1   :  { %v15864_v9 = vunpack.i.l.bf16 %v15863_v47  ;;  %14474 = vmatprep.subr.bf16.mxu0 %v14473_v35  ;;  %v15689_v48 = vunpack.i.l.bf16 %v20236_v40  ;;  %v22780_v1 = vunpack.i.h.bf16 %v20118_v32  ;;  %16102 = vrot.lane.b32.xlu1 %v19698_v20, %s16218_s27  ;;  %v22781_v21 = vunpack.i.h.bf16 %v20238_v6 }
 0x7c2   :  { %v20540_v24 = vsel %vm1889_vm3, %v22779_v17, %v15739_v54  ;;  %14476 = vmatpush1.bf16.msra.mxu0 %v14475_v33  ;;  %v20558_v17 = vsel %vm1889_vm3, %v15734_v14, %v15735_v31  ;;  %v20568_v20 = vpop.permute.xlu0 %15742  ;;  %v22782_v33 = vpack.c.bf16 %v20284_v5, %v20298_v26  ;;  %v22783_v6 = vunpack.i.l.bf16 %v20188_v30 }
 0x7c3   :  { %v20548_v18 = vsel %vm1889_vm3, %v22780_v1, %v15734_v14  ;;  %v20563_v16 = vsel %vm1889_vm3, %v15739_v54, %v22781_v21  ;;  %v9916_v35 = vsel %vm138_vm0, %v15730_v41, %v15864_v9  ;;  %v9917_v1 = vsel %vm138_vm0, %v15864_v9, %v15865_v28  ;;  %v15868_v3 = vpop.permute.xlu1 %15867  ;;  %v22908_v14 = vld [vmem:[#allocation97_spill] sm:$0xff] }
 0x7c4   :  { %14486 = vmatprep.subr.bf16.mxu0 %v22782_v33  ;;  %v22784_v54 = vunpack.i.h.bf16 %v20180_v29  ;;  %v14483_v21 = vpack.c.bf16 %v9916_v35, %v9896_v22  ;;  %v14481_v47 = vpack.c.bf16 %v9917_v1, %v9897_v42  ;;  %v14527_v62 = vpack.c.bf16 %v20470_v12, %v20407_v55  ;;  %16052 = vrot.lane.b32.xlu0 %v22716_v11, %s16218_s27 }
 0x7c5   :  { %v15690_v5 = vunpack.i.h.bf16 %v20236_v40  ;;  %v15870_v26 = vunpack.i.h.bf16 %v15868_v3  ;;  %v15869_v9 = vunpack.i.l.bf16 %v15868_v3  ;;  %14269 = vmatmul.mubr.msk.f32.vlgmr.msra.gmra.mrb[60].mxu0 %vm10014_vm6, %v20555_v13  ;;  %v14487_v29 = vpack.c.bf16 %v20495_v57, %v20275_v8  ;;  %16117 = vrot.lane.b32.xlu1 %v19908_v36, %s16218_s27 }
 0x7c6   :  { %v20581_v41 = vsel %vm138_vm0, %v22784_v54, %v22783_v6  ;;  %v9898_v22 = vsel %vm138_vm0, %v15680_v37, %v15684_v15  ;;  %14482 = vmatprep.subr.bf16.mxu1 %v14481_v47  ;;  %v9899_v42 = vsel %vm138_vm0, %v15684_v15, %v15685_v52  ;;  %v14533_v3 = vpack.c.bf16 %v20504_v27, %v20447_v38  ;;  %v20601_v8 = vpop.permute.xlu0 %15747  ;;  %v22823_v38 = vld [vmem:[#allocation120_spill] sm:$0xff]  ;;  %v22824_v27 = vld [vmem:[#allocation101_spill] sm:$0xff] }
 0x7c7   :  { %v15659_v35 = vunpack.i.l.bf16 %v20198_v63  ;;  %v9900_v11 = vsel %vm138_vm0, %v15685_v52, %v15689_v48  ;;  %v9918_v33 = vsel %vm138_vm0, %v15865_v28, %v15869_v9  ;;  %14484 = vmatpush1.bf16.msra.mxu1 %v14483_v21  ;;  %14488 = vmatpush1.bf16.msra.mxu0 %v14487_v29  ;;  %v9919_v37 = vsel %vm138_vm0, %v15869_v9, %v15870_v26  ;;  %v15873_v36 = vpop.permute.xlu1 %15872 }
 0x7c8   :  { %v14491_v57 = vpack.c.bf16 %v9918_v33, %v9898_v22  ;;  %v15750_v47 = vunpack.i.h.bf16 %v20601_v8  ;;  %v15749_v15 = vunpack.i.l.bf16 %v20601_v8  ;;  %v22785_v1 = vpack.c.bf16 %v20335_v39, %v20314_v4  ;;  %10224 = vmatprep.mubr.f32.mxu0 %v22724_v44  ;;  %16062 = vrot.lane.b32.xlu0 %v22718_v51, %s16218_s27 }
 0x7c9   :  { %v14489_v6 = vpack.c.bf16 %v9919_v37, %v9899_v42  ;;  %v15695_v52 = vunpack.i.h.bf16 %v20246_v25  ;;  %v15875_v28 = vunpack.i.h.bf16 %v15873_v36  ;;  %v15874_v54 = vunpack.i.l.bf16 %v15873_v36  ;;  %16122 = vrot.lane.b32.xlu1 %v19930_v2, %s16218_s27 }
 0x7ca   :  { %14494 = vmatprep.subr.bf16.mxu1 %v22785_v1  ;;  %v9901_v21 = vsel %vm138_vm0, %v15689_v48, %v15690_v5  ;;  %v15694_v9 = vunpack.i.l.bf16 %v20246_v25  ;;  %v20618_v29 = vsel %vm1889_vm3, %v15735_v31, %v15749_v15  ;;  %v20625_v4 = vsel %vm1889_vm3, %v15749_v15, %v15750_v47  ;;  %14270 = vmatmul.mubr.msk.f32.vlgmr.msra.gmra.mrb[60].mxu1 %vm10014_vm6, %v20555_v13  ;;  %v20640_v22 = vpop.permute.xlu0 %15757 }
 0x7cb   :  { %14490 = vmatprep.subr.bf16.mxu0 %v14489_v6  ;;  %v22786_v51 = vunpack.i.h.bf16 %v20251_v7  ;;  %v22787_v39 = vunpack.i.l.bf16 %v20251_v7  ;;  %v15700_v25 = vunpack.i.h.bf16 %v20272_v19  ;;  %v9920_v31 = vsel %vm138_vm0, %v15870_v26, %v15874_v54  ;;  %v15878_v36 = vpop.permute.xlu1 %15877  ;;  %10295 = vmatprep.mubr.f32.mxu1 %v22724_v44 }
 0x7cc   :  { %14492 = vmatpush1.bf16.msra.mxu0 %v14491_v57  ;;  %v9921_v42 = vsel %vm138_vm0, %v15874_v54, %v15875_v28  ;;  %v22326_v7 = vunpack.i.h.bf16 %v20568_v20  ;;  %v14499_v33 = vpack.c.bf16 %v9920_v31, %v9900_v11  ;;  %v22788_v37 = vpack.c.bf16 %v20328_v43, %v20301_v0  ;;  %v22790_v54 = vld [vmem:[#allocation63_spill] sm:$0xff] }
 0x7cd   :  { %v20632_v48 = vsel %vm1889_vm3, %v22787_v39, %v22786_v51  ;;  %v22317_v26 = vunpack.i.l.bf16 %v20640_v22  ;;  %v22789_v15 = vpack.c.bf16 %v20361_v58, %v20325_v46  ;;  %v14497_v1 = vpack.c.bf16 %v9921_v42, %v9901_v21  ;;  %16067 = vrot.lane.b32.xlu0 %v22790_v54, %s16218_s27  ;;  %v22792_v21 = vld [vmem:[#allocation49_spill] sm:$0xff] }
 0x7ce   :  { %14496 = vmatpush1.bf16.msra.mxu1 %v22788_v37  ;;  %v15699_v57 = vunpack.i.l.bf16 %v20272_v19  ;;  %v15880_v6 = vunpack.i.h.bf16 %v15878_v36  ;;  %v15879_v51 = vunpack.i.l.bf16 %v15878_v36  ;;  %v15660_v43 = vunpack.i.h.bf16 %v20198_v63  ;;  %16127 = vrot.lane.b32.xlu1 %v22792_v21, %s16218_s27  ;;  %v20682_v42 = vpop.permute.xlu0 %15762  ;;  %v22794_v54 = vld [vmem:[#allocation69_spill] sm:$0xff] }
 0x7cf   :  { %14502 = vmatprep.subr.bf16.mxu0 %v22789_v15  ;;  %v22791_v46 = vunpack.i.h.bf16 %v20188_v30  ;;  %v20670_v11 = vsel %vm1889_vm3, %v22326_v7, %v22317_v26  ;;  %14498 = vmatprep.subr.bf16.mxu1 %v14497_v1  ;;  %v14535_v39 = vpack.c.bf16 %v20581_v41, %v20433_v10  ;;  %v9902_v30 = vsel %vm138_vm0, %v15690_v5, %v15694_v9  ;;  %v22793_v1 = vld [vmem:[#allocation85_spill] sm:$0xff]  ;;  %v15883_v40 = vpop.permute.xlu1 %15882  ;;  %v22828_v10 = vld [vmem:[#allocation123_spill] sm:$0xff] }
 0x7d0   :  { %v9922_v31 = vsel %vm138_vm0, %v15875_v28, %v15879_v51  ;;  %14271 = vmatmul.mubr.msk.f32.vlgmr.msra.gmra.mrb[62].mxu0 %vm10014_vm6, %v20555_v13  ;;  %v9903_v37 = vsel %vm138_vm0, %v15694_v9, %v15695_v52  ;;  %v9923_v36 = vsel %vm138_vm0, %v15879_v51, %v15880_v6  ;;  %v15765_v5 = vunpack.i.h.bf16 %v20682_v42 }
 0x7d1   :  { %v20663_v58 = vsel %vm138_vm0, %v22791_v46, %v15659_v35  ;;  %v14507_v15 = vpack.c.bf16 %v9922_v31, %v9902_v30  ;;  %v22795_v46 = vpack.c.bf16 %v22793_v1, %v22794_v54  ;;  %v15764_v28 = vunpack.i.l.bf16 %v20682_v42  ;;  %v22798_v30 = vld [vmem:[#allocation74_spill] sm:$0xff]  ;;  %10366 = vmatprep.mubr.f32.mxu0 %v22724_v44 }
 0x7d2   :  { %14500 = vmatpush1.bf16.msra.mxu1 %v14499_v33  ;;  %v14505_v21 = vpack.c.bf16 %v9923_v36, %v9903_v37  ;;  %v9904_v2 = vsel %vm138_vm0, %v15695_v52, %v15699_v57  ;;  %v15885_v0 = vunpack.i.h.bf16 %v15883_v40  ;;  %v15884_v26 = vunpack.i.l.bf16 %v15883_v40  ;;  %v22797_v33 = vld [vmem:[#allocation108_spill] sm:$0xff] }
 0x7d3   :  { %14504 = vmatpush1.bf16.msra.mxu0 %v22795_v46  ;;  %v22796_v9 = vpack.c.bf16 %v20401_v45, %v20347_v50  ;;  %16077 = vrot.lane.b32.xlu0 %v22797_v33, %s16218_s27  ;;  %v9905_v51 = vsel %vm138_vm0, %v15699_v57, %v15700_v25  ;;  %v15704_v31 = vunpack.i.l.bf16 %v22798_v30  ;;  %v20704_v42 = vsel %vm1889_vm3, %v15750_v47, %v15764_v28  ;;  %v22799_v52 = vld [vmem:[#allocation60_spill] sm:$0xff]  ;;  %v22800_v45 = vld [vmem:[#allocation54_spill] sm:$0xff]  ;;  %v22803_v47 = vld [vmem:[#allocation43_spill] sm:$0xff]  ;;  %v20724_v46 = vpop.permute.xlu0 %15772 }
 0x7d4   :  { %16132 = vrot.lane.b32.xlu1 %v22799_v52, %s16218_s27  ;;  %14506 = vmatprep.subr.bf16.mxu0 %v14505_v21  ;;  %v20709_v50 = vsel %vm1889_vm3, %v15764_v28, %v15765_v5  ;;  %v22801_v37 = vunpack.i.h.bf16 %v22800_v45  ;;  %v22802_v36 = vunpack.i.l.bf16 %v22800_v45  ;;  %v15705_v1 = vunpack.i.h.bf16 %v22798_v30  ;;  %v22805_v52 = vld [vmem:[#allocation38_spill] sm:$0xff] }
 0x7d5   :  { %14510 = vmatprep.subr.bf16.mxu1 %v22796_v9  ;;  %v9924_v8 = vsel %vm138_vm0, %v15880_v6, %v15884_v26  ;;  %14272 = vmatmul.mubr.msk.f32.vlgmr.msra.gmra.mrb[62].mxu1 %vm10014_vm6, %v20555_v13  ;;  %v9925_v40 = vsel %vm138_vm0, %v15884_v26, %v15885_v0  ;;  %v22325_v28 = vunpack.i.h.bf16 %v20640_v22  ;;  %v22804_v9 = vpack.c.bf16 %v20404_v61, %v20338_v49  ;;  %v15888_v6 = vpop.permute.xlu1 %15887  ;;  %v22807_v26 = vld [vmem:[#allocation55_spill] sm:$0xff] }
 0x7d6   :  { %v20716_v57 = vsel %vm1889_vm3, %v22802_v36, %v22801_v37  ;;  %v14515_v21 = vpack.c.bf16 %v9924_v8, %v9904_v2  ;;  %v22321_v33 = vunpack.i.l.bf16 %v20724_v46  ;;  %v14513_v30 = vpack.c.bf16 %v9925_v40, %v9905_v51  ;;  %10437 = vmatprep.mubr.f32.mxu1 %v22724_v44  ;;  %v22894_v2 = vld [vmem:[#allocation24_spill] sm:$0xff] }
 0x7d7   :  { %14508 = vmatpush1.bf16.msra.mxu0 %v14507_v15  ;;  %14512 = vmatpush1.bf16.msra.mxu1 %v22804_v9  ;;  %v15709_v45 = vunpack.i.l.bf16 %v22805_v52  ;;  %v15890_v37 = vunpack.i.h.bf16 %v15888_v6  ;;  %v15889_v36 = vunpack.i.l.bf16 %v15888_v6  ;;  %v22806_v54 = vpack.c.bf16 %v20419_v59, %v20387_v34  ;;  %v22808_v34 = vld [vmem:[#allocation70_spill] sm:$0xff] }
 0x7d8   :  { %16082 = vrot.lane.b32.xlu0 %v22807_v26, %s16218_s27  ;;  %v9906_v49 = vsel %vm138_vm0, %v15700_v25, %v15704_v31  ;;  %v15710_v61 = vunpack.i.h.bf16 %v22805_v52  ;;  %v20750_v15 = vsel %vm1889_vm3, %v22325_v28, %v22321_v33  ;;  %16137 = vrot.lane.b32.xlu1 %v22808_v34, %s16218_s27  ;;  %v20757_v59 = vsel %vm138_vm0, %v15659_v35, %v15660_v43  ;;  %v20762_v25 = vpop.permute.xlu0 %15777  ;;  %v22810_v52 = vld [vmem:[#allocation128_spill] sm:$0xff]  ;;  %v22817_v34 = vld [vmem:[#allocation66_spill] sm:$0xff]  ;;  %v22907_v28 = vld [vmem:[#allocation89_spill] sm:$0xff] }
 0x7d9   :  { %14518 = vmatprep.subr.bf16.mxu0 %v22806_v54  ;;  %14514 = vmatprep.subr.bf16.mxu1 %v14513_v30  ;;  %v9926_v19 = vsel %vm138_vm0, %v15885_v0, %v15889_v36  ;;  %v9907_v51 = vsel %vm138_vm0, %v15704_v31, %v15705_v1  ;;  %v9927_v8 = vsel %vm138_vm0, %v15889_v36, %v15890_v37  ;;  %v15893_v35 = vpop.permute.xlu1 %15892  ;;  %v15780_v0 = vunpack.i.h.bf16 %v20762_v25  ;;  %v22811_v31 = vld [vmem:[#allocation30_spill] sm:$0xff] }
 0x7da   :  { %14273 = vmatmul.mubr.msk.f32.vlgmr.msra.gmra.mrb[64].mxu0 %vm10014_vm6, %v20555_v13  ;;  %v14523_v54 = vpack.c.bf16 %v9926_v19, %v9906_v49  ;;  %v22809_v63 = vpack.c.bf16 %v20422_v53, %v20364_v60  ;;  %v15779_v43 = vunpack.i.l.bf16 %v20762_v25  ;;  %v14521_v40 = vpack.c.bf16 %v9927_v8, %v9907_v51  ;;  %v22814_v36 = vld [vmem:[#allocation22_spill] sm:$0xff]  ;;  %v22819_v25 = vld [vmem:[#allocation117_spill] sm:$0xff] }
 0x7db   :  { %14516 = vmatpush1.bf16.msra.mxu1 %v14515_v21  ;;  %v9908_v9 = vsel %vm138_vm0, %v15705_v1, %v15709_v45  ;;  %v15895_v6 = vunpack.i.h.bf16 %v15893_v35  ;;  %v15894_v30 = vunpack.i.l.bf16 %v15893_v35  ;;  %v22812_v26 = vpack.c.bf16 %v22810_v52, %v22811_v31  ;;  %v22813_v21 = vld [vmem:[#allocation15_spill] sm:$0xff]  ;;  %10508 = vmatprep.mubr.f32.mxu0 %v22724_v44  ;;  %v22895_v33 = vld [vmem:[#allocation50_spill] sm:$0xff] }
 0x7dc   :  { %14520 = vmatpush1.bf16.msra.mxu0 %v22809_v63  ;;  %16092 = vrot.lane.b32.xlu0 %v22813_v21, %s16218_s27  ;;  %v22815_v60 = vunpack.i.h.bf16 %v22814_v36  ;;  %v22816_v53 = vunpack.i.l.bf16 %v22814_v36  ;;  %v15714_v19 = vunpack.i.l.bf16 %v22817_v34  ;;  %v20787_v1 = vsel %vm1889_vm3, %v15765_v5, %v15779_v43  ;;  %v20801_v5 = vpop.permute.xlu0 %15787  ;;  %v22821_v36 = vld [vmem:[#allocation65_spill] sm:$0xff]  ;;  %v22871_v31 = vld [vmem:[#allocation39_spill] sm:$0xff] }
 0x7dd   :  { %14526 = vmatprep.subr.bf16.mxu1 %v22812_v26  ;;  %22818 = vst [vmem:[#allocation63_spill] sm:$0xff] %v20787_v1  ;;  %16142 = vrot.lane.b32.xlu1 %v22819_v25, %s16218_s27  ;;  %v9909_v51 = vsel %vm138_vm0, %v15709_v45, %v15710_v61  ;;  %v20793_v8 = vsel %vm1889_vm3, %v15779_v43, %v15780_v0  ;;  %v15715_v63 = vunpack.i.h.bf16 %v22817_v34  ;;  %v22322_v45 = vunpack.i.h.bf16 %v20724_v46 }
 0x7de   :  { %v20783_v49 = vsel %vm1889_vm3, %v22816_v53, %v22815_v60  ;;  %14522 = vmatprep.subr.bf16.mxu0 %v14521_v40  ;;  %v9928_v35 = vsel %vm138_vm0, %v15890_v37, %v15894_v30  ;;  %14274 = vmatmul.mubr.msk.f32.vlgmr.msra.gmra.mrb[64].mxu1 %vm10014_vm6, %v20555_v13  ;;  %v9929_v40 = vsel %vm138_vm0, %v15894_v30, %v15895_v6  ;;  %v15898_v37 = vpop.permute.xlu1 %15897  ;;  %v22320_v26 = vunpack.i.l.bf16 %v20801_v5  ;;  %v22822_v30 = vld [vmem:[#allocation14_spill] sm:$0xff] }
 0x7df   :  { %v14531_v43 = vpack.c.bf16 %v9928_v35, %v9908_v9  ;;  %14528 = vmatpush1.bf16.msra.mxu1 %v14527_v62  ;;  %v14529_v21 = vpack.c.bf16 %v9929_v40, %v9909_v51  ;;  %v15719_v60 = vunpack.i.l.bf16 %v22821_v36  ;;  %v15900_v53 = vunpack.i.h.bf16 %v15898_v37  ;;  %10579 = vmatprep.mubr.f32.mxu1 %v22724_v44 }
 0x7e0   :  { %14524 = vmatpush1.bf16.msra.mxu0 %v14523_v54  ;;  %v15899_v34 = vunpack.i.l.bf16 %v15898_v37  ;;  %16097 = vrot.lane.b32.xlu0 %v22822_v30, %s16218_s27  ;;  %v9910_v12 = vsel %vm138_vm0, %v15710_v61, %v15714_v19  ;;  %v15720_v55 = vunpack.i.h.bf16 %v22821_v36  ;;  %v20825_v62 = vsel %vm1889_vm3, %v22322_v45, %v22320_v26  ;;  %v15793_v61 = vpop.permute.xlu0 %15792 }
 0x7e1   :  { %14534 = vmatprep.subr.bf16.mxu0 %v14533_v3  ;;  %16147 = vrot.lane.b32.xlu1 %v22823_v38, %s16218_s27  ;;  %v14541_v3 = vpack.c.bf16 %v20757_v59, %v22824_v27  ;;  %v9911_v25 = vsel %vm138_vm0, %v15714_v19, %v15715_v63  ;;  %v15795_v59 = vunpack.i.h.bf16 %v15793_v61  ;;  %v15794_v37 = vunpack.i.l.bf16 %v15793_v61  ;;  %v22825_v38 = vld [vmem:[#allocation32_spill] sm:$0xff]  ;;  %v22826_v19 = vld [vmem:[#allocation129_spill] sm:$0xff] }
 0x7e2   :  { %14530 = vmatprep.subr.bf16.mxu1 %v14529_v21  ;;  %v9930_v9 = vsel %vm138_vm0, %v15895_v6, %v15899_v34  ;;  %v9931_v51 = vsel %vm138_vm0, %v15899_v34, %v15900_v53  ;;  %v15903_v40 = vpop.permute.xlu1 %15902  ;;  %v9912_v21 = vsel %vm138_vm0, %v15715_v63, %v15719_v60  ;;  %v14543_v34 = vpack.c.bf16 %v20663_v58, %v22826_v19 }
 0x7e3   :  { %14275 = vmatmul.mubr.msk.f32.vlgmr.msra.gmra.mrb[66].mxu0 %vm10014_vm6, %v20555_v13  ;;  %v14539_v35 = vpack.c.bf16 %v9930_v9, %v9910_v12  ;;  %14532 = vmatpush1.bf16.msra.mxu1 %v14531_v43  ;;  %v14537_v6 = vpack.c.bf16 %v9931_v51, %v9911_v25  ;;  %v15905_v36 = vunpack.i.h.bf16 %v15903_v40  ;;  %v15904_v30 = vunpack.i.l.bf16 %v15903_v40  ;;  %v22831_v9 = vld [vmem:[#allocation41_spill] sm:$0xff]  ;;  %v22835_v51 = vld [vmem:[#allocation23_spill] sm:$0xff] }
 0x7e4   :  { %14536 = vmatpush1.bf16.msra.mxu0 %v14535_v39  ;;  %14542 = vmatprep.subr.bf16.mxu1 %v14541_v3  ;;  %v20846_v43 = vsel %vm1889_vm3, %v15780_v0, %v15794_v37  ;;  %v9913_v41 = vsel %vm138_vm0, %v15719_v60, %v15720_v55  ;;  %v20852_v39 = vsel %vm1889_vm3, %v15794_v37, %v15795_v59  ;;  %v20859_v58 = vpop.permute.xlu0 %15802  ;;  %v22833_v61 = vunpack.i.l.bf16 %v22831_v9  ;;  %v22836_v40 = vld [vmem:[#allocation77_spill] sm:$0xff] }
 0x7e5   :  { %16107 = vrot.lane.b32.xlu0 %v22825_v38, %s16218_s27  ;;  %22827 = vst [vmem:[#allocation49_spill] sm:$0xff] %v20846_v43  ;;  %16152 = vrot.lane.b32.xlu1 %v22828_v10, %s16218_s27  ;;  %22829 = vst [vmem:[#allocation85_spill] sm:$0xff] %v20852_v39  ;;  %v9932_v63 = vsel %vm138_vm0, %v15900_v53, %v15904_v30  ;;  %v9933_v0 = vsel %vm138_vm0, %v15904_v30, %v15905_v36  ;;  %v22832_v53 = vunpack.i.h.bf16 %v22831_v9  ;;  %v22840_v36 = vld [vmem:[#allocation76_spill] sm:$0xff]  ;;  %v22841_v30 = vld [vmem:[#allocation13_spill] sm:$0xff] }
 0x7e6   :  { %14538 = vmatprep.subr.bf16.mxu0 %v14537_v6  ;;  %14276 = vmatmul.mubr.msk.f32.vlgmr.msra.gmra.mrb[66].mxu1 %vm10014_vm6, %v20555_v13  ;;  %v14547_v3 = vpack.c.bf16 %v9932_v63, %v9912_v21  ;;  %v20863_v60 = vpop.permute.xlu1 %15907  ;;  %v14545_v55 = vpack.c.bf16 %v9933_v0, %v9913_v41  ;;  %v22837_v37 = vpack.c.bf16 %v22835_v51, %v22836_v40  ;;  %v22838_v6 = vld [vmem:[#allocation29_spill] sm:$0xff]  ;;  %v22839_v21 = vld [vmem:[#allocation126_spill] sm:$0xff]  ;;  %v22843_v10 = vld [vmem:[#allocation103_spill] sm:$0xff]  ;;  %v22950_v52 = vunpack.i.h.bf16 %v20212_v23 }
 0x7e7   :  { %10650 = vmatprep.mubr.f32.mxu0 %v22724_v44  ;;  %14544 = vmatpush1.bf16.msra.mxu1 %v14543_v34  ;;  %v20870_v25 = vsel %vm1889_vm3, %v22833_v61, %v22832_v53  ;;  %v14551_v38 = vpack.c.bf16 %v22841_v30, %v22840_v36  ;;  %v22842_v34 = vld [vmem:[#allocation79_spill] sm:$0xff]  ;;  %v22845_v9 = vld [vmem:[#allocation17_spill] sm:$0xff]  ;;  %v22848_v51 = vld [vmem:[#allocation78_spill] sm:$0xff]  ;;  %v14591_v45 = vpack.c.bf16 %v22895_v33, %v22894_v2 }
 0x7e8   :  { %14540 = vmatpush1.bf16.msra.mxu0 %v14539_v35  ;;  %22834 = vst [vmem:[#allocation69_spill] sm:$0xff] %v20870_v25  ;;  %14546 = vmatprep.subr.bf16.mxu1 %v14545_v55  ;;  %v20885_v19 = vpop.permute.xlu0 %15807  ;;  %v14557_v41 = vpack.c.bf16 %v22843_v10, %v22842_v34  ;;  %v22844_v55 = vld [vmem:[#allocation114_spill] sm:$0xff]  ;;  %v22851_v36 = vld [vmem:[#allocation81_spill] sm:$0xff]  ;;  %v22852_v30 = vld [vmem:[#allocation87_spill] sm:$0xff]  ;;  %v14599_v7 = vpack.c.bf16 %v22908_v14, %v22907_v28 }
 0x7e9   :  { %14550 = vmatprep.subr.bf16.mxu0 %v22837_v37  ;;  %16112 = vrot.lane.b32.xlu0 %v22838_v6, %s16218_s27  ;;  %v22319_v0 = vunpack.i.l.bf16 %v20885_v19  ;;  %v22846_v53 = vpack.c.bf16 %v22844_v55, %v22845_v9  ;;  %v22849_v40 = vld [vmem:[#allocation102_spill] sm:$0xff]  ;;  %v22853_v34 = vld [vmem:[#allocation113_spill] sm:$0xff]  ;;  %v20920_v55 = vld [vmem:[%s21990_s3] sm:$0x7] }
 0x7ea   :  { %16157 = vrot.lane.b32.xlu1 %v22839_v21, %s16218_s27  ;;  %10721 = vmatprep.mubr.f32.mxu1 %v22724_v44  ;;  %v20890_v63 = vpop.permute.xlu1 %15917  ;;  %v14559_v37 = vpack.c.bf16 %v22849_v40, %v22848_v51  ;;  %v22854_v10 = vld [vmem:[#allocation21_spill] sm:$0xff]  ;;  %v22856_v9 = vld [vmem:[#allocation19_spill] sm:$0xff]  ;;  %v22859_v51 = vld [vmem:[#allocation80_spill] sm:$0xff] }
 0x7eb   :  { %14277 = vmatmul.mubr.msk.f32.vlgmr.msra.gmra.mrb[68].mxu0 %vm10014_vm6, %v20555_v13  ;;  %14548 = vmatpush1.bf16.msra.mxu1 %v14547_v3  ;;  %v20899_v61 = vsel %vm1889_vm3, %v15795_v59, %v22319_v0  ;;  %v22855_v59 = vpack.c.bf16 %v22853_v34, %v22854_v10  ;;  %v22860_v40 = vld [vmem:[#allocation86_spill] sm:$0xff]  ;;  %v22864_v6 = vld [vmem:[#allocation16_spill] sm:$0xff]  ;;  %v22941_v3 = vld [vmem:[#allocation109_spill] sm:$0xff] }
 0x7ec   :  { %14552 = vmatpush1.bf16.msra.mxu0 %v14551_v38  ;;  %14558 = vmatprep.subr.bf16.mxu1 %v14557_v41  ;;  %22847 = vst [vmem:[#allocation108_spill] sm:$0xff] %v20899_v61  ;;  %v20908_v21 = vpop.permute.xlu0 %15817  ;;  %v14565_v38 = vpack.c.bf16 %v22852_v30, %v22851_v36  ;;  %v14567_v36 = vpack.c.bf16 %v22860_v40, %v22859_v51  ;;  %v22861_v30 = vld [vmem:[#allocation83_spill] sm:$0xff]  ;;  %v22862_v34 = vld [vmem:[#allocation90_spill] sm:$0xff]  ;;  %v22868_v51 = vld [vmem:[#allocation104_spill] sm:$0xff] }
 0x7ed   :  { %14554 = vmatprep.subr.bf16.mxu0 %v22846_v53  ;;  %10795 = vmatprep.mubr.f32.mxu0 %v22724_v44  ;;  %v22857_v53 = vld [vmem:[#allocation20_spill] sm:$0xff]  ;;  %v14573_v10 = vpack.c.bf16 %v22862_v34, %v22861_v30  ;;  %v22870_v35 = vld [vmem:[#allocation82_spill] sm:$0xff] }
 0x7ee   :  { %14278 = vmatmul.mubr.msk.f32.vlgmr.msra.gmra.mrb[68].mxu1 %vm10014_vm6, %v20555_v13  ;;  %v20915_v41 = vpop.permute.xlu1 %15932  ;;  %v22858_v13 = vpack.c.bf16 %v22856_v9, %v22857_v53  ;;  %v14575_v54 = vpack.c.bf16 %v22871_v31, %v22870_v35  ;;  %v22875_v30 = vld [vmem:[#allocation94_spill] sm:$0xff]  ;;  %v22879_v35 = vld [vmem:[#allocation48_spill] sm:$0xff] }
 0x7ef   :  { %14560 = vmatpush1.bf16.msra.mxu1 %v14559_v37  ;;  %10866 = vmatprep.mubr.f32.mxu1 %v22724_v44  ;;  %v22940_v61 = vld [vmem:[#allocation118_spill] sm:$0xff]  ;;  %v22943_v43 = vld [vmem:[#allocation88_spill] sm:$0xff] }
 0x7f0   :  { %14556 = vmatpush1.bf16.msra.mxu0 %v22855_v59  ;;  %14562 = vmatprep.subr.bf16.mxu1 %v22858_v13  ;;  %v20930_v37 = vpop.permute.xlu0 %15822  ;;  %v22863_v59 = vld [vmem:[#allocation27_spill] sm:$0xff]  ;;  %v22867_v13 = vld [vmem:[#allocation44_spill] sm:$0xff]  ;;  %v15724_v12 = vunpack.i.l.bf16 %v22943_v43  ;;  %v22948_v25 = vld [vmem:[#allocation34_spill] sm:$0xff] }
 0x7f1   :  { %14566 = vmatprep.subr.bf16.mxu0 %v14565_v38  ;;  %v22865_v27 = vpack.c.bf16 %v22863_v59, %v22864_v6  ;;  %v22318_v38 = vunpack.i.l.bf16 %v20915_v41  ;;  %v22869_v40 = vpack.c.bf16 %v22867_v13, %v22868_v51  ;;  %v22876_v59 = vld [vmem:[#allocation37_spill] sm:$0xff]  ;;  %v22880_v51 = vld [vmem:[#allocation106_spill] sm:$0xff] }
 0x7f2   :  { %v20937_v9 = vpop.permute.xlu1 %15937 }
 0x7f3   :  { %14279 = vmatmul.mubr.msk.f32.vlgmr.msra.gmra.mrb[60].mxu0 %vm10014_vm6, %v20920_v55  ;;  %14564 = vmatpush1.bf16.msra.mxu1 %v22865_v27  ;;  %22866 = vst [vmem:[#allocation74_spill] sm:$0xff] %v20937_v9  ;;  %v15939_v53 = vunpack.i.l.bf16 %v20937_v9  ;;  %v22932_v9 = vld [vmem:[#allocation36_spill] sm:$0xff] }
 0x7f4   :  { %14568 = vmatpush1.bf16.msra.mxu0 %v14567_v36  ;;  %14574 = vmatprep.subr.bf16.mxu1 %v14573_v10  ;;  %v20954_v6 = vpop.permute.xlu0 %15832  ;;  %v22874_v36 = vld [vmem:[#allocation18_spill] sm:$0xff]  ;;  %v22877_v10 = vld [vmem:[#allocation40_spill] sm:$0xff] }
 0x7f5   :  { %14570 = vmatprep.subr.bf16.mxu0 %v22869_v40  ;;  %10937 = vmatprep.mubr.f32.mxu0 %v22724_v44  ;;  %v20950_v27 = vsel %vm2842_vm4, %v15939_v53, %v22318_v38  ;;  %22873 = vst [vmem:[#allocation54_spill] sm:$0xff] %v20954_v6  ;;  %v14581_v34 = vpack.c.bf16 %v22875_v30, %v22874_v36  ;;  %v22882_v53 = vld [vmem:[#allocation35_spill] sm:$0xff]  ;;  %v22883_v38 = vld [vmem:[#allocation92_spill] sm:$0xff]  ;;  %v22885_v30 = vld [vmem:[#allocation25_spill] sm:$0xff] }
 0x7f6   :  { %22872 = vst [vmem:[#allocation60_spill] sm:$0xff] %v20950_v27  ;;  %14280 = vmatmul.mubr.msk.f32.vlgmr.msra.gmra.mrb[60].mxu1 %vm10014_vm6, %v20920_v55  ;;  %v22878_v13 = vpack.c.bf16 %v22876_v59, %v22877_v10  ;;  %v20961_v31 = vpop.permute.xlu1 %15947  ;;  %v22881_v40 = vpack.c.bf16 %v22879_v35, %v22880_v51  ;;  %v14583_v0 = vpack.c.bf16 %v22883_v38, %v22882_v53  ;;  %v22886_v59 = vld [vmem:[#allocation51_spill] sm:$0xff]  ;;  %v22887_v10 = vld [vmem:[#allocation46_spill] sm:$0xff]  ;;  %v22955_v6 = vld [vmem:[#allocation33_spill] sm:$0xff] }
 0x7f7   :  { %14576 = vmatpush1.bf16.msra.mxu1 %v14575_v54  ;;  %11008 = vmatprep.mubr.f32.mxu1 %v22724_v44  ;;  %v14589_v54 = vpack.c.bf16 %v22886_v59, %v22885_v30  ;;  %v22891_v51 = vld [vmem:[#allocation58_spill] sm:$0xff]  ;;  %v22898_v30 = vld [vmem:[#allocation91_spill] sm:$0xff] }
 0x7f8   :  { %14572 = vmatpush1.bf16.msra.mxu0 %v22878_v13  ;;  %14578 = vmatprep.subr.bf16.mxu1 %v22881_v40  ;;  %v20971_v36 = vpop.permute.xlu0 %15837  ;;  %v22888_v13 = vld [vmem:[#allocation105_spill] sm:$0xff]  ;;  %v22892_v40 = vld [vmem:[#allocation52_spill] sm:$0xff]  ;;  %v22899_v59 = vld [vmem:[#allocation98_spill] sm:$0xff] }
 0x7f9   :  { %14582 = vmatprep.subr.bf16.mxu0 %v14581_v34  ;;  %22884 = vst [vmem:[#allocation43_spill] sm:$0xff] %v20971_v36  ;;  %v22889_v26 = vpack.c.bf16 %v22887_v10, %v22888_v13  ;;  %v22324_v34 = vunpack.i.h.bf16 %v20961_v31  ;;  %v22893_v53 = vpack.c.bf16 %v22891_v51, %v22892_v40  ;;  %v22900_v10 = vld [vmem:[#allocation56_spill] sm:$0xff]  ;;  %v22901_v13 = vld [vmem:[#allocation47_spill] sm:$0xff]  ;;  %v22954_v36 = vld [vmem:[#allocation125_spill] sm:$0xff] }
 0x7fa   :  { %v20978_v35 = vpop.permute.xlu1 %15962  ;;  %v22902_v33 = vpack.c.bf16 %v22900_v10, %v22901_v13  ;;  %v22914_v10 = vld [vmem:[#allocation57_spill] sm:$0xff] }
 0x7fb   :  { %14281 = vmatmul.mubr.msk.f32.vlgmr.msra.gmra.mrb[62].mxu0 %vm10014_vm6, %v20920_v55  ;;  %14580 = vmatpush1.bf16.msra.mxu1 %v22889_v26  ;;  %22890 = vst [vmem:[#allocation38_spill] sm:$0xff] %v20978_v35  ;;  %v22323_v38 = vunpack.i.l.bf16 %v20978_v35  ;;  %v22328_v51 = vunpack.i.h.bf16 %v20978_v35  ;;  %v22934_v35 = vld [vmem:[#allocation100_spill] sm:$0xff] }
 0x7fc   :  { %14584 = vmatpush1.bf16.msra.mxu0 %v14583_v0  ;;  %14590 = vmatprep.subr.bf16.mxu1 %v14589_v54  ;;  %v20997_v0 = vpop.permute.xlu0 %15847  ;;  %v14597_v54 = vpack.c.bf16 %v22899_v59, %v22898_v30 }
 0x7fd   :  { %14586 = vmatprep.subr.bf16.mxu0 %v22893_v53  ;;  %11079 = vmatprep.mubr.f32.mxu0 %v22724_v44  ;;  %v20993_v26 = vsel %vm2842_vm4, %v22324_v34, %v22323_v38  ;;  %22897 = vst [vmem:[#allocation70_spill] sm:$0xff] %v20997_v0  ;;  %v22904_v53 = vld [vmem:[#allocation115_spill] sm:$0xff]  ;;  %v22942_v0 = vpack.c.bf16 %v22940_v61, %v22941_v3  ;;  %v22949_v61 = vunpack.i.h.bf16 %v20118_v32 }
 0x7fe   :  { %22896 = vst [vmem:[#allocation55_spill] sm:$0xff] %v20993_v26  ;;  %14282 = vmatmul.mubr.msk.f32.vlgmr.msra.gmra.mrb[62].mxu1 %vm10014_vm6, %v20920_v55  ;;  %v21004_v2 = vpop.permute.xlu1 %15977  ;;  %v22905_v38 = vld [vmem:[#allocation59_spill] sm:$0xff]  ;;  %v22921_v26 = vld [vmem:[#allocation28_spill] sm:$0xff] }
 0x7ff   :  { %14592 = vmatpush1.bf16.msra.mxu1 %v14591_v45  ;;  %22903 = vst [vmem:[#allocation128_spill] sm:$0xff] %v21004_v2  ;;  %v22327_v40 = vunpack.i.l.bf16 %v21004_v2  ;;  %v22906_v34 = vpack.c.bf16 %v22904_v53, %v22905_v38  ;;  %11150 = vmatprep.mubr.f32.mxu1 %v22724_v44  ;;  %v22911_v38 = vld [vmem:[#allocation95_spill] sm:$0xff]  ;;  %v22331_v13 = vunpack.i.h.bf16 %v21004_v2 }
 0x800   :  { %14588 = vmatpush1.bf16.msra.mxu0 %v22902_v33  ;;  %v21023_v30 = vpop.permute.xlu0 %15852  ;;  %v22917_v53 = vld [vmem:[#allocation71_spill] sm:$0xff] }
 0x801   :  { %14594 = vmatprep.subr.bf16.mxu1 %v22906_v34  ;;  %14598 = vmatprep.subr.bf16.mxu0 %v14597_v54  ;;  %v21019_v45 = vsel %vm2842_vm4, %v22328_v51, %v22327_v40  ;;  %22910 = vst [vmem:[#allocation15_spill] sm:$0xff] %v21023_v30  ;;  %v22912_v34 = vld [vmem:[#allocation68_spill] sm:$0xff]  ;;  %v22913_v54 = vld [vmem:[#allocation62_spill] sm:$0xff]  ;;  %v22918_v40 = vld [vmem:[#allocation67_spill] sm:$0xff] }
 0x802   :  { %22909 = vst [vmem:[#allocation30_spill] sm:$0xff] %v21019_v45  ;;  %v14605_v59 = vpack.c.bf16 %v22912_v34, %v22911_v38  ;;  %v22915_v14 = vpack.c.bf16 %v22913_v54, %v22914_v10  ;;  %v21030_v28 = vpop.permute.xlu1 %15992  ;;  %v22919_v51 = vpack.c.bf16 %v22917_v53, %v22918_v40  ;;  %v22920_v45 = vld [vmem:[#allocation93_spill] sm:$0xff]  ;;  %v22923_v40 = vld [vmem:[#allocation96_spill] sm:$0xff]  ;;  %v22927_v10 = vld [vmem:[#allocation107_spill] sm:$0xff] }
 0x803   :  { %14283 = vmatmul.mubr.msk.f32.vlgmr.msra.gmra.mrb[64].mxu0 %vm10014_vm6, %v20920_v55  ;;  %22916 = vst [vmem:[#allocation22_spill] sm:$0xff] %v21030_v28  ;;  %v22330_v33 = vunpack.i.l.bf16 %v21030_v28  ;;  %v14607_v27 = vpack.c.bf16 %v22921_v26, %v22920_v45  ;;  %v22926_v45 = vld [vmem:[#allocation116_spill] sm:$0xff]  ;;  %v22933_v28 = vld [vmem:[#allocation53_spill] sm:$0xff] }
 0x804   :  { %14596 = vmatpush1.bf16.msra.mxu1 %v22915_v14  ;;  %14600 = vmatpush1.bf16.msra.mxu0 %v14599_v7  ;;  %v21049_v38 = vpop.permute.xlu0 %15857  ;;  %v22928_v14 = vpack.c.bf16 %v22926_v45, %v22927_v10  ;;  %v14615_v45 = vpack.c.bf16 %v22934_v35, %v22933_v28  ;;  %v22936_v10 = vld [vmem:[#allocation99_spill] sm:$0xff] }
 0x805   :  { %14602 = vmatprep.subr.bf16.mxu0 %v22919_v51  ;;  %14606 = vmatprep.subr.bf16.mxu1 %v14605_v59  ;;  %v21045_v7 = vsel %vm2842_vm4, %v22331_v13, %v22330_v33  ;;  %v22924_v51 = vld [vmem:[#allocation12_spill] sm:$0xff]  ;;  %v22925_v59 = vld [vmem:[#allocation45_spill] sm:$0xff]  ;;  %v15609_v33 = vunpack.i.l.bf16 %v20118_v32  ;;  %v22929_v13 = vld [vmem:[#allocation119_spill] sm:$0xff] }
 0x806   :  { %11221 = vmatprep.mubr.f32.mxu0 %v22724_v44  ;;  %22922 = vst [vmem:[#allocation66_spill] sm:$0xff] %v21045_v7  ;;  %v14613_v34 = vpack.c.bf16 %v22924_v51, %v22923_v40  ;;  %v15665_v54 = vunpack.i.h.bf16 %v22925_v59  ;;  %v15664_v26 = vunpack.i.l.bf16 %v22925_v59  ;;  %v21058_v53 = vpop.permute.xlu1 %16002  ;;  %v22930_v7 = vld [vmem:[#allocation110_spill] sm:$0xff]  ;;  %v15605_v40 = vunpack.i.h.bf16 %v22932_v9 }
 0x807   :  { %14284 = vmatmul.mubr.msk.f32.vlgmr.msra.gmra.mrb[64].mxu1 %vm10014_vm6, %v20920_v55  ;;  %v22931_v2 = vpack.c.bf16 %v22929_v13, %v22930_v7  ;;  %v15604_v51 = vunpack.i.l.bf16 %v22932_v9  ;;  %v15669_v59 = vunpack.i.l.bf16 %v20212_v23  ;;  %v22937_v13 = vld [vmem:[#allocation26_spill] sm:$0xff]  ;;  %v22938_v7 = vld [vmem:[#allocation73_spill] sm:$0xff]  ;;  %v22939_v9 = vld [vmem:[#allocation75_spill] sm:$0xff]  ;;  %v11613_v3 = vsel %vm1889_vm3, %v15609_v33, %v22949_v61 }
 0x808   :  { %14604 = vmatpush1.bf16.msra.mxu0 %v22928_v14  ;;  %14608 = vmatpush1.bf16.msra.mxu1 %v14607_v27  ;;  %v21072_v27 = vpop.permute.xlu0 %15912  ;;  %v15549_v14 = vunpack.i.l.bf16 %v22938_v7  ;;  %v15545_v30 = vunpack.i.h.bf16 %v22939_v9  ;;  %v11631_v28 = vsel %vm1889_vm3, %v15664_v26, %v15665_v54  ;;  %v16004_v32 = vunpack.i.l.bf16 %v21058_v53  ;;  %v22952_v61 = vld [vmem:[#allocation31_spill] sm:$0xff] }
 0x809   :  { %14610 = vmatprep.subr.bf16.mxu1 %v22931_v2  ;;  %14614 = vmatprep.subr.bf16.mxu0 %v14613_v34  ;;  %22935 = vst [vmem:[#allocation117_spill] sm:$0xff] %v21072_v27  ;;  %v14621_v2 = vpack.c.bf16 %v22937_v13, %v22936_v10  ;;  %v15550_v34 = vunpack.i.h.bf16 %v22938_v7  ;;  %v15544_v27 = vunpack.i.l.bf16 %v22939_v9  ;;  %v22944_v10 = vld [vmem:[#allocation122_spill] sm:$0xff]  ;;  %v22945_v13 = vld [vmem:[#allocation111_spill] sm:$0xff]  ;;  %v22947_v7 = vld [vmem:[#allocation64_spill] sm:$0xff]  ;;  %v11611_v9 = vsel %vm1889_vm3, %v15604_v51, %v15605_v40 }
 0x80a   :  { %11292 = vmatprep.mubr.f32.mxu1 %v22724_v44  ;;  %v21082_v35 = vpop.permute.xlu1 %16007  ;;  %v22946_v39 = vpack.c.bf16 %v22944_v10, %v22945_v13  ;;  %v14623_v1 = vpack.c.bf16 %v22948_v25, %v22947_v7  ;;  %v11632_v13 = vsel %vm1889_vm3, %v15665_v54, %v15669_v59  ;;  %v22951_v7 = vld [vmem:[#allocation121_spill] sm:$0xff]  ;;  %v11650_v25 = vsel %vm1889_vm3, %v15549_v14, %v15724_v12 }
 0x80b   :  { %14285 = vmatmul.mubr.msk.f32.vlgmr.msra.gmra.mrb[66].mxu0 %vm10014_vm6, %v20920_v55  ;;  %v11610_v10 = vsel %vm1889_vm3, %v15544_v27, %v15604_v51  ;;  %v22953_v23 = vpack.c.bf16 %v22951_v7, %v22952_v61  ;;  %v22960_v7 = vld [vmem:[#allocation112_spill] sm:$0xff] }
 0x80c   :  { %14612 = vmatpush1.bf16.msra.mxu1 %v22942_v0  ;;  %14616 = vmatpush1.bf16.msra.mxu0 %v14615_v45  ;;  %v11630_v0 = vsel %vm1889_vm3, %v15545_v30, %v15664_v26  ;;  %v15923_v30 = vpop.permute.xlu0 %15922  ;;  %v14629_v26 = vpack.c.bf16 %v11631_v28, %v11611_v9  ;;  %v15744_v45 = vunpack.i.l.bf16 %v20568_v20  ;;  %v22956_v28 = vpack.c.bf16 %v22954_v36, %v22955_v6 }
 0x80d   :  { %14618 = vmatprep.subr.bf16.mxu0 %v22946_v39  ;;  %14622 = vmatprep.subr.bf16.mxu1 %v14621_v2  ;;  %v11633_v39 = vsel %vm1889_vm3, %v15669_v59, %v22950_v52  ;;  %v11612_v2 = vsel %vm1889_vm3, %v15605_v40, %v15609_v33  ;;  %v15925_v33 = vunpack.i.h.bf16 %v15923_v30  ;;  %v15924_v40 = vunpack.i.l.bf16 %v15923_v30 }
 0x80e   :  { %11363 = vmatprep.mubr.f32.mxu0 %v22724_v44  ;;  %v21112_v52 = vpop.permute.xlu1 %16012  ;;  %v14631_v51 = vpack.c.bf16 %v11630_v0, %v11610_v10  ;;  %v14637_v54 = vpack.c.bf16 %v11633_v39, %v11613_v3  ;;  %v15860_v59 = vunpack.i.h.bf16 %v21049_v38  ;;  %v15910_v30 = vunpack.i.h.bf16 %v20863_v60  ;;  %v22959_v10 = vld [vmem:[#allocation124_spill] sm:$0xff] }
 0x80f   :  { %14286 = vmatmul.mubr.msk.f32.vlgmr.msra.gmra.mrb[66].mxu1 %vm10014_vm6, %v20920_v55  ;;  %v11670_v27 = vsel %vm1889_vm3, %v15550_v34, %v15924_v40  ;;  %v11671_v14 = vsel %vm1889_vm3, %v15924_v40, %v15925_v33  ;;  %v15919_v6 = vunpack.i.l.bf16 %v20890_v63  ;;  %v22958_v34 = vunpack.i.h.bf16 %v21058_v53 }
 0x810   :  { %14620 = vmatpush1.bf16.msra.mxu0 %v22953_v23  ;;  %14624 = vmatpush1.bf16.msra.mxu1 %v14623_v1  ;;  %v22957_v1 = vunpack.i.h.bf16 %v22943_v43  ;;  %v21130_v36 = vpop.permute.xlu0 %15927  ;;  %v16010_v39 = vunpack.i.h.bf16 %v21082_v35  ;;  %v22961_v61 = vpack.c.bf16 %v22959_v10, %v22960_v7 }
 0x811   :  { %14626 = vmatprep.subr.bf16.mxu1 %v22956_v28  ;;  %14630 = vmatprep.subr.bf16.mxu0 %v14629_v26  ;;  %v11673_v0 = vsel %vm1889_vm3, %v16004_v32, %v22958_v34  ;;  %v14635_v26 = vpack.c.bf16 %v11670_v27, %v11650_v25  ;;  %v15929_v40 = vunpack.i.l.bf16 %v21130_v36  ;;  %v14639_v28 = vpack.c.bf16 %v11632_v13, %v11612_v2 }
 0x812   :  { %11434 = vmatprep.mubr.f32.mxu1 %v22724_v44  ;;  %v11651_v9 = vsel %vm1889_vm3, %v15724_v12, %v22957_v1  ;;  %v16009_v12 = vunpack.i.l.bf16 %v21082_v35  ;;  %v21140_v23 = vpop.permute.xlu1 %16017  ;;  %v22962_v1 = vunpack.i.h.bf16 %v20568_v20  ;;  %v21152_v35 = vsel %vm2842_vm4, %v15860_v59, %v15919_v6 }
 0x813   :  { %14287 = vmatmul.mubr.msk.f32.vlgmr.msra.gmra.mrb[68].mxu0 %vm10014_vm6, %v20920_v55  ;;  %v14633_v3 = vpack.c.bf16 %v11671_v14, %v11651_v9  ;;  %v15920_v14 = vunpack.i.h.bf16 %v20890_v63  ;;  %v15930_v25 = vunpack.i.h.bf16 %v21130_v36  ;;  %v21160_v2 = vsel %vm2842_vm4, %v15910_v30, %v15929_v40 }
 0x814   :  { %14628 = vmatpush1.bf16.msra.mxu1 %v22961_v61  ;;  %14632 = vmatpush1.bf16.msra.mxu0 %v14631_v51  ;;  %v11653_v9 = vsel %vm1889_vm3, %v15744_v45, %v22962_v1  ;;  %v15949_v20 = vunpack.i.l.bf16 %v20961_v31  ;;  %v11672_v13 = vsel %vm1889_vm3, %v15925_v33, %v16004_v32  ;;  %v16014_v34 = vunpack.i.l.bf16 %v21112_v52  ;;  %v21179_v32 = vld [vmem:[%s21990_s3 + $0x6] sm:$0x7] }
 0x815   :  { %14638 = vmatprep.subr.bf16.mxu1 %v14637_v54  ;;  %14634 = vmatprep.subr.bf16.mxu0 %v14633_v3  ;;  %v21169_v54 = vpop.permute.xlu0 %15942  ;;  %v14641_v27 = vpack.c.bf16 %v11673_v0, %v11653_v9  ;;  %v16015_v3 = vunpack.i.h.bf16 %v21112_v52  ;;  %v22963_v33 = vunpack.i.h.bf16 %v22943_v43  ;;  %v22964_v52 = vpack.c.bf16 %v20563_v16, %v20558_v17 }
 0x816   :  { %11837 = vmatprep.mubr.f32.mxu0 %v22724_v44  ;;  %v21173_v10 = vpop.permute.xlu1 %16022  ;;  %v15944_v7 = vunpack.i.l.bf16 %v21169_v54  ;;  %v21193_v61 = vsel %vm2842_vm4, %v15930_v25, %v15949_v20  ;;  %v22966_v17 = vunpack.i.l.bf16 %v20640_v22 }
 0x817   :  { %14288 = vmatmul.mubr.msk.f32.vlgmr.msra.gmra.mrb[68].mxu1 %vm10014_vm6, %v20920_v55  ;;  %v11675_v55 = vsel %vm1889_vm3, %v16009_v12, %v16010_v39  ;;  %v11652_v0 = vsel %vm1889_vm3, %v22963_v33, %v15744_v45  ;;  %v22965_v45 = vunpack.i.h.bf16 %v20640_v22  ;;  %v16020_v33 = vunpack.i.h.bf16 %v21140_v23 }
 0x818   :  { %14636 = vmatpush1.bf16.msra.mxu0 %v14635_v26  ;;  %14640 = vmatpush1.bf16.msra.mxu1 %v14639_v28  ;;  %v14643_v26 = vpack.c.bf16 %v11672_v13, %v11652_v0  ;;  %v21200_v43 = vsel %vm2842_vm4, %v15920_v14, %v15944_v7  ;;  %v22967_v28 = vunpack.i.h.bf16 %v21058_v53  ;;  %v16019_v22 = vunpack.i.l.bf16 %v21140_v23 }
 0x819   :  { %14642 = vmatprep.subr.bf16.mxu1 %v14641_v27  ;;  %14646 = vmatprep.subr.bf16.mxu0 %v22964_v52  ;;  %v11655_v16 = vsel %vm1889_vm3, %v22966_v17, %v22965_v45  ;;  %v21215_v13 = vpop.permute.xlu0 %15952  ;;  %v22968_v0 = vpack.c.bf16 %v20540_v24, %v20548_v18  ;;  %v22969_v52 = vpack.c.bf16 %v20632_v48, %v20625_v4  ;;  %v15810_v45 = vunpack.i.h.bf16 %v20885_v19  ;;  %v22972_v17 = vld [vmem:[#allocation131_spill] sm:$0xff] }
 0x81a   :  { %11908 = vmatprep.mubr.f32.mxu1 %v22724_v44  ;;  %v11674_v1 = vsel %vm1889_vm3, %v22967_v28, %v16009_v12  ;;  %v14649_v27 = vpack.c.bf16 %v11675_v55, %v11655_v16  ;;  %v21222_v53 = vpop.permute.xlu1 %16027  ;;  %v11677_v12 = vsel %vm1889_vm3, %v16014_v34, %v16015_v3  ;;  %v15790_v55 = vunpack.i.h.bf16 %v20801_v5 }
 0x81b   :  { %14289 = vmatmul.mubr.msk.f32.vlgmr.msra.gmra.mrb[60].mxu0 %vm10014_vm6, %v21179_v32  ;;  %v14651_v23 = vpack.c.bf16 %v11674_v1, %v20670_v11  ;;  %v22971_v24 = vunpack.i.l.bf16 %v20724_v46  ;;  %v15845_v16 = vunpack.i.h.bf16 %v22972_v17  ;;  %v11676_v28 = vsel %vm1889_vm3, %v16010_v39, %v16014_v34 }
 0x81c   :  { %14644 = vmatpush1.bf16.msra.mxu1 %v14643_v26  ;;  %14648 = vmatpush1.bf16.msra.mxu0 %v22968_v0  ;;  %v22970_v26 = vunpack.i.h.bf16 %v20724_v46  ;;  %v15804_v11 = vunpack.i.l.bf16 %v20859_v58  ;;  %v16025_v1 = vunpack.i.h.bf16 %v21173_v10  ;;  %v16024_v46 = vunpack.i.l.bf16 %v21173_v10  ;;  %v22997_v10 = vld [vmem:[#allocation49_spill] sm:$0xff] }
 0x81d   :  { %14650 = vmatprep.subr.bf16.mxu0 %v14649_v27  ;;  %14654 = vmatprep.subr.bf16.mxu1 %v22969_v52  ;;  %v21241_v4 = vpop.permute.xlu0 %15957  ;;  %v22973_v27 = vpack.c.bf16 %v20270_v56, %v20618_v29  ;;  %v11679_v39 = vsel %vm1889_vm3, %v16019_v22, %v16020_v33  ;;  %v15909_v34 = vunpack.i.l.bf16 %v20863_v60  ;;  %v15805_v52 = vunpack.i.h.bf16 %v20859_v58  ;;  %v22978_v29 = vld [vmem:[#allocation127_spill] sm:$0xff] }
 0x81e   :  { %v11657_v18 = vsel %vm1889_vm3, %v22971_v24, %v22970_v26  ;;  %11979 = vmatprep.mubr.f32.mxu0 %v22724_v44  ;;  %v21249_v0 = vpop.permute.xlu1 %16032  ;;  %v22975_v26 = vld [vmem:[#allocation84_spill] sm:$0xff]  ;;  %v15824_v58 = vunpack.i.l.bf16 %v20930_v37 }
 0x81f   :  { %14290 = vmatmul.mubr.msk.f32.vlgmr.msra.gmra.mrb[60].mxu1 %vm10014_vm6, %v21179_v32  ;;  %v14657_v48 = vpack.c.bf16 %v11677_v12, %v11657_v18  ;;  %v22974_v12 = vpack.c.bf16 %v20716_v57, %v20709_v50  ;;  %v22976_v24 = vunpack.i.h.bf16 %v22975_v26  ;;  %v22979_v18 = vunpack.i.h.bf16 %v22978_v29 }
 0x820   :  { %14652 = vmatpush1.bf16.msra.mxu0 %v14651_v23  ;;  %14656 = vmatpush1.bf16.msra.mxu1 %v22973_v27  ;;  %v22977_v23 = vunpack.i.l.bf16 %v22975_v26  ;;  %v22980_v27 = vunpack.i.l.bf16 %v22978_v29  ;;  %v22981_v50 = vunpack.i.l.bf16 %v20801_v5  ;;  %v22983_v5 = vunpack.i.l.bf16 %v22972_v17 }
 0x821   :  { %14658 = vmatprep.subr.bf16.mxu1 %v14657_v48  ;;  %14662 = vmatprep.subr.bf16.mxu0 %v22974_v12  ;;  %v14659_v48 = vpack.c.bf16 %v11676_v28, %v20750_v15  ;;  %v22982_v12 = vunpack.i.l.bf16 %v20885_v19  ;;  %v21286_v29 = vpop.permute.xlu0 %15967  ;;  %v11660_v19 = vsel %vm1889_vm3, %v15790_v55, %v15804_v11  ;;  %v15819_v17 = vunpack.i.l.bf16 %v20908_v21 }
 0x822   :  { %v21262_v56 = vsel %vm1889_vm3, %v22977_v23, %v22976_v24  ;;  %v21269_v9 = vsel %vm1889_vm3, %v22980_v27, %v22979_v18  ;;  %v11659_v57 = vsel %vm1889_vm3, %v22981_v50, %v15790_v55  ;;  %12050 = vmatprep.mubr.f32.mxu1 %v22724_v44  ;;  %v15825_v24 = vunpack.i.h.bf16 %v20930_v37 }
 0x823   :  { %v21280_v26 = vsel %vm1889_vm3, %v22982_v12, %v15810_v45  ;;  %v11678_v23 = vsel %vm1889_vm3, %v16015_v3, %v16019_v22  ;;  %14291 = vmatmul.mubr.msk.f32.vlgmr.msra.gmra.mrb[62].mxu0 %vm10014_vm6, %v21179_v32  ;;  %v14665_v15 = vpack.c.bf16 %v11679_v39, %v11659_v57  ;;  %v21291_v28 = vsel %vm1889_vm3, %v22983_v5, %v15845_v16  ;;  %v21299_v3 = vpop.permute.xlu1 %16037 }
 0x824   :  { %v16030_v18 = vunpack.i.h.bf16 %v21222_v53  ;;  %v16029_v27 = vunpack.i.l.bf16 %v21222_v53  ;;  %14660 = vmatpush1.bf16.msra.mxu1 %v14659_v48  ;;  %v22984_v37 = vpack.c.bf16 %v22803_v47, %v20704_v42  ;;  %v11681_v22 = vsel %vm1889_vm3, %v16024_v46, %v16025_v1  ;;  %12121 = vmatprep.mubr.f32.mxu0 %v22724_v44 }
 0x825   :  { %v22985_v55 = vpack.c.bf16 %v20783_v49, %v20793_v8  ;;  %v11661_v16 = vsel %vm1889_vm3, %v15804_v11, %v15805_v52  ;;  %v14685_v39 = vpack.c.bf16 %v21262_v56, %v21280_v26  ;;  %v21316_v42 = vsel %vm2842_vm4, %v15909_v34, %v15910_v30  ;;  %v22986_v8 = vld [vmem:[#allocation54_spill] sm:$0xff]  ;;  %v21329_v30 = vpop.permute.xlu0 %15972 }
 0x826   :  { %14664 = vmatpush1.bf16.msra.mxu0 %v22984_v37  ;;  %v15935_v47 = vunpack.i.h.bf16 %v20915_v41  ;;  %v15820_v48 = vunpack.i.h.bf16 %v20908_v21  ;;  %v21321_v50 = vsel %vm1889_vm3, %v15810_v45, %v15824_v58  ;;  %v14667_v49 = vpack.c.bf16 %v11678_v23, %v20825_v62  ;;  %v22987_v21 = vld [vmem:[#allocation43_spill] sm:$0xff]  ;;  %v22988_v23 = vld [vmem:[#allocation42_spill] sm:$0xff] }
 0x827   :  { %14666 = vmatprep.subr.bf16.mxu0 %v14665_v15  ;;  %14670 = vmatprep.subr.bf16.mxu1 %v22985_v55  ;;  %v15834_v11 = vunpack.i.l.bf16 %v22986_v8  ;;  %v11680_v56 = vsel %vm1889_vm3, %v16020_v33, %v16024_v46  ;;  %v14673_v57 = vpack.c.bf16 %v11681_v22, %v11661_v16  ;;  %v11627_v12 = vsel %vm1889_vm3, %v15824_v58, %v15825_v24  ;;  %v22989_v15 = vld [vmem:[#allocation63_spill] sm:$0xff]  ;;  %v21338_v33 = vpop.permute.xlu1 %16042  ;;  %v22991_v55 = vld [vmem:[#allocation69_spill] sm:$0xff] }
 0x828   :  { %14292 = vmatmul.mubr.msk.f32.vlgmr.msra.gmra.mrb[62].mxu1 %vm10014_vm6, %v21179_v32  ;;  %v15839_v26 = vunpack.i.l.bf16 %v22987_v21  ;;  %v16035_v45 = vunpack.i.h.bf16 %v21249_v0  ;;  %v16034_v62 = vunpack.i.l.bf16 %v21249_v0  ;;  %v22990_v5 = vpack.c.bf16 %v22988_v23, %v22989_v15  ;;  %v22992_v16 = vld [vmem:[#allocation85_spill] sm:$0xff]  ;;  %v22994_v15 = vld [vmem:[#allocation130_spill] sm:$0xff] }
 0x829   :  { %v11683_v46 = vsel %vm1889_vm3, %v16029_v27, %v16030_v18  ;;  %v11662_v37 = vsel %vm1889_vm3, %v15805_v52, %v15819_v17  ;;  %v15835_v58 = vunpack.i.h.bf16 %v22986_v8  ;;  %v15840_v22 = vunpack.i.h.bf16 %v22987_v21  ;;  %12192 = vmatprep.mubr.f32.mxu1 %v22724_v44 }
 0x82a   :  { %14668 = vmatpush1.bf16.msra.mxu0 %v14667_v49  ;;  %14672 = vmatpush1.bf16.msra.mxu1 %v22990_v5  ;;  %v22993_v49 = vpack.c.bf16 %v22991_v55, %v22992_v16  ;;  %v21354_v23 = vsel %vm2842_vm4, %v15919_v6, %v15920_v14  ;;  %v14695_v5 = vpack.c.bf16 %v22994_v15, %v21321_v50  ;;  %v21373_v14 = vpop.permute.xlu0 %15982  ;;  %v16039_v55 = vunpack.i.l.bf16 %v21299_v3  ;;  %v23000_v15 = vld [vmem:[#allocation117_spill] sm:$0xff] }
 0x82b   :  { %14674 = vmatprep.subr.bf16.mxu1 %v14673_v57  ;;  %v14675_v52 = vpack.c.bf16 %v11680_v56, %v11660_v19  ;;  %v11663_v51 = vsel %vm1889_vm3, %v15819_v17, %v15820_v48  ;;  %v22995_v57 = vunpack.i.l.bf16 %v20915_v41  ;;  %v11664_v63 = vsel %vm1889_vm3, %v15820_v48, %v15834_v11  ;;  %v22996_v48 = vld [vmem:[#allocation61_spill] sm:$0xff] }
 0x82c   :  { %14678 = vmatprep.subr.bf16.mxu0 %v22993_v49  ;;  %v11682_v6 = vsel %vm1889_vm3, %v16025_v1, %v16029_v27  ;;  %v14681_v19 = vpack.c.bf16 %v11683_v46, %v11663_v51  ;;  %v14693_v17 = vpack.c.bf16 %v21269_v9, %v11627_v12  ;;  %v21377_v50 = vsel %vm1889_vm3, %v15825_v24, %v15839_v26  ;;  %v21384_v1 = vpop.permute.xlu1 %16057  ;;  %v22999_v27 = vld [vmem:[#allocation70_spill] sm:$0xff] }
 0x82d   :  { %v21365_v21 = vsel %vm2842_vm4, %v22995_v57, %v15935_v47  ;;  %14293 = vmatmul.mubr.msk.f32.vlgmr.msra.gmra.mrb[64].mxu0 %vm10014_vm6, %v21179_v32  ;;  %v16040_v56 = vunpack.i.h.bf16 %v21299_v3  ;;  %v22998_v16 = vpack.c.bf16 %v22996_v48, %v22997_v10  ;;  %v11685_v51 = vsel %vm1889_vm3, %v16034_v62, %v16035_v45 }
 0x82e   :  { %14676 = vmatpush1.bf16.msra.mxu1 %v14675_v52  ;;  %v15850_v9 = vunpack.i.h.bf16 %v22999_v27  ;;  %v15849_v24 = vunpack.i.l.bf16 %v22999_v27  ;;  %v11665_v12 = vsel %vm1889_vm3, %v15834_v11, %v15835_v58  ;;  %v11629_v46 = vsel %vm1889_vm3, %v15839_v26, %v15840_v22  ;;  %12263 = vmatprep.mubr.f32.mxu0 %v22724_v44 }
 0x82f   :  { %14680 = vmatpush1.bf16.msra.mxu0 %v22998_v16  ;;  %14686 = vmatprep.subr.bf16.mxu1 %v14685_v39  ;;  %v15859_v49 = vunpack.i.l.bf16 %v21049_v38  ;;  %v15915_v52 = vunpack.i.h.bf16 %v23000_v15  ;;  %v14683_v57 = vpack.c.bf16 %v11682_v6, %v11662_v37  ;;  %v23001_v48 = vunpack.i.h.bf16 %v20961_v31  ;;  %v23002_v39 = vld [vmem:[#allocation132_spill] sm:$0xff]  ;;  %v21413_v37 = vpop.permute.xlu0 %15987 }
 0x830   :  { %14682 = vmatprep.subr.bf16.mxu0 %v14681_v19  ;;  %v14703_v10 = vpack.c.bf16 %v23002_v39, %v21377_v50  ;;  %v15914_v11 = vunpack.i.l.bf16 %v23000_v15  ;;  %v11684_v26 = vsel %vm1889_vm3, %v16030_v18, %v16034_v62  ;;  %v14689_v22 = vpack.c.bf16 %v11685_v51, %v11665_v12  ;;  %v23003_v6 = vld [vmem:[#allocation72_spill] sm:$0xff]  ;;  %v21420_v27 = vpop.permute.xlu1 %16072  ;;  %v23006_v62 = vld [vmem:[#allocation15_spill] sm:$0xff]  ;;  %v23007_v12 = vld [vmem:[#allocation38_spill] sm:$0xff] }
 0x831   :  { %v21403_v19 = vsel %vm2842_vm4, %v15949_v20, %v23001_v48  ;;  %14294 = vmatmul.mubr.msk.f32.vlgmr.msra.gmra.mrb[64].mxu1 %vm10014_vm6, %v21179_v32  ;;  %v16045_v31 = vunpack.i.h.bf16 %v21338_v33  ;;  %v16044_v20 = vunpack.i.l.bf16 %v21338_v33  ;;  %v23004_v16 = vld [vmem:[#allocation108_spill] sm:$0xff]  ;;  %v11687_v53 = vsel %vm1889_vm3, %v16039_v55, %v16040_v56 }
 0x832   :  { %v23005_v50 = vpack.c.bf16 %v23003_v6, %v23004_v16  ;;  %v14701_v18 = vpack.c.bf16 %v21291_v28, %v11629_v46  ;;  %v15855_v15 = vunpack.i.h.bf16 %v23006_v62  ;;  %v15854_v51 = vunpack.i.l.bf16 %v23006_v62  ;;  %v23010_v6 = vld [vmem:[#allocation22_spill] sm:$0xff]  ;;  %12334 = vmatprep.mubr.f32.mxu1 %v22724_v44 }
 0x833   :  { %14684 = vmatpush1.bf16.msra.mxu0 %v14683_v57  ;;  %v11667_v33 = vsel %vm1889_vm3, %v15849_v24, %v15850_v9  ;;  %v23008_v57 = vunpack.i.h.bf16 %v23007_v12  ;;  %v23009_v48 = vunpack.i.l.bf16 %v23007_v12  ;;  %v15995_v16 = vunpack.i.h.bf16 %v23010_v6  ;;  %v21451_v60 = vpop.permute.xlu0 %15997 }
 0x834   :  { %14688 = vmatpush1.bf16.msra.mxu1 %v23005_v50  ;;  %14694 = vmatprep.subr.bf16.mxu0 %v14693_v17  ;;  %v12692_v28 = vsel %vm2842_vm4, %v15915_v52, %v15909_v34  ;;  %v14691_v46 = vpack.c.bf16 %v11684_v26, %v11664_v63  ;;  %v12673_v17 = vsel %vm2842_vm4, %v15859_v49, %v15860_v59  ;;  %v15945_v50 = vunpack.i.h.bf16 %v21169_v54  ;;  %v23011_v63 = vld [vmem:[#allocation74_spill] sm:$0xff]  ;;  %v21457_v59 = vpop.permute.xlu1 %16087 }
 0x835   :  { %14690 = vmatprep.subr.bf16.mxu1 %v14689_v22  ;;  %v21434_v39 = vsel %vm2842_vm4, %v23009_v48, %v23008_v57  ;;  %v12672_v22 = vsel %vm2842_vm4, %v15914_v11, %v15859_v49  ;;  %v11686_v62 = vsel %vm1889_vm3, %v16035_v45, %v16039_v55  ;;  %v14697_v34 = vpack.c.bf16 %v11687_v53, %v11667_v33  ;;  %v23012_v49 = vld [vmem:[#allocation128_spill] sm:$0xff] }
 0x836   :  { %14295 = vmatmul.mubr.msk.f32.vlgmr.msra.gmra.mrb[66].mxu0 %vm10014_vm6, %v21179_v32  ;;  %v15940_v52 = vunpack.i.h.bf16 %v23011_v63  ;;  %v11666_v38 = vsel %vm1889_vm3, %v15835_v58, %v15849_v24  ;;  %v11689_v0 = vsel %vm1889_vm3, %v16044_v20, %v16045_v31  ;;  %v23013_v45 = vunpack.i.h.bf16 %v23012_v49 }
 0x837   :  { %14696 = vmatpush1.bf16.msra.mxu0 %v14695_v5  ;;  %v23014_v55 = vunpack.i.l.bf16 %v23012_v49  ;;  %v11668_v26 = vsel %vm1889_vm3, %v15850_v9, %v15854_v51  ;;  %v15960_v53 = vunpack.i.h.bf16 %v21241_v4  ;;  %v15959_v8 = vunpack.i.l.bf16 %v21241_v4  ;;  %12405 = vmatprep.mubr.f32.mxu0 %v22724_v44 }
 0x838   :  { %14692 = vmatpush1.bf16.msra.mxu1 %v14691_v46  ;;  %14698 = vmatprep.subr.bf16.mxu0 %v14697_v34  ;;  %v11669_v58 = vsel %vm1889_vm3, %v15854_v51, %v15855_v15  ;;  %v14711_v5 = vpack.c.bf16 %v12692_v28, %v12672_v22  ;;  %v14699_v24 = vpack.c.bf16 %v11686_v62, %v11666_v38  ;;  %v23015_v33 = vunpack.i.l.bf16 %v23010_v6  ;;  %v23016_v28 = vld [vmem:[#allocation60_spill] sm:$0xff]  ;;  %v23017_v34 = vld [vmem:[#allocation55_spill] sm:$0xff] }
 0x839   :  { %v21465_v11 = vsel %vm2842_vm4, %v23014_v55, %v23013_v45  ;;  %14702 = vmatprep.subr.bf16.mxu1 %v14701_v18  ;;  %v14709_v31 = vpack.c.bf16 %v21316_v42, %v12673_v17  ;;  %v11688_v4 = vsel %vm1889_vm3, %v16040_v56, %v16044_v20  ;;  %v16048_v18 = vpop.permute.xlu0 %16047  ;;  %v14705_v15 = vpack.c.bf16 %v11689_v0, %v11669_v58  ;;  %v21495_v56 = vpop.permute.xlu1 %16102 }
 0x83a   :  { %v21478_v9 = vsel %vm2842_vm4, %v23015_v33, %v15995_v16  ;;  %v12695_v42 = vsel %vm2842_vm4, %v15929_v40, %v15930_v25  ;;  %v12677_v51 = vsel %vm2842_vm4, %v15944_v7, %v15945_v50  ;;  %v15955_v12 = vunpack.i.h.bf16 %v21215_v13  ;;  %v21553_v33 = vld [vmem:[%s21990_s3 + $0x9] sm:$0x7] }
 0x83b   :  { %14296 = vmatmul.mubr.msk.f32.vlgmr.msra.gmra.mrb[66].mxu1 %vm10014_vm6, %v21179_v32  ;;  %v15954_v3 = vunpack.i.l.bf16 %v21215_v13  ;;  %14700 = vmatpush1.bf16.msra.mxu0 %v14699_v24  ;;  %v16050_v20 = vunpack.i.h.bf16 %v16048_v18  ;;  %v16049_v57 = vunpack.i.l.bf16 %v16048_v18  ;;  %v21498_v48 = vsel %vm2842_vm4, %v15945_v50, %v15959_v8 }
 0x83c   :  { %14704 = vmatpush1.bf16.msra.mxu1 %v14703_v10  ;;  %v15969_v36 = vunpack.i.l.bf16 %v21286_v29  ;;  %v15975_v40 = vunpack.i.h.bf16 %v21329_v30  ;;  %14710 = vmatprep.subr.bf16.mxu0 %v14709_v31  ;;  %v21503_v25 = vsel %vm2842_vm4, %v15959_v8, %v15960_v53  ;;  %v14707_v54 = vpack.c.bf16 %v11688_v4, %v11668_v26 }
 0x83d   :  { %14706 = vmatprep.subr.bf16.mxu1 %v14705_v15  ;;  %v15974_v7 = vunpack.i.l.bf16 %v21329_v30  ;;  %v12732_v13 = vsel %vm2842_vm4, %v15940_v52, %v16049_v57  ;;  %12476 = vmatprep.mubr.f32.mxu1 %v22724_v44  ;;  %v12733_v10 = vsel %vm2842_vm4, %v16049_v57, %v16050_v20  ;;  %v21512_v17 = vpop.permute.xlu0 %16052  ;;  %v14717_v22 = vpack.c.bf16 %v12695_v42, %v21354_v23  ;;  %v16118_v38 = vpop.permute.xlu1 %16117 }
 0x83e   :  { %v14715_v46 = vpack.c.bf16 %v12732_v13, %v23016_v28  ;;  %14297 = vmatmul.mubr.msk.f32.vlgmr.msra.gmra.mrb[68].mxu0 %vm10014_vm6, %v21179_v32  ;;  %v14713_v50 = vpack.c.bf16 %v12733_v10, %v21365_v21  ;;  %v14725_v62 = vpack.c.bf16 %v21403_v19, %v12677_v51  ;;  %v12714_v30 = vsel %vm2842_vm4, %v15935_v47, %v15954_v3 }
 0x83f   :  { %v14735_v63 = vpack.c.bf16 %v23017_v34, %v21498_v48  ;;  %v15970_v52 = vunpack.i.h.bf16 %v21286_v29  ;;  %14712 = vmatpush1.bf16.msra.mxu0 %v14711_v5  ;;  %v12715_v0 = vsel %vm2842_vm4, %v15954_v3, %v15955_v12  ;;  %v21525_v23 = vsel %vm2842_vm4, %v15955_v12, %v15969_v36  ;;  %12899 = vmatprep.mubr.f32.mxu0 %v22724_v44 }
 0x840   :  { %14708 = vmatpush1.bf16.msra.mxu1 %v14707_v54  ;;  %v16120_v21 = vunpack.i.h.bf16 %v16118_v38  ;;  %v16119_v49 = vunpack.i.l.bf16 %v16118_v38  ;;  %14714 = vmatprep.subr.bf16.mxu0 %v14713_v50  ;;  %v14733_v41 = vpack.c.bf16 %v21434_v39, %v21503_v25  ;;  %v21530_v47 = vsel %vm2842_vm4, %v15960_v53, %v15974_v7 }
 0x841   :  { %14718 = vmatprep.subr.bf16.mxu1 %v14717_v22  ;;  %v15985_v29 = vunpack.i.h.bf16 %v21373_v14  ;;  %v15984_v19 = vunpack.i.l.bf16 %v21373_v14  ;;  %v21536_v45 = vsel %vm2842_vm4, %v15974_v7, %v15975_v40  ;;  %v15990_v55 = vunpack.i.h.bf16 %v21413_v37  ;;  %v21543_v39 = vpop.permute.xlu0 %16062  ;;  %v16123_v31 = vpop.permute.xlu1 %16122 }
 0x842   :  { %v15989_v26 = vunpack.i.l.bf16 %v21413_v37  ;;  %v12734_v8 = vsel %vm2842_vm4, %v16050_v20, %v16119_v49  ;;  %v12735_v53 = vsel %vm2842_vm4, %v16119_v49, %v16120_v21  ;;  %v16059_v58 = vunpack.i.l.bf16 %v21384_v1 }
 0x843   :  { %14298 = vmatmul.mubr.msk.f32.vlgmr.msra.gmra.mrb[68].mxu1 %vm10014_vm6, %v21179_v32  ;;  %v14723_v5 = vpack.c.bf16 %v12734_v8, %v12714_v30  ;;  %14716 = vmatpush1.bf16.msra.mxu0 %v14715_v46  ;;  %v23018_v24 = vpack.c.bf16 %v21160_v2, %v21152_v35  ;;  %v14721_v4 = vpack.c.bf16 %v12735_v53, %v12715_v0  ;;  %v16060_v18 = vunpack.i.h.bf16 %v21384_v1  ;;  %v23019_v35 = vld [vmem:[#allocation30_spill] sm:$0xff] }
 0x844   :  { %v12717_v32 = vsel %vm2842_vm4, %v15969_v36, %v15970_v52  ;;  %v16074_v15 = vunpack.i.l.bf16 %v21420_v27  ;;  %v16125_v42 = vunpack.i.h.bf16 %v16123_v31  ;;  %v16124_v51 = vunpack.i.l.bf16 %v16123_v31  ;;  %14726 = vmatprep.subr.bf16.mxu0 %v14725_v62  ;;  %12970 = vmatprep.mubr.f32.mxu1 %v22724_v44 }
 0x845   :  { %14720 = vmatpush1.bf16.msra.mxu1 %v23018_v24  ;;  %v14743_v2 = vpack.c.bf16 %v23019_v35, %v21530_v47  ;;  %v12718_v12 = vsel %vm2842_vm4, %v15970_v52, %v15984_v19  ;;  %v14741_v3 = vpack.c.bf16 %v21465_v11, %v21536_v45  ;;  %v12719_v1 = vsel %vm2842_vm4, %v15984_v19, %v15985_v29  ;;  %v21573_v36 = vpop.permute.xlu0 %16067  ;;  %v16128_v10 = vpop.permute.xlu1 %16127 }
 0x846   :  { %14722 = vmatprep.subr.bf16.mxu1 %v14721_v4  ;;  %v21568_v20 = vsel %vm2842_vm4, %v15975_v40, %v15989_v26  ;;  %v12736_v57 = vsel %vm2842_vm4, %v16120_v21, %v16124_v51  ;;  %14299 = vmatmul.mubr.msk.f32.vlgmr.msra.gmra.mrb[60].mxu0 %vm10014_vm6, %v21553_v33  ;;  %v12737_v25 = vsel %vm2842_vm4, %v16124_v51, %v16125_v42  ;;  %v16075_v40 = vunpack.i.h.bf16 %v21420_v27 }
 0x847   :  { %v12683_v11 = vsel %vm2842_vm4, %v15989_v26, %v15990_v55  ;;  %v21582_v54 = vsel %vm2842_vm4, %v15995_v16, %v16059_v58  ;;  %v14731_v7 = vpack.c.bf16 %v12736_v57, %v21525_v23  ;;  %v23020_v13 = vpack.c.bf16 %v21193_v61, %v21200_v43  ;;  %13041 = vmatprep.mubr.f32.mxu0 %v22724_v44  ;;  %v23021_v16 = vld [vmem:[#allocation66_spill] sm:$0xff] }
 0x848   :  { %v14729_v28 = vpack.c.bf16 %v12737_v25, %v12717_v32  ;;  %v21590_v46 = vsel %vm2842_vm4, %v16060_v18, %v16074_v15  ;;  %v16130_v22 = vunpack.i.h.bf16 %v16128_v10  ;;  %v16129_v50 = vunpack.i.l.bf16 %v16128_v10 }
 0x849   :  { %14724 = vmatpush1.bf16.msra.mxu1 %v14723_v5  ;;  %14728 = vmatpush1.bf16.msra.mxu0 %v23020_v13  ;;  %v21594_v6 = vsel %vm2842_vm4, %v16059_v58, %v16060_v18  ;;  %v14751_v62 = vpack.c.bf16 %v23021_v16, %v21568_v20  ;;  %v16055_v30 = vunpack.i.h.bf16 %v21512_v17  ;;  %v16054_v61 = vunpack.i.l.bf16 %v21512_v17  ;;  %v21606_v23 = vpop.permute.xlu0 %16077 }
 0x84a   :  { %14734 = vmatprep.subr.bf16.mxu1 %v14733_v41  ;;  %14730 = vmatprep.subr.bf16.mxu0 %v14729_v28  ;;  %v14749_v43 = vpack.c.bf16 %v21478_v9, %v12683_v11  ;;  %v16000_v52 = vunpack.i.h.bf16 %v21451_v60  ;;  %v15999_v38 = vunpack.i.l.bf16 %v21451_v60  ;;  %v12738_v0 = vsel %vm2842_vm4, %v16125_v42, %v16129_v50  ;;  %v16133_v9 = vpop.permute.xlu1 %16132 }
 0x84b   :  { %v12739_v21 = vsel %vm2842_vm4, %v16129_v50, %v16130_v22  ;;  %v14739_v49 = vpack.c.bf16 %v12738_v0, %v12718_v12  ;;  %v21615_v60 = vsel %vm2842_vm4, %v16074_v15, %v16075_v40  ;;  %v16090_v47 = vunpack.i.h.bf16 %v21457_v59 }
 0x84c   :  { %14300 = vmatmul.mubr.msk.f32.vlgmr.msra.gmra.mrb[60].mxu1 %vm10014_vm6, %v21553_v33  ;;  %v14737_v41 = vpack.c.bf16 %v12739_v21, %v12719_v1  ;;  %v16064_v19 = vunpack.i.l.bf16 %v21543_v39  ;;  %v16135_v45 = vunpack.i.h.bf16 %v16133_v9  ;;  %v16134_v26 = vunpack.i.l.bf16 %v16133_v9 }
 0x84d   :  { %14732 = vmatpush1.bf16.msra.mxu0 %v14731_v7  ;;  %14736 = vmatpush1.bf16.msra.mxu1 %v14735_v63  ;;  %v16065_v8 = vunpack.i.h.bf16 %v21543_v39  ;;  %v16070_v48 = vunpack.i.h.bf16 %v21573_v36  ;;  %v16069_v34 = vunpack.i.l.bf16 %v21573_v36  ;;  %v12685_v63 = vsel %vm2842_vm4, %v16054_v61, %v16055_v30  ;;  %v21632_v5 = vpop.permute.xlu0 %16082 }
 0x84e   :  { %14742 = vmatprep.subr.bf16.mxu0 %v14741_v3  ;;  %13112 = vmatprep.mubr.f32.mxu1 %v22724_v44  ;;  %v12720_v53 = vsel %vm2842_vm4, %v15985_v29, %v15999_v38  ;;  %v12740_v58 = vsel %vm2842_vm4, %v16130_v22, %v16134_v26  ;;  %v12721_v39 = vsel %vm2842_vm4, %v15999_v38, %v16000_v52  ;;  %v16089_v31 = vunpack.i.l.bf16 %v21457_v59  ;;  %v16138_v29 = vpop.permute.xlu1 %16137 }
 0x84f   :  { %14738 = vmatprep.subr.bf16.mxu1 %v14737_v41  ;;  %v12741_v24 = vsel %vm2842_vm4, %v16134_v26, %v16135_v45  ;;  %v12684_v4 = vsel %vm2842_vm4, %v15990_v55, %v16054_v61  ;;  %v14747_v14 = vpack.c.bf16 %v12740_v58, %v12720_v53  ;;  %v12722_v18 = vsel %vm2842_vm4, %v16000_v52, %v16064_v19 }
 0x850   :  { %14301 = vmatmul.mubr.msk.f32.vlgmr.msra.gmra.mrb[62].mxu0 %vm10014_vm6, %v21553_v33  ;;  %v14745_v32 = vpack.c.bf16 %v12741_v24, %v12721_v39  ;;  %v16140_v15 = vunpack.i.h.bf16 %v16138_v29  ;;  %v16139_v42 = vunpack.i.l.bf16 %v16138_v29  ;;  %v14757_v51 = vpack.c.bf16 %v21594_v6, %v12685_v63 }
 0x851   :  { %14740 = vmatpush1.bf16.msra.mxu1 %v14739_v49  ;;  %14744 = vmatpush1.bf16.msra.mxu0 %v14743_v2  ;;  %v16080_v35 = vunpack.i.h.bf16 %v21606_v23  ;;  %v16079_v37 = vunpack.i.l.bf16 %v21606_v23  ;;  %v12723_v55 = vsel %vm2842_vm4, %v16064_v19, %v16065_v8  ;;  %v12687_v2 = vsel %vm2842_vm4, %v16069_v34, %v16070_v48  ;;  %v21654_v20 = vpop.permute.xlu0 %16092 }
 0x852   :  { %14750 = vmatprep.subr.bf16.mxu1 %v14749_v43  ;;  %13183 = vmatprep.mubr.f32.mxu0 %v22724_v44  ;;  %v12742_v12 = vsel %vm2842_vm4, %v16135_v45, %v16139_v42  ;;  %v16085_v3 = vunpack.i.h.bf16 %v21632_v5  ;;  %v16084_v1 = vunpack.i.l.bf16 %v21632_v5  ;;  %v12743_v57 = vsel %vm2842_vm4, %v16139_v42, %v16140_v15  ;;  %v16143_v11 = vpop.permute.xlu1 %16142 }
 0x853   :  { %14746 = vmatprep.subr.bf16.mxu0 %v14745_v32  ;;  %v14755_v25 = vpack.c.bf16 %v12742_v12, %v12722_v18  ;;  %v14753_v7 = vpack.c.bf16 %v12743_v57, %v12723_v55  ;;  %v12709_v13 = vsel %vm2842_vm4, %v16089_v31, %v16090_v47  ;;  %v14759_v10 = vpack.c.bf16 %v21582_v54, %v12684_v4 }
 0x854   :  { %14302 = vmatmul.mubr.msk.f32.vlgmr.msra.gmra.mrb[62].mxu1 %vm10014_vm6, %v21553_v33  ;;  %v12686_v28 = vsel %vm2842_vm4, %v16055_v30, %v16069_v34  ;;  %v16145_v22 = vunpack.i.h.bf16 %v16143_v11  ;;  %v16144_v50 = vunpack.i.l.bf16 %v16143_v11  ;;  %v12724_v6 = vsel %vm2842_vm4, %v16065_v8, %v16079_v37 }
 0x855   :  { %14748 = vmatpush1.bf16.msra.mxu0 %v14747_v14  ;;  %14752 = vmatpush1.bf16.msra.mxu1 %v14751_v62  ;;  %v16094_v16 = vunpack.i.l.bf16 %v21654_v20  ;;  %v14765_v62 = vpack.c.bf16 %v21615_v60, %v12687_v2  ;;  %v12725_v61 = vsel %vm2842_vm4, %v16079_v37, %v16080_v35  ;;  %v16095_v17 = vunpack.i.h.bf16 %v21654_v20  ;;  %v16098_v30 = vpop.permute.xlu0 %16097 }
 0x856   :  { %14758 = vmatprep.subr.bf16.mxu0 %v14757_v51  ;;  %13254 = vmatprep.mubr.f32.mxu1 %v22724_v44  ;;  %v12744_v54 = vsel %vm2842_vm4, %v16140_v15, %v16144_v50  ;;  %v12745_v43 = vsel %vm2842_vm4, %v16144_v50, %v16145_v22  ;;  %v12689_v52 = vsel %vm2842_vm4, %v16084_v1, %v16085_v3  ;;  %v16148_v0 = vpop.permute.xlu1 %16147  ;;  %v16100_v23 = vunpack.i.h.bf16 %v16098_v30 }
 0x857   :  { %14754 = vmatprep.subr.bf16.mxu1 %v14753_v7  ;;  %v14763_v38 = vpack.c.bf16 %v12744_v54, %v12724_v6  ;;  %v16099_v21 = vunpack.i.l.bf16 %v16098_v30  ;;  %v14761_v49 = vpack.c.bf16 %v12745_v43, %v12725_v61  ;;  %v16105_v9 = vunpack.i.h.bf16 %v21495_v56  ;;  %v23023_v6 = vld [vmem:[#allocation5_spill] sm:$0xff]  ;;  %v23024_v54 = vld [vmem:[#allocation6_spill] sm:$0xff]  ;;  %v23025_v30 = vld [vmem:[#allocation7_spill] sm:$0xff] }
 0x858   :  { %14303 = vmatmul.mubr.msk.f32.vlgmr.msra.gmra.mrb[64].mxu0 %vm10014_vm6, %v21553_v33  ;;  %v16104_v41 = vunpack.i.l.bf16 %v21495_v56  ;;  %v16150_v60 = vunpack.i.h.bf16 %v16148_v0  ;;  %v16149_v19 = vunpack.i.l.bf16 %v16148_v0  ;;  %v14767_v45 = vpack.c.bf16 %v21590_v46, %v12686_v28  ;;  %v13565_v28 = vld [vmem:[%s21991_s12] sm:$0xff] }
 0x859   :  { %14756 = vmatpush1.bf16.msra.mxu1 %v14755_v25  ;;  %14760 = vmatpush1.bf16.msra.mxu0 %v14759_v10  ;;  %v12688_v26 = vsel %vm2842_vm4, %v16070_v48, %v16084_v1  ;;  %v12726_v8 = vsel %vm2842_vm4, %v16080_v35, %v16094_v16  ;;  %v14773_v34 = vpack.c.bf16 %v12709_v13, %v12689_v52  ;;  %v16108_v56 = vpop.permute.xlu0 %16107 }
 0x85a   :  { %14766 = vmatprep.subr.bf16.mxu1 %v14765_v62  ;;  %13325 = vmatprep.mubr.f32.mxu0 %v22724_v44  ;;  %v12746_v63 = vsel %vm2842_vm4, %v16145_v22, %v16149_v19  ;;  %v12727_v53 = vsel %vm2842_vm4, %v16094_v16, %v16095_v17  ;;  %v12747_v58 = vsel %vm2842_vm4, %v16149_v19, %v16150_v60  ;;  %v16153_v36 = vpop.permute.xlu1 %16152  ;;  %v16110_v48 = vunpack.i.h.bf16 %v16108_v56  ;;  %v23022_v22 = vld [vmem:[#allocation4_spill] sm:$0xff] }
 0x85b   :  { %14762 = vmatprep.subr.bf16.mxu0 %v14761_v49  ;;  %v12691_v46 = vsel %vm2842_vm4, %v16099_v21, %v16100_v23  ;;  %v14771_v39 = vpack.c.bf16 %v12746_v63, %v12726_v8  ;;  %v16109_v24 = vunpack.i.l.bf16 %v16108_v56  ;;  %v14769_v4 = vpack.c.bf16 %v12747_v58, %v12727_v53  ;;  %v23026_v19 = vld [vmem:[#allocation8_spill] sm:$0xff] }
 0x85c   :  { %14304 = vmatmul.mubr.msk.f32.vlgmr.msra.gmra.mrb[64].mxu1 %vm10014_vm6, %v21553_v33  ;;  %v12708_v14 = vsel %vm2842_vm4, %v16075_v40, %v16089_v31  ;;  %v16155_v29 = vunpack.i.h.bf16 %v16153_v36  ;;  %v16154_v32 = vunpack.i.l.bf16 %v16153_v36  ;;  %v12711_v42 = vsel %vm2842_vm4, %v16104_v41, %v16105_v9 }
 0x85d   :  { %14764 = vmatpush1.bf16.msra.mxu0 %v14763_v38  ;;  %14768 = vmatpush1.bf16.msra.mxu1 %v14767_v45  ;;  %v14775_v18 = vpack.c.bf16 %v12708_v14, %v12688_v26  ;;  %v12728_v15 = vsel %vm2842_vm4, %v16095_v17, %v16109_v24  ;;  %v12729_v51 = vsel %vm2842_vm4, %v16109_v24, %v16110_v48  ;;  %v16113_v40 = vpop.permute.xlu0 %16112 }
 0x85e   :  { %14774 = vmatprep.subr.bf16.mxu0 %v14773_v34  ;;  %13396 = vmatprep.mubr.f32.mxu1 %v22724_v44  ;;  %v12690_v35 = vsel %vm2842_vm4, %v16085_v3, %v16099_v21  ;;  %v12748_v27 = vsel %vm2842_vm4, %v16150_v60, %v16154_v32  ;;  %v14781_v31 = vpack.c.bf16 %v12711_v42, %v12691_v46  ;;  %v16158_v2 = vpop.permute.xlu1 %16157  ;;  %v16115_v12 = vunpack.i.h.bf16 %v16113_v40  ;;  %v23027_v34 = vld [vmem:[#allocation9_spill] sm:$0xff] }
 0x85f   :  { %14770 = vmatprep.subr.bf16.mxu1 %v14769_v4  ;;  %v12749_v37 = vsel %vm2842_vm4, %v16154_v32, %v16155_v29  ;;  %v14779_v55 = vpack.c.bf16 %v12748_v27, %v12728_v15  ;;  %v16114_v1 = vunpack.i.l.bf16 %v16113_v40  ;;  %v12710_v5 = vsel %vm2842_vm4, %v16090_v47, %v16104_v41  ;;  %v13566_v40 = vld [vmem:[%s21991_s12 + $0x8] sm:$0xff] }
 0x860   :  { %14305 = vmatmul.mubr.msk.f32.vlgmr.msra.gmra.mrb[66].mxu0 %vm10014_vm6, %v21553_v33  ;;  %v14777_v20 = vpack.c.bf16 %v12749_v37, %v12729_v51  ;;  %v16160_v3 = vunpack.i.h.bf16 %v16158_v2  ;;  %v16159_v57 = vunpack.i.l.bf16 %v16158_v2  ;;  %v14783_v25 = vpack.c.bf16 %v12710_v5, %v12690_v35 }
 0x861   :  { %14772 = vmatpush1.bf16.msra.mxu1 %v14771_v39  ;;  %14776 = vmatpush1.bf16.msra.mxu0 %v14775_v18  ;;  %v12730_v11 = vsel %vm2842_vm4, %v16110_v48, %v16114_v1  ;;  %v12731_v7 = vsel %vm2842_vm4, %v16114_v1, %v16115_v12  ;;  %v21728_v50 = vrot.slane %v13565_v28, %v23022_v22  ;;  %v23029_v18 = vld [vmem:[#allocation11_spill] sm:$0xff] }
 0x862   :  { %14782 = vmatprep.subr.bf16.mxu1 %v14781_v31  ;;  %13467 = vmatprep.mubr.f32.mxu0 %v22724_v44  ;;  %v12750_v13 = vsel %vm2842_vm4, %v16155_v29, %v16159_v57  ;;  %v12751_v59 = vsel %vm2842_vm4, %v16159_v57, %v16160_v3  ;;  %v21731_v16 = vrot.slane %v13565_v28, %v23023_v6  ;;  %v23028_v29 = vld [vmem:[#allocation10_spill] sm:$0xff] }
 0x863   :  { %14778 = vmatprep.subr.bf16.mxu0 %v14777_v20  ;;  %v14787_v10 = vpack.c.bf16 %v12750_v13, %v12730_v11  ;;  %v14785_v47 = vpack.c.bf16 %v12751_v59, %v12731_v7  ;;  %v21740_v17 = vrot.slane %v13565_v28, %v23024_v54  ;;  %v21745_v43 = vrot.slane %v13565_v28, %v23025_v30 }
 0x864   :  { %14306 = vmatmul.mubr.msk.f32.vlgmr.msra.gmra.mrb[66].mxu1 %vm10014_vm6, %v21553_v33  ;;  %v21757_v45 = vrot.slane %v13565_v28, %v23026_v19  ;;  %v21763_v63 = vrot.slane %v13565_v28, %v23027_v34  ;;  %v21775_v32 = vrot.slane %v13565_v28, %v23028_v29  ;;  %v21778_v15 = vrot.slane %v13565_v28, %v23029_v18 }
 0x865   :  { %14780 = vmatpush1.bf16.msra.mxu0 %v14779_v55  ;;  %14784 = vmatpush1.bf16.msra.mxu1 %v14783_v25  ;;  %v21796_v25 = vrot.slane %v13566_v40, %v23022_v22  ;;  %v21799_v11 = vrot.slane %v13566_v40, %v23023_v6 }
 0x866   :  { %13538 = vmatprep.mubr.f32.mxu1 %v22724_v44  ;;  %14786 = vmatprep.subr.bf16.mxu1 %v14785_v47 }
 0x868   :  { %14307 = vmatmul.mubr.msk.f32.vlgmr.msra.gmra.mrb[68].mxu0 %vm10014_vm6, %v21553_v33 }
 0x869   :  { %14788 = vmatpush1.bf16.msra.mxu1 %v14787_v10 }
 0x86c   :  { %14308 = vmatmul.mubr.msk.f32.vlgmr.msra.gmra.mrb[68].mxu1 %vm10014_vm6, %v21553_v33 }
 0x919   :  { %v21733_v62 = vpop.f32.mrb[60].mxu0 }
 0x91a   :  { %v13671_v44 = vmul.f32 %v21728_v50, %v21733_v62  ;;  %v21737_v61 = vpop.f32.mrb[61].mxu0 }
 0x91b   :  { %v13672_v33 = vmul.f32 %v21731_v16, %v21737_v61 }
 0x91c   :  { %v13691_v52 = vsel %vm166_vm1, %v13671_v44, 0.0  ;;  %v13732_v38 = vmul.f32 %v13671_v44, %v13671_v44 }
 0x91d   :  { %v13692_v0 = vsel %vm166_vm1, %v13672_v33, 0.0  ;;  %v13733_v23 = vmul.f32 %v13672_v33, %v13672_v33 }
 0x91e   :  { %v13752_v49 = vsel %vm166_vm1, %v13732_v38, 0.0  ;;  %v13693_v9 = vadd.f32 %v13692_v0, %v13691_v52 }
 0x91f   :  { %v21749_v21 = vpop.f32.mrb[60].mxu1  ;;  %v13753_v26 = vsel %vm166_vm1, %v13733_v23, 0.0 }
 0x920   :  { %v13673_v41 = vmul.f32 %v21740_v17, %v21749_v21  ;;  %v21754_v60 = vpop.f32.mrb[61].mxu1  ;;  %v13754_v56 = vadd.f32 %v13753_v26, %v13752_v49  ;;  %v21817_v26 = vrot.slane %v13566_v40, %v23025_v30 }
 0x921   :  { %v13674_v8 = vmul.f32 %v21745_v43, %v21754_v60 }
 0x922   :  { %v13694_v53 = vsel %vm166_vm1, %v13673_v41, 0.0  ;;  %v13734_v58 = vmul.f32 %v13673_v41, %v13673_v41  ;;  %v21814_v41 = vrot.slane %v13566_v40, %v23024_v54 }
 0x923   :  { %v13695_v46 = vadd.f32 %v13694_v53, %v13693_v9  ;;  %v13696_v39 = vsel %vm166_vm1, %v13674_v8, 0.0  ;;  %v13735_v36 = vmul.f32 %v13674_v8, %v13674_v8  ;;  %v21767_v48 = vpop.f32.mrb[62].mxu0 }
 0x924   :  { %v13755_v24 = vsel %vm166_vm1, %v13734_v58, 0.0  ;;  %v13675_v4 = vmul.f32 %v21757_v45, %v21767_v48  ;;  %v21772_v14 = vpop.f32.mrb[63].mxu0 }
 0x925   :  { %v13756_v42 = vadd.f32 %v13755_v24, %v13754_v56  ;;  %v13697_v51 = vadd.f32 %v13696_v39, %v13695_v46  ;;  %v13757_v35 = vsel %vm166_vm1, %v13735_v36, 0.0  ;;  %v13676_v27 = vmul.f32 %v21763_v63, %v21772_v14 }
 0x926   :  { %v13698_v31 = vsel %vm166_vm1, %v13675_v4, 0.0  ;;  %v13736_v37 = vmul.f32 %v13675_v4, %v13675_v4 }
 0x927   :  { %v13758_v55 = vadd.f32 %v13757_v35, %v13756_v42  ;;  %v13699_v2 = vadd.f32 %v13698_v31, %v13697_v51  ;;  %v13700_v12 = vsel %vm166_vm1, %v13676_v27, 0.0  ;;  %v13737_v1 = vmul.f32 %v13676_v27, %v13676_v27  ;;  %v21788_v20 = vpop.f32.mrb[62].mxu1 }
 0x928   :  { %v13759_v5 = vsel %vm166_vm1, %v13736_v37, 0.0  ;;  %v13677_v3 = vmul.f32 %v21775_v32, %v21788_v20  ;;  %v21793_v57 = vpop.f32.mrb[63].mxu1  ;;  %v21832_v37 = vrot.slane %v13566_v40, %v23026_v19 }
 0x929   :  { %v13760_v7 = vadd.f32 %v13759_v5, %v13758_v55  ;;  %v13701_v13 = vadd.f32 %v13700_v12, %v13699_v2  ;;  %v13761_v59 = vsel %vm166_vm1, %v13737_v1, 0.0  ;;  %v13678_v10 = vmul.f32 %v21778_v15, %v21793_v57 }
 0x92a   :  { %v13702_v47 = vsel %vm166_vm1, %v13677_v3, 0.0  ;;  %v13738_v28 = vmul.f32 %v13677_v3, %v13677_v3  ;;  %v21835_v55 = vrot.slane %v13566_v40, %v23027_v34 }
 0x92b   :  { %v13762_v44 = vadd.f32 %v13761_v59, %v13760_v7  ;;  %v13703_v33 = vadd.f32 %v13702_v47, %v13701_v13  ;;  %v13704_v52 = vsel %vm166_vm1, %v13678_v10, 0.0  ;;  %v13739_v38 = vmul.f32 %v13678_v10, %v13678_v10  ;;  %v21806_v0 = vpop.f32.mrb[64].mxu0 }
 0x92c   :  { %v13763_v23 = vsel %vm166_vm1, %v13738_v28, 0.0  ;;  %v13679_v49 = vmul.f32 %v21796_v25, %v21806_v0  ;;  %v21811_v9 = vpop.f32.mrb[65].mxu0 }
 0x92d   :  { %v13764_v8 = vadd.f32 %v13763_v23, %v13762_v44  ;;  %v13705_v56 = vadd.f32 %v13704_v52, %v13703_v33  ;;  %v13765_v53 = vsel %vm166_vm1, %v13739_v38, 0.0  ;;  %v13680_v58 = vmul.f32 %v21799_v11, %v21811_v9 }
 0x92e   :  { %v13706_v46 = vsel %vm166_vm1, %v13679_v49, 0.0  ;;  %v13740_v39 = vmul.f32 %v13679_v49, %v13679_v49  ;;  %v21850_v33 = vrot.slane %v13566_v40, %v23028_v29  ;;  %v21853_v52 = vrot.slane %v13566_v40, %v23029_v18 }
 0x92f   :  { %v13766_v36 = vadd.f32 %v13765_v53, %v13764_v8  ;;  %v13707_v24 = vadd.f32 %v13706_v46, %v13705_v56  ;;  %v13708_v4 = vsel %vm166_vm1, %v13680_v58, 0.0  ;;  %v13741_v42 = vmul.f32 %v13680_v58, %v13680_v58  ;;  %v21824_v51 = vpop.f32.mrb[64].mxu1  ;;  %v13567_v56 = vld [vmem:[%s21991_s12 + $0x10] sm:$0xf] }
 0x930   :  { %v13767_v35 = vsel %vm166_vm1, %v13740_v39, 0.0  ;;  %v13681_v27 = vmul.f32 %v21814_v41, %v21824_v51  ;;  %v21829_v31 = vpop.f32.mrb[65].mxu1 }
 0x931   :  { %v13768_v2 = vadd.f32 %v13767_v35, %v13766_v36  ;;  %v13709_v12 = vadd.f32 %v13708_v4, %v13707_v24  ;;  %v13769_v1 = vsel %vm166_vm1, %v13741_v42, 0.0  ;;  %v13682_v5 = vmul.f32 %v21817_v26, %v21829_v31 }
 0x932   :  { %v13710_v3 = vsel %vm166_vm1, %v13681_v27, 0.0  ;;  %v13742_v7 = vmul.f32 %v13681_v27, %v13681_v27  ;;  %v21871_v42 = vrot.slane %v13567_v56, %v23022_v22  ;;  %v21874_v35 = vrot.slane %v13567_v56, %v23023_v6 }
 0x933   :  { %v13770_v13 = vadd.f32 %v13769_v1, %v13768_v2  ;;  %v13711_v59 = vadd.f32 %v13710_v3, %v13709_v12  ;;  %v13712_v10 = vsel %vm166_vm1, %v13682_v5, 0.0  ;;  %v13743_v47 = vmul.f32 %v13682_v5, %v13682_v5  ;;  %v21842_v19 = vpop.f32.mrb[66].mxu0 }
 0x934   :  { %v13771_v34 = vsel %vm166_vm1, %v13742_v7, 0.0  ;;  %v13683_v28 = vmul.f32 %v21832_v37, %v21842_v19  ;;  %v21847_v44 = vpop.f32.mrb[67].mxu0 }
 0x935   :  { %v13772_v38 = vadd.f32 %v13771_v34, %v13770_v13  ;;  %v13713_v23 = vadd.f32 %v13712_v10, %v13711_v59  ;;  %v13773_v49 = vsel %vm166_vm1, %v13743_v47, 0.0  ;;  %v13684_v8 = vmul.f32 %v21835_v55, %v21847_v44 }
 0x936   :  { %v13714_v53 = vsel %vm166_vm1, %v13683_v28, 0.0  ;;  %v13744_v58 = vmul.f32 %v13683_v28, %v13683_v28  ;;  %v21889_v28 = vrot.slane %v13567_v56, %v23024_v54 }
 0x937   :  { %v13774_v46 = vadd.f32 %v13773_v49, %v13772_v38  ;;  %v13715_v29 = vadd.f32 %v13714_v53, %v13713_v23  ;;  %v13716_v39 = vsel %vm166_vm1, %v13684_v8, 0.0  ;;  %v13745_v18 = vmul.f32 %v13684_v8, %v13684_v8  ;;  %v21863_v40 = vpop.f32.mrb[66].mxu1 }
 0x938   :  { %v13775_v36 = vsel %vm166_vm1, %v13744_v58, 0.0  ;;  %v13685_v24 = vmul.f32 %v21850_v33, %v21863_v40  ;;  %v21868_v4 = vpop.f32.mrb[67].mxu1  ;;  %v21892_v38 = vrot.slane %v13567_v56, %v23025_v30 }
 0x939   :  { %v13776_v27 = vadd.f32 %v13775_v36, %v13774_v46  ;;  %v13717_v2 = vadd.f32 %v13716_v39, %v13715_v29  ;;  %v13777_v12 = vsel %vm166_vm1, %v13745_v18, 0.0  ;;  %v13686_v1 = vmul.f32 %v21853_v52, %v21868_v4 }
 0x93a   :  { %v13718_v5 = vsel %vm166_vm1, %v13685_v24, 0.0  ;;  %v13746_v3 = vmul.f32 %v13685_v24, %v13685_v24 }
 0x93b   :  { %v13778_v7 = vadd.f32 %v13777_v12, %v13776_v27  ;;  %v13719_v13 = vadd.f32 %v13718_v5, %v13717_v2  ;;  %v13720_v59 = vsel %vm166_vm1, %v13686_v1, 0.0  ;;  %v13747_v10 = vmul.f32 %v13686_v1, %v13686_v1  ;;  %v21881_v22 = vpop.f32.mrb[68].mxu0 }
 0x93c   :  { %v13779_v6 = vsel %vm166_vm1, %v13746_v3, 0.0  ;;  %v13687_v47 = vmul.f32 %v21871_v42, %v21881_v22  ;;  %v21886_v34 = vpop.f32.mrb[69].mxu0 }
 0x93d   :  { %v13780_v23 = vadd.f32 %v13779_v6, %v13778_v7  ;;  %v13721_v49 = vadd.f32 %v13720_v59, %v13719_v13  ;;  %v13781_v8 = vsel %vm166_vm1, %v13747_v10, 0.0  ;;  %v13688_v53 = vmul.f32 %v21874_v35, %v21886_v34 }
 0x93e   :  { %v13722_v58 = vsel %vm166_vm1, %v13687_v47, 0.0  ;;  %v13748_v46 = vmul.f32 %v13687_v47, %v13687_v47 }
 0x93f   :  { %v13782_v29 = vadd.f32 %v13781_v8, %v13780_v23  ;;  %v13723_v39 = vadd.f32 %v13722_v58, %v13721_v49  ;;  %v13724_v18 = vsel %vm166_vm1, %v13688_v53, 0.0  ;;  %v13749_v36 = vmul.f32 %v13688_v53, %v13688_v53  ;;  %v13540_v54 = vpop.f32.mrb[68].mxu1 }
 0x940   :  { %v13783_v24 = vsel %vm166_vm1, %v13748_v46, 0.0  ;;  %v13689_v30 = vmul.f32 %v21889_v28, %v13540_v54  ;;  %v13542_v56 = vpop.f32.mrb[69].mxu1 }
 0x941   :  { %v13784_v27 = vadd.f32 %v13783_v24, %v13782_v29  ;;  %v13725_v2 = vadd.f32 %v13724_v18, %v13723_v39  ;;  %v13785_v12 = vsel %vm166_vm1, %v13749_v36, 0.0  ;;  %v13690_v1 = vmul.f32 %v21892_v38, %v13542_v56 }
 0x942   :  { %v13726_v5 = vsel %vm166_vm1, %v13689_v30, 0.0  ;;  %v13750_v3 = vmul.f32 %v13689_v30, %v13689_v30  ;;  %v13798_v30 = vld [vmem:[%s21992_s8] sm:$0x7] }
 0x943   :  { %v13786_v7 = vadd.f32 %v13785_v12, %v13784_v27  ;;  %v13727_v13 = vadd.f32 %v13726_v5, %v13725_v2  ;;  %v13728_v59 = vsel %vm166_vm1, %v13690_v1, 0.0  ;;  %v13751_v10 = vmul.f32 %v13690_v1, %v13690_v1  ;;  %v13802_v12 = vld [vmem:[%s21993_s9] sm:$0x7] }
 0x944   :  { %v13787_v6 = vsel %vm166_vm1, %v13750_v3, 0.0 }
 0x945   :  { %v13729_v47 = vadd.f32 %v13728_v59, %v13727_v13  ;;  %v13789_v23 = vsel %vm166_vm1, %v13751_v10, 0.0  ;;  %v13788_v49 = vadd.f32 %v13787_v6, %v13786_v7 }
 0x947   :  { %13730 = vadd.xlane.f32.xlu0 %v13729_v47  ;;  %v13790_v8 = vadd.f32 %v13789_v23, %v13788_v49 }
 0x949   :  { %13791 = vadd.xlane.f32.xlu1 %v13790_v8 }
 0x9d4   :  { %v13731_v53 = vpop.xlane.xlu0 %13730 }
 0x9d5   :  { %v13793_v58 = vmul.f32 0.00043252597, %v13731_v53 }
 0x9d6   :  { %v13792_v46 = vpop.xlane.xlu1 %13791 }
 0x9d7   :  { %v13795_v29 = vmul.f32 %v13793_v58, %v13793_v58  ;;  %v13794_v39 = vmul.f32 0.00043252597, %v13792_v46 }
 0x9d9   :  { %v13796_v18 = vsub.f32 %v13794_v39, %v13795_v29 }
 0x9db   :  { %v13797_v36 = vmax.f32 %v13796_v18, 0.0 }
 0x9dd   :  { %v13799_v24 = vadd.f32 1e-05, %v13797_v36 }
 0x9df   :  { %16213 = vrsqrt.f32 %v13799_v24 }
 0x9e9   :  { %v16214_v27 = vpop.eup %16213 }
 0x9ea   :  { %v13801_v2 = vmul.f32 %v16214_v27, %v13798_v30 }
 0x9ec   :  { %13807 = vperm.xlu0 %15214, %v13801_v2   ;;  %v13803_v1 = vmul.f32 %v13801_v2, %v13793_v58 }
 0x9ee   :  { %v13804_v5 = vsub.f32 %v13802_v12, %v13803_v1 }
 0x9f0   :  { %13832 = vperm.xlu1 %15215, %v13804_v5  }
 0xa6b   :  { %v13808_v3 = vpop.permute.xlu0 %13807 }
 0xa6c   :  { %v13810_v7 = vmul.f32 %v13808_v3, %v21733_v62  ;;  %v13811_v13 = vmul.f32 %v13808_v3, %v21737_v61  ;;  %v13812_v59 = vmul.f32 %v13808_v3, %v21749_v21  ;;  %v13813_v10 = vmul.f32 %v13808_v3, %v21754_v60 }
 0xa6d   :  { %v13814_v6 = vmul.f32 %v13808_v3, %v21767_v48  ;;  %v13815_v47 = vmul.f32 %v13808_v3, %v21772_v14  ;;  %v13816_v23 = vmul.f32 %v13808_v3, %v21788_v20  ;;  %v13817_v49 = vmul.f32 %v13808_v3, %v21793_v57 }
 0xa6e   :  { %v13818_v8 = vmul.f32 %v13808_v3, %v21806_v0  ;;  %v13819_v53 = vmul.f32 %v13808_v3, %v21811_v9  ;;  %v13820_v62 = vmul.f32 %v13808_v3, %v21824_v51  ;;  %v13821_v61 = vmul.f32 %v13808_v3, %v21829_v31 }
 0xa6f   :  { %v13822_v21 = vmul.f32 %v13808_v3, %v21842_v19  ;;  %v13823_v60 = vmul.f32 %v13808_v3, %v21847_v44  ;;  %v13824_v48 = vmul.f32 %v13808_v3, %v21863_v40  ;;  %v13825_v14 = vmul.f32 %v13808_v3, %v21868_v4  ;;  %v13833_v58 = vpop.permute.xlu1 %13832 }
 0xa70   :  { %v13826_v20 = vmul.f32 %v13808_v3, %v21881_v22  ;;  %v13827_v57 = vmul.f32 %v13808_v3, %v21886_v34  ;;  %v13828_v0 = vmul.f32 %v13808_v3, %v13540_v54  ;;  %v13829_v46 = vmul.f32 %v13808_v3, %v13542_v56 }
 0xa71   :  { %v13835_v9 = vadd.f32 %v13833_v58, %v13810_v7  ;;  %v13836_v29 = vadd.f32 %v13833_v58, %v13811_v13  ;;  %v13837_v51 = vadd.f32 %v13833_v58, %v13812_v59  ;;  %v13838_v39 = vadd.f32 %v13833_v58, %v13813_v10 }
 0xa72   :  { %v13839_v31 = vadd.f32 %v13833_v58, %v13814_v6  ;;  %v13840_v18 = vadd.f32 %v13833_v58, %v13815_v47  ;;  %v13841_v19 = vadd.f32 %v13833_v58, %v13816_v23  ;;  %v13842_v36 = vadd.f32 %v13833_v58, %v13817_v49 }
 0xa73   :  { %v13843_v44 = vadd.f32 %v13833_v58, %v13818_v8  ;;  %v13844_v24 = vadd.f32 %v13833_v58, %v13819_v53  ;;  %v13845_v40 = vadd.f32 %v13833_v58, %v13820_v62  ;;  %v13846_v30 = vadd.f32 %v13833_v58, %v13821_v61 }
 0xa74   :  { %v13847_v4 = vadd.f32 %v13833_v58, %v13822_v21  ;;  %v13848_v27 = vadd.f32 %v13833_v58, %v13823_v60  ;;  %v13849_v2 = vadd.f32 %v13833_v58, %v13824_v48  ;;  %v13850_v22 = vadd.f32 %v13833_v58, %v13825_v14 }
 0xa75   :  { %v13851_v12 = vadd.f32 %v13833_v58, %v13826_v20  ;;  %v13852_v34 = vadd.f32 %v13833_v58, %v13827_v57  ;;  %v13853_v54 = vadd.f32 %v13833_v58, %v13828_v0  ;;  %v13854_v56 = vadd.f32 %v13833_v58, %v13829_v46 }
 0xa76   :  { %v13855_v1 = vmax.f32 %v13835_v9, 0.0  ;;  %v13856_v5 = vmax.f32 %v13836_v29, 0.0  ;;  %v13857_v3 = vmax.f32 %v13837_v51, 0.0  ;;  %v13858_v7 = vmax.f32 %v13838_v39, 0.0 }
 0xa77   :  { %v13859_v13 = vmax.f32 %v13839_v31, 0.0  ;;  %v13860_v59 = vmax.f32 %v13840_v18, 0.0  ;;  %v13861_v10 = vmax.f32 %v13841_v19, 0.0  ;;  %v13862_v6 = vmax.f32 %v13842_v36, 0.0 }
 0xa78   :  { %v13863_v47 = vmax.f32 %v13843_v44, 0.0  ;;  %v13864_v23 = vmax.f32 %v13844_v24, 0.0  ;;  %v13865_v49 = vmax.f32 %v13845_v40, 0.0  ;;  %v13866_v8 = vmax.f32 %v13846_v30, 0.0 }
 0xa79   :  { %v13867_v53 = vmax.f32 %v13847_v4, 0.0  ;;  %v13868_v62 = vmax.f32 %v13848_v27, 0.0  ;;  %v13869_v61 = vmax.f32 %v13849_v2, 0.0  ;;  %v13870_v21 = vmax.f32 %v13850_v22, 0.0 }
 0xa7a   :  { %v13871_v60 = vmax.f32 %v13851_v12, 0.0  ;;  %v13872_v48 = vmax.f32 %v13852_v34, 0.0  ;;  %v13873_v14 = vmax.f32 %v13853_v54, 0.0  ;;  %v13874_v58 = vmax.f32 %v13854_v56, 0.0 }
 0xa7b   :  { %v13875_v20 = vmul.f32 %v13855_v1, %v21728_v50  ;;  %v13876_v57 = vmul.f32 %v13856_v5, %v21731_v16  ;;  %v13877_v0 = vmul.f32 %v13857_v3, %v21740_v17  ;;  %v13878_v46 = vmul.f32 %v13858_v7, %v21745_v43 }
 0xa7c   :  { %v13879_v9 = vmul.f32 %v13859_v13, %v21757_v45  ;;  %v13880_v29 = vmul.f32 %v13860_v59, %v21763_v63  ;;  %v13881_v51 = vmul.f32 %v13861_v10, %v21775_v32  ;;  %v13882_v39 = vmul.f32 %v13862_v6, %v21778_v15 }
 0xa7d   :  { %v13883_v31 = vmul.f32 %v13863_v47, %v21796_v25  ;;  %v13884_v18 = vmul.f32 %v13864_v23, %v21799_v11  ;;  %v13885_v50 = vmul.f32 %v13865_v49, %v21814_v41  ;;  %v13886_v16 = vmul.f32 %v13866_v8, %v21817_v26 }
 0xa7e   :  { %v13887_v17 = vmul.f32 %v13867_v53, %v21832_v37  ;;  %v13888_v43 = vmul.f32 %v13868_v62, %v21835_v55  ;;  %v13889_v45 = vmul.f32 %v13869_v61, %v21850_v33  ;;  %v13890_v63 = vmul.f32 %v13870_v21, %v21853_v52 }
 0xa7f   :  { %v13891_v32 = vmul.f32 %v13871_v60, %v21871_v42  ;;  %v13892_v15 = vmul.f32 %v13872_v48, %v21874_v35  ;;  %v13893_v25 = vmul.f32 %v13873_v14, %v21889_v28  ;;  %v13894_v11 = vmul.f32 %v13874_v58, %v21892_v38 }
 0xa80   :  { %v13915_v19 = vcombine.low %v13875_v20, %v13876_v57  ;;  %v13916_v41 = vcombine.low %v13877_v0, %v13878_v46  ;;  %v13917_v36 = vcombine.low %v13879_v9, %v13880_v29  ;;  %v13918_v26 = vcombine.low %v13881_v51, %v13882_v39 }
 0xa81   :  { %v13919_v44 = vcombine.low %v13883_v31, %v13884_v18  ;;  %v13920_v37 = vcombine.low %v13885_v50, %v13886_v16  ;;  %v13921_v24 = vcombine.low %v13887_v17, %v13888_v43  ;;  %v13922_v55 = vcombine.low %v13889_v45, %v13890_v63 }
 0xa82   :  { %v13923_v40 = vcombine.low %v13891_v32, %v13892_v15  ;;  %v13924_v33 = vcombine.low %v13893_v25, %v13894_v11  ;;  %13935 = vst [vmem:[%s21994_s13] sm:$0x77] %v13915_v19  ;;  %13936 = vst [vmem:[%s21994_s13 + $0x8] sm:$0x77] %v13916_v41 }
 0xa83   :  { %13937 = vst [vmem:[%s21994_s13 + $0x10] sm:$0x77] %v13917_v36  ;;  %13938 = vst [vmem:[%s21994_s13 + $0x18] sm:$0x77] %v13918_v26 }
 0xa84   :  { %13939 = vst [vmem:[%s21994_s13 + $0x20] sm:$0x77] %v13919_v44  ;;  %13940 = vst [vmem:[%s21994_s13 + $0x28] sm:$0x77] %v13920_v37 }
 0xa85   :  { %13941 = vst [vmem:[%s21994_s13 + $0x30] sm:$0x77] %v13921_v24  ;;  %13942 = vst [vmem:[%s21994_s13 + $0x38] sm:$0x77] %v13922_v55 }
 0xa86   :  { %13943 = vst [vmem:[%s21994_s13 + $0x40] sm:$0x77] %v13923_v40  ;;  %13944 = vst [vmem:[%s21994_s13 + $0x48] sm:$0x77] %v13924_v33 }

</bundles_post_ra>
